<compile_context>
chip_gen: v7x
topology: tpu7x:2x2x1
jax: 0.10.0
libtpu: 0.0.40
codegen_flags: <defaults>
</compile_context>

<pallas_src>
import functools
import math
from math import ceil

import numpy as np

import jax
import jax.numpy as jnp
from jax.experimental import pallas as pl
from jax.experimental.pallas import tpu as pltpu

_LN_EPS = 1e-5
_PARALLEL = pltpu.CompilerParams(dimension_semantics=("parallel",))


# --------------------------------------------------------------------------
# small helpers used inside kernels
# --------------------------------------------------------------------------
def _num_parallel_blocks(n_outer, row_factors):
    """Split the batch/row axis into 2 grid blocks (one per v7x TensorCore via
    "parallel" semantics) only when every resulting row-block height stays a
    multiple of 8 sublanes; otherwise do everything in one grid step (lowest
    overhead on single-TC v5e/v6e)."""
    if n_outer % 2 == 0:
        bb = n_outer // 2
        if all((bb * r) % 8 == 0 for r in row_factors):
            return 2
    return 1


def _layernorm(x, g, b):
    mean = jnp.mean(x, axis=-1, keepdims=True)
    var = jnp.mean((x - mean) ** 2, axis=-1, keepdims=True)  # biased, like torch
    return (x - mean) * jax.lax.rsqrt(var + _LN_EPS) * g + b


def _gelu_exact(x):
    # Exact (erf-based) GELU, matching torch.nn.GELU().  erf itself is computed
    # with Abramowitz&Stegun 7.1.26 (|abs err| <= 1.5e-7, ~f32 rounding level)
    # because lax.erf lowering inside Mosaic is not guaranteed on all versions.
    # TODO(synk): switch to lax.erf once its Mosaic lowering is guaranteed.
    z = x * (1.0 / math.sqrt(2.0))
    az = jnp.abs(z)
    t = 1.0 / (1.0 + 0.3275911 * az)
    poly = ((((1.061405429 * t - 1.453152027) * t + 1.421413741) * t
             - 0.284496736) * t + 0.254829592) * t
    erf_abs = 1.0 - poly * jnp.exp(-az * az)
    erf = jnp.where(z < 0.0, -erf_abs, erf_abs)
    return 0.5 * x * (1.0 + erf)


# --------------------------------------------------------------------------
# Pallas kernels
# --------------------------------------------------------------------------
def _attn_fused_kernel(q_ref, kv_ref, rid_ref, cid_ref,
                       wq_ref, bq_ref, wkv_ref, bkv_ref, wo_ref, bo_ref,
                       *rest, n_heads, head_dim, scale, residual,
                       has_ln, has_mlp, has_pred):
    """Fused multi-head attention (+ residual + LN + MLP + LN2 + pred head)
    over bb flattened batch elements.

    q_ref : (bb*L, D)  rows grouped by batch element
    kv_ref: (bb*S, D)
    rid   : (bb*L, 1)  batch-id per query row   } compared in-kernel to form
    cid   : (1, bb*S)  batch-id per key column  } the block-diagonal mask
    """
    i = 0
    if has_ln:
        g1_ref, bn1_ref = rest[i], rest[i + 1]
        i += 2
    if has_mlp:
        w1_ref, b1_ref, w2_ref, b2_ref, g2_ref, bn2_ref = rest[i:i + 6]
        i += 6
    if has_pred:
        wp_ref, bp_ref = rest[i], rest[i + 1]
        i += 2
    o_ref = rest[i]
    p_ref = rest[i + 1] if has_pred else None

    d_model = n_heads * head_dim
    x_q = q_ref[...]
    x_kv = kv_ref[...]
    q = jnp.dot(x_q, wq_ref[...], preferred_element_type=jnp.float32) + bq_ref[...]
    kv = jnp.dot(x_kv, wkv_ref[...], preferred_element_type=jnp.float32) + bkv_ref[...]
    k = kv[:, :d_model]
    v = kv[:, d_model:]
    same = rid_ref[...] == cid_ref[...]            # (bb*L, bb*S) via broadcast

    heads = []
    for h in range(n_heads):                       # static unroll (tiny n_heads)
        sl = slice(h * head_dim, (h + 1) * head_dim)
        s = jax.lax.dot_general(q[:, sl], k[:, sl], (((1,), (1,)), ((), ())),
                                preferred_element_type=jnp.float32)
        s = jnp.where(same, s * scale, -1e30)
        s = s - jnp.max(s, axis=-1, keepdims=True)
        e = jnp.exp(s)
        e = e * pl.reciprocal(jnp.sum(e, axis=-1, keepdims=True), approx=True)
        heads.append(jnp.dot(e, v[:, sl], preferred_element_type=jnp.float32))
    ctx = jnp.concatenate(heads, axis=-1)          # (bb*L, D)

    out = jnp.dot(ctx, wo_ref[...], preferred_element_type=jnp.float32) + bo_ref[...]
    if residual:
        out = out + x_q
    if has_ln:
        out = _layernorm(out, g1_ref[...], bn1_ref[...])
    if has_mlp:
        hid = _gelu_exact(jnp.dot(out, w1_ref[...],
                                  preferred_element_type=jnp.float32) + b1_ref[...])
        out = out + jnp.dot(hid, w2_ref[...],
                            preferred_element_type=jnp.float32) + b2_ref[...]
        out = _layernorm(out, g2_ref[...], bn2_ref[...])
    o_ref[...] = out
    if has_pred:
        p_ref[...] = (jnp.dot(out, wp_ref[...], preferred_element_type=jnp.float32)
                      + bp_ref[...])


def _ln_linear_kernel(x_ref, g_ref, b_ref, w_ref, wb_ref, o_ref):
    xn = _layernorm(x_ref[...], g_ref[...], b_ref[...])
    o_ref[...] = jnp.dot(xn, w_ref[...], preferred_element_type=jnp.float32) + wb_ref[...]


def _embed_kernel(x_ref, w_ref, b_ref, pos_ref, g_ref, bn_ref, o_ref):
    emb = jnp.dot(x_ref[...], w_ref[...], preferred_element_type=jnp.float32) + b_ref[...]
    o_ref[...] = _layernorm(emb + pos_ref[...], g_ref[...], bn_ref[...])


# --------------------------------------------------------------------------
# Pallas wrappers
# --------------------------------------------------------------------------
def attn_block(p, q_in, kv_in, n_heads, *, residual=False, ln=None,
               mlp=None, ln2=None, pred=None):
    """Fused attention (+MLP/LN/pred) layer.
    q_in: (N, L, D), kv_in: (N, S, D) -> (N, L, D) [, (N, L, P)]."""
    N, L, D = q_in.shape
    S = kv_in.shape[1]
    assert kv_in.shape[0] == N
    nb = _num_parallel_blocks(N, (L, S))
    bb = N // nb
    QL, KS = bb * L, bb * S
    E = D // n_heads
    scale = 1.0 / math.sqrt(E)

    qf = q_in.reshape(N * L, D)
    kvf = kv_in.reshape(N * S, D)
    # Tiny per-row / per-column batch-id vectors; the (QL, KS) block-diagonal
    # mask is rebuilt in-kernel with a single VPU compare (no dense HBM mask).
    rowid = jnp.asarray(np.repeat(np.arange(bb), L).astype(np.float32)[:, None])
    colid = jnp.asarray(np.repeat(np.arange(bb), S).astype(np.float32)[None, :])

    has_ln = ln is not None
    has_mlp = mlp is not None
    has_pred = pred is not None
    const = lambda i: (0, 0)

    in_specs = [
        pl.BlockSpec((QL, D), lambda i: (i, 0)),
        pl.BlockSpec((KS, D), lambda i: (i, 0)),
        pl.BlockSpec((QL, 1), const),
        pl.BlockSpec((1, KS), const),
        pl.BlockSpec((D, D), const),
        pl.BlockSpec((1, D), const),
        pl.BlockSpec((D, 2 * D), const),
        pl.BlockSpec((1, 2 * D), const),
        pl.BlockSpec((D, D), const),
        pl.BlockSpec((1, D), const),
    ]
    args = [qf, kvf, rowid, colid,
            p["wq"], p["bq"].reshape(1, D), p["wkv"], p["bkv"].reshape(1, 2 * D),
            p["wo"], p["bo"].reshape(1, D)]
    if has_ln:
        in_specs += [pl.BlockSpec((1, D), const), pl.BlockSpec((1, D), const)]
        args += [ln["g"].reshape(1, D), ln["b"].reshape(1, D)]
    if has_mlp:
        d_ff = mlp["w1"].shape[1]
        in_specs += [pl.BlockSpec((D, d_ff), const), pl.BlockSpec((1, d_ff), const),
                     pl.BlockSpec((d_ff, D), const), pl.BlockSpec((1, D), const),
                     pl.BlockSpec((1, D), const), pl.BlockSpec((1, D), const)]
        args += [mlp["w1"], mlp["b1"].reshape(1, d_ff), mlp["w2"],
                 mlp["b2"].reshape(1, D),
                 ln2["g"].reshape(1, D), ln2["b"].reshape(1, D)]
    if has_pred:
        P = pred["w"].shape[1]
        in_specs += [pl.BlockSpec((D, P), const), pl.BlockSpec((1, P), const)]
        args += [pred["w"], pred["b"].reshape(1, P)]
        out_shape = (jax.ShapeDtypeStruct((N * L, D), jnp.float32),
                     jax.ShapeDtypeStruct((N * L, P), jnp.float32))
        out_specs = (pl.BlockSpec((QL, D), lambda i: (i, 0)),
                     pl.BlockSpec((QL, P), lambda i: (i, 0)))
    else:
        out_shape = jax.ShapeDtypeStruct((N * L, D), jnp.float32)
        out_specs = pl.BlockSpec((QL, D), lambda i: (i, 0))

    res = pl.pallas_call(
        functools.partial(_attn_fused_kernel, n_heads=n_heads, head_dim=E,
                          scale=scale, residual=residual, has_ln=has_ln,
                          has_mlp=has_mlp, has_pred=has_pred),
        out_shape=out_shape,
        grid=(nb,),
        in_specs=in_specs,
        out_specs=out_specs,
        compiler_params=_PARALLEL,
    )(*args)
    if has_pred:
        o, pr = res
        return o.reshape(N, L, D), pr.reshape(N, L, pred["w"].shape[1])
    return res.reshape(N, L, D)


def ln_linear(x2d, g, b, w, wb):
    M, K = x2d.shape
    Nout = w.shape[1]
    nb = _num_parallel_blocks(M, (1,))
    bm = M // nb
    const = lambda i: (0, 0)
    return pl.pallas_call(
        _ln_linear_kernel,
        out_shape=jax.ShapeDtypeStruct((M, Nout), jnp.float32),
        grid=(nb,),
        in_specs=[
            pl.BlockSpec((bm, K), lambda i: (i, 0)),
            pl.BlockSpec((1, K), const),
            pl.BlockSpec((1, K), const),
            pl.BlockSpec((K, Nout), const),
            pl.BlockSpec((1, Nout), const),
        ],
        out_specs=pl.BlockSpec((bm, Nout), lambda i: (i, 0)),
        compiler_params=_PARALLEL,
    )(x2d, g.reshape(1, K), b.reshape(1, K), w, wb.reshape(1, Nout))


def embed_prenorm(p_emb, pos, pre_ln, x_seq, seg_len, d_model):
    """DSW embedding linear + positional embedding add + pre-norm, fused."""
    B, T, Dd = x_seq.shape
    seg_num = T // seg_len
    P = Dd * seg_num
    xs = (x_seq.reshape(B, seg_num, seg_len, Dd)
          .transpose(0, 3, 1, 2)
          .reshape(B * P, seg_len))
    pos2d = pos.reshape(P, d_model)
    if P % 8 == 0:
        grid, rows, pos_arr = (B,), P, pos2d
    else:
        grid, rows = (1,), B * P
        pos_arr = jnp.broadcast_to(pos2d[None], (B, P, d_model)).reshape(B * P, d_model)
    const = lambda i: (0, 0)
    out = pl.pallas_call(
        _embed_kernel,
        out_shape=jax.ShapeDtypeStruct((B * P, d_model), jnp.float32),
        grid=grid,
        in_specs=[
            pl.BlockSpec((rows, seg_len), lambda i: (i, 0)),
            pl.BlockSpec((seg_len, d_model), const),
            pl.BlockSpec((1, d_model), const),
            pl.BlockSpec((rows, d_model), const),
            pl.BlockSpec((1, d_model), const),
            pl.BlockSpec((1, d_model), const),
        ],
        out_specs=pl.BlockSpec((rows, d_model), lambda i: (i, 0)),
        compiler_params=_PARALLEL,
    )(xs, p_emb["w"], p_emb["b"].reshape(1, d_model), pos_arr,
      pre_ln["g"].reshape(1, d_model), pre_ln["b"].reshape(1, d_model))
    return out.reshape(B, Dd, seg_num, d_model)


# --------------------------------------------------------------------------
# Model sub-modules (layout glue in plain JAX, compute in the fused kernels)
# --------------------------------------------------------------------------
def tsa_layer(p, x, n_heads):
    """Two-Stage Attention layer. x: (B, ts_d, seg_num, d_model). dropout=0."""
    B, ts_d, seg, D = x.shape
    # ---- cross-time stage: attention + residual + norm1 + MLP1 + norm2 fused
    time_in = x.reshape(B * ts_d, seg, D)
    dim_in = attn_block(p["time_attention"], time_in, time_in, n_heads,
                        residual=True, ln=p["norm1"],
                        mlp=p["mlp1"], ln2=p["norm2"])
    dim_in = dim_in.reshape(B, ts_d, seg, D)
    # ---- cross-dimension stage (router) ----
    dim_send = dim_in.transpose(0, 2, 1, 3).reshape(B * seg, ts_d, D)
    # Router broadcast (a few KB): BlockSpec-broadcasting it instead would need
    # router row-counts padded to the (8,128) sublane tile, not worth it here.
    router = jnp.broadcast_to(p["router"][None],
                              (B,) + p["router"].shape).reshape(B * seg, -1, D)
    dim_buffer = attn_block(p["dim_sender"], router, dim_send, n_heads)
    dim_enc = attn_block(p["dim_receiver"], dim_send, dim_buffer, n_heads,
                         residual=True, ln=p["norm3"],
                         mlp=p["mlp2"], ln2=p["norm4"])
    return dim_enc.reshape(B, seg, ts_d, D).transpose(0, 2, 1, 3)


def seg_merging(p, x, win_size):
    B, ts_d, seg, D = x.shape
    pad_num = seg % win_size
    if pad_num != 0:
        pad_num = win_size - pad_num
        x = jnp.concatenate([x, x[:, :, -pad_num:, :]], axis=2)
        seg = seg + pad_num
    parts = [x[:, :, i::win_size, :] for i in range(win_size)]
    xm = jnp.concatenate(parts, axis=-1)          # (B, ts_d, seg/win, win*D)
    seg2 = seg // win_size
    flat = xm.reshape(B * ts_d * seg2, win_size * D)
    out = ln_linear(flat, p["norm"]["g"], p["norm"]["b"],
                    p["lin"]["w"], p["lin"]["b"])
    return out.reshape(B, ts_d, seg2, D)


def encoder_forward(p, x, win_size, n_heads):
    outs = [x]
    for blk in p["blocks"]:
        if blk["merge"] is not None:
            x = seg_merging(blk["merge"], x, win_size)
        for lp in blk["layers"]:
            x = tsa_layer(lp, x, n_heads)
        outs.append(x)
    return outs


def decoder_layer_forward(p, x, cross, n_heads, seg_len):
    B, ts_d, out_seg, D = x.shape
    x = tsa_layer(p["self_attention"], x, n_heads)
    xf = x.reshape(B * ts_d, out_seg, D)
    crossf = cross.reshape(B * ts_d, cross.shape[2], D)
    # one fused call: cross attention + residual + norm1 + MLP1 + norm2 + pred
    dec, pred = attn_block(p["cross_attention"], xf, crossf, n_heads,
                           residual=True, ln=p["norm1"],
                           mlp=p["mlp1"], ln2=p["norm2"], pred=p["pred"])
    dec_output = dec.reshape(B, ts_d, out_seg, D)
    layer_predict = pred.reshape(B, ts_d * out_seg, seg_len)
    return dec_output, layer_predict


def decoder_forward(p, x, cross_list, n_heads, seg_len):
    final = None
    ts_d = x.shape[1]
    for i, lp in enumerate(p["layers"]):
        x, pred = decoder_layer_forward(lp, x, cross_list[i], n_heads, seg_len)
        final = pred if final is None else final + pred
    B = final.shape[0]
    out_seg = final.shape[1] // ts_d
    final = final.reshape(B, ts_d, out_seg, seg_len)
    final = final.transpose(0, 2, 3, 1).reshape(B, out_seg * seg_len, ts_d)
    return final


def crossformer_forward(params, x_seq, *, cfg):
    B = x_seq.shape[0]
    D = cfg["d_model"]
    if cfg["in_len_add"] != 0:
        pad = jnp.broadcast_to(x_seq[:, :1, :], (B, cfg["in_len_add"], x_seq.shape[2]))
        x_seq = jnp.concatenate([pad, x_seq], axis=1)
    x = embed_prenorm(params["enc_value_embedding"], params["enc_pos_embedding"],
                      params["pre_norm"], x_seq, cfg["seg_len"], D)
    enc_out = encoder_forward(params["encoder"], x, cfg["win_size"], cfg["n_heads"])
    dec_in = jnp.broadcast_to(params["dec_pos_embedding"],
                              (B,) + params["dec_pos_embedding"].shape[1:])
    predict_y = decoder_forward(params["decoder"], dec_in, enc_out,
                                cfg["n_heads"], cfg["seg_len"])
    # baseline=False in the reference module -> base = 0
    return predict_y[:, :cfg["out_len"], :]


# --------------------------------------------------------------------------
# Deterministic parameter initialization (synthetic weights)
# --------------------------------------------------------------------------
def _kg(key):
    while True:
        key, sub = jax.random.split(key)
        yield sub


def init_linear_p(kg, d_in, d_out, scale=0.02):
    return {
        "w": scale * jax.random.normal(next(kg), (d_in, d_out), jnp.float32),
        "b": jnp.zeros((d_out,), jnp.float32),
    }


def init_ln(d):
    return {"g": jnp.ones((d,), jnp.float32), "b": jnp.zeros((d,), jnp.float32)}


def init_mlp_p(kg, d_in, d_hidden, d_out):
    a = init_linear_p(kg, d_in, d_hidden)
    b = init_linear_p(kg, d_hidden, d_out)
    return {"w1": a["w"], "b1": a["b"], "w2": b["w"], "b2": b["b"]}


def init_attn_p(kg, d_model):
    q = init_linear_p(kg, d_model, d_model)
    k = init_linear_p(kg, d_model, d_model)
    v = init_linear_p(kg, d_model, d_model)
    o = init_linear_p(kg, d_model, d_model)
    return {
        "wq": q["w"], "bq": q["b"],
        # K and V projection weights are pre-concatenated -> one matmul in-kernel
        "wkv": jnp.concatenate([k["w"], v["w"]], axis=1),
        "bkv": jnp.concatenate([k["b"], v["b"]], axis=0),
        "wo": o["w"], "bo": o["b"],
    }


def init_tsa_p(kg, seg_num, factor, d_model, d_ff):
    return {
        "time_attention": init_attn_p(kg, d_model),
        "dim_sender": init_attn_p(kg, d_model),
        "dim_receiver": init_attn_p(kg, d_model),
        "router": jax.random.normal(next(kg), (seg_num, factor, d_model), jnp.float32),
        "norm1": init_ln(d_model),
        "norm2": init_ln(d_model),
        "norm3": init_ln(d_model),
        "norm4": init_ln(d_model),
        "mlp1": init_mlp_p(kg, d_model, d_ff, d_model),
        "mlp2": init_mlp_p(kg, d_model, d_ff, d_model),
    }


def init_encoder_p(kg, e_layers, win_size, d_model, d_ff, block_depth, in_seg_num, factor):
    blocks = [
        {
            "merge": None,
            "layers": [init_tsa_p(kg, in_seg_num, factor, d_model, d_ff)
                       for _ in range(block_depth)],
        }
    ]
    for i in range(1, e_layers):
        seg_num = ceil(in_seg_num / win_size ** i)
        blocks.append(
            {
                "merge": {
                    "norm": init_ln(win_size * d_model),
                    "lin": init_linear_p(kg, win_size * d_model, d_model),
                },
                "layers": [init_tsa_p(kg, seg_num, factor, d_model, d_ff)
                           for _ in range(block_depth)],
            }
        )
    return {"blocks": blocks}


def init_decoder_p(kg, seg_len, d_layers, d_model, d_ff, out_seg_num, factor):
    layers = []
    for _ in range(d_layers):
        layers.append(
            {
                "self_attention": init_tsa_p(kg, out_seg_num, factor, d_model, d_ff),
                "cross_attention": init_attn_p(kg, d_model),
                "norm1": init_ln(d_model),
                "norm2": init_ln(d_model),
                "mlp1": init_mlp_p(kg, d_model, d_model, d_model),
                "pred": init_linear_p(kg, d_model, seg_len),
            }
        )
    return {"layers": layers}


def init_crossformer_params(key, cfg):
    kg = _kg(key)
    in_seg_num = cfg["pad_in_len"] // cfg["seg_len"]
    out_seg_num = cfg["pad_out_len"] // cfg["seg_len"]
    return {
        "enc_value_embedding": init_linear_p(kg, cfg["seg_len"], cfg["d_model"]),
        "enc_pos_embedding": jax.random.normal(
            next(kg), (1, cfg["data_dim"], in_seg_num, cfg["d_model"]), jnp.float32),
        "pre_norm": init_ln(cfg["d_model"]),
        "encoder": init_encoder_p(
            kg, cfg["e_layers"], cfg["win_size"], cfg["d_model"], cfg["d_ff"],
            1, in_seg_num, cfg["factor"]),
        "dec_pos_embedding": jax.random.normal(
            next(kg), (1, cfg["data_dim"], out_seg_num, cfg["d_model"]), jnp.float32),
        "decoder": init_decoder_p(
            kg, cfg["seg_len"], cfg["e_layers"] + 1, cfg["d_model"], cfg["d_ff"],
            out_seg_num, cfg["factor"]),
    }


# --------------------------------------------------------------------------
if __name__ == "__main__":
    # Small, self-consistent configuration.
    data_dim, in_len, out_len, seg_len = 4, 16, 8, 4
    win_size, factor = 2, 3
    d_model, d_ff, n_heads, e_layers = 32, 64, 2, 2
    batch = 2

    pad_in_len = ceil(1.0 * in_len / seg_len) * seg_len
    pad_out_len = ceil(1.0 * out_len / seg_len) * seg_len
    cfg = dict(
        data_dim=data_dim, in_len=in_len, out_len=out_len, seg_len=seg_len,
        win_size=win_size, factor=factor, d_model=d_model, d_ff=d_ff,
        n_heads=n_heads, e_layers=e_layers,
        pad_in_len=pad_in_len, pad_out_len=pad_out_len,
        in_len_add=pad_in_len - in_len,
    )

    key = jax.random.PRNGKey(0)
    pkey, xkey = jax.random.split(key)
    params = init_crossformer_params(pkey, cfg)
    x_seq = jax.random.normal(xkey, (batch, in_len, data_dim), jnp.float32)

    fwd = jax.jit(functools.partial(crossformer_forward, cfg=cfg))
    y = fwd(params, x_seq)
    jax.block_until_ready(y)
    assert y.shape == (batch, out_len, data_dim), y.shape
    assert bool(jnp.all(jnp.isfinite(y)))
    print("KERNEL_OK")
</pallas_src>

<mosaic_0001>
module attributes {stable_mosaic.version = 11 : i64} {
  func.func @_attn_fused_kernel(%arg0: i32, %arg1: memref<8x32xf32, #tpu.memory_space<vmem>>, %arg2: memref<8x32xf32, #tpu.memory_space<vmem>>, %arg3: memref<8x1xf32, #tpu.memory_space<vmem>>, %arg4: memref<1x8xf32, #tpu.memory_space<vmem>>, %arg5: memref<32x32xf32, #tpu.memory_space<vmem>>, %arg6: memref<1x32xf32, #tpu.memory_space<vmem>>, %arg7: memref<32x64xf32, #tpu.memory_space<vmem>>, %arg8: memref<1x64xf32, #tpu.memory_space<vmem>>, %arg9: memref<32x32xf32, #tpu.memory_space<vmem>>, %arg10: memref<1x32xf32, #tpu.memory_space<vmem>>, %arg11: memref<1x32xf32, #tpu.memory_space<vmem>>, %arg12: memref<1x32xf32, #tpu.memory_space<vmem>>, %arg13: memref<32x64xf32, #tpu.memory_space<vmem>>, %arg14: memref<1x64xf32, #tpu.memory_space<vmem>>, %arg15: memref<64x32xf32, #tpu.memory_space<vmem>>, %arg16: memref<1x32xf32, #tpu.memory_space<vmem>>, %arg17: memref<1x32xf32, #tpu.memory_space<vmem>>, %arg18: memref<1x32xf32, #tpu.memory_space<vmem>>, %arg19: memref<8x32xf32, #tpu.memory_space<vmem>>) attributes {dimension_semantics = [#tpu.dimension_semantics<parallel>], iteration_bounds = array<i64: 2>, scalar_prefetch = 0 : i64, scratch_operands = 0 : i64, tpu.core_type = #tpu.core_type<tc>, window_params = [{transform_indices = @transform_0, window_bounds = array<i64: 8, 32>}, {transform_indices = @transform_1, window_bounds = array<i64: 8, 32>}, {pipeline_mode = #tpu.pipeline_mode<synchronous>, transform_indices = @transform_2, window_bounds = array<i64: 8, 1>}, {pipeline_mode = #tpu.pipeline_mode<synchronous>, transform_indices = @transform_3, window_bounds = array<i64: 1, 8>}, {pipeline_mode = #tpu.pipeline_mode<synchronous>, transform_indices = @transform_4, window_bounds = array<i64: 32, 32>}, {pipeline_mode = #tpu.pipeline_mode<synchronous>, transform_indices = @transform_5, window_bounds = array<i64: 1, 32>}, {pipeline_mode = #tpu.pipeline_mode<synchronous>, transform_indices = @transform_6, window_bounds = array<i64: 32, 64>}, {pipeline_mode = #tpu.pipeline_mode<synchronous>, transform_indices = @transform_7, window_bounds = array<i64: 1, 64>}, {pipeline_mode = #tpu.pipeline_mode<synchronous>, transform_indices = @transform_8, window_bounds = array<i64: 32, 32>}, {pipeline_mode = #tpu.pipeline_mode<synchronous>, transform_indices = @transform_9, window_bounds = array<i64: 1, 32>}, {pipeline_mode = #tpu.pipeline_mode<synchronous>, transform_indices = @transform_10, window_bounds = array<i64: 1, 32>}, {pipeline_mode = #tpu.pipeline_mode<synchronous>, transform_indices = @transform_11, window_bounds = array<i64: 1, 32>}, {pipeline_mode = #tpu.pipeline_mode<synchronous>, transform_indices = @transform_12, window_bounds = array<i64: 32, 64>}, {pipeline_mode = #tpu.pipeline_mode<synchronous>, transform_indices = @transform_13, window_bounds = array<i64: 1, 64>}, {pipeline_mode = #tpu.pipeline_mode<synchronous>, transform_indices = @transform_14, window_bounds = array<i64: 64, 32>}, {pipeline_mode = #tpu.pipeline_mode<synchronous>, transform_indices = @transform_15, window_bounds = array<i64: 1, 32>}, {pipeline_mode = #tpu.pipeline_mode<synchronous>, transform_indices = @transform_16, window_bounds = array<i64: 1, 32>}, {pipeline_mode = #tpu.pipeline_mode<synchronous>, transform_indices = @transform_17, window_bounds = array<i64: 1, 32>}, {transform_indices = @transform_18, window_bounds = array<i64: 8, 32>}]} {
    %c0 = arith.constant 0 : index
    %c0_0 = arith.constant 0 : index
    %0 = vector.load %arg1[%c0, %c0_0] : memref<8x32xf32, #tpu.memory_space<vmem>>, vector<8x32xf32>
    %c0_1 = arith.constant 0 : index
    %c0_2 = arith.constant 0 : index
    %1 = vector.load %arg2[%c0_1, %c0_2] : memref<8x32xf32, #tpu.memory_space<vmem>>, vector<8x32xf32>
    %c0_3 = arith.constant 0 : index
    %c0_4 = arith.constant 0 : index
    %2 = vector.load %arg5[%c0_3, %c0_4] : memref<32x32xf32, #tpu.memory_space<vmem>>, vector<32x32xf32>
    %cst = arith.constant dense<0.000000e+00> : vector<8x32xf32>
    %3 = tpu.matmul %0, %2, %cst {dimension_numbers = #tpu.dot_dimension_numbers<[1], [0], [0], [1], [0, 0, 1, 1], [], []>} : vector<8x32xf32>, vector<32x32xf32>, vector<8x32xf32> -> vector<8x32xf32>
    %c0_5 = arith.constant 0 : index
    %c0_6 = arith.constant 0 : index
    %4 = vector.load %arg6[%c0_5, %c0_6] : memref<1x32xf32, #tpu.memory_space<vmem>>, vector<1x32xf32>
    %5 = vector.broadcast %4 : vector<1x32xf32> to vector<8x32xf32>
    %6 = arith.addf %3, %5 : vector<8x32xf32>
    %c0_7 = arith.constant 0 : index
    %c0_8 = arith.constant 0 : index
    %7 = vector.load %arg7[%c0_7, %c0_8] : memref<32x64xf32, #tpu.memory_space<vmem>>, vector<32x64xf32>
    %cst_9 = arith.constant dense<0.000000e+00> : vector<8x64xf32>
    %8 = tpu.matmul %1, %7, %cst_9 {dimension_numbers = #tpu.dot_dimension_numbers<[1], [0], [0], [1], [0, 0, 1, 1], [], []>} : vector<8x32xf32>, vector<32x64xf32>, vector<8x64xf32> -> vector<8x64xf32>
    %c0_10 = arith.constant 0 : index
    %c0_11 = arith.constant 0 : index
    %9 = vector.load %arg8[%c0_10, %c0_11] : memref<1x64xf32, #tpu.memory_space<vmem>>, vector<1x64xf32>
    %10 = vector.broadcast %9 : vector<1x64xf32> to vector<8x64xf32>
    %11 = arith.addf %8, %10 : vector<8x64xf32>
    %12 = vector.extract_strided_slice %11 {offsets = [0, 0], sizes = [8, 32], strides = [1, 1]} : vector<8x64xf32> to vector<8x32xf32>
    %13 = vector.extract_strided_slice %11 {offsets = [0, 32], sizes = [8, 32], strides = [1, 1]} : vector<8x64xf32> to vector<8x32xf32>
    %c0_12 = arith.constant 0 : index
    %c0_13 = arith.constant 0 : index
    %14 = vector.load %arg3[%c0_12, %c0_13] : memref<8x1xf32, #tpu.memory_space<vmem>>, vector<8x1xf32>
    %c0_14 = arith.constant 0 : index
    %c0_15 = arith.constant 0 : index
    %15 = vector.load %arg4[%c0_14, %c0_15] : memref<1x8xf32, #tpu.memory_space<vmem>>, vector<1x8xf32>
    %16 = vector.broadcast %14 : vector<8x1xf32> to vector<8x8xf32>
    %17 = vector.broadcast %15 : vector<1x8xf32> to vector<8x8xf32>
    %18 = arith.cmpf oeq, %16, %17 : vector<8x8xf32>
    %19 = vector.extract_strided_slice %6 {offsets = [0, 0], sizes = [8, 16], strides = [1, 1]} : vector<8x32xf32> to vector<8x16xf32>
    %20 = vector.extract_strided_slice %12 {offsets = [0, 0], sizes = [8, 16], strides = [1, 1]} : vector<8x32xf32> to vector<8x16xf32>
    %cst_16 = arith.constant dense<0.000000e+00> : vector<8x8xf32>
    %21 = tpu.matmul %19, %20, %cst_16 {dimension_numbers = #tpu.dot_dimension_numbers<[1], [1], [0], [0], [0, 0, 1, 0], [], []>} : vector<8x16xf32>, vector<8x16xf32>, vector<8x8xf32> -> vector<8x8xf32>
    %cst_17 = arith.constant 2.500000e-01 : f32
    %22 = vector.broadcast %cst_17 : f32 to vector<8x8xf32>
    %23 = arith.mulf %21, %22 : vector<8x8xf32>
    %cst_18 = arith.constant -1.000000e+30 : f32
    %24 = vector.broadcast %cst_18 : f32 to vector<8x8xf32>
    %25 = arith.select %18, %23, %24 : vector<8x8xi1>, vector<8x8xf32>
    %cst_19 = arith.constant dense<0xFF800000> : vector<8xf32>
    %26 = vector.multi_reduction <maximumf>, %25, %cst_19 [1] : vector<8x8xf32> to vector<8xf32>
    %27 = vector.shape_cast %26 : vector<8xf32> to vector<8x1xf32>
    %28 = vector.broadcast %27 : vector<8x1xf32> to vector<8x8xf32>
    %29 = arith.subf %25, %28 : vector<8x8xf32>
    %30 = math.exp %29 : vector<8x8xf32>
    %cst_20 = arith.constant dense<0.000000e+00> : vector<8xf32>
    %31 = vector.multi_reduction <add>, %30, %cst_20 [1] : vector<8x8xf32> to vector<8xf32>
    %32 = vector.shape_cast %31 : vector<8xf32> to vector<8x1xf32>
    %33 = tpu.reciprocal %32 {approx = true} : vector<8x1xf32> -> vector<8x1xf32>
    %34 = vector.broadcast %33 : vector<8x1xf32> to vector<8x8xf32>
    %35 = arith.mulf %30, %34 : vector<8x8xf32>
    %36 = vector.extract_strided_slice %13 {offsets = [0, 0], sizes = [8, 16], strides = [1, 1]} : vector<8x32xf32> to vector<8x16xf32>
    %cst_21 = arith.constant dense<0.000000e+00> : vector<8x16xf32>
    %37 = tpu.matmul %35, %36, %cst_21 {dimension_numbers = #tpu.dot_dimension_numbers<[1], [0], [0], [1], [0, 0, 1, 1], [], []>} : vector<8x8xf32>, vector<8x16xf32>, vector<8x16xf32> -> vector<8x16xf32>
    %38 = vector.extract_strided_slice %6 {offsets = [0, 16], sizes = [8, 16], strides = [1, 1]} : vector<8x32xf32> to vector<8x16xf32>
    %39 = vector.extract_strided_slice %12 {offsets = [0, 16], sizes = [8, 16], strides = [1, 1]} : vector<8x32xf32> to vector<8x16xf32>
    %cst_22 = arith.constant dense<0.000000e+00> : vector<8x8xf32>
    %40 = tpu.matmul %38, %39, %cst_22 {dimension_numbers = #tpu.dot_dimension_numbers<[1], [1], [0], [0], [0, 0, 1, 0], [], []>} : vector<8x16xf32>, vector<8x16xf32>, vector<8x8xf32> -> vector<8x8xf32>
    %cst_23 = arith.constant 2.500000e-01 : f32
    %41 = vector.broadcast %cst_23 : f32 to vector<8x8xf32>
    %42 = arith.mulf %40, %41 : vector<8x8xf32>
    %cst_24 = arith.constant -1.000000e+30 : f32
    %43 = vector.broadcast %cst_24 : f32 to vector<8x8xf32>
    %44 = arith.select %18, %42, %43 : vector<8x8xi1>, vector<8x8xf32>
    %cst_25 = arith.constant dense<0xFF800000> : vector<8xf32>
    %45 = vector.multi_reduction <maximumf>, %44, %cst_25 [1] : vector<8x8xf32> to vector<8xf32>
    %46 = vector.shape_cast %45 : vector<8xf32> to vector<8x1xf32>
    %47 = vector.broadcast %46 : vector<8x1xf32> to vector<8x8xf32>
    %48 = arith.subf %44, %47 : vector<8x8xf32>
    %49 = math.exp %48 : vector<8x8xf32>
    %cst_26 = arith.constant dense<0.000000e+00> : vector<8xf32>
    %50 = vector.multi_reduction <add>, %49, %cst_26 [1] : vector<8x8xf32> to vector<8xf32>
    %51 = vector.shape_cast %50 : vector<8xf32> to vector<8x1xf32>
    %52 = tpu.reciprocal %51 {approx = true} : vector<8x1xf32> -> vector<8x1xf32>
    %53 = vector.broadcast %52 : vector<8x1xf32> to vector<8x8xf32>
    %54 = arith.mulf %49, %53 : vector<8x8xf32>
    %55 = vector.extract_strided_slice %13 {offsets = [0, 16], sizes = [8, 16], strides = [1, 1]} : vector<8x32xf32> to vector<8x16xf32>
    %cst_27 = arith.constant dense<0.000000e+00> : vector<8x16xf32>
    %56 = tpu.matmul %54, %55, %cst_27 {dimension_numbers = #tpu.dot_dimension_numbers<[1], [0], [0], [1], [0, 0, 1, 1], [], []>} : vector<8x8xf32>, vector<8x16xf32>, vector<8x16xf32> -> vector<8x16xf32>
    %57 = tpu.concatenate %37, %56 in 1 : vector<8x16xf32>, vector<8x16xf32> -> vector<8x32xf32>
    %c0_28 = arith.constant 0 : index
    %c0_29 = arith.constant 0 : index
    %58 = vector.load %arg9[%c0_28, %c0_29] : memref<32x32xf32, #tpu.memory_space<vmem>>, vector<32x32xf32>
    %cst_30 = arith.constant dense<0.000000e+00> : vector<8x32xf32>
    %59 = tpu.matmul %57, %58, %cst_30 {dimension_numbers = #tpu.dot_dimension_numbers<[1], [0], [0], [1], [0, 0, 1, 1], [], []>} : vector<8x32xf32>, vector<32x32xf32>, vector<8x32xf32> -> vector<8x32xf32>
    %c0_31 = arith.constant 0 : index
    %c0_32 = arith.constant 0 : index
    %60 = vector.load %arg10[%c0_31, %c0_32] : memref<1x32xf32, #tpu.memory_space<vmem>>, vector<1x32xf32>
    %61 = vector.broadcast %60 : vector<1x32xf32> to vector<8x32xf32>
    %62 = arith.addf %59, %61 : vector<8x32xf32>
    %63 = arith.addf %62, %0 : vector<8x32xf32>
    %c0_33 = arith.constant 0 : index
    %c0_34 = arith.constant 0 : index
    %64 = vector.load %arg11[%c0_33, %c0_34] : memref<1x32xf32, #tpu.memory_space<vmem>>, vector<1x32xf32>
    %c0_35 = arith.constant 0 : index
    %c0_36 = arith.constant 0 : index
    %65 = vector.load %arg12[%c0_35, %c0_36] : memref<1x32xf32, #tpu.memory_space<vmem>>, vector<1x32xf32>
    %cst_37 = arith.constant dense<0.000000e+00> : vector<8xf32>
    %66 = vector.multi_reduction <add>, %63, %cst_37 [1] : vector<8x32xf32> to vector<8xf32>
    %67 = vector.shape_cast %66 : vector<8xf32> to vector<8x1xf32>
    %cst_38 = arith.constant 3.200000e+01 : f32
    %68 = vector.broadcast %cst_38 : f32 to vector<8x1xf32>
    %69 = arith.divf %67, %68 : vector<8x1xf32>
    %70 = vector.broadcast %69 : vector<8x1xf32> to vector<8x32xf32>
    %71 = arith.subf %63, %70 : vector<8x32xf32>
    %72 = arith.mulf %71, %71 : vector<8x32xf32>
    %cst_39 = arith.constant dense<0.000000e+00> : vector<8xf32>
    %73 = vector.multi_reduction <add>, %72, %cst_39 [1] : vector<8x32xf32> to vector<8xf32>
    %74 = vector.shape_cast %73 : vector<8xf32> to vector<8x1xf32>
    %cst_40 = arith.constant 3.200000e+01 : f32
    %75 = vector.broadcast %cst_40 : f32 to vector<8x1xf32>
    %76 = arith.divf %74, %75 : vector<8x1xf32>
    %77 = vector.broadcast %69 : vector<8x1xf32> to vector<8x32xf32>
    %78 = arith.subf %63, %77 : vector<8x32xf32>
    %cst_41 = arith.constant 9.99999974E-6 : f32
    %79 = vector.broadcast %cst_41 : f32 to vector<8x1xf32>
    %80 = arith.addf %76, %79 : vector<8x1xf32>
    %81 = math.rsqrt %80 : vector<8x1xf32>
    %82 = vector.broadcast %81 : vector<8x1xf32> to vector<8x32xf32>
    %83 = arith.mulf %78, %82 : vector<8x32xf32>
    %84 = vector.broadcast %64 : vector<1x32xf32> to vector<8x32xf32>
    %85 = arith.mulf %83, %84 : vector<8x32xf32>
    %86 = vector.broadcast %65 : vector<1x32xf32> to vector<8x32xf32>
    %87 = arith.addf %85, %86 : vector<8x32xf32>
    %c0_42 = arith.constant 0 : index
    %c0_43 = arith.constant 0 : index
    %88 = vector.load %arg13[%c0_42, %c0_43] : memref<32x64xf32, #tpu.memory_space<vmem>>, vector<32x64xf32>
    %cst_44 = arith.constant dense<0.000000e+00> : vector<8x64xf32>
    %89 = tpu.matmul %87, %88, %cst_44 {dimension_numbers = #tpu.dot_dimension_numbers<[1], [0], [0], [1], [0, 0, 1, 1], [], []>} : vector<8x32xf32>, vector<32x64xf32>, vector<8x64xf32> -> vector<8x64xf32>
    %c0_45 = arith.constant 0 : index
    %c0_46 = arith.constant 0 : index
    %90 = vector.load %arg14[%c0_45, %c0_46] : memref<1x64xf32, #tpu.memory_space<vmem>>, vector<1x64xf32>
    %91 = vector.broadcast %90 : vector<1x64xf32> to vector<8x64xf32>
    %92 = arith.addf %89, %91 : vector<8x64xf32>
    %cst_47 = arith.constant 0.707106769 : f32
    %93 = vector.broadcast %cst_47 : f32 to vector<8x64xf32>
    %94 = arith.mulf %92, %93 : vector<8x64xf32>
    %95 = math.absf %94 : vector<8x64xf32>
    %cst_48 = arith.constant 0.327591091 : f32
    %96 = vector.broadcast %cst_48 : f32 to vector<8x64xf32>
    %97 = arith.mulf %96, %95 : vector<8x64xf32>
    %cst_49 = arith.constant 1.000000e+00 : f32
    %98 = vector.broadcast %cst_49 : f32 to vector<8x64xf32>
    %99 = arith.addf %98, %97 : vector<8x64xf32>
    %cst_50 = arith.constant 1.000000e+00 : f32
    %100 = vector.broadcast %cst_50 : f32 to vector<8x64xf32>
    %101 = arith.divf %100, %99 : vector<8x64xf32>
    %cst_51 = arith.constant 1.06140542 : f32
    %102 = vector.broadcast %cst_51 : f32 to vector<8x64xf32>
    %103 = arith.mulf %102, %101 : vector<8x64xf32>
    %cst_52 = arith.constant 1.45315206 : f32
    %104 = vector.broadcast %cst_52 : f32 to vector<8x64xf32>
    %105 = arith.subf %103, %104 : vector<8x64xf32>
    %106 = arith.mulf %105, %101 : vector<8x64xf32>
    %cst_53 = arith.constant 1.42141378 : f32
    %107 = vector.broadcast %cst_53 : f32 to vector<8x64xf32>
    %108 = arith.addf %106, %107 : vector<8x64xf32>
    %109 = arith.mulf %108, %101 : vector<8x64xf32>
    %cst_54 = arith.constant 0.284496725 : f32
    %110 = vector.broadcast %cst_54 : f32 to vector<8x64xf32>
    %111 = arith.subf %109, %110 : vector<8x64xf32>
    %112 = arith.mulf %111, %101 : vector<8x64xf32>
    %cst_55 = arith.constant 0.254829586 : f32
    %113 = vector.broadcast %cst_55 : f32 to vector<8x64xf32>
    %114 = arith.addf %112, %113 : vector<8x64xf32>
    %115 = arith.mulf %114, %101 : vector<8x64xf32>
    %cst_56 = arith.constant 0.000000e+00 : f32
    %116 = vector.broadcast %cst_56 : f32 to vector<8x64xf32>
    %117 = arith.subf %116, %95 : vector<8x64xf32>
    %118 = arith.mulf %117, %95 : vector<8x64xf32>
    %119 = math.exp %118 : vector<8x64xf32>
    %120 = arith.mulf %115, %119 : vector<8x64xf32>
    %cst_57 = arith.constant 1.000000e+00 : f32
    %121 = vector.broadcast %cst_57 : f32 to vector<8x64xf32>
    %122 = arith.subf %121, %120 : vector<8x64xf32>
    %cst_58 = arith.constant 0.000000e+00 : f32
    %123 = vector.broadcast %cst_58 : f32 to vector<8x64xf32>
    %124 = arith.cmpf olt, %94, %123 : vector<8x64xf32>
    %cst_59 = arith.constant 0.000000e+00 : f32
    %125 = vector.broadcast %cst_59 : f32 to vector<8x64xf32>
    %126 = arith.subf %125, %122 : vector<8x64xf32>
    %127 = arith.select %124, %126, %122 : vector<8x64xi1>, vector<8x64xf32>
    %cst_60 = arith.constant 5.000000e-01 : f32
    %128 = vector.broadcast %cst_60 : f32 to vector<8x64xf32>
    %129 = arith.mulf %128, %92 : vector<8x64xf32>
    %cst_61 = arith.constant 1.000000e+00 : f32
    %130 = vector.broadcast %cst_61 : f32 to vector<8x64xf32>
    %131 = arith.addf %130, %127 : vector<8x64xf32>
    %132 = arith.mulf %129, %131 : vector<8x64xf32>
    %c0_62 = arith.constant 0 : index
    %c0_63 = arith.constant 0 : index
    %133 = vector.load %arg15[%c0_62, %c0_63] : memref<64x32xf32, #tpu.memory_space<vmem>>, vector<64x32xf32>
    %cst_64 = arith.constant dense<0.000000e+00> : vector<8x32xf32>
    %134 = tpu.matmul %132, %133, %cst_64 {dimension_numbers = #tpu.dot_dimension_numbers<[1], [0], [0], [1], [0, 0, 1, 1], [], []>} : vector<8x64xf32>, vector<64x32xf32>, vector<8x32xf32> -> vector<8x32xf32>
    %135 = arith.addf %87, %134 : vector<8x32xf32>
    %c0_65 = arith.constant 0 : index
    %c0_66 = arith.constant 0 : index
    %136 = vector.load %arg16[%c0_65, %c0_66] : memref<1x32xf32, #tpu.memory_space<vmem>>, vector<1x32xf32>
    %137 = vector.broadcast %136 : vector<1x32xf32> to vector<8x32xf32>
    %138 = arith.addf %135, %137 : vector<8x32xf32>
    %c0_67 = arith.constant 0 : index
    %c0_68 = arith.constant 0 : index
    %139 = vector.load %arg17[%c0_67, %c0_68] : memref<1x32xf32, #tpu.memory_space<vmem>>, vector<1x32xf32>
    %c0_69 = arith.constant 0 : index
    %c0_70 = arith.constant 0 : index
    %140 = vector.load %arg18[%c0_69, %c0_70] : memref<1x32xf32, #tpu.memory_space<vmem>>, vector<1x32xf32>
    %cst_71 = arith.constant dense<0.000000e+00> : vector<8xf32>
    %141 = vector.multi_reduction <add>, %138, %cst_71 [1] : vector<8x32xf32> to vector<8xf32>
    %142 = vector.shape_cast %141 : vector<8xf32> to vector<8x1xf32>
    %cst_72 = arith.constant 3.200000e+01 : f32
    %143 = vector.broadcast %cst_72 : f32 to vector<8x1xf32>
    %144 = arith.divf %142, %143 : vector<8x1xf32>
    %145 = vector.broadcast %144 : vector<8x1xf32> to vector<8x32xf32>
    %146 = arith.subf %138, %145 : vector<8x32xf32>
    %147 = arith.mulf %146, %146 : vector<8x32xf32>
    %cst_73 = arith.constant dense<0.000000e+00> : vector<8xf32>
    %148 = vector.multi_reduction <add>, %147, %cst_73 [1] : vector<8x32xf32> to vector<8xf32>
    %149 = vector.shape_cast %148 : vector<8xf32> to vector<8x1xf32>
    %cst_74 = arith.constant 3.200000e+01 : f32
    %150 = vector.broadcast %cst_74 : f32 to vector<8x1xf32>
    %151 = arith.divf %149, %150 : vector<8x1xf32>
    %152 = vector.broadcast %144 : vector<8x1xf32> to vector<8x32xf32>
    %153 = arith.subf %138, %152 : vector<8x32xf32>
    %cst_75 = arith.constant 9.99999974E-6 : f32
    %154 = vector.broadcast %cst_75 : f32 to vector<8x1xf32>
    %155 = arith.addf %151, %154 : vector<8x1xf32>
    %156 = math.rsqrt %155 : vector<8x1xf32>
    %157 = vector.broadcast %156 : vector<8x1xf32> to vector<8x32xf32>
    %158 = arith.mulf %153, %157 : vector<8x32xf32>
    %159 = vector.broadcast %139 : vector<1x32xf32> to vector<8x32xf32>
    %160 = arith.mulf %158, %159 : vector<8x32xf32>
    %161 = vector.broadcast %140 : vector<1x32xf32> to vector<8x32xf32>
    %162 = arith.addf %160, %161 : vector<8x32xf32>
    %c0_76 = arith.constant 0 : index
    %c0_77 = arith.constant 0 : index
    %163 = vector.load %arg19[%c0_76, %c0_77] : memref<8x32xf32, #tpu.memory_space<vmem>>, vector<8x32xf32>
    tpu.vector_store %arg19[%c0_76, %c0_77], %162 {strides = array<i32>} : memref<8x32xf32, #tpu.memory_space<vmem>>, vector<8x32xf32>,
    return
  }
  func.func @transform_0(%arg0: i32) -> (i32, i32) {
    %c0_i32 = arith.constant 0 : i32
    %c0_i32_0 = arith.constant 0 : i32
    return %arg0, %c0_i32 : i32, i32
  }
  func.func @transform_1(%arg0: i32) -> (i32, i32) {
    %c0_i32 = arith.constant 0 : i32
    %c0_i32_0 = arith.constant 0 : i32
    return %arg0, %c0_i32 : i32, i32
  }
  func.func @transform_2(%arg0: i32) -> (i32, i32) {
    %c0_i32 = arith.constant 0 : i32
    %c0_i32_0 = arith.constant 0 : i32
    %c0_i32_1 = arith.constant 0 : i32
    return %c0_i32, %c0_i32_0 : i32, i32
  }
  func.func @transform_3(%arg0: i32) -> (i32, i32) {
    %c0_i32 = arith.constant 0 : i32
    %c0_i32_0 = arith.constant 0 : i32
    %c0_i32_1 = arith.constant 0 : i32
    return %c0_i32, %c0_i32_0 : i32, i32
  }
  func.func @transform_4(%arg0: i32) -> (i32, i32) {
    %c0_i32 = arith.constant 0 : i32
    %c0_i32_0 = arith.constant 0 : i32
    %c0_i32_1 = arith.constant 0 : i32
    return %c0_i32, %c0_i32_0 : i32, i32
  }
  func.func @transform_5(%arg0: i32) -> (i32, i32) {
    %c0_i32 = arith.constant 0 : i32
    %c0_i32_0 = arith.constant 0 : i32
    %c0_i32_1 = arith.constant 0 : i32
    return %c0_i32, %c0_i32_0 : i32, i32
  }
  func.func @transform_6(%arg0: i32) -> (i32, i32) {
    %c0_i32 = arith.constant 0 : i32
    %c0_i32_0 = arith.constant 0 : i32
    %c0_i32_1 = arith.constant 0 : i32
    return %c0_i32, %c0_i32_0 : i32, i32
  }
  func.func @transform_7(%arg0: i32) -> (i32, i32) {
    %c0_i32 = arith.constant 0 : i32
    %c0_i32_0 = arith.constant 0 : i32
    %c0_i32_1 = arith.constant 0 : i32
    return %c0_i32, %c0_i32_0 : i32, i32
  }
  func.func @transform_8(%arg0: i32) -> (i32, i32) {
    %c0_i32 = arith.constant 0 : i32
    %c0_i32_0 = arith.constant 0 : i32
    %c0_i32_1 = arith.constant 0 : i32
    return %c0_i32, %c0_i32_0 : i32, i32
  }
  func.func @transform_9(%arg0: i32) -> (i32, i32) {
    %c0_i32 = arith.constant 0 : i32
    %c0_i32_0 = arith.constant 0 : i32
    %c0_i32_1 = arith.constant 0 : i32
    return %c0_i32, %c0_i32_0 : i32, i32
  }
  func.func @transform_10(%arg0: i32) -> (i32, i32) {
    %c0_i32 = arith.constant 0 : i32
    %c0_i32_0 = arith.constant 0 : i32
    %c0_i32_1 = arith.constant 0 : i32
    return %c0_i32, %c0_i32_0 : i32, i32
  }
  func.func @transform_11(%arg0: i32) -> (i32, i32) {
    %c0_i32 = arith.constant 0 : i32
    %c0_i32_0 = arith.constant 0 : i32
    %c0_i32_1 = arith.constant 0 : i32
    return %c0_i32, %c0_i32_0 : i32, i32
  }
  func.func @transform_12(%arg0: i32) -> (i32, i32) {
    %c0_i32 = arith.constant 0 : i32
    %c0_i32_0 = arith.constant 0 : i32
    %c0_i32_1 = arith.constant 0 : i32
    return %c0_i32, %c0_i32_0 : i32, i32
  }
  func.func @transform_13(%arg0: i32) -> (i32, i32) {
    %c0_i32 = arith.constant 0 : i32
    %c0_i32_0 = arith.constant 0 : i32
    %c0_i32_1 = arith.constant 0 : i32
    return %c0_i32, %c0_i32_0 : i32, i32
  }
  func.func @transform_14(%arg0: i32) -> (i32, i32) {
    %c0_i32 = arith.constant 0 : i32
    %c0_i32_0 = arith.constant 0 : i32
    %c0_i32_1 = arith.constant 0 : i32
    return %c0_i32, %c0_i32_0 : i32, i32
  }
  func.func @transform_15(%arg0: i32) -> (i32, i32) {
    %c0_i32 = arith.constant 0 : i32
    %c0_i32_0 = arith.constant 0 : i32
    %c0_i32_1 = arith.constant 0 : i32
    return %c0_i32, %c0_i32_0 : i32, i32
  }
  func.func @transform_16(%arg0: i32) -> (i32, i32) {
    %c0_i32 = arith.constant 0 : i32
    %c0_i32_0 = arith.constant 0 : i32
    %c0_i32_1 = arith.constant 0 : i32
    return %c0_i32, %c0_i32_0 : i32, i32
  }
  func.func @transform_17(%arg0: i32) -> (i32, i32) {
    %c0_i32 = arith.constant 0 : i32
    %c0_i32_0 = arith.constant 0 : i32
    %c0_i32_1 = arith.constant 0 : i32
    return %c0_i32, %c0_i32_0 : i32, i32
  }
  func.func @transform_18(%arg0: i32) -> (i32, i32) {
    %c0_i32 = arith.constant 0 : i32
    %c0_i32_0 = arith.constant 0 : i32
    return %arg0, %c0_i32 : i32, i32
  }
}

module attributes {stable_mosaic.version = 11 : i64} {
  func.func @_attn_fused_kernel(%arg0: i32, %arg1: memref<12x32xf32, #tpu.memory_space<vmem>>, %arg2: memref<16x32xf32, #tpu.memory_space<vmem>>, %arg3: memref<12x1xf32, #tpu.memory_space<vmem>>, %arg4: memref<1x16xf32, #tpu.memory_space<vmem>>, %arg5: memref<32x32xf32, #tpu.memory_space<vmem>>, %arg6: memref<1x32xf32, #tpu.memory_space<vmem>>, %arg7: memref<32x64xf32, #tpu.memory_space<vmem>>, %arg8: memref<1x64xf32, #tpu.memory_space<vmem>>, %arg9: memref<32x32xf32, #tpu.memory_space<vmem>>, %arg10: memref<1x32xf32, #tpu.memory_space<vmem>>, %arg11: memref<12x32xf32, #tpu.memory_space<vmem>>) attributes {dimension_semantics = [#tpu.dimension_semantics<parallel>], iteration_bounds = array<i64: 1>, scalar_prefetch = 0 : i64, scratch_operands = 0 : i64, tpu.core_type = #tpu.core_type<tc>, window_params = [{transform_indices = @transform_0, window_bounds = array<i64: 12, 32>}, {transform_indices = @transform_1, window_bounds = array<i64: 16, 32>}, {pipeline_mode = #tpu.pipeline_mode<synchronous>, transform_indices = @transform_2, window_bounds = array<i64: 12, 1>}, {pipeline_mode = #tpu.pipeline_mode<synchronous>, transform_indices = @transform_3, window_bounds = array<i64: 1, 16>}, {pipeline_mode = #tpu.pipeline_mode<synchronous>, transform_indices = @transform_4, window_bounds = array<i64: 32, 32>}, {pipeline_mode = #tpu.pipeline_mode<synchronous>, transform_indices = @transform_5, window_bounds = array<i64: 1, 32>}, {pipeline_mode = #tpu.pipeline_mode<synchronous>, transform_indices = @transform_6, window_bounds = array<i64: 32, 64>}, {pipeline_mode = #tpu.pipeline_mode<synchronous>, transform_indices = @transform_7, window_bounds = array<i64: 1, 64>}, {pipeline_mode = #tpu.pipeline_mode<synchronous>, transform_indices = @transform_8, window_bounds = array<i64: 32, 32>}, {pipeline_mode = #tpu.pipeline_mode<synchronous>, transform_indices = @transform_9, window_bounds = array<i64: 1, 32>}, {transform_indices = @transform_10, window_bounds = array<i64: 12, 32>}]} {
    %c0 = arith.constant 0 : index
    %c0_0 = arith.constant 0 : index
    %0 = vector.load %arg1[%c0, %c0_0] : memref<12x32xf32, #tpu.memory_space<vmem>>, vector<12x32xf32>
    %c0_1 = arith.constant 0 : index
    %c0_2 = arith.constant 0 : index
    %1 = vector.load %arg2[%c0_1, %c0_2] : memref<16x32xf32, #tpu.memory_space<vmem>>, vector<16x32xf32>
    %c0_3 = arith.constant 0 : index
    %c0_4 = arith.constant 0 : index
    %2 = vector.load %arg5[%c0_3, %c0_4] : memref<32x32xf32, #tpu.memory_space<vmem>>, vector<32x32xf32>
    %cst = arith.constant dense<0.000000e+00> : vector<12x32xf32>
    %3 = tpu.matmul %0, %2, %cst {dimension_numbers = #tpu.dot_dimension_numbers<[1], [0], [0], [1], [0, 0, 1, 1], [], []>} : vector<12x32xf32>, vector<32x32xf32>, vector<12x32xf32> -> vector<12x32xf32>
    %c0_5 = arith.constant 0 : index
    %c0_6 = arith.constant 0 : index
    %4 = vector.load %arg6[%c0_5, %c0_6] : memref<1x32xf32, #tpu.memory_space<vmem>>, vector<1x32xf32>
    %5 = vector.broadcast %4 : vector<1x32xf32> to vector<12x32xf32>
    %6 = arith.addf %3, %5 : vector<12x32xf32>
    %c0_7 = arith.constant 0 : index
    %c0_8 = arith.constant 0 : index
    %7 = vector.load %arg7[%c0_7, %c0_8] : memref<32x64xf32, #tpu.memory_space<vmem>>, vector<32x64xf32>
    %cst_9 = arith.constant dense<0.000000e+00> : vector<16x64xf32>
    %8 = tpu.matmul %1, %7, %cst_9 {dimension_numbers = #tpu.dot_dimension_numbers<[1], [0], [0], [1], [0, 0, 1, 1], [], []>} : vector<16x32xf32>, vector<32x64xf32>, vector<16x64xf32> -> vector<16x64xf32>
    %c0_10 = arith.constant 0 : index
    %c0_11 = arith.constant 0 : index
    %9 = vector.load %arg8[%c0_10, %c0_11] : memref<1x64xf32, #tpu.memory_space<vmem>>, vector<1x64xf32>
    %10 = vector.broadcast %9 : vector<1x64xf32> to vector<16x64xf32>
    %11 = arith.addf %8, %10 : vector<16x64xf32>
    %12 = vector.extract_strided_slice %11 {offsets = [0, 0], sizes = [16, 32], strides = [1, 1]} : vector<16x64xf32> to vector<16x32xf32>
    %13 = vector.extract_strided_slice %11 {offsets = [0, 32], sizes = [16, 32], strides = [1, 1]} : vector<16x64xf32> to vector<16x32xf32>
    %c0_12 = arith.constant 0 : index
    %c0_13 = arith.constant 0 : index
    %14 = vector.load %arg3[%c0_12, %c0_13] : memref<12x1xf32, #tpu.memory_space<vmem>>, vector<12x1xf32>
    %c0_14 = arith.constant 0 : index
    %c0_15 = arith.constant 0 : index
    %15 = vector.load %arg4[%c0_14, %c0_15] : memref<1x16xf32, #tpu.memory_space<vmem>>, vector<1x16xf32>
    %16 = vector.broadcast %14 : vector<12x1xf32> to vector<12x16xf32>
    %17 = vector.broadcast %15 : vector<1x16xf32> to vector<12x16xf32>
    %18 = arith.cmpf oeq, %16, %17 : vector<12x16xf32>
    %19 = vector.extract_strided_slice %6 {offsets = [0, 0], sizes = [12, 16], strides = [1, 1]} : vector<12x32xf32> to vector<12x16xf32>
    %20 = vector.extract_strided_slice %12 {offsets = [0, 0], sizes = [16, 16], strides = [1, 1]} : vector<16x32xf32> to vector<16x16xf32>
    %cst_16 = arith.constant dense<0.000000e+00> : vector<12x16xf32>
    %21 = tpu.matmul %19, %20, %cst_16 {dimension_numbers = #tpu.dot_dimension_numbers<[1], [1], [0], [0], [0, 0, 1, 0], [], []>} : vector<12x16xf32>, vector<16x16xf32>, vector<12x16xf32> -> vector<12x16xf32>
    %cst_17 = arith.constant 2.500000e-01 : f32
    %22 = vector.broadcast %cst_17 : f32 to vector<12x16xf32>
    %23 = arith.mulf %21, %22 : vector<12x16xf32>
    %cst_18 = arith.constant -1.000000e+30 : f32
    %24 = vector.broadcast %cst_18 : f32 to vector<12x16xf32>
    %25 = arith.select %18, %23, %24 : vector<12x16xi1>, vector<12x16xf32>
    %cst_19 = arith.constant dense<0xFF800000> : vector<12xf32>
    %26 = vector.multi_reduction <maximumf>, %25, %cst_19 [1] : vector<12x16xf32> to vector<12xf32>
    %27 = vector.shape_cast %26 : vector<12xf32> to vector<12x1xf32>
    %28 = vector.broadcast %27 : vector<12x1xf32> to vector<12x16xf32>
    %29 = arith.subf %25, %28 : vector<12x16xf32>
    %30 = math.exp %29 : vector<12x16xf32>
    %cst_20 = arith.constant dense<0.000000e+00> : vector<12xf32>
    %31 = vector.multi_reduction <add>, %30, %cst_20 [1] : vector<12x16xf32> to vector<12xf32>
    %32 = vector.shape_cast %31 : vector<12xf32> to vector<12x1xf32>
    %33 = tpu.reciprocal %32 {approx = true} : vector<12x1xf32> -> vector<12x1xf32>
    %34 = vector.broadcast %33 : vector<12x1xf32> to vector<12x16xf32>
    %35 = arith.mulf %30, %34 : vector<12x16xf32>
    %36 = vector.extract_strided_slice %13 {offsets = [0, 0], sizes = [16, 16], strides = [1, 1]} : vector<16x32xf32> to vector<16x16xf32>
    %cst_21 = arith.constant dense<0.000000e+00> : vector<12x16xf32>
    %37 = tpu.matmul %35, %36, %cst_21 {dimension_numbers = #tpu.dot_dimension_numbers<[1], [0], [0], [1], [0, 0, 1, 1], [], []>} : vector<12x16xf32>, vector<16x16xf32>, vector<12x16xf32> -> vector<12x16xf32>
    %38 = vector.extract_strided_slice %6 {offsets = [0, 16], sizes = [12, 16], strides = [1, 1]} : vector<12x32xf32> to vector<12x16xf32>
    %39 = vector.extract_strided_slice %12 {offsets = [0, 16], sizes = [16, 16], strides = [1, 1]} : vector<16x32xf32> to vector<16x16xf32>
    %cst_22 = arith.constant dense<0.000000e+00> : vector<12x16xf32>
    %40 = tpu.matmul %38, %39, %cst_22 {dimension_numbers = #tpu.dot_dimension_numbers<[1], [1], [0], [0], [0, 0, 1, 0], [], []>} : vector<12x16xf32>, vector<16x16xf32>, vector<12x16xf32> -> vector<12x16xf32>
    %cst_23 = arith.constant 2.500000e-01 : f32
    %41 = vector.broadcast %cst_23 : f32 to vector<12x16xf32>
    %42 = arith.mulf %40, %41 : vector<12x16xf32>
    %cst_24 = arith.constant -1.000000e+30 : f32
    %43 = vector.broadcast %cst_24 : f32 to vector<12x16xf32>
    %44 = arith.select %18, %42, %43 : vector<12x16xi1>, vector<12x16xf32>
    %cst_25 = arith.constant dense<0xFF800000> : vector<12xf32>
    %45 = vector.multi_reduction <maximumf>, %44, %cst_25 [1] : vector<12x16xf32> to vector<12xf32>
    %46 = vector.shape_cast %45 : vector<12xf32> to vector<12x1xf32>
    %47 = vector.broadcast %46 : vector<12x1xf32> to vector<12x16xf32>
    %48 = arith.subf %44, %47 : vector<12x16xf32>
    %49 = math.exp %48 : vector<12x16xf32>
    %cst_26 = arith.constant dense<0.000000e+00> : vector<12xf32>
    %50 = vector.multi_reduction <add>, %49, %cst_26 [1] : vector<12x16xf32> to vector<12xf32>
    %51 = vector.shape_cast %50 : vector<12xf32> to vector<12x1xf32>
    %52 = tpu.reciprocal %51 {approx = true} : vector<12x1xf32> -> vector<12x1xf32>
    %53 = vector.broadcast %52 : vector<12x1xf32> to vector<12x16xf32>
    %54 = arith.mulf %49, %53 : vector<12x16xf32>
    %55 = vector.extract_strided_slice %13 {offsets = [0, 16], sizes = [16, 16], strides = [1, 1]} : vector<16x32xf32> to vector<16x16xf32>
    %cst_27 = arith.constant dense<0.000000e+00> : vector<12x16xf32>
    %56 = tpu.matmul %54, %55, %cst_27 {dimension_numbers = #tpu.dot_dimension_numbers<[1], [0], [0], [1], [0, 0, 1, 1], [], []>} : vector<12x16xf32>, vector<16x16xf32>, vector<12x16xf32> -> vector<12x16xf32>
    %57 = tpu.concatenate %37, %56 in 1 : vector<12x16xf32>, vector<12x16xf32> -> vector<12x32xf32>
    %c0_28 = arith.constant 0 : index
    %c0_29 = arith.constant 0 : index
    %58 = vector.load %arg9[%c0_28, %c0_29] : memref<32x32xf32, #tpu.memory_space<vmem>>, vector<32x32xf32>
    %cst_30 = arith.constant dense<0.000000e+00> : vector<12x32xf32>
    %59 = tpu.matmul %57, %58, %cst_30 {dimension_numbers = #tpu.dot_dimension_numbers<[1], [0], [0], [1], [0, 0, 1, 1], [], []>} : vector<12x32xf32>, vector<32x32xf32>, vector<12x32xf32> -> vector<12x32xf32>
    %c0_31 = arith.constant 0 : index
    %c0_32 = arith.constant 0 : index
    %60 = vector.load %arg10[%c0_31, %c0_32] : memref<1x32xf32, #tpu.memory_space<vmem>>, vector<1x32xf32>
    %61 = vector.broadcast %60 : vector<1x32xf32> to vector<12x32xf32>
    %62 = arith.addf %59, %61 : vector<12x32xf32>
    %c0_33 = arith.constant 0 : index
    %c0_34 = arith.constant 0 : index
    %63 = vector.load %arg11[%c0_33, %c0_34] : memref<12x32xf32, #tpu.memory_space<vmem>>, vector<12x32xf32>
    tpu.vector_store %arg11[%c0_33, %c0_34], %62 {strides = array<i32>} : memref<12x32xf32, #tpu.memory_space<vmem>>, vector<12x32xf32>,
    return
  }
  func.func @transform_0(%arg0: i32) -> (i32, i32) {
    %c0_i32 = arith.constant 0 : i32
    %c0_i32_0 = arith.constant 0 : i32
    return %arg0, %c0_i32 : i32, i32
  }
  func.func @transform_1(%arg0: i32) -> (i32, i32) {
    %c0_i32 = arith.constant 0 : i32
    %c0_i32_0 = arith.constant 0 : i32
    return %arg0, %c0_i32 : i32, i32
  }
  func.func @transform_2(%arg0: i32) -> (i32, i32) {
    %c0_i32 = arith.constant 0 : i32
    %c0_i32_0 = arith.constant 0 : i32
    %c0_i32_1 = arith.constant 0 : i32
    return %c0_i32, %c0_i32_0 : i32, i32
  }
  func.func @transform_3(%arg0: i32) -> (i32, i32) {
    %c0_i32 = arith.constant 0 : i32
    %c0_i32_0 = arith.constant 0 : i32
    %c0_i32_1 = arith.constant 0 : i32
    return %c0_i32, %c0_i32_0 : i32, i32
  }
  func.func @transform_4(%arg0: i32) -> (i32, i32) {
    %c0_i32 = arith.constant 0 : i32
    %c0_i32_0 = arith.constant 0 : i32
    %c0_i32_1 = arith.constant 0 : i32
    return %c0_i32, %c0_i32_0 : i32, i32
  }
  func.func @transform_5(%arg0: i32) -> (i32, i32) {
    %c0_i32 = arith.constant 0 : i32
    %c0_i32_0 = arith.constant 0 : i32
    %c0_i32_1 = arith.constant 0 : i32
    return %c0_i32, %c0_i32_0 : i32, i32
  }
  func.func @transform_6(%arg0: i32) -> (i32, i32) {
    %c0_i32 = arith.constant 0 : i32
    %c0_i32_0 = arith.constant 0 : i32
    %c0_i32_1 = arith.constant 0 : i32
    return %c0_i32, %c0_i32_0 : i32, i32
  }
  func.func @transform_7(%arg0: i32) -> (i32, i32) {
    %c0_i32 = arith.constant 0 : i32
    %c0_i32_0 = arith.constant 0 : i32
    %c0_i32_1 = arith.constant 0 : i32
    return %c0_i32, %c0_i32_0 : i32, i32
  }
  func.func @transform_8(%arg0: i32) -> (i32, i32) {
    %c0_i32 = arith.constant 0 : i32
    %c0_i32_0 = arith.constant 0 : i32
    %c0_i32_1 = arith.constant 0 : i32
    return %c0_i32, %c0_i32_0 : i32, i32
  }
  func.func @transform_9(%arg0: i32) -> (i32, i32) {
    %c0_i32 = arith.constant 0 : i32
    %c0_i32_0 = arith.constant 0 : i32
    %c0_i32_1 = arith.constant 0 : i32
    return %c0_i32, %c0_i32_0 : i32, i32
  }
  func.func @transform_10(%arg0: i32) -> (i32, i32) {
    %c0_i32 = arith.constant 0 : i32
    %c0_i32_0 = arith.constant 0 : i32
    return %arg0, %c0_i32 : i32, i32
  }
}

module attributes {stable_mosaic.version = 11 : i64} {
  func.func @_attn_fused_kernel(%arg0: i32, %arg1: memref<16x32xf32, #tpu.memory_space<vmem>>, %arg2: memref<12x32xf32, #tpu.memory_space<vmem>>, %arg3: memref<16x1xf32, #tpu.memory_space<vmem>>, %arg4: memref<1x12xf32, #tpu.memory_space<vmem>>, %arg5: memref<32x32xf32, #tpu.memory_space<vmem>>, %arg6: memref<1x32xf32, #tpu.memory_space<vmem>>, %arg7: memref<32x64xf32, #tpu.memory_space<vmem>>, %arg8: memref<1x64xf32, #tpu.memory_space<vmem>>, %arg9: memref<32x32xf32, #tpu.memory_space<vmem>>, %arg10: memref<1x32xf32, #tpu.memory_space<vmem>>, %arg11: memref<1x32xf32, #tpu.memory_space<vmem>>, %arg12: memref<1x32xf32, #tpu.memory_space<vmem>>, %arg13: memref<32x64xf32, #tpu.memory_space<vmem>>, %arg14: memref<1x64xf32, #tpu.memory_space<vmem>>, %arg15: memref<64x32xf32, #tpu.memory_space<vmem>>, %arg16: memref<1x32xf32, #tpu.memory_space<vmem>>, %arg17: memref<1x32xf32, #tpu.memory_space<vmem>>, %arg18: memref<1x32xf32, #tpu.memory_space<vmem>>, %arg19: memref<16x32xf32, #tpu.memory_space<vmem>>) attributes {dimension_semantics = [#tpu.dimension_semantics<parallel>], iteration_bounds = array<i64: 1>, scalar_prefetch = 0 : i64, scratch_operands = 0 : i64, tpu.core_type = #tpu.core_type<tc>, window_params = [{transform_indices = @transform_0, window_bounds = array<i64: 16, 32>}, {transform_indices = @transform_1, window_bounds = array<i64: 12, 32>}, {pipeline_mode = #tpu.pipeline_mode<synchronous>, transform_indices = @transform_2, window_bounds = array<i64: 16, 1>}, {pipeline_mode = #tpu.pipeline_mode<synchronous>, transform_indices = @transform_3, window_bounds = array<i64: 1, 12>}, {pipeline_mode = #tpu.pipeline_mode<synchronous>, transform_indices = @transform_4, window_bounds = array<i64: 32, 32>}, {pipeline_mode = #tpu.pipeline_mode<synchronous>, transform_indices = @transform_5, window_bounds = array<i64: 1, 32>}, {pipeline_mode = #tpu.pipeline_mode<synchronous>, transform_indices = @transform_6, window_bounds = array<i64: 32, 64>}, {pipeline_mode = #tpu.pipeline_mode<synchronous>, transform_indices = @transform_7, window_bounds = array<i64: 1, 64>}, {pipeline_mode = #tpu.pipeline_mode<synchronous>, transform_indices = @transform_8, window_bounds = array<i64: 32, 32>}, {pipeline_mode = #tpu.pipeline_mode<synchronous>, transform_indices = @transform_9, window_bounds = array<i64: 1, 32>}, {pipeline_mode = #tpu.pipeline_mode<synchronous>, transform_indices = @transform_10, window_bounds = array<i64: 1, 32>}, {pipeline_mode = #tpu.pipeline_mode<synchronous>, transform_indices = @transform_11, window_bounds = array<i64: 1, 32>}, {pipeline_mode = #tpu.pipeline_mode<synchronous>, transform_indices = @transform_12, window_bounds = array<i64: 32, 64>}, {pipeline_mode = #tpu.pipeline_mode<synchronous>, transform_indices = @transform_13, window_bounds = array<i64: 1, 64>}, {pipeline_mode = #tpu.pipeline_mode<synchronous>, transform_indices = @transform_14, window_bounds = array<i64: 64, 32>}, {pipeline_mode = #tpu.pipeline_mode<synchronous>, transform_indices = @transform_15, window_bounds = array<i64: 1, 32>}, {pipeline_mode = #tpu.pipeline_mode<synchronous>, transform_indices = @transform_16, window_bounds = array<i64: 1, 32>}, {pipeline_mode = #tpu.pipeline_mode<synchronous>, transform_indices = @transform_17, window_bounds = array<i64: 1, 32>}, {transform_indices = @transform_18, window_bounds = array<i64: 16, 32>}]} {
    %c0 = arith.constant 0 : index
    %c0_0 = arith.constant 0 : index
    %0 = vector.load %arg1[%c0, %c0_0] : memref<16x32xf32, #tpu.memory_space<vmem>>, vector<16x32xf32>
    %c0_1 = arith.constant 0 : index
    %c0_2 = arith.constant 0 : index
    %1 = vector.load %arg2[%c0_1, %c0_2] : memref<12x32xf32, #tpu.memory_space<vmem>>, vector<12x32xf32>
    %c0_3 = arith.constant 0 : index
    %c0_4 = arith.constant 0 : index
    %2 = vector.load %arg5[%c0_3, %c0_4] : memref<32x32xf32, #tpu.memory_space<vmem>>, vector<32x32xf32>
    %cst = arith.constant dense<0.000000e+00> : vector<16x32xf32>
    %3 = tpu.matmul %0, %2, %cst {dimension_numbers = #tpu.dot_dimension_numbers<[1], [0], [0], [1], [0, 0, 1, 1], [], []>} : vector<16x32xf32>, vector<32x32xf32>, vector<16x32xf32> -> vector<16x32xf32>
    %c0_5 = arith.constant 0 : index
    %c0_6 = arith.constant 0 : index
    %4 = vector.load %arg6[%c0_5, %c0_6] : memref<1x32xf32, #tpu.memory_space<vmem>>, vector<1x32xf32>
    %5 = vector.broadcast %4 : vector<1x32xf32> to vector<16x32xf32>
    %6 = arith.addf %3, %5 : vector<16x32xf32>
    %c0_7 = arith.constant 0 : index
    %c0_8 = arith.constant 0 : index
    %7 = vector.load %arg7[%c0_7, %c0_8] : memref<32x64xf32, #tpu.memory_space<vmem>>, vector<32x64xf32>
    %cst_9 = arith.constant dense<0.000000e+00> : vector<12x64xf32>
    %8 = tpu.matmul %1, %7, %cst_9 {dimension_numbers = #tpu.dot_dimension_numbers<[1], [0], [0], [1], [0, 0, 1, 1], [], []>} : vector<12x32xf32>, vector<32x64xf32>, vector<12x64xf32> -> vector<12x64xf32>
    %c0_10 = arith.constant 0 : index
    %c0_11 = arith.constant 0 : index
    %9 = vector.load %arg8[%c0_10, %c0_11] : memref<1x64xf32, #tpu.memory_space<vmem>>, vector<1x64xf32>
    %10 = vector.broadcast %9 : vector<1x64xf32> to vector<12x64xf32>
    %11 = arith.addf %8, %10 : vector<12x64xf32>
    %12 = vector.extract_strided_slice %11 {offsets = [0, 0], sizes = [12, 32], strides = [1, 1]} : vector<12x64xf32> to vector<12x32xf32>
    %13 = vector.extract_strided_slice %11 {offsets = [0, 32], sizes = [12, 32], strides = [1, 1]} : vector<12x64xf32> to vector<12x32xf32>
    %c0_12 = arith.constant 0 : index
    %c0_13 = arith.constant 0 : index
    %14 = vector.load %arg3[%c0_12, %c0_13] : memref<16x1xf32, #tpu.memory_space<vmem>>, vector<16x1xf32>
    %c0_14 = arith.constant 0 : index
    %c0_15 = arith.constant 0 : index
    %15 = vector.load %arg4[%c0_14, %c0_15] : memref<1x12xf32, #tpu.memory_space<vmem>>, vector<1x12xf32>
    %16 = vector.broadcast %14 : vector<16x1xf32> to vector<16x12xf32>
    %17 = vector.broadcast %15 : vector<1x12xf32> to vector<16x12xf32>
    %18 = arith.cmpf oeq, %16, %17 : vector<16x12xf32>
    %19 = vector.extract_strided_slice %6 {offsets = [0, 0], sizes = [16, 16], strides = [1, 1]} : vector<16x32xf32> to vector<16x16xf32>
    %20 = vector.extract_strided_slice %12 {offsets = [0, 0], sizes = [12, 16], strides = [1, 1]} : vector<12x32xf32> to vector<12x16xf32>
    %cst_16 = arith.constant dense<0.000000e+00> : vector<16x12xf32>
    %21 = tpu.matmul %19, %20, %cst_16 {dimension_numbers = #tpu.dot_dimension_numbers<[1], [1], [0], [0], [0, 0, 1, 0], [], []>} : vector<16x16xf32>, vector<12x16xf32>, vector<16x12xf32> -> vector<16x12xf32>
    %cst_17 = arith.constant 2.500000e-01 : f32
    %22 = vector.broadcast %cst_17 : f32 to vector<16x12xf32>
    %23 = arith.mulf %21, %22 : vector<16x12xf32>
    %cst_18 = arith.constant -1.000000e+30 : f32
    %24 = vector.broadcast %cst_18 : f32 to vector<16x12xf32>
    %25 = arith.select %18, %23, %24 : vector<16x12xi1>, vector<16x12xf32>
    %cst_19 = arith.constant dense<0xFF800000> : vector<16xf32>
    %26 = vector.multi_reduction <maximumf>, %25, %cst_19 [1] : vector<16x12xf32> to vector<16xf32>
    %27 = vector.shape_cast %26 : vector<16xf32> to vector<16x1xf32>
    %28 = vector.broadcast %27 : vector<16x1xf32> to vector<16x12xf32>
    %29 = arith.subf %25, %28 : vector<16x12xf32>
    %30 = math.exp %29 : vector<16x12xf32>
    %cst_20 = arith.constant dense<0.000000e+00> : vector<16xf32>
    %31 = vector.multi_reduction <add>, %30, %cst_20 [1] : vector<16x12xf32> to vector<16xf32>
    %32 = vector.shape_cast %31 : vector<16xf32> to vector<16x1xf32>
    %33 = tpu.reciprocal %32 {approx = true} : vector<16x1xf32> -> vector<16x1xf32>
    %34 = vector.broadcast %33 : vector<16x1xf32> to vector<16x12xf32>
    %35 = arith.mulf %30, %34 : vector<16x12xf32>
    %36 = vector.extract_strided_slice %13 {offsets = [0, 0], sizes = [12, 16], strides = [1, 1]} : vector<12x32xf32> to vector<12x16xf32>
    %cst_21 = arith.constant dense<0.000000e+00> : vector<16x16xf32>
    %37 = tpu.matmul %35, %36, %cst_21 {dimension_numbers = #tpu.dot_dimension_numbers<[1], [0], [0], [1], [0, 0, 1, 1], [], []>} : vector<16x12xf32>, vector<12x16xf32>, vector<16x16xf32> -> vector<16x16xf32>
    %38 = vector.extract_strided_slice %6 {offsets = [0, 16], sizes = [16, 16], strides = [1, 1]} : vector<16x32xf32> to vector<16x16xf32>
    %39 = vector.extract_strided_slice %12 {offsets = [0, 16], sizes = [12, 16], strides = [1, 1]} : vector<12x32xf32> to vector<12x16xf32>
    %cst_22 = arith.constant dense<0.000000e+00> : vector<16x12xf32>
    %40 = tpu.matmul %38, %39, %cst_22 {dimension_numbers = #tpu.dot_dimension_numbers<[1], [1], [0], [0], [0, 0, 1, 0], [], []>} : vector<16x16xf32>, vector<12x16xf32>, vector<16x12xf32> -> vector<16x12xf32>
    %cst_23 = arith.constant 2.500000e-01 : f32
    %41 = vector.broadcast %cst_23 : f32 to vector<16x12xf32>
    %42 = arith.mulf %40, %41 : vector<16x12xf32>
    %cst_24 = arith.constant -1.000000e+30 : f32
    %43 = vector.broadcast %cst_24 : f32 to vector<16x12xf32>
    %44 = arith.select %18, %42, %43 : vector<16x12xi1>, vector<16x12xf32>
    %cst_25 = arith.constant dense<0xFF800000> : vector<16xf32>
    %45 = vector.multi_reduction <maximumf>, %44, %cst_25 [1] : vector<16x12xf32> to vector<16xf32>
    %46 = vector.shape_cast %45 : vector<16xf32> to vector<16x1xf32>
    %47 = vector.broadcast %46 : vector<16x1xf32> to vector<16x12xf32>
    %48 = arith.subf %44, %47 : vector<16x12xf32>
    %49 = math.exp %48 : vector<16x12xf32>
    %cst_26 = arith.constant dense<0.000000e+00> : vector<16xf32>
    %50 = vector.multi_reduction <add>, %49, %cst_26 [1] : vector<16x12xf32> to vector<16xf32>
    %51 = vector.shape_cast %50 : vector<16xf32> to vector<16x1xf32>
    %52 = tpu.reciprocal %51 {approx = true} : vector<16x1xf32> -> vector<16x1xf32>
    %53 = vector.broadcast %52 : vector<16x1xf32> to vector<16x12xf32>
    %54 = arith.mulf %49, %53 : vector<16x12xf32>
    %55 = vector.extract_strided_slice %13 {offsets = [0, 16], sizes = [12, 16], strides = [1, 1]} : vector<12x32xf32> to vector<12x16xf32>
    %cst_27 = arith.constant dense<0.000000e+00> : vector<16x16xf32>
    %56 = tpu.matmul %54, %55, %cst_27 {dimension_numbers = #tpu.dot_dimension_numbers<[1], [0], [0], [1], [0, 0, 1, 1], [], []>} : vector<16x12xf32>, vector<12x16xf32>, vector<16x16xf32> -> vector<16x16xf32>
    %57 = tpu.concatenate %37, %56 in 1 : vector<16x16xf32>, vector<16x16xf32> -> vector<16x32xf32>
    %c0_28 = arith.constant 0 : index
    %c0_29 = arith.constant 0 : index
    %58 = vector.load %arg9[%c0_28, %c0_29] : memref<32x32xf32, #tpu.memory_space<vmem>>, vector<32x32xf32>
    %cst_30 = arith.constant dense<0.000000e+00> : vector<16x32xf32>
    %59 = tpu.matmul %57, %58, %cst_30 {dimension_numbers = #tpu.dot_dimension_numbers<[1], [0], [0], [1], [0, 0, 1, 1], [], []>} : vector<16x32xf32>, vector<32x32xf32>, vector<16x32xf32> -> vector<16x32xf32>
    %c0_31 = arith.constant 0 : index
    %c0_32 = arith.constant 0 : index
    %60 = vector.load %arg10[%c0_31, %c0_32] : memref<1x32xf32, #tpu.memory_space<vmem>>, vector<1x32xf32>
    %61 = vector.broadcast %60 : vector<1x32xf32> to vector<16x32xf32>
    %62 = arith.addf %59, %61 : vector<16x32xf32>
    %63 = arith.addf %62, %0 : vector<16x32xf32>
    %c0_33 = arith.constant 0 : index
    %c0_34 = arith.constant 0 : index
    %64 = vector.load %arg11[%c0_33, %c0_34] : memref<1x32xf32, #tpu.memory_space<vmem>>, vector<1x32xf32>
    %c0_35 = arith.constant 0 : index
    %c0_36 = arith.constant 0 : index
    %65 = vector.load %arg12[%c0_35, %c0_36] : memref<1x32xf32, #tpu.memory_space<vmem>>, vector<1x32xf32>
    %cst_37 = arith.constant dense<0.000000e+00> : vector<16xf32>
    %66 = vector.multi_reduction <add>, %63, %cst_37 [1] : vector<16x32xf32> to vector<16xf32>
    %67 = vector.shape_cast %66 : vector<16xf32> to vector<16x1xf32>
    %cst_38 = arith.constant 3.200000e+01 : f32
    %68 = vector.broadcast %cst_38 : f32 to vector<16x1xf32>
    %69 = arith.divf %67, %68 : vector<16x1xf32>
    %70 = vector.broadcast %69 : vector<16x1xf32> to vector<16x32xf32>
    %71 = arith.subf %63, %70 : vector<16x32xf32>
    %72 = arith.mulf %71, %71 : vector<16x32xf32>
    %cst_39 = arith.constant dense<0.000000e+00> : vector<16xf32>
    %73 = vector.multi_reduction <add>, %72, %cst_39 [1] : vector<16x32xf32> to vector<16xf32>
    %74 = vector.shape_cast %73 : vector<16xf32> to vector<16x1xf32>
    %cst_40 = arith.constant 3.200000e+01 : f32
    %75 = vector.broadcast %cst_40 : f32 to vector<16x1xf32>
    %76 = arith.divf %74, %75 : vector<16x1xf32>
    %77 = vector.broadcast %69 : vector<16x1xf32> to vector<16x32xf32>
    %78 = arith.subf %63, %77 : vector<16x32xf32>
    %cst_41 = arith.constant 9.99999974E-6 : f32
    %79 = vector.broadcast %cst_41 : f32 to vector<16x1xf32>
    %80 = arith.addf %76, %79 : vector<16x1xf32>
    %81 = math.rsqrt %80 : vector<16x1xf32>
    %82 = vector.broadcast %81 : vector<16x1xf32> to vector<16x32xf32>
    %83 = arith.mulf %78, %82 : vector<16x32xf32>
    %84 = vector.broadcast %64 : vector<1x32xf32> to vector<16x32xf32>
    %85 = arith.mulf %83, %84 : vector<16x32xf32>
    %86 = vector.broadcast %65 : vector<1x32xf32> to vector<16x32xf32>
    %87 = arith.addf %85, %86 : vector<16x32xf32>
    %c0_42 = arith.constant 0 : index
    %c0_43 = arith.constant 0 : index
    %88 = vector.load %arg13[%c0_42, %c0_43] : memref<32x64xf32, #tpu.memory_space<vmem>>, vector<32x64xf32>
    %cst_44 = arith.constant dense<0.000000e+00> : vector<16x64xf32>
    %89 = tpu.matmul %87, %88, %cst_44 {dimension_numbers = #tpu.dot_dimension_numbers<[1], [0], [0], [1], [0, 0, 1, 1], [], []>} : vector<16x32xf32>, vector<32x64xf32>, vector<16x64xf32> -> vector<16x64xf32>
    %c0_45 = arith.constant 0 : index
    %c0_46 = arith.constant 0 : index
    %90 = vector.load %arg14[%c0_45, %c0_46] : memref<1x64xf32, #tpu.memory_space<vmem>>, vector<1x64xf32>
    %91 = vector.broadcast %90 : vector<1x64xf32> to vector<16x64xf32>
    %92 = arith.addf %89, %91 : vector<16x64xf32>
    %cst_47 = arith.constant 0.707106769 : f32
    %93 = vector.broadcast %cst_47 : f32 to vector<16x64xf32>
    %94 = arith.mulf %92, %93 : vector<16x64xf32>
    %95 = math.absf %94 : vector<16x64xf32>
    %cst_48 = arith.constant 0.327591091 : f32
    %96 = vector.broadcast %cst_48 : f32 to vector<16x64xf32>
    %97 = arith.mulf %96, %95 : vector<16x64xf32>
    %cst_49 = arith.constant 1.000000e+00 : f32
    %98 = vector.broadcast %cst_49 : f32 to vector<16x64xf32>
    %99 = arith.addf %98, %97 : vector<16x64xf32>
    %cst_50 = arith.constant 1.000000e+00 : f32
    %100 = vector.broadcast %cst_50 : f32 to vector<16x64xf32>
    %101 = arith.divf %100, %99 : vector<16x64xf32>
    %cst_51 = arith.constant 1.06140542 : f32
    %102 = vector.broadcast %cst_51 : f32 to vector<16x64xf32>
    %103 = arith.mulf %102, %101 : vector<16x64xf32>
    %cst_52 = arith.constant 1.45315206 : f32
    %104 = vector.broadcast %cst_52 : f32 to vector<16x64xf32>
    %105 = arith.subf %103, %104 : vector<16x64xf32>
    %106 = arith.mulf %105, %101 : vector<16x64xf32>
    %cst_53 = arith.constant 1.42141378 : f32
    %107 = vector.broadcast %cst_53 : f32 to vector<16x64xf32>
    %108 = arith.addf %106, %107 : vector<16x64xf32>
    %109 = arith.mulf %108, %101 : vector<16x64xf32>
    %cst_54 = arith.constant 0.284496725 : f32
    %110 = vector.broadcast %cst_54 : f32 to vector<16x64xf32>
    %111 = arith.subf %109, %110 : vector<16x64xf32>
    %112 = arith.mulf %111, %101 : vector<16x64xf32>
    %cst_55 = arith.constant 0.254829586 : f32
    %113 = vector.broadcast %cst_55 : f32 to vector<16x64xf32>
    %114 = arith.addf %112, %113 : vector<16x64xf32>
    %115 = arith.mulf %114, %101 : vector<16x64xf32>
    %cst_56 = arith.constant 0.000000e+00 : f32
    %116 = vector.broadcast %cst_56 : f32 to vector<16x64xf32>
    %117 = arith.subf %116, %95 : vector<16x64xf32>
    %118 = arith.mulf %117, %95 : vector<16x64xf32>
    %119 = math.exp %118 : vector<16x64xf32>
    %120 = arith.mulf %115, %119 : vector<16x64xf32>
    %cst_57 = arith.constant 1.000000e+00 : f32
    %121 = vector.broadcast %cst_57 : f32 to vector<16x64xf32>
    %122 = arith.subf %121, %120 : vector<16x64xf32>
    %cst_58 = arith.constant 0.000000e+00 : f32
    %123 = vector.broadcast %cst_58 : f32 to vector<16x64xf32>
    %124 = arith.cmpf olt, %94, %123 : vector<16x64xf32>
    %cst_59 = arith.constant 0.000000e+00 : f32
    %125 = vector.broadcast %cst_59 : f32 to vector<16x64xf32>
    %126 = arith.subf %125, %122 : vector<16x64xf32>
    %127 = arith.select %124, %126, %122 : vector<16x64xi1>, vector<16x64xf32>
    %cst_60 = arith.constant 5.000000e-01 : f32
    %128 = vector.broadcast %cst_60 : f32 to vector<16x64xf32>
    %129 = arith.mulf %128, %92 : vector<16x64xf32>
    %cst_61 = arith.constant 1.000000e+00 : f32
    %130 = vector.broadcast %cst_61 : f32 to vector<16x64xf32>
    %131 = arith.addf %130, %127 : vector<16x64xf32>
    %132 = arith.mulf %129, %131 : vector<16x64xf32>
    %c0_62 = arith.constant 0 : index
    %c0_63 = arith.constant 0 : index
    %133 = vector.load %arg15[%c0_62, %c0_63] : memref<64x32xf32, #tpu.memory_space<vmem>>, vector<64x32xf32>
    %cst_64 = arith.constant dense<0.000000e+00> : vector<16x32xf32>
    %134 = tpu.matmul %132, %133, %cst_64 {dimension_numbers = #tpu.dot_dimension_numbers<[1], [0], [0], [1], [0, 0, 1, 1], [], []>} : vector<16x64xf32>, vector<64x32xf32>, vector<16x32xf32> -> vector<16x32xf32>
    %135 = arith.addf %87, %134 : vector<16x32xf32>
    %c0_65 = arith.constant 0 : index
    %c0_66 = arith.constant 0 : index
    %136 = vector.load %arg16[%c0_65, %c0_66] : memref<1x32xf32, #tpu.memory_space<vmem>>, vector<1x32xf32>
    %137 = vector.broadcast %136 : vector<1x32xf32> to vector<16x32xf32>
    %138 = arith.addf %135, %137 : vector<16x32xf32>
    %c0_67 = arith.constant 0 : index
    %c0_68 = arith.constant 0 : index
    %139 = vector.load %arg17[%c0_67, %c0_68] : memref<1x32xf32, #tpu.memory_space<vmem>>, vector<1x32xf32>
    %c0_69 = arith.constant 0 : index
    %c0_70 = arith.constant 0 : index
    %140 = vector.load %arg18[%c0_69, %c0_70] : memref<1x32xf32, #tpu.memory_space<vmem>>, vector<1x32xf32>
    %cst_71 = arith.constant dense<0.000000e+00> : vector<16xf32>
    %141 = vector.multi_reduction <add>, %138, %cst_71 [1] : vector<16x32xf32> to vector<16xf32>
    %142 = vector.shape_cast %141 : vector<16xf32> to vector<16x1xf32>
    %cst_72 = arith.constant 3.200000e+01 : f32
    %143 = vector.broadcast %cst_72 : f32 to vector<16x1xf32>
    %144 = arith.divf %142, %143 : vector<16x1xf32>
    %145 = vector.broadcast %144 : vector<16x1xf32> to vector<16x32xf32>
    %146 = arith.subf %138, %145 : vector<16x32xf32>
    %147 = arith.mulf %146, %146 : vector<16x32xf32>
    %cst_73 = arith.constant dense<0.000000e+00> : vector<16xf32>
    %148 = vector.multi_reduction <add>, %147, %cst_73 [1] : vector<16x32xf32> to vector<16xf32>
    %149 = vector.shape_cast %148 : vector<16xf32> to vector<16x1xf32>
    %cst_74 = arith.constant 3.200000e+01 : f32
    %150 = vector.broadcast %cst_74 : f32 to vector<16x1xf32>
    %151 = arith.divf %149, %150 : vector<16x1xf32>
    %152 = vector.broadcast %144 : vector<16x1xf32> to vector<16x32xf32>
    %153 = arith.subf %138, %152 : vector<16x32xf32>
    %cst_75 = arith.constant 9.99999974E-6 : f32
    %154 = vector.broadcast %cst_75 : f32 to vector<16x1xf32>
    %155 = arith.addf %151, %154 : vector<16x1xf32>
    %156 = math.rsqrt %155 : vector<16x1xf32>
    %157 = vector.broadcast %156 : vector<16x1xf32> to vector<16x32xf32>
    %158 = arith.mulf %153, %157 : vector<16x32xf32>
    %159 = vector.broadcast %139 : vector<1x32xf32> to vector<16x32xf32>
    %160 = arith.mulf %158, %159 : vector<16x32xf32>
    %161 = vector.broadcast %140 : vector<1x32xf32> to vector<16x32xf32>
    %162 = arith.addf %160, %161 : vector<16x32xf32>
    %c0_76 = arith.constant 0 : index
    %c0_77 = arith.constant 0 : index
    %163 = vector.load %arg19[%c0_76, %c0_77] : memref<16x32xf32, #tpu.memory_space<vmem>>, vector<16x32xf32>
    tpu.vector_store %arg19[%c0_76, %c0_77], %162 {strides = array<i32>} : memref<16x32xf32, #tpu.memory_space<vmem>>, vector<16x32xf32>,
    return
  }
  func.func @transform_0(%arg0: i32) -> (i32, i32) {
    %c0_i32 = arith.constant 0 : i32
    %c0_i32_0 = arith.constant 0 : i32
    return %arg0, %c0_i32 : i32, i32
  }
  func.func @transform_1(%arg0: i32) -> (i32, i32) {
    %c0_i32 = arith.constant 0 : i32
    %c0_i32_0 = arith.constant 0 : i32
    return %arg0, %c0_i32 : i32, i32
  }
  func.func @transform_2(%arg0: i32) -> (i32, i32) {
    %c0_i32 = arith.constant 0 : i32
    %c0_i32_0 = arith.constant 0 : i32
    %c0_i32_1 = arith.constant 0 : i32
    return %c0_i32, %c0_i32_0 : i32, i32
  }
  func.func @transform_3(%arg0: i32) -> (i32, i32) {
    %c0_i32 = arith.constant 0 : i32
    %c0_i32_0 = arith.constant 0 : i32
    %c0_i32_1 = arith.constant 0 : i32
    return %c0_i32, %c0_i32_0 : i32, i32
  }
  func.func @transform_4(%arg0: i32) -> (i32, i32) {
    %c0_i32 = arith.constant 0 : i32
    %c0_i32_0 = arith.constant 0 : i32
    %c0_i32_1 = arith.constant 0 : i32
    return %c0_i32, %c0_i32_0 : i32, i32
  }
  func.func @transform_5(%arg0: i32) -> (i32, i32) {
    %c0_i32 = arith.constant 0 : i32
    %c0_i32_0 = arith.constant 0 : i32
    %c0_i32_1 = arith.constant 0 : i32
    return %c0_i32, %c0_i32_0 : i32, i32
  }
  func.func @transform_6(%arg0: i32) -> (i32, i32) {
    %c0_i32 = arith.constant 0 : i32
    %c0_i32_0 = arith.constant 0 : i32
    %c0_i32_1 = arith.constant 0 : i32
    return %c0_i32, %c0_i32_0 : i32, i32
  }
  func.func @transform_7(%arg0: i32) -> (i32, i32) {
    %c0_i32 = arith.constant 0 : i32
    %c0_i32_0 = arith.constant 0 : i32
    %c0_i32_1 = arith.constant 0 : i32
    return %c0_i32, %c0_i32_0 : i32, i32
  }
  func.func @transform_8(%arg0: i32) -> (i32, i32) {
    %c0_i32 = arith.constant 0 : i32
    %c0_i32_0 = arith.constant 0 : i32
    %c0_i32_1 = arith.constant 0 : i32
    return %c0_i32, %c0_i32_0 : i32, i32
  }
  func.func @transform_9(%arg0: i32) -> (i32, i32) {
    %c0_i32 = arith.constant 0 : i32
    %c0_i32_0 = arith.constant 0 : i32
    %c0_i32_1 = arith.constant 0 : i32
    return %c0_i32, %c0_i32_0 : i32, i32
  }
  func.func @transform_10(%arg0: i32) -> (i32, i32) {
    %c0_i32 = arith.constant 0 : i32
    %c0_i32_0 = arith.constant 0 : i32
    %c0_i32_1 = arith.constant 0 : i32
    return %c0_i32, %c0_i32_0 : i32, i32
  }
  func.func @transform_11(%arg0: i32) -> (i32, i32) {
    %c0_i32 = arith.constant 0 : i32
    %c0_i32_0 = arith.constant 0 : i32
    %c0_i32_1 = arith.constant 0 : i32
    return %c0_i32, %c0_i32_0 : i32, i32
  }
  func.func @transform_12(%arg0: i32) -> (i32, i32) {
    %c0_i32 = arith.constant 0 : i32
    %c0_i32_0 = arith.constant 0 : i32
    %c0_i32_1 = arith.constant 0 : i32
    return %c0_i32, %c0_i32_0 : i32, i32
  }
  func.func @transform_13(%arg0: i32) -> (i32, i32) {
    %c0_i32 = arith.constant 0 : i32
    %c0_i32_0 = arith.constant 0 : i32
    %c0_i32_1 = arith.constant 0 : i32
    return %c0_i32, %c0_i32_0 : i32, i32
  }
  func.func @transform_14(%arg0: i32) -> (i32, i32) {
    %c0_i32 = arith.constant 0 : i32
    %c0_i32_0 = arith.constant 0 : i32
    %c0_i32_1 = arith.constant 0 : i32
    return %c0_i32, %c0_i32_0 : i32, i32
  }
  func.func @transform_15(%arg0: i32) -> (i32, i32) {
    %c0_i32 = arith.constant 0 : i32
    %c0_i32_0 = arith.constant 0 : i32
    %c0_i32_1 = arith.constant 0 : i32
    return %c0_i32, %c0_i32_0 : i32, i32
  }
  func.func @transform_16(%arg0: i32) -> (i32, i32) {
    %c0_i32 = arith.constant 0 : i32
    %c0_i32_0 = arith.constant 0 : i32
    %c0_i32_1 = arith.constant 0 : i32
    return %c0_i32, %c0_i32_0 : i32, i32
  }
  func.func @transform_17(%arg0: i32) -> (i32, i32) {
    %c0_i32 = arith.constant 0 : i32
    %c0_i32_0 = arith.constant 0 : i32
    %c0_i32_1 = arith.constant 0 : i32
    return %c0_i32, %c0_i32_0 : i32, i32
  }
  func.func @transform_18(%arg0: i32) -> (i32, i32) {
    %c0_i32 = arith.constant 0 : i32
    %c0_i32_0 = arith.constant 0 : i32
    return %arg0, %c0_i32 : i32, i32
  }
}

module attributes {stable_mosaic.version = 11 : i64} {
  func.func @_embed_kernel(%arg0: i32, %arg1: memref<16x4xf32, #tpu.memory_space<vmem>>, %arg2: memref<4x32xf32, #tpu.memory_space<vmem>>, %arg3: memref<1x32xf32, #tpu.memory_space<vmem>>, %arg4: memref<16x32xf32, #tpu.memory_space<vmem>>, %arg5: memref<1x32xf32, #tpu.memory_space<vmem>>, %arg6: memref<1x32xf32, #tpu.memory_space<vmem>>, %arg7: memref<16x32xf32, #tpu.memory_space<vmem>>) attributes {dimension_semantics = [#tpu.dimension_semantics<parallel>], iteration_bounds = array<i64: 2>, scalar_prefetch = 0 : i64, scratch_operands = 0 : i64, tpu.core_type = #tpu.core_type<tc>, window_params = [{transform_indices = @transform_0, window_bounds = array<i64: 16, 4>}, {pipeline_mode = #tpu.pipeline_mode<synchronous>, transform_indices = @transform_1, window_bounds = array<i64: 4, 32>}, {pipeline_mode = #tpu.pipeline_mode<synchronous>, transform_indices = @transform_2, window_bounds = array<i64: 1, 32>}, {pipeline_mode = #tpu.pipeline_mode<synchronous>, transform_indices = @transform_3, window_bounds = array<i64: 16, 32>}, {pipeline_mode = #tpu.pipeline_mode<synchronous>, transform_indices = @transform_4, window_bounds = array<i64: 1, 32>}, {pipeline_mode = #tpu.pipeline_mode<synchronous>, transform_indices = @transform_5, window_bounds = array<i64: 1, 32>}, {transform_indices = @transform_6, window_bounds = array<i64: 16, 32>}]} {
    %c0 = arith.constant 0 : index
    %c0_0 = arith.constant 0 : index
    %0 = vector.load %arg1[%c0, %c0_0] : memref<16x4xf32, #tpu.memory_space<vmem>>, vector<16x4xf32>
    %c0_1 = arith.constant 0 : index
    %c0_2 = arith.constant 0 : index
    %1 = vector.load %arg2[%c0_1, %c0_2] : memref<4x32xf32, #tpu.memory_space<vmem>>, vector<4x32xf32>
    %cst = arith.constant dense<0.000000e+00> : vector<16x32xf32>
    %2 = tpu.matmul %0, %1, %cst {dimension_numbers = #tpu.dot_dimension_numbers<[1], [0], [0], [1], [0, 0, 1, 1], [], []>} : vector<16x4xf32>, vector<4x32xf32>, vector<16x32xf32> -> vector<16x32xf32>
    %c0_3 = arith.constant 0 : index
    %c0_4 = arith.constant 0 : index
    %3 = vector.load %arg3[%c0_3, %c0_4] : memref<1x32xf32, #tpu.memory_space<vmem>>, vector<1x32xf32>
    %4 = vector.broadcast %3 : vector<1x32xf32> to vector<16x32xf32>
    %5 = arith.addf %2, %4 : vector<16x32xf32>
    %c0_5 = arith.constant 0 : index
    %c0_6 = arith.constant 0 : index
    %6 = vector.load %arg4[%c0_5, %c0_6] : memref<16x32xf32, #tpu.memory_space<vmem>>, vector<16x32xf32>
    %7 = arith.addf %5, %6 : vector<16x32xf32>
    %c0_7 = arith.constant 0 : index
    %c0_8 = arith.constant 0 : index
    %8 = vector.load %arg5[%c0_7, %c0_8] : memref<1x32xf32, #tpu.memory_space<vmem>>, vector<1x32xf32>
    %c0_9 = arith.constant 0 : index
    %c0_10 = arith.constant 0 : index
    %9 = vector.load %arg6[%c0_9, %c0_10] : memref<1x32xf32, #tpu.memory_space<vmem>>, vector<1x32xf32>
    %cst_11 = arith.constant dense<0.000000e+00> : vector<16xf32>
    %10 = vector.multi_reduction <add>, %7, %cst_11 [1] : vector<16x32xf32> to vector<16xf32>
    %11 = vector.shape_cast %10 : vector<16xf32> to vector<16x1xf32>
    %cst_12 = arith.constant 3.200000e+01 : f32
    %12 = vector.broadcast %cst_12 : f32 to vector<16x1xf32>
    %13 = arith.divf %11, %12 : vector<16x1xf32>
    %14 = vector.broadcast %13 : vector<16x1xf32> to vector<16x32xf32>
    %15 = arith.subf %7, %14 : vector<16x32xf32>
    %16 = arith.mulf %15, %15 : vector<16x32xf32>
    %cst_13 = arith.constant dense<0.000000e+00> : vector<16xf32>
    %17 = vector.multi_reduction <add>, %16, %cst_13 [1] : vector<16x32xf32> to vector<16xf32>
    %18 = vector.shape_cast %17 : vector<16xf32> to vector<16x1xf32>
    %cst_14 = arith.constant 3.200000e+01 : f32
    %19 = vector.broadcast %cst_14 : f32 to vector<16x1xf32>
    %20 = arith.divf %18, %19 : vector<16x1xf32>
    %21 = vector.broadcast %13 : vector<16x1xf32> to vector<16x32xf32>
    %22 = arith.subf %7, %21 : vector<16x32xf32>
    %cst_15 = arith.constant 9.99999974E-6 : f32
    %23 = vector.broadcast %cst_15 : f32 to vector<16x1xf32>
    %24 = arith.addf %20, %23 : vector<16x1xf32>
    %25 = math.rsqrt %24 : vector<16x1xf32>
    %26 = vector.broadcast %25 : vector<16x1xf32> to vector<16x32xf32>
    %27 = arith.mulf %22, %26 : vector<16x32xf32>
    %28 = vector.broadcast %8 : vector<1x32xf32> to vector<16x32xf32>
    %29 = arith.mulf %27, %28 : vector<16x32xf32>
    %30 = vector.broadcast %9 : vector<1x32xf32> to vector<16x32xf32>
    %31 = arith.addf %29, %30 : vector<16x32xf32>
    %c0_16 = arith.constant 0 : index
    %c0_17 = arith.constant 0 : index
    %32 = vector.load %arg7[%c0_16, %c0_17] : memref<16x32xf32, #tpu.memory_space<vmem>>, vector<16x32xf32>
    tpu.vector_store %arg7[%c0_16, %c0_17], %31 {strides = array<i32>} : memref<16x32xf32, #tpu.memory_space<vmem>>, vector<16x32xf32>,
    return
  }
  func.func @transform_0(%arg0: i32) -> (i32, i32) {
    %c0_i32 = arith.constant 0 : i32
    %c0_i32_0 = arith.constant 0 : i32
    return %arg0, %c0_i32 : i32, i32
  }
  func.func @transform_1(%arg0: i32) -> (i32, i32) {
    %c0_i32 = arith.constant 0 : i32
    %c0_i32_0 = arith.constant 0 : i32
    %c0_i32_1 = arith.constant 0 : i32
    return %c0_i32, %c0_i32_0 : i32, i32
  }
  func.func @transform_2(%arg0: i32) -> (i32, i32) {
    %c0_i32 = arith.constant 0 : i32
    %c0_i32_0 = arith.constant 0 : i32
    %c0_i32_1 = arith.constant 0 : i32
    return %c0_i32, %c0_i32_0 : i32, i32
  }
  func.func @transform_3(%arg0: i32) -> (i32, i32) {
    %c0_i32 = arith.constant 0 : i32
    %c0_i32_0 = arith.constant 0 : i32
    %c0_i32_1 = arith.constant 0 : i32
    return %c0_i32, %c0_i32_0 : i32, i32
  }
  func.func @transform_4(%arg0: i32) -> (i32, i32) {
    %c0_i32 = arith.constant 0 : i32
    %c0_i32_0 = arith.constant 0 : i32
    %c0_i32_1 = arith.constant 0 : i32
    return %c0_i32, %c0_i32_0 : i32, i32
  }
  func.func @transform_5(%arg0: i32) -> (i32, i32) {
    %c0_i32 = arith.constant 0 : i32
    %c0_i32_0 = arith.constant 0 : i32
    %c0_i32_1 = arith.constant 0 : i32
    return %c0_i32, %c0_i32_0 : i32, i32
  }
  func.func @transform_6(%arg0: i32) -> (i32, i32) {
    %c0_i32 = arith.constant 0 : i32
    %c0_i32_0 = arith.constant 0 : i32
    return %arg0, %c0_i32 : i32, i32
  }
}

module attributes {stable_mosaic.version = 11 : i64} {
  func.func @_attn_fused_kernel(%arg0: i32, %arg1: memref<16x32xf32, #tpu.memory_space<vmem>>, %arg2: memref<16x32xf32, #tpu.memory_space<vmem>>, %arg3: memref<16x1xf32, #tpu.memory_space<vmem>>, %arg4: memref<1x16xf32, #tpu.memory_space<vmem>>, %arg5: memref<32x32xf32, #tpu.memory_space<vmem>>, %arg6: memref<1x32xf32, #tpu.memory_space<vmem>>, %arg7: memref<32x64xf32, #tpu.memory_space<vmem>>, %arg8: memref<1x64xf32, #tpu.memory_space<vmem>>, %arg9: memref<32x32xf32, #tpu.memory_space<vmem>>, %arg10: memref<1x32xf32, #tpu.memory_space<vmem>>, %arg11: memref<1x32xf32, #tpu.memory_space<vmem>>, %arg12: memref<1x32xf32, #tpu.memory_space<vmem>>, %arg13: memref<32x64xf32, #tpu.memory_space<vmem>>, %arg14: memref<1x64xf32, #tpu.memory_space<vmem>>, %arg15: memref<64x32xf32, #tpu.memory_space<vmem>>, %arg16: memref<1x32xf32, #tpu.memory_space<vmem>>, %arg17: memref<1x32xf32, #tpu.memory_space<vmem>>, %arg18: memref<1x32xf32, #tpu.memory_space<vmem>>, %arg19: memref<16x32xf32, #tpu.memory_space<vmem>>) attributes {dimension_semantics = [#tpu.dimension_semantics<parallel>], iteration_bounds = array<i64: 2>, scalar_prefetch = 0 : i64, scratch_operands = 0 : i64, tpu.core_type = #tpu.core_type<tc>, window_params = [{transform_indices = @transform_0, window_bounds = array<i64: 16, 32>}, {transform_indices = @transform_1, window_bounds = array<i64: 16, 32>}, {pipeline_mode = #tpu.pipeline_mode<synchronous>, transform_indices = @transform_2, window_bounds = array<i64: 16, 1>}, {pipeline_mode = #tpu.pipeline_mode<synchronous>, transform_indices = @transform_3, window_bounds = array<i64: 1, 16>}, {pipeline_mode = #tpu.pipeline_mode<synchronous>, transform_indices = @transform_4, window_bounds = array<i64: 32, 32>}, {pipeline_mode = #tpu.pipeline_mode<synchronous>, transform_indices = @transform_5, window_bounds = array<i64: 1, 32>}, {pipeline_mode = #tpu.pipeline_mode<synchronous>, transform_indices = @transform_6, window_bounds = array<i64: 32, 64>}, {pipeline_mode = #tpu.pipeline_mode<synchronous>, transform_indices = @transform_7, window_bounds = array<i64: 1, 64>}, {pipeline_mode = #tpu.pipeline_mode<synchronous>, transform_indices = @transform_8, window_bounds = array<i64: 32, 32>}, {pipeline_mode = #tpu.pipeline_mode<synchronous>, transform_indices = @transform_9, window_bounds = array<i64: 1, 32>}, {pipeline_mode = #tpu.pipeline_mode<synchronous>, transform_indices = @transform_10, window_bounds = array<i64: 1, 32>}, {pipeline_mode = #tpu.pipeline_mode<synchronous>, transform_indices = @transform_11, window_bounds = array<i64: 1, 32>}, {pipeline_mode = #tpu.pipeline_mode<synchronous>, transform_indices = @transform_12, window_bounds = array<i64: 32, 64>}, {pipeline_mode = #tpu.pipeline_mode<synchronous>, transform_indices = @transform_13, window_bounds = array<i64: 1, 64>}, {pipeline_mode = #tpu.pipeline_mode<synchronous>, transform_indices = @transform_14, window_bounds = array<i64: 64, 32>}, {pipeline_mode = #tpu.pipeline_mode<synchronous>, transform_indices = @transform_15, window_bounds = array<i64: 1, 32>}, {pipeline_mode = #tpu.pipeline_mode<synchronous>, transform_indices = @transform_16, window_bounds = array<i64: 1, 32>}, {pipeline_mode = #tpu.pipeline_mode<synchronous>, transform_indices = @transform_17, window_bounds = array<i64: 1, 32>}, {transform_indices = @transform_18, window_bounds = array<i64: 16, 32>}]} {
    %c0 = arith.constant 0 : index
    %c0_0 = arith.constant 0 : index
    %0 = vector.load %arg1[%c0, %c0_0] : memref<16x32xf32, #tpu.memory_space<vmem>>, vector<16x32xf32>
    %c0_1 = arith.constant 0 : index
    %c0_2 = arith.constant 0 : index
    %1 = vector.load %arg2[%c0_1, %c0_2] : memref<16x32xf32, #tpu.memory_space<vmem>>, vector<16x32xf32>
    %c0_3 = arith.constant 0 : index
    %c0_4 = arith.constant 0 : index
    %2 = vector.load %arg5[%c0_3, %c0_4] : memref<32x32xf32, #tpu.memory_space<vmem>>, vector<32x32xf32>
    %cst = arith.constant dense<0.000000e+00> : vector<16x32xf32>
    %3 = tpu.matmul %0, %2, %cst {dimension_numbers = #tpu.dot_dimension_numbers<[1], [0], [0], [1], [0, 0, 1, 1], [], []>} : vector<16x32xf32>, vector<32x32xf32>, vector<16x32xf32> -> vector<16x32xf32>
    %c0_5 = arith.constant 0 : index
    %c0_6 = arith.constant 0 : index
    %4 = vector.load %arg6[%c0_5, %c0_6] : memref<1x32xf32, #tpu.memory_space<vmem>>, vector<1x32xf32>
    %5 = vector.broadcast %4 : vector<1x32xf32> to vector<16x32xf32>
    %6 = arith.addf %3, %5 : vector<16x32xf32>
    %c0_7 = arith.constant 0 : index
    %c0_8 = arith.constant 0 : index
    %7 = vector.load %arg7[%c0_7, %c0_8] : memref<32x64xf32, #tpu.memory_space<vmem>>, vector<32x64xf32>
    %cst_9 = arith.constant dense<0.000000e+00> : vector<16x64xf32>
    %8 = tpu.matmul %1, %7, %cst_9 {dimension_numbers = #tpu.dot_dimension_numbers<[1], [0], [0], [1], [0, 0, 1, 1], [], []>} : vector<16x32xf32>, vector<32x64xf32>, vector<16x64xf32> -> vector<16x64xf32>
    %c0_10 = arith.constant 0 : index
    %c0_11 = arith.constant 0 : index
    %9 = vector.load %arg8[%c0_10, %c0_11] : memref<1x64xf32, #tpu.memory_space<vmem>>, vector<1x64xf32>
    %10 = vector.broadcast %9 : vector<1x64xf32> to vector<16x64xf32>
    %11 = arith.addf %8, %10 : vector<16x64xf32>
    %12 = vector.extract_strided_slice %11 {offsets = [0, 0], sizes = [16, 32], strides = [1, 1]} : vector<16x64xf32> to vector<16x32xf32>
    %13 = vector.extract_strided_slice %11 {offsets = [0, 32], sizes = [16, 32], strides = [1, 1]} : vector<16x64xf32> to vector<16x32xf32>
    %c0_12 = arith.constant 0 : index
    %c0_13 = arith.constant 0 : index
    %14 = vector.load %arg3[%c0_12, %c0_13] : memref<16x1xf32, #tpu.memory_space<vmem>>, vector<16x1xf32>
    %c0_14 = arith.constant 0 : index
    %c0_15 = arith.constant 0 : index
    %15 = vector.load %arg4[%c0_14, %c0_15] : memref<1x16xf32, #tpu.memory_space<vmem>>, vector<1x16xf32>
    %16 = vector.broadcast %14 : vector<16x1xf32> to vector<16x16xf32>
    %17 = vector.broadcast %15 : vector<1x16xf32> to vector<16x16xf32>
    %18 = arith.cmpf oeq, %16, %17 : vector<16x16xf32>
    %19 = vector.extract_strided_slice %6 {offsets = [0, 0], sizes = [16, 16], strides = [1, 1]} : vector<16x32xf32> to vector<16x16xf32>
    %20 = vector.extract_strided_slice %12 {offsets = [0, 0], sizes = [16, 16], strides = [1, 1]} : vector<16x32xf32> to vector<16x16xf32>
    %cst_16 = arith.constant dense<0.000000e+00> : vector<16x16xf32>
    %21 = tpu.matmul %19, %20, %cst_16 {dimension_numbers = #tpu.dot_dimension_numbers<[1], [1], [0], [0], [0, 0, 1, 0], [], []>} : vector<16x16xf32>, vector<16x16xf32>, vector<16x16xf32> -> vector<16x16xf32>
    %cst_17 = arith.constant 2.500000e-01 : f32
    %22 = vector.broadcast %cst_17 : f32 to vector<16x16xf32>
    %23 = arith.mulf %21, %22 : vector<16x16xf32>
    %cst_18 = arith.constant -1.000000e+30 : f32
    %24 = vector.broadcast %cst_18 : f32 to vector<16x16xf32>
    %25 = arith.select %18, %23, %24 : vector<16x16xi1>, vector<16x16xf32>
    %cst_19 = arith.constant dense<0xFF800000> : vector<16xf32>
    %26 = vector.multi_reduction <maximumf>, %25, %cst_19 [1] : vector<16x16xf32> to vector<16xf32>
    %27 = vector.shape_cast %26 : vector<16xf32> to vector<16x1xf32>
    %28 = vector.broadcast %27 : vector<16x1xf32> to vector<16x16xf32>
    %29 = arith.subf %25, %28 : vector<16x16xf32>
    %30 = math.exp %29 : vector<16x16xf32>
    %cst_20 = arith.constant dense<0.000000e+00> : vector<16xf32>
    %31 = vector.multi_reduction <add>, %30, %cst_20 [1] : vector<16x16xf32> to vector<16xf32>
    %32 = vector.shape_cast %31 : vector<16xf32> to vector<16x1xf32>
    %33 = tpu.reciprocal %32 {approx = true} : vector<16x1xf32> -> vector<16x1xf32>
    %34 = vector.broadcast %33 : vector<16x1xf32> to vector<16x16xf32>
    %35 = arith.mulf %30, %34 : vector<16x16xf32>
    %36 = vector.extract_strided_slice %13 {offsets = [0, 0], sizes = [16, 16], strides = [1, 1]} : vector<16x32xf32> to vector<16x16xf32>
    %cst_21 = arith.constant dense<0.000000e+00> : vector<16x16xf32>
    %37 = tpu.matmul %35, %36, %cst_21 {dimension_numbers = #tpu.dot_dimension_numbers<[1], [0], [0], [1], [0, 0, 1, 1], [], []>} : vector<16x16xf32>, vector<16x16xf32>, vector<16x16xf32> -> vector<16x16xf32>
    %38 = vector.extract_strided_slice %6 {offsets = [0, 16], sizes = [16, 16], strides = [1, 1]} : vector<16x32xf32> to vector<16x16xf32>
    %39 = vector.extract_strided_slice %12 {offsets = [0, 16], sizes = [16, 16], strides = [1, 1]} : vector<16x32xf32> to vector<16x16xf32>
    %cst_22 = arith.constant dense<0.000000e+00> : vector<16x16xf32>
    %40 = tpu.matmul %38, %39, %cst_22 {dimension_numbers = #tpu.dot_dimension_numbers<[1], [1], [0], [0], [0, 0, 1, 0], [], []>} : vector<16x16xf32>, vector<16x16xf32>, vector<16x16xf32> -> vector<16x16xf32>
    %cst_23 = arith.constant 2.500000e-01 : f32
    %41 = vector.broadcast %cst_23 : f32 to vector<16x16xf32>
    %42 = arith.mulf %40, %41 : vector<16x16xf32>
    %cst_24 = arith.constant -1.000000e+30 : f32
    %43 = vector.broadcast %cst_24 : f32 to vector<16x16xf32>
    %44 = arith.select %18, %42, %43 : vector<16x16xi1>, vector<16x16xf32>
    %cst_25 = arith.constant dense<0xFF800000> : vector<16xf32>
    %45 = vector.multi_reduction <maximumf>, %44, %cst_25 [1] : vector<16x16xf32> to vector<16xf32>
    %46 = vector.shape_cast %45 : vector<16xf32> to vector<16x1xf32>
    %47 = vector.broadcast %46 : vector<16x1xf32> to vector<16x16xf32>
    %48 = arith.subf %44, %47 : vector<16x16xf32>
    %49 = math.exp %48 : vector<16x16xf32>
    %cst_26 = arith.constant dense<0.000000e+00> : vector<16xf32>
    %50 = vector.multi_reduction <add>, %49, %cst_26 [1] : vector<16x16xf32> to vector<16xf32>
    %51 = vector.shape_cast %50 : vector<16xf32> to vector<16x1xf32>
    %52 = tpu.reciprocal %51 {approx = true} : vector<16x1xf32> -> vector<16x1xf32>
    %53 = vector.broadcast %52 : vector<16x1xf32> to vector<16x16xf32>
    %54 = arith.mulf %49, %53 : vector<16x16xf32>
    %55 = vector.extract_strided_slice %13 {offsets = [0, 16], sizes = [16, 16], strides = [1, 1]} : vector<16x32xf32> to vector<16x16xf32>
    %cst_27 = arith.constant dense<0.000000e+00> : vector<16x16xf32>
    %56 = tpu.matmul %54, %55, %cst_27 {dimension_numbers = #tpu.dot_dimension_numbers<[1], [0], [0], [1], [0, 0, 1, 1], [], []>} : vector<16x16xf32>, vector<16x16xf32>, vector<16x16xf32> -> vector<16x16xf32>
    %57 = tpu.concatenate %37, %56 in 1 : vector<16x16xf32>, vector<16x16xf32> -> vector<16x32xf32>
    %c0_28 = arith.constant 0 : index
    %c0_29 = arith.constant 0 : index
    %58 = vector.load %arg9[%c0_28, %c0_29] : memref<32x32xf32, #tpu.memory_space<vmem>>, vector<32x32xf32>
    %cst_30 = arith.constant dense<0.000000e+00> : vector<16x32xf32>
    %59 = tpu.matmul %57, %58, %cst_30 {dimension_numbers = #tpu.dot_dimension_numbers<[1], [0], [0], [1], [0, 0, 1, 1], [], []>} : vector<16x32xf32>, vector<32x32xf32>, vector<16x32xf32> -> vector<16x32xf32>
    %c0_31 = arith.constant 0 : index
    %c0_32 = arith.constant 0 : index
    %60 = vector.load %arg10[%c0_31, %c0_32] : memref<1x32xf32, #tpu.memory_space<vmem>>, vector<1x32xf32>
    %61 = vector.broadcast %60 : vector<1x32xf32> to vector<16x32xf32>
    %62 = arith.addf %59, %61 : vector<16x32xf32>
    %63 = arith.addf %62, %0 : vector<16x32xf32>
    %c0_33 = arith.constant 0 : index
    %c0_34 = arith.constant 0 : index
    %64 = vector.load %arg11[%c0_33, %c0_34] : memref<1x32xf32, #tpu.memory_space<vmem>>, vector<1x32xf32>
    %c0_35 = arith.constant 0 : index
    %c0_36 = arith.constant 0 : index
    %65 = vector.load %arg12[%c0_35, %c0_36] : memref<1x32xf32, #tpu.memory_space<vmem>>, vector<1x32xf32>
    %cst_37 = arith.constant dense<0.000000e+00> : vector<16xf32>
    %66 = vector.multi_reduction <add>, %63, %cst_37 [1] : vector<16x32xf32> to vector<16xf32>
    %67 = vector.shape_cast %66 : vector<16xf32> to vector<16x1xf32>
    %cst_38 = arith.constant 3.200000e+01 : f32
    %68 = vector.broadcast %cst_38 : f32 to vector<16x1xf32>
    %69 = arith.divf %67, %68 : vector<16x1xf32>
    %70 = vector.broadcast %69 : vector<16x1xf32> to vector<16x32xf32>
    %71 = arith.subf %63, %70 : vector<16x32xf32>
    %72 = arith.mulf %71, %71 : vector<16x32xf32>
    %cst_39 = arith.constant dense<0.000000e+00> : vector<16xf32>
    %73 = vector.multi_reduction <add>, %72, %cst_39 [1] : vector<16x32xf32> to vector<16xf32>
    %74 = vector.shape_cast %73 : vector<16xf32> to vector<16x1xf32>
    %cst_40 = arith.constant 3.200000e+01 : f32
    %75 = vector.broadcast %cst_40 : f32 to vector<16x1xf32>
    %76 = arith.divf %74, %75 : vector<16x1xf32>
    %77 = vector.broadcast %69 : vector<16x1xf32> to vector<16x32xf32>
    %78 = arith.subf %63, %77 : vector<16x32xf32>
    %cst_41 = arith.constant 9.99999974E-6 : f32
    %79 = vector.broadcast %cst_41 : f32 to vector<16x1xf32>
    %80 = arith.addf %76, %79 : vector<16x1xf32>
    %81 = math.rsqrt %80 : vector<16x1xf32>
    %82 = vector.broadcast %81 : vector<16x1xf32> to vector<16x32xf32>
    %83 = arith.mulf %78, %82 : vector<16x32xf32>
    %84 = vector.broadcast %64 : vector<1x32xf32> to vector<16x32xf32>
    %85 = arith.mulf %83, %84 : vector<16x32xf32>
    %86 = vector.broadcast %65 : vector<1x32xf32> to vector<16x32xf32>
    %87 = arith.addf %85, %86 : vector<16x32xf32>
    %c0_42 = arith.constant 0 : index
    %c0_43 = arith.constant 0 : index
    %88 = vector.load %arg13[%c0_42, %c0_43] : memref<32x64xf32, #tpu.memory_space<vmem>>, vector<32x64xf32>
    %cst_44 = arith.constant dense<0.000000e+00> : vector<16x64xf32>
    %89 = tpu.matmul %87, %88, %cst_44 {dimension_numbers = #tpu.dot_dimension_numbers<[1], [0], [0], [1], [0, 0, 1, 1], [], []>} : vector<16x32xf32>, vector<32x64xf32>, vector<16x64xf32> -> vector<16x64xf32>
    %c0_45 = arith.constant 0 : index
    %c0_46 = arith.constant 0 : index
    %90 = vector.load %arg14[%c0_45, %c0_46] : memref<1x64xf32, #tpu.memory_space<vmem>>, vector<1x64xf32>
    %91 = vector.broadcast %90 : vector<1x64xf32> to vector<16x64xf32>
    %92 = arith.addf %89, %91 : vector<16x64xf32>
    %cst_47 = arith.constant 0.707106769 : f32
    %93 = vector.broadcast %cst_47 : f32 to vector<16x64xf32>
    %94 = arith.mulf %92, %93 : vector<16x64xf32>
    %95 = math.absf %94 : vector<16x64xf32>
    %cst_48 = arith.constant 0.327591091 : f32
    %96 = vector.broadcast %cst_48 : f32 to vector<16x64xf32>
    %97 = arith.mulf %96, %95 : vector<16x64xf32>
    %cst_49 = arith.constant 1.000000e+00 : f32
    %98 = vector.broadcast %cst_49 : f32 to vector<16x64xf32>
    %99 = arith.addf %98, %97 : vector<16x64xf32>
    %cst_50 = arith.constant 1.000000e+00 : f32
    %100 = vector.broadcast %cst_50 : f32 to vector<16x64xf32>
    %101 = arith.divf %100, %99 : vector<16x64xf32>
    %cst_51 = arith.constant 1.06140542 : f32
    %102 = vector.broadcast %cst_51 : f32 to vector<16x64xf32>
    %103 = arith.mulf %102, %101 : vector<16x64xf32>
    %cst_52 = arith.constant 1.45315206 : f32
    %104 = vector.broadcast %cst_52 : f32 to vector<16x64xf32>
    %105 = arith.subf %103, %104 : vector<16x64xf32>
    %106 = arith.mulf %105, %101 : vector<16x64xf32>
    %cst_53 = arith.constant 1.42141378 : f32
    %107 = vector.broadcast %cst_53 : f32 to vector<16x64xf32>
    %108 = arith.addf %106, %107 : vector<16x64xf32>
    %109 = arith.mulf %108, %101 : vector<16x64xf32>
    %cst_54 = arith.constant 0.284496725 : f32
    %110 = vector.broadcast %cst_54 : f32 to vector<16x64xf32>
    %111 = arith.subf %109, %110 : vector<16x64xf32>
    %112 = arith.mulf %111, %101 : vector<16x64xf32>
    %cst_55 = arith.constant 0.254829586 : f32
    %113 = vector.broadcast %cst_55 : f32 to vector<16x64xf32>
    %114 = arith.addf %112, %113 : vector<16x64xf32>
    %115 = arith.mulf %114, %101 : vector<16x64xf32>
    %cst_56 = arith.constant 0.000000e+00 : f32
    %116 = vector.broadcast %cst_56 : f32 to vector<16x64xf32>
    %117 = arith.subf %116, %95 : vector<16x64xf32>
    %118 = arith.mulf %117, %95 : vector<16x64xf32>
    %119 = math.exp %118 : vector<16x64xf32>
    %120 = arith.mulf %115, %119 : vector<16x64xf32>
    %cst_57 = arith.constant 1.000000e+00 : f32
    %121 = vector.broadcast %cst_57 : f32 to vector<16x64xf32>
    %122 = arith.subf %121, %120 : vector<16x64xf32>
    %cst_58 = arith.constant 0.000000e+00 : f32
    %123 = vector.broadcast %cst_58 : f32 to vector<16x64xf32>
    %124 = arith.cmpf olt, %94, %123 : vector<16x64xf32>
    %cst_59 = arith.constant 0.000000e+00 : f32
    %125 = vector.broadcast %cst_59 : f32 to vector<16x64xf32>
    %126 = arith.subf %125, %122 : vector<16x64xf32>
    %127 = arith.select %124, %126, %122 : vector<16x64xi1>, vector<16x64xf32>
    %cst_60 = arith.constant 5.000000e-01 : f32
    %128 = vector.broadcast %cst_60 : f32 to vector<16x64xf32>
    %129 = arith.mulf %128, %92 : vector<16x64xf32>
    %cst_61 = arith.constant 1.000000e+00 : f32
    %130 = vector.broadcast %cst_61 : f32 to vector<16x64xf32>
    %131 = arith.addf %130, %127 : vector<16x64xf32>
    %132 = arith.mulf %129, %131 : vector<16x64xf32>
    %c0_62 = arith.constant 0 : index
    %c0_63 = arith.constant 0 : index
    %133 = vector.load %arg15[%c0_62, %c0_63] : memref<64x32xf32, #tpu.memory_space<vmem>>, vector<64x32xf32>
    %cst_64 = arith.constant dense<0.000000e+00> : vector<16x32xf32>
    %134 = tpu.matmul %132, %133, %cst_64 {dimension_numbers = #tpu.dot_dimension_numbers<[1], [0], [0], [1], [0, 0, 1, 1], [], []>} : vector<16x64xf32>, vector<64x32xf32>, vector<16x32xf32> -> vector<16x32xf32>
    %135 = arith.addf %87, %134 : vector<16x32xf32>
    %c0_65 = arith.constant 0 : index
    %c0_66 = arith.constant 0 : index
    %136 = vector.load %arg16[%c0_65, %c0_66] : memref<1x32xf32, #tpu.memory_space<vmem>>, vector<1x32xf32>
    %137 = vector.broadcast %136 : vector<1x32xf32> to vector<16x32xf32>
    %138 = arith.addf %135, %137 : vector<16x32xf32>
    %c0_67 = arith.constant 0 : index
    %c0_68 = arith.constant 0 : index
    %139 = vector.load %arg17[%c0_67, %c0_68] : memref<1x32xf32, #tpu.memory_space<vmem>>, vector<1x32xf32>
    %c0_69 = arith.constant 0 : index
    %c0_70 = arith.constant 0 : index
    %140 = vector.load %arg18[%c0_69, %c0_70] : memref<1x32xf32, #tpu.memory_space<vmem>>, vector<1x32xf32>
    %cst_71 = arith.constant dense<0.000000e+00> : vector<16xf32>
    %141 = vector.multi_reduction <add>, %138, %cst_71 [1] : vector<16x32xf32> to vector<16xf32>
    %142 = vector.shape_cast %141 : vector<16xf32> to vector<16x1xf32>
    %cst_72 = arith.constant 3.200000e+01 : f32
    %143 = vector.broadcast %cst_72 : f32 to vector<16x1xf32>
    %144 = arith.divf %142, %143 : vector<16x1xf32>
    %145 = vector.broadcast %144 : vector<16x1xf32> to vector<16x32xf32>
    %146 = arith.subf %138, %145 : vector<16x32xf32>
    %147 = arith.mulf %146, %146 : vector<16x32xf32>
    %cst_73 = arith.constant dense<0.000000e+00> : vector<16xf32>
    %148 = vector.multi_reduction <add>, %147, %cst_73 [1] : vector<16x32xf32> to vector<16xf32>
    %149 = vector.shape_cast %148 : vector<16xf32> to vector<16x1xf32>
    %cst_74 = arith.constant 3.200000e+01 : f32
    %150 = vector.broadcast %cst_74 : f32 to vector<16x1xf32>
    %151 = arith.divf %149, %150 : vector<16x1xf32>
    %152 = vector.broadcast %144 : vector<16x1xf32> to vector<16x32xf32>
    %153 = arith.subf %138, %152 : vector<16x32xf32>
    %cst_75 = arith.constant 9.99999974E-6 : f32
    %154 = vector.broadcast %cst_75 : f32 to vector<16x1xf32>
    %155 = arith.addf %151, %154 : vector<16x1xf32>
    %156 = math.rsqrt %155 : vector<16x1xf32>
    %157 = vector.broadcast %156 : vector<16x1xf32> to vector<16x32xf32>
    %158 = arith.mulf %153, %157 : vector<16x32xf32>
    %159 = vector.broadcast %139 : vector<1x32xf32> to vector<16x32xf32>
    %160 = arith.mulf %158, %159 : vector<16x32xf32>
    %161 = vector.broadcast %140 : vector<1x32xf32> to vector<16x32xf32>
    %162 = arith.addf %160, %161 : vector<16x32xf32>
    %c0_76 = arith.constant 0 : index
    %c0_77 = arith.constant 0 : index
    %163 = vector.load %arg19[%c0_76, %c0_77] : memref<16x32xf32, #tpu.memory_space<vmem>>, vector<16x32xf32>
    tpu.vector_store %arg19[%c0_76, %c0_77], %162 {strides = array<i32>} : memref<16x32xf32, #tpu.memory_space<vmem>>, vector<16x32xf32>,
    return
  }
  func.func @transform_0(%arg0: i32) -> (i32, i32) {
    %c0_i32 = arith.constant 0 : i32
    %c0_i32_0 = arith.constant 0 : i32
    return %arg0, %c0_i32 : i32, i32
  }
  func.func @transform_1(%arg0: i32) -> (i32, i32) {
    %c0_i32 = arith.constant 0 : i32
    %c0_i32_0 = arith.constant 0 : i32
    return %arg0, %c0_i32 : i32, i32
  }
  func.func @transform_2(%arg0: i32) -> (i32, i32) {
    %c0_i32 = arith.constant 0 : i32
    %c0_i32_0 = arith.constant 0 : i32
    %c0_i32_1 = arith.constant 0 : i32
    return %c0_i32, %c0_i32_0 : i32, i32
  }
  func.func @transform_3(%arg0: i32) -> (i32, i32) {
    %c0_i32 = arith.constant 0 : i32
    %c0_i32_0 = arith.constant 0 : i32
    %c0_i32_1 = arith.constant 0 : i32
    return %c0_i32, %c0_i32_0 : i32, i32
  }
  func.func @transform_4(%arg0: i32) -> (i32, i32) {
    %c0_i32 = arith.constant 0 : i32
    %c0_i32_0 = arith.constant 0 : i32
    %c0_i32_1 = arith.constant 0 : i32
    return %c0_i32, %c0_i32_0 : i32, i32
  }
  func.func @transform_5(%arg0: i32) -> (i32, i32) {
    %c0_i32 = arith.constant 0 : i32
    %c0_i32_0 = arith.constant 0 : i32
    %c0_i32_1 = arith.constant 0 : i32
    return %c0_i32, %c0_i32_0 : i32, i32
  }
  func.func @transform_6(%arg0: i32) -> (i32, i32) {
    %c0_i32 = arith.constant 0 : i32
    %c0_i32_0 = arith.constant 0 : i32
    %c0_i32_1 = arith.constant 0 : i32
    return %c0_i32, %c0_i32_0 : i32, i32
  }
  func.func @transform_7(%arg0: i32) -> (i32, i32) {
    %c0_i32 = arith.constant 0 : i32
    %c0_i32_0 = arith.constant 0 : i32
    %c0_i32_1 = arith.constant 0 : i32
    return %c0_i32, %c0_i32_0 : i32, i32
  }
  func.func @transform_8(%arg0: i32) -> (i32, i32) {
    %c0_i32 = arith.constant 0 : i32
    %c0_i32_0 = arith.constant 0 : i32
    %c0_i32_1 = arith.constant 0 : i32
    return %c0_i32, %c0_i32_0 : i32, i32
  }
  func.func @transform_9(%arg0: i32) -> (i32, i32) {
    %c0_i32 = arith.constant 0 : i32
    %c0_i32_0 = arith.constant 0 : i32
    %c0_i32_1 = arith.constant 0 : i32
    return %c0_i32, %c0_i32_0 : i32, i32
  }
  func.func @transform_10(%arg0: i32) -> (i32, i32) {
    %c0_i32 = arith.constant 0 : i32
    %c0_i32_0 = arith.constant 0 : i32
    %c0_i32_1 = arith.constant 0 : i32
    return %c0_i32, %c0_i32_0 : i32, i32
  }
  func.func @transform_11(%arg0: i32) -> (i32, i32) {
    %c0_i32 = arith.constant 0 : i32
    %c0_i32_0 = arith.constant 0 : i32
    %c0_i32_1 = arith.constant 0 : i32
    return %c0_i32, %c0_i32_0 : i32, i32
  }
  func.func @transform_12(%arg0: i32) -> (i32, i32) {
    %c0_i32 = arith.constant 0 : i32
    %c0_i32_0 = arith.constant 0 : i32
    %c0_i32_1 = arith.constant 0 : i32
    return %c0_i32, %c0_i32_0 : i32, i32
  }
  func.func @transform_13(%arg0: i32) -> (i32, i32) {
    %c0_i32 = arith.constant 0 : i32
    %c0_i32_0 = arith.constant 0 : i32
    %c0_i32_1 = arith.constant 0 : i32
    return %c0_i32, %c0_i32_0 : i32, i32
  }
  func.func @transform_14(%arg0: i32) -> (i32, i32) {
    %c0_i32 = arith.constant 0 : i32
    %c0_i32_0 = arith.constant 0 : i32
    %c0_i32_1 = arith.constant 0 : i32
    return %c0_i32, %c0_i32_0 : i32, i32
  }
  func.func @transform_15(%arg0: i32) -> (i32, i32) {
    %c0_i32 = arith.constant 0 : i32
    %c0_i32_0 = arith.constant 0 : i32
    %c0_i32_1 = arith.constant 0 : i32
    return %c0_i32, %c0_i32_0 : i32, i32
  }
  func.func @transform_16(%arg0: i32) -> (i32, i32) {
    %c0_i32 = arith.constant 0 : i32
    %c0_i32_0 = arith.constant 0 : i32
    %c0_i32_1 = arith.constant 0 : i32
    return %c0_i32, %c0_i32_0 : i32, i32
  }
  func.func @transform_17(%arg0: i32) -> (i32, i32) {
    %c0_i32 = arith.constant 0 : i32
    %c0_i32_0 = arith.constant 0 : i32
    %c0_i32_1 = arith.constant 0 : i32
    return %c0_i32, %c0_i32_0 : i32, i32
  }
  func.func @transform_18(%arg0: i32) -> (i32, i32) {
    %c0_i32 = arith.constant 0 : i32
    %c0_i32_0 = arith.constant 0 : i32
    return %arg0, %c0_i32 : i32, i32
  }
}

module attributes {stable_mosaic.version = 11 : i64} {
  func.func @_attn_fused_kernel(%arg0: i32, %arg1: memref<8x32xf32, #tpu.memory_space<vmem>>, %arg2: memref<16x32xf32, #tpu.memory_space<vmem>>, %arg3: memref<8x1xf32, #tpu.memory_space<vmem>>, %arg4: memref<1x16xf32, #tpu.memory_space<vmem>>, %arg5: memref<32x32xf32, #tpu.memory_space<vmem>>, %arg6: memref<1x32xf32, #tpu.memory_space<vmem>>, %arg7: memref<32x64xf32, #tpu.memory_space<vmem>>, %arg8: memref<1x64xf32, #tpu.memory_space<vmem>>, %arg9: memref<32x32xf32, #tpu.memory_space<vmem>>, %arg10: memref<1x32xf32, #tpu.memory_space<vmem>>, %arg11: memref<1x32xf32, #tpu.memory_space<vmem>>, %arg12: memref<1x32xf32, #tpu.memory_space<vmem>>, %arg13: memref<32x32xf32, #tpu.memory_space<vmem>>, %arg14: memref<1x32xf32, #tpu.memory_space<vmem>>, %arg15: memref<32x32xf32, #tpu.memory_space<vmem>>, %arg16: memref<1x32xf32, #tpu.memory_space<vmem>>, %arg17: memref<1x32xf32, #tpu.memory_space<vmem>>, %arg18: memref<1x32xf32, #tpu.memory_space<vmem>>, %arg19: memref<32x4xf32, #tpu.memory_space<vmem>>, %arg20: memref<1x4xf32, #tpu.memory_space<vmem>>, %arg21: memref<8x32xf32, #tpu.memory_space<vmem>>, %arg22: memref<8x4xf32, #tpu.memory_space<vmem>>) attributes {dimension_semantics = [#tpu.dimension_semantics<parallel>], iteration_bounds = array<i64: 2>, scalar_prefetch = 0 : i64, scratch_operands = 0 : i64, tpu.core_type = #tpu.core_type<tc>, window_params = [{transform_indices = @transform_0, window_bounds = array<i64: 8, 32>}, {transform_indices = @transform_1, window_bounds = array<i64: 16, 32>}, {pipeline_mode = #tpu.pipeline_mode<synchronous>, transform_indices = @transform_2, window_bounds = array<i64: 8, 1>}, {pipeline_mode = #tpu.pipeline_mode<synchronous>, transform_indices = @transform_3, window_bounds = array<i64: 1, 16>}, {pipeline_mode = #tpu.pipeline_mode<synchronous>, transform_indices = @transform_4, window_bounds = array<i64: 32, 32>}, {pipeline_mode = #tpu.pipeline_mode<synchronous>, transform_indices = @transform_5, window_bounds = array<i64: 1, 32>}, {pipeline_mode = #tpu.pipeline_mode<synchronous>, transform_indices = @transform_6, window_bounds = array<i64: 32, 64>}, {pipeline_mode = #tpu.pipeline_mode<synchronous>, transform_indices = @transform_7, window_bounds = array<i64: 1, 64>}, {pipeline_mode = #tpu.pipeline_mode<synchronous>, transform_indices = @transform_8, window_bounds = array<i64: 32, 32>}, {pipeline_mode = #tpu.pipeline_mode<synchronous>, transform_indices = @transform_9, window_bounds = array<i64: 1, 32>}, {pipeline_mode = #tpu.pipeline_mode<synchronous>, transform_indices = @transform_10, window_bounds = array<i64: 1, 32>}, {pipeline_mode = #tpu.pipeline_mode<synchronous>, transform_indices = @transform_11, window_bounds = array<i64: 1, 32>}, {pipeline_mode = #tpu.pipeline_mode<synchronous>, transform_indices = @transform_12, window_bounds = array<i64: 32, 32>}, {pipeline_mode = #tpu.pipeline_mode<synchronous>, transform_indices = @transform_13, window_bounds = array<i64: 1, 32>}, {pipeline_mode = #tpu.pipeline_mode<synchronous>, transform_indices = @transform_14, window_bounds = array<i64: 32, 32>}, {pipeline_mode = #tpu.pipeline_mode<synchronous>, transform_indices = @transform_15, window_bounds = array<i64: 1, 32>}, {pipeline_mode = #tpu.pipeline_mode<synchronous>, transform_indices = @transform_16, window_bounds = array<i64: 1, 32>}, {pipeline_mode = #tpu.pipeline_mode<synchronous>, transform_indices = @transform_17, window_bounds = array<i64: 1, 32>}, {pipeline_mode = #tpu.pipeline_mode<synchronous>, transform_indices = @transform_18, window_bounds = array<i64: 32, 4>}, {pipeline_mode = #tpu.pipeline_mode<synchronous>, transform_indices = @transform_19, window_bounds = array<i64: 1, 4>}, {transform_indices = @transform_20, window_bounds = array<i64: 8, 32>}, {transform_indices = @transform_21, window_bounds = array<i64: 8, 4>}]} {
    %c0 = arith.constant 0 : index
    %c0_0 = arith.constant 0 : index
    %0 = vector.load %arg1[%c0, %c0_0] : memref<8x32xf32, #tpu.memory_space<vmem>>, vector<8x32xf32>
    %c0_1 = arith.constant 0 : index
    %c0_2 = arith.constant 0 : index
    %1 = vector.load %arg2[%c0_1, %c0_2] : memref<16x32xf32, #tpu.memory_space<vmem>>, vector<16x32xf32>
    %c0_3 = arith.constant 0 : index
    %c0_4 = arith.constant 0 : index
    %2 = vector.load %arg5[%c0_3, %c0_4] : memref<32x32xf32, #tpu.memory_space<vmem>>, vector<32x32xf32>
    %cst = arith.constant dense<0.000000e+00> : vector<8x32xf32>
    %3 = tpu.matmul %0, %2, %cst {dimension_numbers = #tpu.dot_dimension_numbers<[1], [0], [0], [1], [0, 0, 1, 1], [], []>} : vector<8x32xf32>, vector<32x32xf32>, vector<8x32xf32> -> vector<8x32xf32>
    %c0_5 = arith.constant 0 : index
    %c0_6 = arith.constant 0 : index
    %4 = vector.load %arg6[%c0_5, %c0_6] : memref<1x32xf32, #tpu.memory_space<vmem>>, vector<1x32xf32>
    %5 = vector.broadcast %4 : vector<1x32xf32> to vector<8x32xf32>
    %6 = arith.addf %3, %5 : vector<8x32xf32>
    %c0_7 = arith.constant 0 : index
    %c0_8 = arith.constant 0 : index
    %7 = vector.load %arg7[%c0_7, %c0_8] : memref<32x64xf32, #tpu.memory_space<vmem>>, vector<32x64xf32>
    %cst_9 = arith.constant dense<0.000000e+00> : vector<16x64xf32>
    %8 = tpu.matmul %1, %7, %cst_9 {dimension_numbers = #tpu.dot_dimension_numbers<[1], [0], [0], [1], [0, 0, 1, 1], [], []>} : vector<16x32xf32>, vector<32x64xf32>, vector<16x64xf32> -> vector<16x64xf32>
    %c0_10 = arith.constant 0 : index
    %c0_11 = arith.constant 0 : index
    %9 = vector.load %arg8[%c0_10, %c0_11] : memref<1x64xf32, #tpu.memory_space<vmem>>, vector<1x64xf32>
    %10 = vector.broadcast %9 : vector<1x64xf32> to vector<16x64xf32>
    %11 = arith.addf %8, %10 : vector<16x64xf32>
    %12 = vector.extract_strided_slice %11 {offsets = [0, 0], sizes = [16, 32], strides = [1, 1]} : vector<16x64xf32> to vector<16x32xf32>
    %13 = vector.extract_strided_slice %11 {offsets = [0, 32], sizes = [16, 32], strides = [1, 1]} : vector<16x64xf32> to vector<16x32xf32>
    %c0_12 = arith.constant 0 : index
    %c0_13 = arith.constant 0 : index
    %14 = vector.load %arg3[%c0_12, %c0_13] : memref<8x1xf32, #tpu.memory_space<vmem>>, vector<8x1xf32>
    %c0_14 = arith.constant 0 : index
    %c0_15 = arith.constant 0 : index
    %15 = vector.load %arg4[%c0_14, %c0_15] : memref<1x16xf32, #tpu.memory_space<vmem>>, vector<1x16xf32>
    %16 = vector.broadcast %14 : vector<8x1xf32> to vector<8x16xf32>
    %17 = vector.broadcast %15 : vector<1x16xf32> to vector<8x16xf32>
    %18 = arith.cmpf oeq, %16, %17 : vector<8x16xf32>
    %19 = vector.extract_strided_slice %6 {offsets = [0, 0], sizes = [8, 16], strides = [1, 1]} : vector<8x32xf32> to vector<8x16xf32>
    %20 = vector.extract_strided_slice %12 {offsets = [0, 0], sizes = [16, 16], strides = [1, 1]} : vector<16x32xf32> to vector<16x16xf32>
    %cst_16 = arith.constant dense<0.000000e+00> : vector<8x16xf32>
    %21 = tpu.matmul %19, %20, %cst_16 {dimension_numbers = #tpu.dot_dimension_numbers<[1], [1], [0], [0], [0, 0, 1, 0], [], []>} : vector<8x16xf32>, vector<16x16xf32>, vector<8x16xf32> -> vector<8x16xf32>
    %cst_17 = arith.constant 2.500000e-01 : f32
    %22 = vector.broadcast %cst_17 : f32 to vector<8x16xf32>
    %23 = arith.mulf %21, %22 : vector<8x16xf32>
    %cst_18 = arith.constant -1.000000e+30 : f32
    %24 = vector.broadcast %cst_18 : f32 to vector<8x16xf32>
    %25 = arith.select %18, %23, %24 : vector<8x16xi1>, vector<8x16xf32>
    %cst_19 = arith.constant dense<0xFF800000> : vector<8xf32>
    %26 = vector.multi_reduction <maximumf>, %25, %cst_19 [1] : vector<8x16xf32> to vector<8xf32>
    %27 = vector.shape_cast %26 : vector<8xf32> to vector<8x1xf32>
    %28 = vector.broadcast %27 : vector<8x1xf32> to vector<8x16xf32>
    %29 = arith.subf %25, %28 : vector<8x16xf32>
    %30 = math.exp %29 : vector<8x16xf32>
    %cst_20 = arith.constant dense<0.000000e+00> : vector<8xf32>
    %31 = vector.multi_reduction <add>, %30, %cst_20 [1] : vector<8x16xf32> to vector<8xf32>
    %32 = vector.shape_cast %31 : vector<8xf32> to vector<8x1xf32>
    %33 = tpu.reciprocal %32 {approx = true} : vector<8x1xf32> -> vector<8x1xf32>
    %34 = vector.broadcast %33 : vector<8x1xf32> to vector<8x16xf32>
    %35 = arith.mulf %30, %34 : vector<8x16xf32>
    %36 = vector.extract_strided_slice %13 {offsets = [0, 0], sizes = [16, 16], strides = [1, 1]} : vector<16x32xf32> to vector<16x16xf32>
    %cst_21 = arith.constant dense<0.000000e+00> : vector<8x16xf32>
    %37 = tpu.matmul %35, %36, %cst_21 {dimension_numbers = #tpu.dot_dimension_numbers<[1], [0], [0], [1], [0, 0, 1, 1], [], []>} : vector<8x16xf32>, vector<16x16xf32>, vector<8x16xf32> -> vector<8x16xf32>
    %38 = vector.extract_strided_slice %6 {offsets = [0, 16], sizes = [8, 16], strides = [1, 1]} : vector<8x32xf32> to vector<8x16xf32>
    %39 = vector.extract_strided_slice %12 {offsets = [0, 16], sizes = [16, 16], strides = [1, 1]} : vector<16x32xf32> to vector<16x16xf32>
    %cst_22 = arith.constant dense<0.000000e+00> : vector<8x16xf32>
    %40 = tpu.matmul %38, %39, %cst_22 {dimension_numbers = #tpu.dot_dimension_numbers<[1], [1], [0], [0], [0, 0, 1, 0], [], []>} : vector<8x16xf32>, vector<16x16xf32>, vector<8x16xf32> -> vector<8x16xf32>
    %cst_23 = arith.constant 2.500000e-01 : f32
    %41 = vector.broadcast %cst_23 : f32 to vector<8x16xf32>
    %42 = arith.mulf %40, %41 : vector<8x16xf32>
    %cst_24 = arith.constant -1.000000e+30 : f32
    %43 = vector.broadcast %cst_24 : f32 to vector<8x16xf32>
    %44 = arith.select %18, %42, %43 : vector<8x16xi1>, vector<8x16xf32>
    %cst_25 = arith.constant dense<0xFF800000> : vector<8xf32>
    %45 = vector.multi_reduction <maximumf>, %44, %cst_25 [1] : vector<8x16xf32> to vector<8xf32>
    %46 = vector.shape_cast %45 : vector<8xf32> to vector<8x1xf32>
    %47 = vector.broadcast %46 : vector<8x1xf32> to vector<8x16xf32>
    %48 = arith.subf %44, %47 : vector<8x16xf32>
    %49 = math.exp %48 : vector<8x16xf32>
    %cst_26 = arith.constant dense<0.000000e+00> : vector<8xf32>
    %50 = vector.multi_reduction <add>, %49, %cst_26 [1] : vector<8x16xf32> to vector<8xf32>
    %51 = vector.shape_cast %50 : vector<8xf32> to vector<8x1xf32>
    %52 = tpu.reciprocal %51 {approx = true} : vector<8x1xf32> -> vector<8x1xf32>
    %53 = vector.broadcast %52 : vector<8x1xf32> to vector<8x16xf32>
    %54 = arith.mulf %49, %53 : vector<8x16xf32>
    %55 = vector.extract_strided_slice %13 {offsets = [0, 16], sizes = [16, 16], strides = [1, 1]} : vector<16x32xf32> to vector<16x16xf32>
    %cst_27 = arith.constant dense<0.000000e+00> : vector<8x16xf32>
    %56 = tpu.matmul %54, %55, %cst_27 {dimension_numbers = #tpu.dot_dimension_numbers<[1], [0], [0], [1], [0, 0, 1, 1], [], []>} : vector<8x16xf32>, vector<16x16xf32>, vector<8x16xf32> -> vector<8x16xf32>
    %57 = tpu.concatenate %37, %56 in 1 : vector<8x16xf32>, vector<8x16xf32> -> vector<8x32xf32>
    %c0_28 = arith.constant 0 : index
    %c0_29 = arith.constant 0 : index
    %58 = vector.load %arg9[%c0_28, %c0_29] : memref<32x32xf32, #tpu.memory_space<vmem>>, vector<32x32xf32>
    %cst_30 = arith.constant dense<0.000000e+00> : vector<8x32xf32>
    %59 = tpu.matmul %57, %58, %cst_30 {dimension_numbers = #tpu.dot_dimension_numbers<[1], [0], [0], [1], [0, 0, 1, 1], [], []>} : vector<8x32xf32>, vector<32x32xf32>, vector<8x32xf32> -> vector<8x32xf32>
    %c0_31 = arith.constant 0 : index
    %c0_32 = arith.constant 0 : index
    %60 = vector.load %arg10[%c0_31, %c0_32] : memref<1x32xf32, #tpu.memory_space<vmem>>, vector<1x32xf32>
    %61 = vector.broadcast %60 : vector<1x32xf32> to vector<8x32xf32>
    %62 = arith.addf %59, %61 : vector<8x32xf32>
    %63 = arith.addf %62, %0 : vector<8x32xf32>
    %c0_33 = arith.constant 0 : index
    %c0_34 = arith.constant 0 : index
    %64 = vector.load %arg11[%c0_33, %c0_34] : memref<1x32xf32, #tpu.memory_space<vmem>>, vector<1x32xf32>
    %c0_35 = arith.constant 0 : index
    %c0_36 = arith.constant 0 : index
    %65 = vector.load %arg12[%c0_35, %c0_36] : memref<1x32xf32, #tpu.memory_space<vmem>>, vector<1x32xf32>
    %cst_37 = arith.constant dense<0.000000e+00> : vector<8xf32>
    %66 = vector.multi_reduction <add>, %63, %cst_37 [1] : vector<8x32xf32> to vector<8xf32>
    %67 = vector.shape_cast %66 : vector<8xf32> to vector<8x1xf32>
    %cst_38 = arith.constant 3.200000e+01 : f32
    %68 = vector.broadcast %cst_38 : f32 to vector<8x1xf32>
    %69 = arith.divf %67, %68 : vector<8x1xf32>
    %70 = vector.broadcast %69 : vector<8x1xf32> to vector<8x32xf32>
    %71 = arith.subf %63, %70 : vector<8x32xf32>
    %72 = arith.mulf %71, %71 : vector<8x32xf32>
    %cst_39 = arith.constant dense<0.000000e+00> : vector<8xf32>
    %73 = vector.multi_reduction <add>, %72, %cst_39 [1] : vector<8x32xf32> to vector<8xf32>
    %74 = vector.shape_cast %73 : vector<8xf32> to vector<8x1xf32>
    %cst_40 = arith.constant 3.200000e+01 : f32
    %75 = vector.broadcast %cst_40 : f32 to vector<8x1xf32>
    %76 = arith.divf %74, %75 : vector<8x1xf32>
    %77 = vector.broadcast %69 : vector<8x1xf32> to vector<8x32xf32>
    %78 = arith.subf %63, %77 : vector<8x32xf32>
    %cst_41 = arith.constant 9.99999974E-6 : f32
    %79 = vector.broadcast %cst_41 : f32 to vector<8x1xf32>
    %80 = arith.addf %76, %79 : vector<8x1xf32>
    %81 = math.rsqrt %80 : vector<8x1xf32>
    %82 = vector.broadcast %81 : vector<8x1xf32> to vector<8x32xf32>
    %83 = arith.mulf %78, %82 : vector<8x32xf32>
    %84 = vector.broadcast %64 : vector<1x32xf32> to vector<8x32xf32>
    %85 = arith.mulf %83, %84 : vector<8x32xf32>
    %86 = vector.broadcast %65 : vector<1x32xf32> to vector<8x32xf32>
    %87 = arith.addf %85, %86 : vector<8x32xf32>
    %c0_42 = arith.constant 0 : index
    %c0_43 = arith.constant 0 : index
    %88 = vector.load %arg13[%c0_42, %c0_43] : memref<32x32xf32, #tpu.memory_space<vmem>>, vector<32x32xf32>
    %cst_44 = arith.constant dense<0.000000e+00> : vector<8x32xf32>
    %89 = tpu.matmul %87, %88, %cst_44 {dimension_numbers = #tpu.dot_dimension_numbers<[1], [0], [0], [1], [0, 0, 1, 1], [], []>} : vector<8x32xf32>, vector<32x32xf32>, vector<8x32xf32> -> vector<8x32xf32>
    %c0_45 = arith.constant 0 : index
    %c0_46 = arith.constant 0 : index
    %90 = vector.load %arg14[%c0_45, %c0_46] : memref<1x32xf32, #tpu.memory_space<vmem>>, vector<1x32xf32>
    %91 = vector.broadcast %90 : vector<1x32xf32> to vector<8x32xf32>
    %92 = arith.addf %89, %91 : vector<8x32xf32>
    %cst_47 = arith.constant 0.707106769 : f32
    %93 = vector.broadcast %cst_47 : f32 to vector<8x32xf32>
    %94 = arith.mulf %92, %93 : vector<8x32xf32>
    %95 = math.absf %94 : vector<8x32xf32>
    %cst_48 = arith.constant 0.327591091 : f32
    %96 = vector.broadcast %cst_48 : f32 to vector<8x32xf32>
    %97 = arith.mulf %96, %95 : vector<8x32xf32>
    %cst_49 = arith.constant 1.000000e+00 : f32
    %98 = vector.broadcast %cst_49 : f32 to vector<8x32xf32>
    %99 = arith.addf %98, %97 : vector<8x32xf32>
    %cst_50 = arith.constant 1.000000e+00 : f32
    %100 = vector.broadcast %cst_50 : f32 to vector<8x32xf32>
    %101 = arith.divf %100, %99 : vector<8x32xf32>
    %cst_51 = arith.constant 1.06140542 : f32
    %102 = vector.broadcast %cst_51 : f32 to vector<8x32xf32>
    %103 = arith.mulf %102, %101 : vector<8x32xf32>
    %cst_52 = arith.constant 1.45315206 : f32
    %104 = vector.broadcast %cst_52 : f32 to vector<8x32xf32>
    %105 = arith.subf %103, %104 : vector<8x32xf32>
    %106 = arith.mulf %105, %101 : vector<8x32xf32>
    %cst_53 = arith.constant 1.42141378 : f32
    %107 = vector.broadcast %cst_53 : f32 to vector<8x32xf32>
    %108 = arith.addf %106, %107 : vector<8x32xf32>
    %109 = arith.mulf %108, %101 : vector<8x32xf32>
    %cst_54 = arith.constant 0.284496725 : f32
    %110 = vector.broadcast %cst_54 : f32 to vector<8x32xf32>
    %111 = arith.subf %109, %110 : vector<8x32xf32>
    %112 = arith.mulf %111, %101 : vector<8x32xf32>
    %cst_55 = arith.constant 0.254829586 : f32
    %113 = vector.broadcast %cst_55 : f32 to vector<8x32xf32>
    %114 = arith.addf %112, %113 : vector<8x32xf32>
    %115 = arith.mulf %114, %101 : vector<8x32xf32>
    %cst_56 = arith.constant 0.000000e+00 : f32
    %116 = vector.broadcast %cst_56 : f32 to vector<8x32xf32>
    %117 = arith.subf %116, %95 : vector<8x32xf32>
    %118 = arith.mulf %117, %95 : vector<8x32xf32>
    %119 = math.exp %118 : vector<8x32xf32>
    %120 = arith.mulf %115, %119 : vector<8x32xf32>
    %cst_57 = arith.constant 1.000000e+00 : f32
    %121 = vector.broadcast %cst_57 : f32 to vector<8x32xf32>
    %122 = arith.subf %121, %120 : vector<8x32xf32>
    %cst_58 = arith.constant 0.000000e+00 : f32
    %123 = vector.broadcast %cst_58 : f32 to vector<8x32xf32>
    %124 = arith.cmpf olt, %94, %123 : vector<8x32xf32>
    %cst_59 = arith.constant 0.000000e+00 : f32
    %125 = vector.broadcast %cst_59 : f32 to vector<8x32xf32>
    %126 = arith.subf %125, %122 : vector<8x32xf32>
    %127 = arith.select %124, %126, %122 : vector<8x32xi1>, vector<8x32xf32>
    %cst_60 = arith.constant 5.000000e-01 : f32
    %128 = vector.broadcast %cst_60 : f32 to vector<8x32xf32>
    %129 = arith.mulf %128, %92 : vector<8x32xf32>
    %cst_61 = arith.constant 1.000000e+00 : f32
    %130 = vector.broadcast %cst_61 : f32 to vector<8x32xf32>
    %131 = arith.addf %130, %127 : vector<8x32xf32>
    %132 = arith.mulf %129, %131 : vector<8x32xf32>
    %c0_62 = arith.constant 0 : index
    %c0_63 = arith.constant 0 : index
    %133 = vector.load %arg15[%c0_62, %c0_63] : memref<32x32xf32, #tpu.memory_space<vmem>>, vector<32x32xf32>
    %cst_64 = arith.constant dense<0.000000e+00> : vector<8x32xf32>
    %134 = tpu.matmul %132, %133, %cst_64 {dimension_numbers = #tpu.dot_dimension_numbers<[1], [0], [0], [1], [0, 0, 1, 1], [], []>} : vector<8x32xf32>, vector<32x32xf32>, vector<8x32xf32> -> vector<8x32xf32>
    %135 = arith.addf %87, %134 : vector<8x32xf32>
    %c0_65 = arith.constant 0 : index
    %c0_66 = arith.constant 0 : index
    %136 = vector.load %arg16[%c0_65, %c0_66] : memref<1x32xf32, #tpu.memory_space<vmem>>, vector<1x32xf32>
    %137 = vector.broadcast %136 : vector<1x32xf32> to vector<8x32xf32>
    %138 = arith.addf %135, %137 : vector<8x32xf32>
    %c0_67 = arith.constant 0 : index
    %c0_68 = arith.constant 0 : index
    %139 = vector.load %arg17[%c0_67, %c0_68] : memref<1x32xf32, #tpu.memory_space<vmem>>, vector<1x32xf32>
    %c0_69 = arith.constant 0 : index
    %c0_70 = arith.constant 0 : index
    %140 = vector.load %arg18[%c0_69, %c0_70] : memref<1x32xf32, #tpu.memory_space<vmem>>, vector<1x32xf32>
    %cst_71 = arith.constant dense<0.000000e+00> : vector<8xf32>
    %141 = vector.multi_reduction <add>, %138, %cst_71 [1] : vector<8x32xf32> to vector<8xf32>
    %142 = vector.shape_cast %141 : vector<8xf32> to vector<8x1xf32>
    %cst_72 = arith.constant 3.200000e+01 : f32
    %143 = vector.broadcast %cst_72 : f32 to vector<8x1xf32>
    %144 = arith.divf %142, %143 : vector<8x1xf32>
    %145 = vector.broadcast %144 : vector<8x1xf32> to vector<8x32xf32>
    %146 = arith.subf %138, %145 : vector<8x32xf32>
    %147 = arith.mulf %146, %146 : vector<8x32xf32>
    %cst_73 = arith.constant dense<0.000000e+00> : vector<8xf32>
    %148 = vector.multi_reduction <add>, %147, %cst_73 [1] : vector<8x32xf32> to vector<8xf32>
    %149 = vector.shape_cast %148 : vector<8xf32> to vector<8x1xf32>
    %cst_74 = arith.constant 3.200000e+01 : f32
    %150 = vector.broadcast %cst_74 : f32 to vector<8x1xf32>
    %151 = arith.divf %149, %150 : vector<8x1xf32>
    %152 = vector.broadcast %144 : vector<8x1xf32> to vector<8x32xf32>
    %153 = arith.subf %138, %152 : vector<8x32xf32>
    %cst_75 = arith.constant 9.99999974E-6 : f32
    %154 = vector.broadcast %cst_75 : f32 to vector<8x1xf32>
    %155 = arith.addf %151, %154 : vector<8x1xf32>
    %156 = math.rsqrt %155 : vector<8x1xf32>
    %157 = vector.broadcast %156 : vector<8x1xf32> to vector<8x32xf32>
    %158 = arith.mulf %153, %157 : vector<8x32xf32>
    %159 = vector.broadcast %139 : vector<1x32xf32> to vector<8x32xf32>
    %160 = arith.mulf %158, %159 : vector<8x32xf32>
    %161 = vector.broadcast %140 : vector<1x32xf32> to vector<8x32xf32>
    %162 = arith.addf %160, %161 : vector<8x32xf32>
    %c0_76 = arith.constant 0 : index
    %c0_77 = arith.constant 0 : index
    %163 = vector.load %arg21[%c0_76, %c0_77] : memref<8x32xf32, #tpu.memory_space<vmem>>, vector<8x32xf32>
    tpu.vector_store %arg21[%c0_76, %c0_77], %162 {strides = array<i32>} : memref<8x32xf32, #tpu.memory_space<vmem>>, vector<8x32xf32>,
    %c0_78 = arith.constant 0 : index
    %c0_79 = arith.constant 0 : index
    %164 = vector.load %arg19[%c0_78, %c0_79] : memref<32x4xf32, #tpu.memory_space<vmem>>, vector<32x4xf32>
    %cst_80 = arith.constant dense<0.000000e+00> : vector<8x4xf32>
    %165 = tpu.matmul %162, %164, %cst_80 {dimension_numbers = #tpu.dot_dimension_numbers<[1], [0], [0], [1], [0, 0, 1, 1], [], []>} : vector<8x32xf32>, vector<32x4xf32>, vector<8x4xf32> -> vector<8x4xf32>
    %c0_81 = arith.constant 0 : index
    %c0_82 = arith.constant 0 : index
    %166 = vector.load %arg20[%c0_81, %c0_82] : memref<1x4xf32, #tpu.memory_space<vmem>>, vector<1x4xf32>
    %167 = vector.broadcast %166 : vector<1x4xf32> to vector<8x4xf32>
    %168 = arith.addf %165, %167 : vector<8x4xf32>
    %c0_83 = arith.constant 0 : index
    %c0_84 = arith.constant 0 : index
    %169 = vector.load %arg22[%c0_83, %c0_84] : memref<8x4xf32, #tpu.memory_space<vmem>>, vector<8x4xf32>
    tpu.vector_store %arg22[%c0_83, %c0_84], %168 {strides = array<i32>} : memref<8x4xf32, #tpu.memory_space<vmem>>, vector<8x4xf32>,
    return
  }
  func.func @transform_0(%arg0: i32) -> (i32, i32) {
    %c0_i32 = arith.constant 0 : i32
    %c0_i32_0 = arith.constant 0 : i32
    return %arg0, %c0_i32 : i32, i32
  }
  func.func @transform_1(%arg0: i32) -> (i32, i32) {
    %c0_i32 = arith.constant 0 : i32
    %c0_i32_0 = arith.constant 0 : i32
    return %arg0, %c0_i32 : i32, i32
  }
  func.func @transform_2(%arg0: i32) -> (i32, i32) {
    %c0_i32 = arith.constant 0 : i32
    %c0_i32_0 = arith.constant 0 : i32
    %c0_i32_1 = arith.constant 0 : i32
    return %c0_i32, %c0_i32_0 : i32, i32
  }
  func.func @transform_3(%arg0: i32) -> (i32, i32) {
    %c0_i32 = arith.constant 0 : i32
    %c0_i32_0 = arith.constant 0 : i32
    %c0_i32_1 = arith.constant 0 : i32
    return %c0_i32, %c0_i32_0 : i32, i32
  }
  func.func @transform_4(%arg0: i32) -> (i32, i32) {
    %c0_i32 = arith.constant 0 : i32
    %c0_i32_0 = arith.constant 0 : i32
    %c0_i32_1 = arith.constant 0 : i32
    return %c0_i32, %c0_i32_0 : i32, i32
  }
  func.func @transform_5(%arg0: i32) -> (i32, i32) {
    %c0_i32 = arith.constant 0 : i32
    %c0_i32_0 = arith.constant 0 : i32
    %c0_i32_1 = arith.constant 0 : i32
    return %c0_i32, %c0_i32_0 : i32, i32
  }
  func.func @transform_6(%arg0: i32) -> (i32, i32) {
    %c0_i32 = arith.constant 0 : i32
    %c0_i32_0 = arith.constant 0 : i32
    %c0_i32_1 = arith.constant 0 : i32
    return %c0_i32, %c0_i32_0 : i32, i32
  }
  func.func @transform_7(%arg0: i32) -> (i32, i32) {
    %c0_i32 = arith.constant 0 : i32
    %c0_i32_0 = arith.constant 0 : i32
    %c0_i32_1 = arith.constant 0 : i32
    return %c0_i32, %c0_i32_0 : i32, i32
  }
  func.func @transform_8(%arg0: i32) -> (i32, i32) {
    %c0_i32 = arith.constant 0 : i32
    %c0_i32_0 = arith.constant 0 : i32
    %c0_i32_1 = arith.constant 0 : i32
    return %c0_i32, %c0_i32_0 : i32, i32
  }
  func.func @transform_9(%arg0: i32) -> (i32, i32) {
    %c0_i32 = arith.constant 0 : i32
    %c0_i32_0 = arith.constant 0 : i32
    %c0_i32_1 = arith.constant 0 : i32
    return %c0_i32, %c0_i32_0 : i32, i32
  }
  func.func @transform_10(%arg0: i32) -> (i32, i32) {
    %c0_i32 = arith.constant 0 : i32
    %c0_i32_0 = arith.constant 0 : i32
    %c0_i32_1 = arith.constant 0 : i32
    return %c0_i32, %c0_i32_0 : i32, i32
  }
  func.func @transform_11(%arg0: i32) -> (i32, i32) {
    %c0_i32 = arith.constant 0 : i32
    %c0_i32_0 = arith.constant 0 : i32
    %c0_i32_1 = arith.constant 0 : i32
    return %c0_i32, %c0_i32_0 : i32, i32
  }
  func.func @transform_12(%arg0: i32) -> (i32, i32) {
    %c0_i32 = arith.constant 0 : i32
    %c0_i32_0 = arith.constant 0 : i32
    %c0_i32_1 = arith.constant 0 : i32
    return %c0_i32, %c0_i32_0 : i32, i32
  }
  func.func @transform_13(%arg0: i32) -> (i32, i32) {
    %c0_i32 = arith.constant 0 : i32
    %c0_i32_0 = arith.constant 0 : i32
    %c0_i32_1 = arith.constant 0 : i32
    return %c0_i32, %c0_i32_0 : i32, i32
  }
  func.func @transform_14(%arg0: i32) -> (i32, i32) {
    %c0_i32 = arith.constant 0 : i32
    %c0_i32_0 = arith.constant 0 : i32
    %c0_i32_1 = arith.constant 0 : i32
    return %c0_i32, %c0_i32_0 : i32, i32
  }
  func.func @transform_15(%arg0: i32) -> (i32, i32) {
    %c0_i32 = arith.constant 0 : i32
    %c0_i32_0 = arith.constant 0 : i32
    %c0_i32_1 = arith.constant 0 : i32
    return %c0_i32, %c0_i32_0 : i32, i32
  }
  func.func @transform_16(%arg0: i32) -> (i32, i32) {
    %c0_i32 = arith.constant 0 : i32
    %c0_i32_0 = arith.constant 0 : i32
    %c0_i32_1 = arith.constant 0 : i32
    return %c0_i32, %c0_i32_0 : i32, i32
  }
  func.func @transform_17(%arg0: i32) -> (i32, i32) {
    %c0_i32 = arith.constant 0 : i32
    %c0_i32_0 = arith.constant 0 : i32
    %c0_i32_1 = arith.constant 0 : i32
    return %c0_i32, %c0_i32_0 : i32, i32
  }
  func.func @transform_18(%arg0: i32) -> (i32, i32) {
    %c0_i32 = arith.constant 0 : i32
    %c0_i32_0 = arith.constant 0 : i32
    %c0_i32_1 = arith.constant 0 : i32
    return %c0_i32, %c0_i32_0 : i32, i32
  }
  func.func @transform_19(%arg0: i32) -> (i32, i32) {
    %c0_i32 = arith.constant 0 : i32
    %c0_i32_0 = arith.constant 0 : i32
    %c0_i32_1 = arith.constant 0 : i32
    return %c0_i32, %c0_i32_0 : i32, i32
  }
  func.func @transform_20(%arg0: i32) -> (i32, i32) {
    %c0_i32 = arith.constant 0 : i32
    %c0_i32_0 = arith.constant 0 : i32
    return %arg0, %c0_i32 : i32, i32
  }
  func.func @transform_21(%arg0: i32) -> (i32, i32) {
    %c0_i32 = arith.constant 0 : i32
    %c0_i32_0 = arith.constant 0 : i32
    return %arg0, %c0_i32 : i32, i32
  }
}

module attributes {stable_mosaic.version = 11 : i64} {
  func.func @_attn_fused_kernel(%arg0: i32, %arg1: memref<24x32xf32, #tpu.memory_space<vmem>>, %arg2: memref<32x32xf32, #tpu.memory_space<vmem>>, %arg3: memref<24x1xf32, #tpu.memory_space<vmem>>, %arg4: memref<1x32xf32, #tpu.memory_space<vmem>>, %arg5: memref<32x32xf32, #tpu.memory_space<vmem>>, %arg6: memref<1x32xf32, #tpu.memory_space<vmem>>, %arg7: memref<32x64xf32, #tpu.memory_space<vmem>>, %arg8: memref<1x64xf32, #tpu.memory_space<vmem>>, %arg9: memref<32x32xf32, #tpu.memory_space<vmem>>, %arg10: memref<1x32xf32, #tpu.memory_space<vmem>>, %arg11: memref<24x32xf32, #tpu.memory_space<vmem>>) attributes {dimension_semantics = [#tpu.dimension_semantics<parallel>], iteration_bounds = array<i64: 1>, scalar_prefetch = 0 : i64, scratch_operands = 0 : i64, tpu.core_type = #tpu.core_type<tc>, window_params = [{transform_indices = @transform_0, window_bounds = array<i64: 24, 32>}, {transform_indices = @transform_1, window_bounds = array<i64: 32, 32>}, {pipeline_mode = #tpu.pipeline_mode<synchronous>, transform_indices = @transform_2, window_bounds = array<i64: 24, 1>}, {pipeline_mode = #tpu.pipeline_mode<synchronous>, transform_indices = @transform_3, window_bounds = array<i64: 1, 32>}, {pipeline_mode = #tpu.pipeline_mode<synchronous>, transform_indices = @transform_4, window_bounds = array<i64: 32, 32>}, {pipeline_mode = #tpu.pipeline_mode<synchronous>, transform_indices = @transform_5, window_bounds = array<i64: 1, 32>}, {pipeline_mode = #tpu.pipeline_mode<synchronous>, transform_indices = @transform_6, window_bounds = array<i64: 32, 64>}, {pipeline_mode = #tpu.pipeline_mode<synchronous>, transform_indices = @transform_7, window_bounds = array<i64: 1, 64>}, {pipeline_mode = #tpu.pipeline_mode<synchronous>, transform_indices = @transform_8, window_bounds = array<i64: 32, 32>}, {pipeline_mode = #tpu.pipeline_mode<synchronous>, transform_indices = @transform_9, window_bounds = array<i64: 1, 32>}, {transform_indices = @transform_10, window_bounds = array<i64: 24, 32>}]} {
    %c0 = arith.constant 0 : index
    %c0_0 = arith.constant 0 : index
    %0 = vector.load %arg1[%c0, %c0_0] : memref<24x32xf32, #tpu.memory_space<vmem>>, vector<24x32xf32>
    %c0_1 = arith.constant 0 : index
    %c0_2 = arith.constant 0 : index
    %1 = vector.load %arg2[%c0_1, %c0_2] : memref<32x32xf32, #tpu.memory_space<vmem>>, vector<32x32xf32>
    %c0_3 = arith.constant 0 : index
    %c0_4 = arith.constant 0 : index
    %2 = vector.load %arg5[%c0_3, %c0_4] : memref<32x32xf32, #tpu.memory_space<vmem>>, vector<32x32xf32>
    %cst = arith.constant dense<0.000000e+00> : vector<24x32xf32>
    %3 = tpu.matmul %0, %2, %cst {dimension_numbers = #tpu.dot_dimension_numbers<[1], [0], [0], [1], [0, 0, 1, 1], [], []>} : vector<24x32xf32>, vector<32x32xf32>, vector<24x32xf32> -> vector<24x32xf32>
    %c0_5 = arith.constant 0 : index
    %c0_6 = arith.constant 0 : index
    %4 = vector.load %arg6[%c0_5, %c0_6] : memref<1x32xf32, #tpu.memory_space<vmem>>, vector<1x32xf32>
    %5 = vector.broadcast %4 : vector<1x32xf32> to vector<24x32xf32>
    %6 = arith.addf %3, %5 : vector<24x32xf32>
    %c0_7 = arith.constant 0 : index
    %c0_8 = arith.constant 0 : index
    %7 = vector.load %arg7[%c0_7, %c0_8] : memref<32x64xf32, #tpu.memory_space<vmem>>, vector<32x64xf32>
    %cst_9 = arith.constant dense<0.000000e+00> : vector<32x64xf32>
    %8 = tpu.matmul %1, %7, %cst_9 {dimension_numbers = #tpu.dot_dimension_numbers<[1], [0], [0], [1], [0, 0, 1, 1], [], []>} : vector<32x32xf32>, vector<32x64xf32>, vector<32x64xf32> -> vector<32x64xf32>
    %c0_10 = arith.constant 0 : index
    %c0_11 = arith.constant 0 : index
    %9 = vector.load %arg8[%c0_10, %c0_11] : memref<1x64xf32, #tpu.memory_space<vmem>>, vector<1x64xf32>
    %10 = vector.broadcast %9 : vector<1x64xf32> to vector<32x64xf32>
    %11 = arith.addf %8, %10 : vector<32x64xf32>
    %12 = vector.extract_strided_slice %11 {offsets = [0, 0], sizes = [32, 32], strides = [1, 1]} : vector<32x64xf32> to vector<32x32xf32>
    %13 = vector.extract_strided_slice %11 {offsets = [0, 32], sizes = [32, 32], strides = [1, 1]} : vector<32x64xf32> to vector<32x32xf32>
    %c0_12 = arith.constant 0 : index
    %c0_13 = arith.constant 0 : index
    %14 = vector.load %arg3[%c0_12, %c0_13] : memref<24x1xf32, #tpu.memory_space<vmem>>, vector<24x1xf32>
    %c0_14 = arith.constant 0 : index
    %c0_15 = arith.constant 0 : index
    %15 = vector.load %arg4[%c0_14, %c0_15] : memref<1x32xf32, #tpu.memory_space<vmem>>, vector<1x32xf32>
    %16 = vector.broadcast %14 : vector<24x1xf32> to vector<24x32xf32>
    %17 = vector.broadcast %15 : vector<1x32xf32> to vector<24x32xf32>
    %18 = arith.cmpf oeq, %16, %17 : vector<24x32xf32>
    %19 = vector.extract_strided_slice %6 {offsets = [0, 0], sizes = [24, 16], strides = [1, 1]} : vector<24x32xf32> to vector<24x16xf32>
    %20 = vector.extract_strided_slice %12 {offsets = [0, 0], sizes = [32, 16], strides = [1, 1]} : vector<32x32xf32> to vector<32x16xf32>
    %cst_16 = arith.constant dense<0.000000e+00> : vector<24x32xf32>
    %21 = tpu.matmul %19, %20, %cst_16 {dimension_numbers = #tpu.dot_dimension_numbers<[1], [1], [0], [0], [0, 0, 1, 0], [], []>} : vector<24x16xf32>, vector<32x16xf32>, vector<24x32xf32> -> vector<24x32xf32>
    %cst_17 = arith.constant 2.500000e-01 : f32
    %22 = vector.broadcast %cst_17 : f32 to vector<24x32xf32>
    %23 = arith.mulf %21, %22 : vector<24x32xf32>
    %cst_18 = arith.constant -1.000000e+30 : f32
    %24 = vector.broadcast %cst_18 : f32 to vector<24x32xf32>
    %25 = arith.select %18, %23, %24 : vector<24x32xi1>, vector<24x32xf32>
    %cst_19 = arith.constant dense<0xFF800000> : vector<24xf32>
    %26 = vector.multi_reduction <maximumf>, %25, %cst_19 [1] : vector<24x32xf32> to vector<24xf32>
    %27 = vector.shape_cast %26 : vector<24xf32> to vector<24x1xf32>
    %28 = vector.broadcast %27 : vector<24x1xf32> to vector<24x32xf32>
    %29 = arith.subf %25, %28 : vector<24x32xf32>
    %30 = math.exp %29 : vector<24x32xf32>
    %cst_20 = arith.constant dense<0.000000e+00> : vector<24xf32>
    %31 = vector.multi_reduction <add>, %30, %cst_20 [1] : vector<24x32xf32> to vector<24xf32>
    %32 = vector.shape_cast %31 : vector<24xf32> to vector<24x1xf32>
    %33 = tpu.reciprocal %32 {approx = true} : vector<24x1xf32> -> vector<24x1xf32>
    %34 = vector.broadcast %33 : vector<24x1xf32> to vector<24x32xf32>
    %35 = arith.mulf %30, %34 : vector<24x32xf32>
    %36 = vector.extract_strided_slice %13 {offsets = [0, 0], sizes = [32, 16], strides = [1, 1]} : vector<32x32xf32> to vector<32x16xf32>
    %cst_21 = arith.constant dense<0.000000e+00> : vector<24x16xf32>
    %37 = tpu.matmul %35, %36, %cst_21 {dimension_numbers = #tpu.dot_dimension_numbers<[1], [0], [0], [1], [0, 0, 1, 1], [], []>} : vector<24x32xf32>, vector<32x16xf32>, vector<24x16xf32> -> vector<24x16xf32>
    %38 = vector.extract_strided_slice %6 {offsets = [0, 16], sizes = [24, 16], strides = [1, 1]} : vector<24x32xf32> to vector<24x16xf32>
    %39 = vector.extract_strided_slice %12 {offsets = [0, 16], sizes = [32, 16], strides = [1, 1]} : vector<32x32xf32> to vector<32x16xf32>
    %cst_22 = arith.constant dense<0.000000e+00> : vector<24x32xf32>
    %40 = tpu.matmul %38, %39, %cst_22 {dimension_numbers = #tpu.dot_dimension_numbers<[1], [1], [0], [0], [0, 0, 1, 0], [], []>} : vector<24x16xf32>, vector<32x16xf32>, vector<24x32xf32> -> vector<24x32xf32>
    %cst_23 = arith.constant 2.500000e-01 : f32
    %41 = vector.broadcast %cst_23 : f32 to vector<24x32xf32>
    %42 = arith.mulf %40, %41 : vector<24x32xf32>
    %cst_24 = arith.constant -1.000000e+30 : f32
    %43 = vector.broadcast %cst_24 : f32 to vector<24x32xf32>
    %44 = arith.select %18, %42, %43 : vector<24x32xi1>, vector<24x32xf32>
    %cst_25 = arith.constant dense<0xFF800000> : vector<24xf32>
    %45 = vector.multi_reduction <maximumf>, %44, %cst_25 [1] : vector<24x32xf32> to vector<24xf32>
    %46 = vector.shape_cast %45 : vector<24xf32> to vector<24x1xf32>
    %47 = vector.broadcast %46 : vector<24x1xf32> to vector<24x32xf32>
    %48 = arith.subf %44, %47 : vector<24x32xf32>
    %49 = math.exp %48 : vector<24x32xf32>
    %cst_26 = arith.constant dense<0.000000e+00> : vector<24xf32>
    %50 = vector.multi_reduction <add>, %49, %cst_26 [1] : vector<24x32xf32> to vector<24xf32>
    %51 = vector.shape_cast %50 : vector<24xf32> to vector<24x1xf32>
    %52 = tpu.reciprocal %51 {approx = true} : vector<24x1xf32> -> vector<24x1xf32>
    %53 = vector.broadcast %52 : vector<24x1xf32> to vector<24x32xf32>
    %54 = arith.mulf %49, %53 : vector<24x32xf32>
    %55 = vector.extract_strided_slice %13 {offsets = [0, 16], sizes = [32, 16], strides = [1, 1]} : vector<32x32xf32> to vector<32x16xf32>
    %cst_27 = arith.constant dense<0.000000e+00> : vector<24x16xf32>
    %56 = tpu.matmul %54, %55, %cst_27 {dimension_numbers = #tpu.dot_dimension_numbers<[1], [0], [0], [1], [0, 0, 1, 1], [], []>} : vector<24x32xf32>, vector<32x16xf32>, vector<24x16xf32> -> vector<24x16xf32>
    %57 = tpu.concatenate %37, %56 in 1 : vector<24x16xf32>, vector<24x16xf32> -> vector<24x32xf32>
    %c0_28 = arith.constant 0 : index
    %c0_29 = arith.constant 0 : index
    %58 = vector.load %arg9[%c0_28, %c0_29] : memref<32x32xf32, #tpu.memory_space<vmem>>, vector<32x32xf32>
    %cst_30 = arith.constant dense<0.000000e+00> : vector<24x32xf32>
    %59 = tpu.matmul %57, %58, %cst_30 {dimension_numbers = #tpu.dot_dimension_numbers<[1], [0], [0], [1], [0, 0, 1, 1], [], []>} : vector<24x32xf32>, vector<32x32xf32>, vector<24x32xf32> -> vector<24x32xf32>
    %c0_31 = arith.constant 0 : index
    %c0_32 = arith.constant 0 : index
    %60 = vector.load %arg10[%c0_31, %c0_32] : memref<1x32xf32, #tpu.memory_space<vmem>>, vector<1x32xf32>
    %61 = vector.broadcast %60 : vector<1x32xf32> to vector<24x32xf32>
    %62 = arith.addf %59, %61 : vector<24x32xf32>
    %c0_33 = arith.constant 0 : index
    %c0_34 = arith.constant 0 : index
    %63 = vector.load %arg11[%c0_33, %c0_34] : memref<24x32xf32, #tpu.memory_space<vmem>>, vector<24x32xf32>
    tpu.vector_store %arg11[%c0_33, %c0_34], %62 {strides = array<i32>} : memref<24x32xf32, #tpu.memory_space<vmem>>, vector<24x32xf32>,
    return
  }
  func.func @transform_0(%arg0: i32) -> (i32, i32) {
    %c0_i32 = arith.constant 0 : i32
    %c0_i32_0 = arith.constant 0 : i32
    return %arg0, %c0_i32 : i32, i32
  }
  func.func @transform_1(%arg0: i32) -> (i32, i32) {
    %c0_i32 = arith.constant 0 : i32
    %c0_i32_0 = arith.constant 0 : i32
    return %arg0, %c0_i32 : i32, i32
  }
  func.func @transform_2(%arg0: i32) -> (i32, i32) {
    %c0_i32 = arith.constant 0 : i32
    %c0_i32_0 = arith.constant 0 : i32
    %c0_i32_1 = arith.constant 0 : i32
    return %c0_i32, %c0_i32_0 : i32, i32
  }
  func.func @transform_3(%arg0: i32) -> (i32, i32) {
    %c0_i32 = arith.constant 0 : i32
    %c0_i32_0 = arith.constant 0 : i32
    %c0_i32_1 = arith.constant 0 : i32
    return %c0_i32, %c0_i32_0 : i32, i32
  }
  func.func @transform_4(%arg0: i32) -> (i32, i32) {
    %c0_i32 = arith.constant 0 : i32
    %c0_i32_0 = arith.constant 0 : i32
    %c0_i32_1 = arith.constant 0 : i32
    return %c0_i32, %c0_i32_0 : i32, i32
  }
  func.func @transform_5(%arg0: i32) -> (i32, i32) {
    %c0_i32 = arith.constant 0 : i32
    %c0_i32_0 = arith.constant 0 : i32
    %c0_i32_1 = arith.constant 0 : i32
    return %c0_i32, %c0_i32_0 : i32, i32
  }
  func.func @transform_6(%arg0: i32) -> (i32, i32) {
    %c0_i32 = arith.constant 0 : i32
    %c0_i32_0 = arith.constant 0 : i32
    %c0_i32_1 = arith.constant 0 : i32
    return %c0_i32, %c0_i32_0 : i32, i32
  }
  func.func @transform_7(%arg0: i32) -> (i32, i32) {
    %c0_i32 = arith.constant 0 : i32
    %c0_i32_0 = arith.constant 0 : i32
    %c0_i32_1 = arith.constant 0 : i32
    return %c0_i32, %c0_i32_0 : i32, i32
  }
  func.func @transform_8(%arg0: i32) -> (i32, i32) {
    %c0_i32 = arith.constant 0 : i32
    %c0_i32_0 = arith.constant 0 : i32
    %c0_i32_1 = arith.constant 0 : i32
    return %c0_i32, %c0_i32_0 : i32, i32
  }
  func.func @transform_9(%arg0: i32) -> (i32, i32) {
    %c0_i32 = arith.constant 0 : i32
    %c0_i32_0 = arith.constant 0 : i32
    %c0_i32_1 = arith.constant 0 : i32
    return %c0_i32, %c0_i32_0 : i32, i32
  }
  func.func @transform_10(%arg0: i32) -> (i32, i32) {
    %c0_i32 = arith.constant 0 : i32
    %c0_i32_0 = arith.constant 0 : i32
    return %arg0, %c0_i32 : i32, i32
  }
}

module attributes {stable_mosaic.version = 11 : i64} {
  func.func @_attn_fused_kernel(%arg0: i32, %arg1: memref<32x32xf32, #tpu.memory_space<vmem>>, %arg2: memref<24x32xf32, #tpu.memory_space<vmem>>, %arg3: memref<32x1xf32, #tpu.memory_space<vmem>>, %arg4: memref<1x24xf32, #tpu.memory_space<vmem>>, %arg5: memref<32x32xf32, #tpu.memory_space<vmem>>, %arg6: memref<1x32xf32, #tpu.memory_space<vmem>>, %arg7: memref<32x64xf32, #tpu.memory_space<vmem>>, %arg8: memref<1x64xf32, #tpu.memory_space<vmem>>, %arg9: memref<32x32xf32, #tpu.memory_space<vmem>>, %arg10: memref<1x32xf32, #tpu.memory_space<vmem>>, %arg11: memref<1x32xf32, #tpu.memory_space<vmem>>, %arg12: memref<1x32xf32, #tpu.memory_space<vmem>>, %arg13: memref<32x64xf32, #tpu.memory_space<vmem>>, %arg14: memref<1x64xf32, #tpu.memory_space<vmem>>, %arg15: memref<64x32xf32, #tpu.memory_space<vmem>>, %arg16: memref<1x32xf32, #tpu.memory_space<vmem>>, %arg17: memref<1x32xf32, #tpu.memory_space<vmem>>, %arg18: memref<1x32xf32, #tpu.memory_space<vmem>>, %arg19: memref<32x32xf32, #tpu.memory_space<vmem>>) attributes {dimension_semantics = [#tpu.dimension_semantics<parallel>], iteration_bounds = array<i64: 1>, scalar_prefetch = 0 : i64, scratch_operands = 0 : i64, tpu.core_type = #tpu.core_type<tc>, window_params = [{transform_indices = @transform_0, window_bounds = array<i64: 32, 32>}, {transform_indices = @transform_1, window_bounds = array<i64: 24, 32>}, {pipeline_mode = #tpu.pipeline_mode<synchronous>, transform_indices = @transform_2, window_bounds = array<i64: 32, 1>}, {pipeline_mode = #tpu.pipeline_mode<synchronous>, transform_indices = @transform_3, window_bounds = array<i64: 1, 24>}, {pipeline_mode = #tpu.pipeline_mode<synchronous>, transform_indices = @transform_4, window_bounds = array<i64: 32, 32>}, {pipeline_mode = #tpu.pipeline_mode<synchronous>, transform_indices = @transform_5, window_bounds = array<i64: 1, 32>}, {pipeline_mode = #tpu.pipeline_mode<synchronous>, transform_indices = @transform_6, window_bounds = array<i64: 32, 64>}, {pipeline_mode = #tpu.pipeline_mode<synchronous>, transform_indices = @transform_7, window_bounds = array<i64: 1, 64>}, {pipeline_mode = #tpu.pipeline_mode<synchronous>, transform_indices = @transform_8, window_bounds = array<i64: 32, 32>}, {pipeline_mode = #tpu.pipeline_mode<synchronous>, transform_indices = @transform_9, window_bounds = array<i64: 1, 32>}, {pipeline_mode = #tpu.pipeline_mode<synchronous>, transform_indices = @transform_10, window_bounds = array<i64: 1, 32>}, {pipeline_mode = #tpu.pipeline_mode<synchronous>, transform_indices = @transform_11, window_bounds = array<i64: 1, 32>}, {pipeline_mode = #tpu.pipeline_mode<synchronous>, transform_indices = @transform_12, window_bounds = array<i64: 32, 64>}, {pipeline_mode = #tpu.pipeline_mode<synchronous>, transform_indices = @transform_13, window_bounds = array<i64: 1, 64>}, {pipeline_mode = #tpu.pipeline_mode<synchronous>, transform_indices = @transform_14, window_bounds = array<i64: 64, 32>}, {pipeline_mode = #tpu.pipeline_mode<synchronous>, transform_indices = @transform_15, window_bounds = array<i64: 1, 32>}, {pipeline_mode = #tpu.pipeline_mode<synchronous>, transform_indices = @transform_16, window_bounds = array<i64: 1, 32>}, {pipeline_mode = #tpu.pipeline_mode<synchronous>, transform_indices = @transform_17, window_bounds = array<i64: 1, 32>}, {transform_indices = @transform_18, window_bounds = array<i64: 32, 32>}]} {
    %c0 = arith.constant 0 : index
    %c0_0 = arith.constant 0 : index
    %0 = vector.load %arg1[%c0, %c0_0] : memref<32x32xf32, #tpu.memory_space<vmem>>, vector<32x32xf32>
    %c0_1 = arith.constant 0 : index
    %c0_2 = arith.constant 0 : index
    %1 = vector.load %arg2[%c0_1, %c0_2] : memref<24x32xf32, #tpu.memory_space<vmem>>, vector<24x32xf32>
    %c0_3 = arith.constant 0 : index
    %c0_4 = arith.constant 0 : index
    %2 = vector.load %arg5[%c0_3, %c0_4] : memref<32x32xf32, #tpu.memory_space<vmem>>, vector<32x32xf32>
    %cst = arith.constant dense<0.000000e+00> : vector<32x32xf32>
    %3 = tpu.matmul %0, %2, %cst {dimension_numbers = #tpu.dot_dimension_numbers<[1], [0], [0], [1], [0, 0, 1, 1], [], []>} : vector<32x32xf32>, vector<32x32xf32>, vector<32x32xf32> -> vector<32x32xf32>
    %c0_5 = arith.constant 0 : index
    %c0_6 = arith.constant 0 : index
    %4 = vector.load %arg6[%c0_5, %c0_6] : memref<1x32xf32, #tpu.memory_space<vmem>>, vector<1x32xf32>
    %5 = vector.broadcast %4 : vector<1x32xf32> to vector<32x32xf32>
    %6 = arith.addf %3, %5 : vector<32x32xf32>
    %c0_7 = arith.constant 0 : index
    %c0_8 = arith.constant 0 : index
    %7 = vector.load %arg7[%c0_7, %c0_8] : memref<32x64xf32, #tpu.memory_space<vmem>>, vector<32x64xf32>
    %cst_9 = arith.constant dense<0.000000e+00> : vector<24x64xf32>
    %8 = tpu.matmul %1, %7, %cst_9 {dimension_numbers = #tpu.dot_dimension_numbers<[1], [0], [0], [1], [0, 0, 1, 1], [], []>} : vector<24x32xf32>, vector<32x64xf32>, vector<24x64xf32> -> vector<24x64xf32>
    %c0_10 = arith.constant 0 : index
    %c0_11 = arith.constant 0 : index
    %9 = vector.load %arg8[%c0_10, %c0_11] : memref<1x64xf32, #tpu.memory_space<vmem>>, vector<1x64xf32>
    %10 = vector.broadcast %9 : vector<1x64xf32> to vector<24x64xf32>
    %11 = arith.addf %8, %10 : vector<24x64xf32>
    %12 = vector.extract_strided_slice %11 {offsets = [0, 0], sizes = [24, 32], strides = [1, 1]} : vector<24x64xf32> to vector<24x32xf32>
    %13 = vector.extract_strided_slice %11 {offsets = [0, 32], sizes = [24, 32], strides = [1, 1]} : vector<24x64xf32> to vector<24x32xf32>
    %c0_12 = arith.constant 0 : index
    %c0_13 = arith.constant 0 : index
    %14 = vector.load %arg3[%c0_12, %c0_13] : memref<32x1xf32, #tpu.memory_space<vmem>>, vector<32x1xf32>
    %c0_14 = arith.constant 0 : index
    %c0_15 = arith.constant 0 : index
    %15 = vector.load %arg4[%c0_14, %c0_15] : memref<1x24xf32, #tpu.memory_space<vmem>>, vector<1x24xf32>
    %16 = vector.broadcast %14 : vector<32x1xf32> to vector<32x24xf32>
    %17 = vector.broadcast %15 : vector<1x24xf32> to vector<32x24xf32>
    %18 = arith.cmpf oeq, %16, %17 : vector<32x24xf32>
    %19 = vector.extract_strided_slice %6 {offsets = [0, 0], sizes = [32, 16], strides = [1, 1]} : vector<32x32xf32> to vector<32x16xf32>
    %20 = vector.extract_strided_slice %12 {offsets = [0, 0], sizes = [24, 16], strides = [1, 1]} : vector<24x32xf32> to vector<24x16xf32>
    %cst_16 = arith.constant dense<0.000000e+00> : vector<32x24xf32>
    %21 = tpu.matmul %19, %20, %cst_16 {dimension_numbers = #tpu.dot_dimension_numbers<[1], [1], [0], [0], [0, 0, 1, 0], [], []>} : vector<32x16xf32>, vector<24x16xf32>, vector<32x24xf32> -> vector<32x24xf32>
    %cst_17 = arith.constant 2.500000e-01 : f32
    %22 = vector.broadcast %cst_17 : f32 to vector<32x24xf32>
    %23 = arith.mulf %21, %22 : vector<32x24xf32>
    %cst_18 = arith.constant -1.000000e+30 : f32
    %24 = vector.broadcast %cst_18 : f32 to vector<32x24xf32>
    %25 = arith.select %18, %23, %24 : vector<32x24xi1>, vector<32x24xf32>
    %cst_19 = arith.constant dense<0xFF800000> : vector<32xf32>
    %26 = vector.multi_reduction <maximumf>, %25, %cst_19 [1] : vector<32x24xf32> to vector<32xf32>
    %27 = vector.shape_cast %26 : vector<32xf32> to vector<32x1xf32>
    %28 = vector.broadcast %27 : vector<32x1xf32> to vector<32x24xf32>
    %29 = arith.subf %25, %28 : vector<32x24xf32>
    %30 = math.exp %29 : vector<32x24xf32>
    %cst_20 = arith.constant dense<0.000000e+00> : vector<32xf32>
    %31 = vector.multi_reduction <add>, %30, %cst_20 [1] : vector<32x24xf32> to vector<32xf32>
    %32 = vector.shape_cast %31 : vector<32xf32> to vector<32x1xf32>
    %33 = tpu.reciprocal %32 {approx = true} : vector<32x1xf32> -> vector<32x1xf32>
    %34 = vector.broadcast %33 : vector<32x1xf32> to vector<32x24xf32>
    %35 = arith.mulf %30, %34 : vector<32x24xf32>
    %36 = vector.extract_strided_slice %13 {offsets = [0, 0], sizes = [24, 16], strides = [1, 1]} : vector<24x32xf32> to vector<24x16xf32>
    %cst_21 = arith.constant dense<0.000000e+00> : vector<32x16xf32>
    %37 = tpu.matmul %35, %36, %cst_21 {dimension_numbers = #tpu.dot_dimension_numbers<[1], [0], [0], [1], [0, 0, 1, 1], [], []>} : vector<32x24xf32>, vector<24x16xf32>, vector<32x16xf32> -> vector<32x16xf32>
    %38 = vector.extract_strided_slice %6 {offsets = [0, 16], sizes = [32, 16], strides = [1, 1]} : vector<32x32xf32> to vector<32x16xf32>
    %39 = vector.extract_strided_slice %12 {offsets = [0, 16], sizes = [24, 16], strides = [1, 1]} : vector<24x32xf32> to vector<24x16xf32>
    %cst_22 = arith.constant dense<0.000000e+00> : vector<32x24xf32>
    %40 = tpu.matmul %38, %39, %cst_22 {dimension_numbers = #tpu.dot_dimension_numbers<[1], [1], [0], [0], [0, 0, 1, 0], [], []>} : vector<32x16xf32>, vector<24x16xf32>, vector<32x24xf32> -> vector<32x24xf32>
    %cst_23 = arith.constant 2.500000e-01 : f32
    %41 = vector.broadcast %cst_23 : f32 to vector<32x24xf32>
    %42 = arith.mulf %40, %41 : vector<32x24xf32>
    %cst_24 = arith.constant -1.000000e+30 : f32
    %43 = vector.broadcast %cst_24 : f32 to vector<32x24xf32>
    %44 = arith.select %18, %42, %43 : vector<32x24xi1>, vector<32x24xf32>
    %cst_25 = arith.constant dense<0xFF800000> : vector<32xf32>
    %45 = vector.multi_reduction <maximumf>, %44, %cst_25 [1] : vector<32x24xf32> to vector<32xf32>
    %46 = vector.shape_cast %45 : vector<32xf32> to vector<32x1xf32>
    %47 = vector.broadcast %46 : vector<32x1xf32> to vector<32x24xf32>
    %48 = arith.subf %44, %47 : vector<32x24xf32>
    %49 = math.exp %48 : vector<32x24xf32>
    %cst_26 = arith.constant dense<0.000000e+00> : vector<32xf32>
    %50 = vector.multi_reduction <add>, %49, %cst_26 [1] : vector<32x24xf32> to vector<32xf32>
    %51 = vector.shape_cast %50 : vector<32xf32> to vector<32x1xf32>
    %52 = tpu.reciprocal %51 {approx = true} : vector<32x1xf32> -> vector<32x1xf32>
    %53 = vector.broadcast %52 : vector<32x1xf32> to vector<32x24xf32>
    %54 = arith.mulf %49, %53 : vector<32x24xf32>
    %55 = vector.extract_strided_slice %13 {offsets = [0, 16], sizes = [24, 16], strides = [1, 1]} : vector<24x32xf32> to vector<24x16xf32>
    %cst_27 = arith.constant dense<0.000000e+00> : vector<32x16xf32>
    %56 = tpu.matmul %54, %55, %cst_27 {dimension_numbers = #tpu.dot_dimension_numbers<[1], [0], [0], [1], [0, 0, 1, 1], [], []>} : vector<32x24xf32>, vector<24x16xf32>, vector<32x16xf32> -> vector<32x16xf32>
    %57 = tpu.concatenate %37, %56 in 1 : vector<32x16xf32>, vector<32x16xf32> -> vector<32x32xf32>
    %c0_28 = arith.constant 0 : index
    %c0_29 = arith.constant 0 : index
    %58 = vector.load %arg9[%c0_28, %c0_29] : memref<32x32xf32, #tpu.memory_space<vmem>>, vector<32x32xf32>
    %cst_30 = arith.constant dense<0.000000e+00> : vector<32x32xf32>
    %59 = tpu.matmul %57, %58, %cst_30 {dimension_numbers = #tpu.dot_dimension_numbers<[1], [0], [0], [1], [0, 0, 1, 1], [], []>} : vector<32x32xf32>, vector<32x32xf32>, vector<32x32xf32> -> vector<32x32xf32>
    %c0_31 = arith.constant 0 : index
    %c0_32 = arith.constant 0 : index
    %60 = vector.load %arg10[%c0_31, %c0_32] : memref<1x32xf32, #tpu.memory_space<vmem>>, vector<1x32xf32>
    %61 = vector.broadcast %60 : vector<1x32xf32> to vector<32x32xf32>
    %62 = arith.addf %59, %61 : vector<32x32xf32>
    %63 = arith.addf %62, %0 : vector<32x32xf32>
    %c0_33 = arith.constant 0 : index
    %c0_34 = arith.constant 0 : index
    %64 = vector.load %arg11[%c0_33, %c0_34] : memref<1x32xf32, #tpu.memory_space<vmem>>, vector<1x32xf32>
    %c0_35 = arith.constant 0 : index
    %c0_36 = arith.constant 0 : index
    %65 = vector.load %arg12[%c0_35, %c0_36] : memref<1x32xf32, #tpu.memory_space<vmem>>, vector<1x32xf32>
    %cst_37 = arith.constant dense<0.000000e+00> : vector<32xf32>
    %66 = vector.multi_reduction <add>, %63, %cst_37 [1] : vector<32x32xf32> to vector<32xf32>
    %67 = vector.shape_cast %66 : vector<32xf32> to vector<32x1xf32>
    %cst_38 = arith.constant 3.200000e+01 : f32
    %68 = vector.broadcast %cst_38 : f32 to vector<32x1xf32>
    %69 = arith.divf %67, %68 : vector<32x1xf32>
    %70 = vector.broadcast %69 : vector<32x1xf32> to vector<32x32xf32>
    %71 = arith.subf %63, %70 : vector<32x32xf32>
    %72 = arith.mulf %71, %71 : vector<32x32xf32>
    %cst_39 = arith.constant dense<0.000000e+00> : vector<32xf32>
    %73 = vector.multi_reduction <add>, %72, %cst_39 [1] : vector<32x32xf32> to vector<32xf32>
    %74 = vector.shape_cast %73 : vector<32xf32> to vector<32x1xf32>
    %cst_40 = arith.constant 3.200000e+01 : f32
    %75 = vector.broadcast %cst_40 : f32 to vector<32x1xf32>
    %76 = arith.divf %74, %75 : vector<32x1xf32>
    %77 = vector.broadcast %69 : vector<32x1xf32> to vector<32x32xf32>
    %78 = arith.subf %63, %77 : vector<32x32xf32>
    %cst_41 = arith.constant 9.99999974E-6 : f32
    %79 = vector.broadcast %cst_41 : f32 to vector<32x1xf32>
    %80 = arith.addf %76, %79 : vector<32x1xf32>
    %81 = math.rsqrt %80 : vector<32x1xf32>
    %82 = vector.broadcast %81 : vector<32x1xf32> to vector<32x32xf32>
    %83 = arith.mulf %78, %82 : vector<32x32xf32>
    %84 = vector.broadcast %64 : vector<1x32xf32> to vector<32x32xf32>
    %85 = arith.mulf %83, %84 : vector<32x32xf32>
    %86 = vector.broadcast %65 : vector<1x32xf32> to vector<32x32xf32>
    %87 = arith.addf %85, %86 : vector<32x32xf32>
    %c0_42 = arith.constant 0 : index
    %c0_43 = arith.constant 0 : index
    %88 = vector.load %arg13[%c0_42, %c0_43] : memref<32x64xf32, #tpu.memory_space<vmem>>, vector<32x64xf32>
    %cst_44 = arith.constant dense<0.000000e+00> : vector<32x64xf32>
    %89 = tpu.matmul %87, %88, %cst_44 {dimension_numbers = #tpu.dot_dimension_numbers<[1], [0], [0], [1], [0, 0, 1, 1], [], []>} : vector<32x32xf32>, vector<32x64xf32>, vector<32x64xf32> -> vector<32x64xf32>
    %c0_45 = arith.constant 0 : index
    %c0_46 = arith.constant 0 : index
    %90 = vector.load %arg14[%c0_45, %c0_46] : memref<1x64xf32, #tpu.memory_space<vmem>>, vector<1x64xf32>
    %91 = vector.broadcast %90 : vector<1x64xf32> to vector<32x64xf32>
    %92 = arith.addf %89, %91 : vector<32x64xf32>
    %cst_47 = arith.constant 0.707106769 : f32
    %93 = vector.broadcast %cst_47 : f32 to vector<32x64xf32>
    %94 = arith.mulf %92, %93 : vector<32x64xf32>
    %95 = math.absf %94 : vector<32x64xf32>
    %cst_48 = arith.constant 0.327591091 : f32
    %96 = vector.broadcast %cst_48 : f32 to vector<32x64xf32>
    %97 = arith.mulf %96, %95 : vector<32x64xf32>
    %cst_49 = arith.constant 1.000000e+00 : f32
    %98 = vector.broadcast %cst_49 : f32 to vector<32x64xf32>
    %99 = arith.addf %98, %97 : vector<32x64xf32>
    %cst_50 = arith.constant 1.000000e+00 : f32
    %100 = vector.broadcast %cst_50 : f32 to vector<32x64xf32>
    %101 = arith.divf %100, %99 : vector<32x64xf32>
    %cst_51 = arith.constant 1.06140542 : f32
    %102 = vector.broadcast %cst_51 : f32 to vector<32x64xf32>
    %103 = arith.mulf %102, %101 : vector<32x64xf32>
    %cst_52 = arith.constant 1.45315206 : f32
    %104 = vector.broadcast %cst_52 : f32 to vector<32x64xf32>
    %105 = arith.subf %103, %104 : vector<32x64xf32>
    %106 = arith.mulf %105, %101 : vector<32x64xf32>
    %cst_53 = arith.constant 1.42141378 : f32
    %107 = vector.broadcast %cst_53 : f32 to vector<32x64xf32>
    %108 = arith.addf %106, %107 : vector<32x64xf32>
    %109 = arith.mulf %108, %101 : vector<32x64xf32>
    %cst_54 = arith.constant 0.284496725 : f32
    %110 = vector.broadcast %cst_54 : f32 to vector<32x64xf32>
    %111 = arith.subf %109, %110 : vector<32x64xf32>
    %112 = arith.mulf %111, %101 : vector<32x64xf32>
    %cst_55 = arith.constant 0.254829586 : f32
    %113 = vector.broadcast %cst_55 : f32 to vector<32x64xf32>
    %114 = arith.addf %112, %113 : vector<32x64xf32>
    %115 = arith.mulf %114, %101 : vector<32x64xf32>
    %cst_56 = arith.constant 0.000000e+00 : f32
    %116 = vector.broadcast %cst_56 : f32 to vector<32x64xf32>
    %117 = arith.subf %116, %95 : vector<32x64xf32>
    %118 = arith.mulf %117, %95 : vector<32x64xf32>
    %119 = math.exp %118 : vector<32x64xf32>
    %120 = arith.mulf %115, %119 : vector<32x64xf32>
    %cst_57 = arith.constant 1.000000e+00 : f32
    %121 = vector.broadcast %cst_57 : f32 to vector<32x64xf32>
    %122 = arith.subf %121, %120 : vector<32x64xf32>
    %cst_58 = arith.constant 0.000000e+00 : f32
    %123 = vector.broadcast %cst_58 : f32 to vector<32x64xf32>
    %124 = arith.cmpf olt, %94, %123 : vector<32x64xf32>
    %cst_59 = arith.constant 0.000000e+00 : f32
    %125 = vector.broadcast %cst_59 : f32 to vector<32x64xf32>
    %126 = arith.subf %125, %122 : vector<32x64xf32>
    %127 = arith.select %124, %126, %122 : vector<32x64xi1>, vector<32x64xf32>
    %cst_60 = arith.constant 5.000000e-01 : f32
    %128 = vector.broadcast %cst_60 : f32 to vector<32x64xf32>
    %129 = arith.mulf %128, %92 : vector<32x64xf32>
    %cst_61 = arith.constant 1.000000e+00 : f32
    %130 = vector.broadcast %cst_61 : f32 to vector<32x64xf32>
    %131 = arith.addf %130, %127 : vector<32x64xf32>
    %132 = arith.mulf %129, %131 : vector<32x64xf32>
    %c0_62 = arith.constant 0 : index
    %c0_63 = arith.constant 0 : index
    %133 = vector.load %arg15[%c0_62, %c0_63] : memref<64x32xf32, #tpu.memory_space<vmem>>, vector<64x32xf32>
    %cst_64 = arith.constant dense<0.000000e+00> : vector<32x32xf32>
    %134 = tpu.matmul %132, %133, %cst_64 {dimension_numbers = #tpu.dot_dimension_numbers<[1], [0], [0], [1], [0, 0, 1, 1], [], []>} : vector<32x64xf32>, vector<64x32xf32>, vector<32x32xf32> -> vector<32x32xf32>
    %135 = arith.addf %87, %134 : vector<32x32xf32>
    %c0_65 = arith.constant 0 : index
    %c0_66 = arith.constant 0 : index
    %136 = vector.load %arg16[%c0_65, %c0_66] : memref<1x32xf32, #tpu.memory_space<vmem>>, vector<1x32xf32>
    %137 = vector.broadcast %136 : vector<1x32xf32> to vector<32x32xf32>
    %138 = arith.addf %135, %137 : vector<32x32xf32>
    %c0_67 = arith.constant 0 : index
    %c0_68 = arith.constant 0 : index
    %139 = vector.load %arg17[%c0_67, %c0_68] : memref<1x32xf32, #tpu.memory_space<vmem>>, vector<1x32xf32>
    %c0_69 = arith.constant 0 : index
    %c0_70 = arith.constant 0 : index
    %140 = vector.load %arg18[%c0_69, %c0_70] : memref<1x32xf32, #tpu.memory_space<vmem>>, vector<1x32xf32>
    %cst_71 = arith.constant dense<0.000000e+00> : vector<32xf32>
    %141 = vector.multi_reduction <add>, %138, %cst_71 [1] : vector<32x32xf32> to vector<32xf32>
    %142 = vector.shape_cast %141 : vector<32xf32> to vector<32x1xf32>
    %cst_72 = arith.constant 3.200000e+01 : f32
    %143 = vector.broadcast %cst_72 : f32 to vector<32x1xf32>
    %144 = arith.divf %142, %143 : vector<32x1xf32>
    %145 = vector.broadcast %144 : vector<32x1xf32> to vector<32x32xf32>
    %146 = arith.subf %138, %145 : vector<32x32xf32>
    %147 = arith.mulf %146, %146 : vector<32x32xf32>
    %cst_73 = arith.constant dense<0.000000e+00> : vector<32xf32>
    %148 = vector.multi_reduction <add>, %147, %cst_73 [1] : vector<32x32xf32> to vector<32xf32>
    %149 = vector.shape_cast %148 : vector<32xf32> to vector<32x1xf32>
    %cst_74 = arith.constant 3.200000e+01 : f32
    %150 = vector.broadcast %cst_74 : f32 to vector<32x1xf32>
    %151 = arith.divf %149, %150 : vector<32x1xf32>
    %152 = vector.broadcast %144 : vector<32x1xf32> to vector<32x32xf32>
    %153 = arith.subf %138, %152 : vector<32x32xf32>
    %cst_75 = arith.constant 9.99999974E-6 : f32
    %154 = vector.broadcast %cst_75 : f32 to vector<32x1xf32>
    %155 = arith.addf %151, %154 : vector<32x1xf32>
    %156 = math.rsqrt %155 : vector<32x1xf32>
    %157 = vector.broadcast %156 : vector<32x1xf32> to vector<32x32xf32>
    %158 = arith.mulf %153, %157 : vector<32x32xf32>
    %159 = vector.broadcast %139 : vector<1x32xf32> to vector<32x32xf32>
    %160 = arith.mulf %158, %159 : vector<32x32xf32>
    %161 = vector.broadcast %140 : vector<1x32xf32> to vector<32x32xf32>
    %162 = arith.addf %160, %161 : vector<32x32xf32>
    %c0_76 = arith.constant 0 : index
    %c0_77 = arith.constant 0 : index
    %163 = vector.load %arg19[%c0_76, %c0_77] : memref<32x32xf32, #tpu.memory_space<vmem>>, vector<32x32xf32>
    tpu.vector_store %arg19[%c0_76, %c0_77], %162 {strides = array<i32>} : memref<32x32xf32, #tpu.memory_space<vmem>>, vector<32x32xf32>,
    return
  }
  func.func @transform_0(%arg0: i32) -> (i32, i32) {
    %c0_i32 = arith.constant 0 : i32
    %c0_i32_0 = arith.constant 0 : i32
    return %arg0, %c0_i32 : i32, i32
  }
  func.func @transform_1(%arg0: i32) -> (i32, i32) {
    %c0_i32 = arith.constant 0 : i32
    %c0_i32_0 = arith.constant 0 : i32
    return %arg0, %c0_i32 : i32, i32
  }
  func.func @transform_2(%arg0: i32) -> (i32, i32) {
    %c0_i32 = arith.constant 0 : i32
    %c0_i32_0 = arith.constant 0 : i32
    %c0_i32_1 = arith.constant 0 : i32
    return %c0_i32, %c0_i32_0 : i32, i32
  }
  func.func @transform_3(%arg0: i32) -> (i32, i32) {
    %c0_i32 = arith.constant 0 : i32
    %c0_i32_0 = arith.constant 0 : i32
    %c0_i32_1 = arith.constant 0 : i32
    return %c0_i32, %c0_i32_0 : i32, i32
  }
  func.func @transform_4(%arg0: i32) -> (i32, i32) {
    %c0_i32 = arith.constant 0 : i32
    %c0_i32_0 = arith.constant 0 : i32
    %c0_i32_1 = arith.constant 0 : i32
    return %c0_i32, %c0_i32_0 : i32, i32
  }
  func.func @transform_5(%arg0: i32) -> (i32, i32) {
    %c0_i32 = arith.constant 0 : i32
    %c0_i32_0 = arith.constant 0 : i32
    %c0_i32_1 = arith.constant 0 : i32
    return %c0_i32, %c0_i32_0 : i32, i32
  }
  func.func @transform_6(%arg0: i32) -> (i32, i32) {
    %c0_i32 = arith.constant 0 : i32
    %c0_i32_0 = arith.constant 0 : i32
    %c0_i32_1 = arith.constant 0 : i32
    return %c0_i32, %c0_i32_0 : i32, i32
  }
  func.func @transform_7(%arg0: i32) -> (i32, i32) {
    %c0_i32 = arith.constant 0 : i32
    %c0_i32_0 = arith.constant 0 : i32
    %c0_i32_1 = arith.constant 0 : i32
    return %c0_i32, %c0_i32_0 : i32, i32
  }
  func.func @transform_8(%arg0: i32) -> (i32, i32) {
    %c0_i32 = arith.constant 0 : i32
    %c0_i32_0 = arith.constant 0 : i32
    %c0_i32_1 = arith.constant 0 : i32
    return %c0_i32, %c0_i32_0 : i32, i32
  }
  func.func @transform_9(%arg0: i32) -> (i32, i32) {
    %c0_i32 = arith.constant 0 : i32
    %c0_i32_0 = arith.constant 0 : i32
    %c0_i32_1 = arith.constant 0 : i32
    return %c0_i32, %c0_i32_0 : i32, i32
  }
  func.func @transform_10(%arg0: i32) -> (i32, i32) {
    %c0_i32 = arith.constant 0 : i32
    %c0_i32_0 = arith.constant 0 : i32
    %c0_i32_1 = arith.constant 0 : i32
    return %c0_i32, %c0_i32_0 : i32, i32
  }
  func.func @transform_11(%arg0: i32) -> (i32, i32) {
    %c0_i32 = arith.constant 0 : i32
    %c0_i32_0 = arith.constant 0 : i32
    %c0_i32_1 = arith.constant 0 : i32
    return %c0_i32, %c0_i32_0 : i32, i32
  }
  func.func @transform_12(%arg0: i32) -> (i32, i32) {
    %c0_i32 = arith.constant 0 : i32
    %c0_i32_0 = arith.constant 0 : i32
    %c0_i32_1 = arith.constant 0 : i32
    return %c0_i32, %c0_i32_0 : i32, i32
  }
  func.func @transform_13(%arg0: i32) -> (i32, i32) {
    %c0_i32 = arith.constant 0 : i32
    %c0_i32_0 = arith.constant 0 : i32
    %c0_i32_1 = arith.constant 0 : i32
    return %c0_i32, %c0_i32_0 : i32, i32
  }
  func.func @transform_14(%arg0: i32) -> (i32, i32) {
    %c0_i32 = arith.constant 0 : i32
    %c0_i32_0 = arith.constant 0 : i32
    %c0_i32_1 = arith.constant 0 : i32
    return %c0_i32, %c0_i32_0 : i32, i32
  }
  func.func @transform_15(%arg0: i32) -> (i32, i32) {
    %c0_i32 = arith.constant 0 : i32
    %c0_i32_0 = arith.constant 0 : i32
    %c0_i32_1 = arith.constant 0 : i32
    return %c0_i32, %c0_i32_0 : i32, i32
  }
  func.func @transform_16(%arg0: i32) -> (i32, i32) {
    %c0_i32 = arith.constant 0 : i32
    %c0_i32_0 = arith.constant 0 : i32
    %c0_i32_1 = arith.constant 0 : i32
    return %c0_i32, %c0_i32_0 : i32, i32
  }
  func.func @transform_17(%arg0: i32) -> (i32, i32) {
    %c0_i32 = arith.constant 0 : i32
    %c0_i32_0 = arith.constant 0 : i32
    %c0_i32_1 = arith.constant 0 : i32
    return %c0_i32, %c0_i32_0 : i32, i32
  }
  func.func @transform_18(%arg0: i32) -> (i32, i32) {
    %c0_i32 = arith.constant 0 : i32
    %c0_i32_0 = arith.constant 0 : i32
    return %arg0, %c0_i32 : i32, i32
  }
}

module attributes {stable_mosaic.version = 11 : i64} {
  func.func @_ln_linear_kernel(%arg0: i32, %arg1: memref<8x64xf32, #tpu.memory_space<vmem>>, %arg2: memref<1x64xf32, #tpu.memory_space<vmem>>, %arg3: memref<1x64xf32, #tpu.memory_space<vmem>>, %arg4: memref<64x32xf32, #tpu.memory_space<vmem>>, %arg5: memref<1x32xf32, #tpu.memory_space<vmem>>, %arg6: memref<8x32xf32, #tpu.memory_space<vmem>>) attributes {dimension_semantics = [#tpu.dimension_semantics<parallel>], iteration_bounds = array<i64: 2>, scalar_prefetch = 0 : i64, scratch_operands = 0 : i64, tpu.core_type = #tpu.core_type<tc>, window_params = [{transform_indices = @transform_0, window_bounds = array<i64: 8, 64>}, {pipeline_mode = #tpu.pipeline_mode<synchronous>, transform_indices = @transform_1, window_bounds = array<i64: 1, 64>}, {pipeline_mode = #tpu.pipeline_mode<synchronous>, transform_indices = @transform_2, window_bounds = array<i64: 1, 64>}, {pipeline_mode = #tpu.pipeline_mode<synchronous>, transform_indices = @transform_3, window_bounds = array<i64: 64, 32>}, {pipeline_mode = #tpu.pipeline_mode<synchronous>, transform_indices = @transform_4, window_bounds = array<i64: 1, 32>}, {transform_indices = @transform_5, window_bounds = array<i64: 8, 32>}]} {
    %c0 = arith.constant 0 : index
    %c0_0 = arith.constant 0 : index
    %0 = vector.load %arg1[%c0, %c0_0] : memref<8x64xf32, #tpu.memory_space<vmem>>, vector<8x64xf32>
    %c0_1 = arith.constant 0 : index
    %c0_2 = arith.constant 0 : index
    %1 = vector.load %arg2[%c0_1, %c0_2] : memref<1x64xf32, #tpu.memory_space<vmem>>, vector<1x64xf32>
    %c0_3 = arith.constant 0 : index
    %c0_4 = arith.constant 0 : index
    %2 = vector.load %arg3[%c0_3, %c0_4] : memref<1x64xf32, #tpu.memory_space<vmem>>, vector<1x64xf32>
    %cst = arith.constant dense<0.000000e+00> : vector<8xf32>
    %3 = vector.multi_reduction <add>, %0, %cst [1] : vector<8x64xf32> to vector<8xf32>
    %4 = vector.shape_cast %3 : vector<8xf32> to vector<8x1xf32>
    %cst_5 = arith.constant 6.400000e+01 : f32
    %5 = vector.broadcast %cst_5 : f32 to vector<8x1xf32>
    %6 = arith.divf %4, %5 : vector<8x1xf32>
    %7 = vector.broadcast %6 : vector<8x1xf32> to vector<8x64xf32>
    %8 = arith.subf %0, %7 : vector<8x64xf32>
    %9 = arith.mulf %8, %8 : vector<8x64xf32>
    %cst_6 = arith.constant dense<0.000000e+00> : vector<8xf32>
    %10 = vector.multi_reduction <add>, %9, %cst_6 [1] : vector<8x64xf32> to vector<8xf32>
    %11 = vector.shape_cast %10 : vector<8xf32> to vector<8x1xf32>
    %cst_7 = arith.constant 6.400000e+01 : f32
    %12 = vector.broadcast %cst_7 : f32 to vector<8x1xf32>
    %13 = arith.divf %11, %12 : vector<8x1xf32>
    %14 = vector.broadcast %6 : vector<8x1xf32> to vector<8x64xf32>
    %15 = arith.subf %0, %14 : vector<8x64xf32>
    %cst_8 = arith.constant 9.99999974E-6 : f32
    %16 = vector.broadcast %cst_8 : f32 to vector<8x1xf32>
    %17 = arith.addf %13, %16 : vector<8x1xf32>
    %18 = math.rsqrt %17 : vector<8x1xf32>
    %19 = vector.broadcast %18 : vector<8x1xf32> to vector<8x64xf32>
    %20 = arith.mulf %15, %19 : vector<8x64xf32>
    %21 = vector.broadcast %1 : vector<1x64xf32> to vector<8x64xf32>
    %22 = arith.mulf %20, %21 : vector<8x64xf32>
    %23 = vector.broadcast %2 : vector<1x64xf32> to vector<8x64xf32>
    %24 = arith.addf %22, %23 : vector<8x64xf32>
    %c0_9 = arith.constant 0 : index
    %c0_10 = arith.constant 0 : index
    %25 = vector.load %arg4[%c0_9, %c0_10] : memref<64x32xf32, #tpu.memory_space<vmem>>, vector<64x32xf32>
    %cst_11 = arith.constant dense<0.000000e+00> : vector<8x32xf32>
    %26 = tpu.matmul %24, %25, %cst_11 {dimension_numbers = #tpu.dot_dimension_numbers<[1], [0], [0], [1], [0, 0, 1, 1], [], []>} : vector<8x64xf32>, vector<64x32xf32>, vector<8x32xf32> -> vector<8x32xf32>
    %c0_12 = arith.constant 0 : index
    %c0_13 = arith.constant 0 : index
    %27 = vector.load %arg5[%c0_12, %c0_13] : memref<1x32xf32, #tpu.memory_space<vmem>>, vector<1x32xf32>
    %28 = vector.broadcast %27 : vector<1x32xf32> to vector<8x32xf32>
    %29 = arith.addf %26, %28 : vector<8x32xf32>
    %c0_14 = arith.constant 0 : index
    %c0_15 = arith.constant 0 : index
    %30 = vector.load %arg6[%c0_14, %c0_15] : memref<8x32xf32, #tpu.memory_space<vmem>>, vector<8x32xf32>
    tpu.vector_store %arg6[%c0_14, %c0_15], %29 {strides = array<i32>} : memref<8x32xf32, #tpu.memory_space<vmem>>, vector<8x32xf32>,
    return
  }
  func.func @transform_0(%arg0: i32) -> (i32, i32) {
    %c0_i32 = arith.constant 0 : i32
    %c0_i32_0 = arith.constant 0 : i32
    return %arg0, %c0_i32 : i32, i32
  }
  func.func @transform_1(%arg0: i32) -> (i32, i32) {
    %c0_i32 = arith.constant 0 : i32
    %c0_i32_0 = arith.constant 0 : i32
    %c0_i32_1 = arith.constant 0 : i32
    return %c0_i32, %c0_i32_0 : i32, i32
  }
  func.func @transform_2(%arg0: i32) -> (i32, i32) {
    %c0_i32 = arith.constant 0 : i32
    %c0_i32_0 = arith.constant 0 : i32
    %c0_i32_1 = arith.constant 0 : i32
    return %c0_i32, %c0_i32_0 : i32, i32
  }
  func.func @transform_3(%arg0: i32) -> (i32, i32) {
    %c0_i32 = arith.constant 0 : i32
    %c0_i32_0 = arith.constant 0 : i32
    %c0_i32_1 = arith.constant 0 : i32
    return %c0_i32, %c0_i32_0 : i32, i32
  }
  func.func @transform_4(%arg0: i32) -> (i32, i32) {
    %c0_i32 = arith.constant 0 : i32
    %c0_i32_0 = arith.constant 0 : i32
    %c0_i32_1 = arith.constant 0 : i32
    return %c0_i32, %c0_i32_0 : i32, i32
  }
  func.func @transform_5(%arg0: i32) -> (i32, i32) {
    %c0_i32 = arith.constant 0 : i32
    %c0_i32_0 = arith.constant 0 : i32
    return %arg0, %c0_i32 : i32, i32
  }
}

module attributes {stable_mosaic.version = 11 : i64} {
  func.func @_attn_fused_kernel(%arg0: i32, %arg1: memref<8x32xf32, #tpu.memory_space<vmem>>, %arg2: memref<8x32xf32, #tpu.memory_space<vmem>>, %arg3: memref<8x1xf32, #tpu.memory_space<vmem>>, %arg4: memref<1x8xf32, #tpu.memory_space<vmem>>, %arg5: memref<32x32xf32, #tpu.memory_space<vmem>>, %arg6: memref<1x32xf32, #tpu.memory_space<vmem>>, %arg7: memref<32x64xf32, #tpu.memory_space<vmem>>, %arg8: memref<1x64xf32, #tpu.memory_space<vmem>>, %arg9: memref<32x32xf32, #tpu.memory_space<vmem>>, %arg10: memref<1x32xf32, #tpu.memory_space<vmem>>, %arg11: memref<1x32xf32, #tpu.memory_space<vmem>>, %arg12: memref<1x32xf32, #tpu.memory_space<vmem>>, %arg13: memref<32x32xf32, #tpu.memory_space<vmem>>, %arg14: memref<1x32xf32, #tpu.memory_space<vmem>>, %arg15: memref<32x32xf32, #tpu.memory_space<vmem>>, %arg16: memref<1x32xf32, #tpu.memory_space<vmem>>, %arg17: memref<1x32xf32, #tpu.memory_space<vmem>>, %arg18: memref<1x32xf32, #tpu.memory_space<vmem>>, %arg19: memref<32x4xf32, #tpu.memory_space<vmem>>, %arg20: memref<1x4xf32, #tpu.memory_space<vmem>>, %arg21: memref<8x32xf32, #tpu.memory_space<vmem>>, %arg22: memref<8x4xf32, #tpu.memory_space<vmem>>) attributes {dimension_semantics = [#tpu.dimension_semantics<parallel>], iteration_bounds = array<i64: 2>, scalar_prefetch = 0 : i64, scratch_operands = 0 : i64, tpu.core_type = #tpu.core_type<tc>, window_params = [{transform_indices = @transform_0, window_bounds = array<i64: 8, 32>}, {transform_indices = @transform_1, window_bounds = array<i64: 8, 32>}, {pipeline_mode = #tpu.pipeline_mode<synchronous>, transform_indices = @transform_2, window_bounds = array<i64: 8, 1>}, {pipeline_mode = #tpu.pipeline_mode<synchronous>, transform_indices = @transform_3, window_bounds = array<i64: 1, 8>}, {pipeline_mode = #tpu.pipeline_mode<synchronous>, transform_indices = @transform_4, window_bounds = array<i64: 32, 32>}, {pipeline_mode = #tpu.pipeline_mode<synchronous>, transform_indices = @transform_5, window_bounds = array<i64: 1, 32>}, {pipeline_mode = #tpu.pipeline_mode<synchronous>, transform_indices = @transform_6, window_bounds = array<i64: 32, 64>}, {pipeline_mode = #tpu.pipeline_mode<synchronous>, transform_indices = @transform_7, window_bounds = array<i64: 1, 64>}, {pipeline_mode = #tpu.pipeline_mode<synchronous>, transform_indices = @transform_8, window_bounds = array<i64: 32, 32>}, {pipeline_mode = #tpu.pipeline_mode<synchronous>, transform_indices = @transform_9, window_bounds = array<i64: 1, 32>}, {pipeline_mode = #tpu.pipeline_mode<synchronous>, transform_indices = @transform_10, window_bounds = array<i64: 1, 32>}, {pipeline_mode = #tpu.pipeline_mode<synchronous>, transform_indices = @transform_11, window_bounds = array<i64: 1, 32>}, {pipeline_mode = #tpu.pipeline_mode<synchronous>, transform_indices = @transform_12, window_bounds = array<i64: 32, 32>}, {pipeline_mode = #tpu.pipeline_mode<synchronous>, transform_indices = @transform_13, window_bounds = array<i64: 1, 32>}, {pipeline_mode = #tpu.pipeline_mode<synchronous>, transform_indices = @transform_14, window_bounds = array<i64: 32, 32>}, {pipeline_mode = #tpu.pipeline_mode<synchronous>, transform_indices = @transform_15, window_bounds = array<i64: 1, 32>}, {pipeline_mode = #tpu.pipeline_mode<synchronous>, transform_indices = @transform_16, window_bounds = array<i64: 1, 32>}, {pipeline_mode = #tpu.pipeline_mode<synchronous>, transform_indices = @transform_17, window_bounds = array<i64: 1, 32>}, {pipeline_mode = #tpu.pipeline_mode<synchronous>, transform_indices = @transform_18, window_bounds = array<i64: 32, 4>}, {pipeline_mode = #tpu.pipeline_mode<synchronous>, transform_indices = @transform_19, window_bounds = array<i64: 1, 4>}, {transform_indices = @transform_20, window_bounds = array<i64: 8, 32>}, {transform_indices = @transform_21, window_bounds = array<i64: 8, 4>}]} {
    %c0 = arith.constant 0 : index
    %c0_0 = arith.constant 0 : index
    %0 = vector.load %arg1[%c0, %c0_0] : memref<8x32xf32, #tpu.memory_space<vmem>>, vector<8x32xf32>
    %c0_1 = arith.constant 0 : index
    %c0_2 = arith.constant 0 : index
    %1 = vector.load %arg2[%c0_1, %c0_2] : memref<8x32xf32, #tpu.memory_space<vmem>>, vector<8x32xf32>
    %c0_3 = arith.constant 0 : index
    %c0_4 = arith.constant 0 : index
    %2 = vector.load %arg5[%c0_3, %c0_4] : memref<32x32xf32, #tpu.memory_space<vmem>>, vector<32x32xf32>
    %cst = arith.constant dense<0.000000e+00> : vector<8x32xf32>
    %3 = tpu.matmul %0, %2, %cst {dimension_numbers = #tpu.dot_dimension_numbers<[1], [0], [0], [1], [0, 0, 1, 1], [], []>} : vector<8x32xf32>, vector<32x32xf32>, vector<8x32xf32> -> vector<8x32xf32>
    %c0_5 = arith.constant 0 : index
    %c0_6 = arith.constant 0 : index
    %4 = vector.load %arg6[%c0_5, %c0_6] : memref<1x32xf32, #tpu.memory_space<vmem>>, vector<1x32xf32>
    %5 = vector.broadcast %4 : vector<1x32xf32> to vector<8x32xf32>
    %6 = arith.addf %3, %5 : vector<8x32xf32>
    %c0_7 = arith.constant 0 : index
    %c0_8 = arith.constant 0 : index
    %7 = vector.load %arg7[%c0_7, %c0_8] : memref<32x64xf32, #tpu.memory_space<vmem>>, vector<32x64xf32>
    %cst_9 = arith.constant dense<0.000000e+00> : vector<8x64xf32>
    %8 = tpu.matmul %1, %7, %cst_9 {dimension_numbers = #tpu.dot_dimension_numbers<[1], [0], [0], [1], [0, 0, 1, 1], [], []>} : vector<8x32xf32>, vector<32x64xf32>, vector<8x64xf32> -> vector<8x64xf32>
    %c0_10 = arith.constant 0 : index
    %c0_11 = arith.constant 0 : index
    %9 = vector.load %arg8[%c0_10, %c0_11] : memref<1x64xf32, #tpu.memory_space<vmem>>, vector<1x64xf32>
    %10 = vector.broadcast %9 : vector<1x64xf32> to vector<8x64xf32>
    %11 = arith.addf %8, %10 : vector<8x64xf32>
    %12 = vector.extract_strided_slice %11 {offsets = [0, 0], sizes = [8, 32], strides = [1, 1]} : vector<8x64xf32> to vector<8x32xf32>
    %13 = vector.extract_strided_slice %11 {offsets = [0, 32], sizes = [8, 32], strides = [1, 1]} : vector<8x64xf32> to vector<8x32xf32>
    %c0_12 = arith.constant 0 : index
    %c0_13 = arith.constant 0 : index
    %14 = vector.load %arg3[%c0_12, %c0_13] : memref<8x1xf32, #tpu.memory_space<vmem>>, vector<8x1xf32>
    %c0_14 = arith.constant 0 : index
    %c0_15 = arith.constant 0 : index
    %15 = vector.load %arg4[%c0_14, %c0_15] : memref<1x8xf32, #tpu.memory_space<vmem>>, vector<1x8xf32>
    %16 = vector.broadcast %14 : vector<8x1xf32> to vector<8x8xf32>
    %17 = vector.broadcast %15 : vector<1x8xf32> to vector<8x8xf32>
    %18 = arith.cmpf oeq, %16, %17 : vector<8x8xf32>
    %19 = vector.extract_strided_slice %6 {offsets = [0, 0], sizes = [8, 16], strides = [1, 1]} : vector<8x32xf32> to vector<8x16xf32>
    %20 = vector.extract_strided_slice %12 {offsets = [0, 0], sizes = [8, 16], strides = [1, 1]} : vector<8x32xf32> to vector<8x16xf32>
    %cst_16 = arith.constant dense<0.000000e+00> : vector<8x8xf32>
    %21 = tpu.matmul %19, %20, %cst_16 {dimension_numbers = #tpu.dot_dimension_numbers<[1], [1], [0], [0], [0, 0, 1, 0], [], []>} : vector<8x16xf32>, vector<8x16xf32>, vector<8x8xf32> -> vector<8x8xf32>
    %cst_17 = arith.constant 2.500000e-01 : f32
    %22 = vector.broadcast %cst_17 : f32 to vector<8x8xf32>
    %23 = arith.mulf %21, %22 : vector<8x8xf32>
    %cst_18 = arith.constant -1.000000e+30 : f32
    %24 = vector.broadcast %cst_18 : f32 to vector<8x8xf32>
    %25 = arith.select %18, %23, %24 : vector<8x8xi1>, vector<8x8xf32>
    %cst_19 = arith.constant dense<0xFF800000> : vector<8xf32>
    %26 = vector.multi_reduction <maximumf>, %25, %cst_19 [1] : vector<8x8xf32> to vector<8xf32>
    %27 = vector.shape_cast %26 : vector<8xf32> to vector<8x1xf32>
    %28 = vector.broadcast %27 : vector<8x1xf32> to vector<8x8xf32>
    %29 = arith.subf %25, %28 : vector<8x8xf32>
    %30 = math.exp %29 : vector<8x8xf32>
    %cst_20 = arith.constant dense<0.000000e+00> : vector<8xf32>
    %31 = vector.multi_reduction <add>, %30, %cst_20 [1] : vector<8x8xf32> to vector<8xf32>
    %32 = vector.shape_cast %31 : vector<8xf32> to vector<8x1xf32>
    %33 = tpu.reciprocal %32 {approx = true} : vector<8x1xf32> -> vector<8x1xf32>
    %34 = vector.broadcast %33 : vector<8x1xf32> to vector<8x8xf32>
    %35 = arith.mulf %30, %34 : vector<8x8xf32>
    %36 = vector.extract_strided_slice %13 {offsets = [0, 0], sizes = [8, 16], strides = [1, 1]} : vector<8x32xf32> to vector<8x16xf32>
    %cst_21 = arith.constant dense<0.000000e+00> : vector<8x16xf32>
    %37 = tpu.matmul %35, %36, %cst_21 {dimension_numbers = #tpu.dot_dimension_numbers<[1], [0], [0], [1], [0, 0, 1, 1], [], []>} : vector<8x8xf32>, vector<8x16xf32>, vector<8x16xf32> -> vector<8x16xf32>
    %38 = vector.extract_strided_slice %6 {offsets = [0, 16], sizes = [8, 16], strides = [1, 1]} : vector<8x32xf32> to vector<8x16xf32>
    %39 = vector.extract_strided_slice %12 {offsets = [0, 16], sizes = [8, 16], strides = [1, 1]} : vector<8x32xf32> to vector<8x16xf32>
    %cst_22 = arith.constant dense<0.000000e+00> : vector<8x8xf32>
    %40 = tpu.matmul %38, %39, %cst_22 {dimension_numbers = #tpu.dot_dimension_numbers<[1], [1], [0], [0], [0, 0, 1, 0], [], []>} : vector<8x16xf32>, vector<8x16xf32>, vector<8x8xf32> -> vector<8x8xf32>
    %cst_23 = arith.constant 2.500000e-01 : f32
    %41 = vector.broadcast %cst_23 : f32 to vector<8x8xf32>
    %42 = arith.mulf %40, %41 : vector<8x8xf32>
    %cst_24 = arith.constant -1.000000e+30 : f32
    %43 = vector.broadcast %cst_24 : f32 to vector<8x8xf32>
    %44 = arith.select %18, %42, %43 : vector<8x8xi1>, vector<8x8xf32>
    %cst_25 = arith.constant dense<0xFF800000> : vector<8xf32>
    %45 = vector.multi_reduction <maximumf>, %44, %cst_25 [1] : vector<8x8xf32> to vector<8xf32>
    %46 = vector.shape_cast %45 : vector<8xf32> to vector<8x1xf32>
    %47 = vector.broadcast %46 : vector<8x1xf32> to vector<8x8xf32>
    %48 = arith.subf %44, %47 : vector<8x8xf32>
    %49 = math.exp %48 : vector<8x8xf32>
    %cst_26 = arith.constant dense<0.000000e+00> : vector<8xf32>
    %50 = vector.multi_reduction <add>, %49, %cst_26 [1] : vector<8x8xf32> to vector<8xf32>
    %51 = vector.shape_cast %50 : vector<8xf32> to vector<8x1xf32>
    %52 = tpu.reciprocal %51 {approx = true} : vector<8x1xf32> -> vector<8x1xf32>
    %53 = vector.broadcast %52 : vector<8x1xf32> to vector<8x8xf32>
    %54 = arith.mulf %49, %53 : vector<8x8xf32>
    %55 = vector.extract_strided_slice %13 {offsets = [0, 16], sizes = [8, 16], strides = [1, 1]} : vector<8x32xf32> to vector<8x16xf32>
    %cst_27 = arith.constant dense<0.000000e+00> : vector<8x16xf32>
    %56 = tpu.matmul %54, %55, %cst_27 {dimension_numbers = #tpu.dot_dimension_numbers<[1], [0], [0], [1], [0, 0, 1, 1], [], []>} : vector<8x8xf32>, vector<8x16xf32>, vector<8x16xf32> -> vector<8x16xf32>
    %57 = tpu.concatenate %37, %56 in 1 : vector<8x16xf32>, vector<8x16xf32> -> vector<8x32xf32>
    %c0_28 = arith.constant 0 : index
    %c0_29 = arith.constant 0 : index
    %58 = vector.load %arg9[%c0_28, %c0_29] : memref<32x32xf32, #tpu.memory_space<vmem>>, vector<32x32xf32>
    %cst_30 = arith.constant dense<0.000000e+00> : vector<8x32xf32>
    %59 = tpu.matmul %57, %58, %cst_30 {dimension_numbers = #tpu.dot_dimension_numbers<[1], [0], [0], [1], [0, 0, 1, 1], [], []>} : vector<8x32xf32>, vector<32x32xf32>, vector<8x32xf32> -> vector<8x32xf32>
    %c0_31 = arith.constant 0 : index
    %c0_32 = arith.constant 0 : index
    %60 = vector.load %arg10[%c0_31, %c0_32] : memref<1x32xf32, #tpu.memory_space<vmem>>, vector<1x32xf32>
    %61 = vector.broadcast %60 : vector<1x32xf32> to vector<8x32xf32>
    %62 = arith.addf %59, %61 : vector<8x32xf32>
    %63 = arith.addf %62, %0 : vector<8x32xf32>
    %c0_33 = arith.constant 0 : index
    %c0_34 = arith.constant 0 : index
    %64 = vector.load %arg11[%c0_33, %c0_34] : memref<1x32xf32, #tpu.memory_space<vmem>>, vector<1x32xf32>
    %c0_35 = arith.constant 0 : index
    %c0_36 = arith.constant 0 : index
    %65 = vector.load %arg12[%c0_35, %c0_36] : memref<1x32xf32, #tpu.memory_space<vmem>>, vector<1x32xf32>
    %cst_37 = arith.constant dense<0.000000e+00> : vector<8xf32>
    %66 = vector.multi_reduction <add>, %63, %cst_37 [1] : vector<8x32xf32> to vector<8xf32>
    %67 = vector.shape_cast %66 : vector<8xf32> to vector<8x1xf32>
    %cst_38 = arith.constant 3.200000e+01 : f32
    %68 = vector.broadcast %cst_38 : f32 to vector<8x1xf32>
    %69 = arith.divf %67, %68 : vector<8x1xf32>
    %70 = vector.broadcast %69 : vector<8x1xf32> to vector<8x32xf32>
    %71 = arith.subf %63, %70 : vector<8x32xf32>
    %72 = arith.mulf %71, %71 : vector<8x32xf32>
    %cst_39 = arith.constant dense<0.000000e+00> : vector<8xf32>
    %73 = vector.multi_reduction <add>, %72, %cst_39 [1] : vector<8x32xf32> to vector<8xf32>
    %74 = vector.shape_cast %73 : vector<8xf32> to vector<8x1xf32>
    %cst_40 = arith.constant 3.200000e+01 : f32
    %75 = vector.broadcast %cst_40 : f32 to vector<8x1xf32>
    %76 = arith.divf %74, %75 : vector<8x1xf32>
    %77 = vector.broadcast %69 : vector<8x1xf32> to vector<8x32xf32>
    %78 = arith.subf %63, %77 : vector<8x32xf32>
    %cst_41 = arith.constant 9.99999974E-6 : f32
    %79 = vector.broadcast %cst_41 : f32 to vector<8x1xf32>
    %80 = arith.addf %76, %79 : vector<8x1xf32>
    %81 = math.rsqrt %80 : vector<8x1xf32>
    %82 = vector.broadcast %81 : vector<8x1xf32> to vector<8x32xf32>
    %83 = arith.mulf %78, %82 : vector<8x32xf32>
    %84 = vector.broadcast %64 : vector<1x32xf32> to vector<8x32xf32>
    %85 = arith.mulf %83, %84 : vector<8x32xf32>
    %86 = vector.broadcast %65 : vector<1x32xf32> to vector<8x32xf32>
    %87 = arith.addf %85, %86 : vector<8x32xf32>
    %c0_42 = arith.constant 0 : index
    %c0_43 = arith.constant 0 : index
    %88 = vector.load %arg13[%c0_42, %c0_43] : memref<32x32xf32, #tpu.memory_space<vmem>>, vector<32x32xf32>
    %cst_44 = arith.constant dense<0.000000e+00> : vector<8x32xf32>
    %89 = tpu.matmul %87, %88, %cst_44 {dimension_numbers = #tpu.dot_dimension_numbers<[1], [0], [0], [1], [0, 0, 1, 1], [], []>} : vector<8x32xf32>, vector<32x32xf32>, vector<8x32xf32> -> vector<8x32xf32>
    %c0_45 = arith.constant 0 : index
    %c0_46 = arith.constant 0 : index
    %90 = vector.load %arg14[%c0_45, %c0_46] : memref<1x32xf32, #tpu.memory_space<vmem>>, vector<1x32xf32>
    %91 = vector.broadcast %90 : vector<1x32xf32> to vector<8x32xf32>
    %92 = arith.addf %89, %91 : vector<8x32xf32>
    %cst_47 = arith.constant 0.707106769 : f32
    %93 = vector.broadcast %cst_47 : f32 to vector<8x32xf32>
    %94 = arith.mulf %92, %93 : vector<8x32xf32>
    %95 = math.absf %94 : vector<8x32xf32>
    %cst_48 = arith.constant 0.327591091 : f32
    %96 = vector.broadcast %cst_48 : f32 to vector<8x32xf32>
    %97 = arith.mulf %96, %95 : vector<8x32xf32>
    %cst_49 = arith.constant 1.000000e+00 : f32
    %98 = vector.broadcast %cst_49 : f32 to vector<8x32xf32>
    %99 = arith.addf %98, %97 : vector<8x32xf32>
    %cst_50 = arith.constant 1.000000e+00 : f32
    %100 = vector.broadcast %cst_50 : f32 to vector<8x32xf32>
    %101 = arith.divf %100, %99 : vector<8x32xf32>
    %cst_51 = arith.constant 1.06140542 : f32
    %102 = vector.broadcast %cst_51 : f32 to vector<8x32xf32>
    %103 = arith.mulf %102, %101 : vector<8x32xf32>
    %cst_52 = arith.constant 1.45315206 : f32
    %104 = vector.broadcast %cst_52 : f32 to vector<8x32xf32>
    %105 = arith.subf %103, %104 : vector<8x32xf32>
    %106 = arith.mulf %105, %101 : vector<8x32xf32>
    %cst_53 = arith.constant 1.42141378 : f32
    %107 = vector.broadcast %cst_53 : f32 to vector<8x32xf32>
    %108 = arith.addf %106, %107 : vector<8x32xf32>
    %109 = arith.mulf %108, %101 : vector<8x32xf32>
    %cst_54 = arith.constant 0.284496725 : f32
    %110 = vector.broadcast %cst_54 : f32 to vector<8x32xf32>
    %111 = arith.subf %109, %110 : vector<8x32xf32>
    %112 = arith.mulf %111, %101 : vector<8x32xf32>
    %cst_55 = arith.constant 0.254829586 : f32
    %113 = vector.broadcast %cst_55 : f32 to vector<8x32xf32>
    %114 = arith.addf %112, %113 : vector<8x32xf32>
    %115 = arith.mulf %114, %101 : vector<8x32xf32>
    %cst_56 = arith.constant 0.000000e+00 : f32
    %116 = vector.broadcast %cst_56 : f32 to vector<8x32xf32>
    %117 = arith.subf %116, %95 : vector<8x32xf32>
    %118 = arith.mulf %117, %95 : vector<8x32xf32>
    %119 = math.exp %118 : vector<8x32xf32>
    %120 = arith.mulf %115, %119 : vector<8x32xf32>
    %cst_57 = arith.constant 1.000000e+00 : f32
    %121 = vector.broadcast %cst_57 : f32 to vector<8x32xf32>
    %122 = arith.subf %121, %120 : vector<8x32xf32>
    %cst_58 = arith.constant 0.000000e+00 : f32
    %123 = vector.broadcast %cst_58 : f32 to vector<8x32xf32>
    %124 = arith.cmpf olt, %94, %123 : vector<8x32xf32>
    %cst_59 = arith.constant 0.000000e+00 : f32
    %125 = vector.broadcast %cst_59 : f32 to vector<8x32xf32>
    %126 = arith.subf %125, %122 : vector<8x32xf32>
    %127 = arith.select %124, %126, %122 : vector<8x32xi1>, vector<8x32xf32>
    %cst_60 = arith.constant 5.000000e-01 : f32
    %128 = vector.broadcast %cst_60 : f32 to vector<8x32xf32>
    %129 = arith.mulf %128, %92 : vector<8x32xf32>
    %cst_61 = arith.constant 1.000000e+00 : f32
    %130 = vector.broadcast %cst_61 : f32 to vector<8x32xf32>
    %131 = arith.addf %130, %127 : vector<8x32xf32>
    %132 = arith.mulf %129, %131 : vector<8x32xf32>
    %c0_62 = arith.constant 0 : index
    %c0_63 = arith.constant 0 : index
    %133 = vector.load %arg15[%c0_62, %c0_63] : memref<32x32xf32, #tpu.memory_space<vmem>>, vector<32x32xf32>
    %cst_64 = arith.constant dense<0.000000e+00> : vector<8x32xf32>
    %134 = tpu.matmul %132, %133, %cst_64 {dimension_numbers = #tpu.dot_dimension_numbers<[1], [0], [0], [1], [0, 0, 1, 1], [], []>} : vector<8x32xf32>, vector<32x32xf32>, vector<8x32xf32> -> vector<8x32xf32>
    %135 = arith.addf %87, %134 : vector<8x32xf32>
    %c0_65 = arith.constant 0 : index
    %c0_66 = arith.constant 0 : index
    %136 = vector.load %arg16[%c0_65, %c0_66] : memref<1x32xf32, #tpu.memory_space<vmem>>, vector<1x32xf32>
    %137 = vector.broadcast %136 : vector<1x32xf32> to vector<8x32xf32>
    %138 = arith.addf %135, %137 : vector<8x32xf32>
    %c0_67 = arith.constant 0 : index
    %c0_68 = arith.constant 0 : index
    %139 = vector.load %arg17[%c0_67, %c0_68] : memref<1x32xf32, #tpu.memory_space<vmem>>, vector<1x32xf32>
    %c0_69 = arith.constant 0 : index
    %c0_70 = arith.constant 0 : index
    %140 = vector.load %arg18[%c0_69, %c0_70] : memref<1x32xf32, #tpu.memory_space<vmem>>, vector<1x32xf32>
    %cst_71 = arith.constant dense<0.000000e+00> : vector<8xf32>
    %141 = vector.multi_reduction <add>, %138, %cst_71 [1] : vector<8x32xf32> to vector<8xf32>
    %142 = vector.shape_cast %141 : vector<8xf32> to vector<8x1xf32>
    %cst_72 = arith.constant 3.200000e+01 : f32
    %143 = vector.broadcast %cst_72 : f32 to vector<8x1xf32>
    %144 = arith.divf %142, %143 : vector<8x1xf32>
    %145 = vector.broadcast %144 : vector<8x1xf32> to vector<8x32xf32>
    %146 = arith.subf %138, %145 : vector<8x32xf32>
    %147 = arith.mulf %146, %146 : vector<8x32xf32>
    %cst_73 = arith.constant dense<0.000000e+00> : vector<8xf32>
    %148 = vector.multi_reduction <add>, %147, %cst_73 [1] : vector<8x32xf32> to vector<8xf32>
    %149 = vector.shape_cast %148 : vector<8xf32> to vector<8x1xf32>
    %cst_74 = arith.constant 3.200000e+01 : f32
    %150 = vector.broadcast %cst_74 : f32 to vector<8x1xf32>
    %151 = arith.divf %149, %150 : vector<8x1xf32>
    %152 = vector.broadcast %144 : vector<8x1xf32> to vector<8x32xf32>
    %153 = arith.subf %138, %152 : vector<8x32xf32>
    %cst_75 = arith.constant 9.99999974E-6 : f32
    %154 = vector.broadcast %cst_75 : f32 to vector<8x1xf32>
    %155 = arith.addf %151, %154 : vector<8x1xf32>
    %156 = math.rsqrt %155 : vector<8x1xf32>
    %157 = vector.broadcast %156 : vector<8x1xf32> to vector<8x32xf32>
    %158 = arith.mulf %153, %157 : vector<8x32xf32>
    %159 = vector.broadcast %139 : vector<1x32xf32> to vector<8x32xf32>
    %160 = arith.mulf %158, %159 : vector<8x32xf32>
    %161 = vector.broadcast %140 : vector<1x32xf32> to vector<8x32xf32>
    %162 = arith.addf %160, %161 : vector<8x32xf32>
    %c0_76 = arith.constant 0 : index
    %c0_77 = arith.constant 0 : index
    %163 = vector.load %arg21[%c0_76, %c0_77] : memref<8x32xf32, #tpu.memory_space<vmem>>, vector<8x32xf32>
    tpu.vector_store %arg21[%c0_76, %c0_77], %162 {strides = array<i32>} : memref<8x32xf32, #tpu.memory_space<vmem>>, vector<8x32xf32>,
    %c0_78 = arith.constant 0 : index
    %c0_79 = arith.constant 0 : index
    %164 = vector.load %arg19[%c0_78, %c0_79] : memref<32x4xf32, #tpu.memory_space<vmem>>, vector<32x4xf32>
    %cst_80 = arith.constant dense<0.000000e+00> : vector<8x4xf32>
    %165 = tpu.matmul %162, %164, %cst_80 {dimension_numbers = #tpu.dot_dimension_numbers<[1], [0], [0], [1], [0, 0, 1, 1], [], []>} : vector<8x32xf32>, vector<32x4xf32>, vector<8x4xf32> -> vector<8x4xf32>
    %c0_81 = arith.constant 0 : index
    %c0_82 = arith.constant 0 : index
    %166 = vector.load %arg20[%c0_81, %c0_82] : memref<1x4xf32, #tpu.memory_space<vmem>>, vector<1x4xf32>
    %167 = vector.broadcast %166 : vector<1x4xf32> to vector<8x4xf32>
    %168 = arith.addf %165, %167 : vector<8x4xf32>
    %c0_83 = arith.constant 0 : index
    %c0_84 = arith.constant 0 : index
    %169 = vector.load %arg22[%c0_83, %c0_84] : memref<8x4xf32, #tpu.memory_space<vmem>>, vector<8x4xf32>
    tpu.vector_store %arg22[%c0_83, %c0_84], %168 {strides = array<i32>} : memref<8x4xf32, #tpu.memory_space<vmem>>, vector<8x4xf32>,
    return
  }
  func.func @transform_0(%arg0: i32) -> (i32, i32) {
    %c0_i32 = arith.constant 0 : i32
    %c0_i32_0 = arith.constant 0 : i32
    return %arg0, %c0_i32 : i32, i32
  }
  func.func @transform_1(%arg0: i32) -> (i32, i32) {
    %c0_i32 = arith.constant 0 : i32
    %c0_i32_0 = arith.constant 0 : i32
    return %arg0, %c0_i32 : i32, i32
  }
  func.func @transform_2(%arg0: i32) -> (i32, i32) {
    %c0_i32 = arith.constant 0 : i32
    %c0_i32_0 = arith.constant 0 : i32
    %c0_i32_1 = arith.constant 0 : i32
    return %c0_i32, %c0_i32_0 : i32, i32
  }
  func.func @transform_3(%arg0: i32) -> (i32, i32) {
    %c0_i32 = arith.constant 0 : i32
    %c0_i32_0 = arith.constant 0 : i32
    %c0_i32_1 = arith.constant 0 : i32
    return %c0_i32, %c0_i32_0 : i32, i32
  }
  func.func @transform_4(%arg0: i32) -> (i32, i32) {
    %c0_i32 = arith.constant 0 : i32
    %c0_i32_0 = arith.constant 0 : i32
    %c0_i32_1 = arith.constant 0 : i32
    return %c0_i32, %c0_i32_0 : i32, i32
  }
  func.func @transform_5(%arg0: i32) -> (i32, i32) {
    %c0_i32 = arith.constant 0 : i32
    %c0_i32_0 = arith.constant 0 : i32
    %c0_i32_1 = arith.constant 0 : i32
    return %c0_i32, %c0_i32_0 : i32, i32
  }
  func.func @transform_6(%arg0: i32) -> (i32, i32) {
    %c0_i32 = arith.constant 0 : i32
    %c0_i32_0 = arith.constant 0 : i32
    %c0_i32_1 = arith.constant 0 : i32
    return %c0_i32, %c0_i32_0 : i32, i32
  }
  func.func @transform_7(%arg0: i32) -> (i32, i32) {
    %c0_i32 = arith.constant 0 : i32
    %c0_i32_0 = arith.constant 0 : i32
    %c0_i32_1 = arith.constant 0 : i32
    return %c0_i32, %c0_i32_0 : i32, i32
  }
  func.func @transform_8(%arg0: i32) -> (i32, i32) {
    %c0_i32 = arith.constant 0 : i32
    %c0_i32_0 = arith.constant 0 : i32
    %c0_i32_1 = arith.constant 0 : i32
    return %c0_i32, %c0_i32_0 : i32, i32
  }
  func.func @transform_9(%arg0: i32) -> (i32, i32) {
    %c0_i32 = arith.constant 0 : i32
    %c0_i32_0 = arith.constant 0 : i32
    %c0_i32_1 = arith.constant 0 : i32
    return %c0_i32, %c0_i32_0 : i32, i32
  }
  func.func @transform_10(%arg0: i32) -> (i32, i32) {
    %c0_i32 = arith.constant 0 : i32
    %c0_i32_0 = arith.constant 0 : i32
    %c0_i32_1 = arith.constant 0 : i32
    return %c0_i32, %c0_i32_0 : i32, i32
  }
  func.func @transform_11(%arg0: i32) -> (i32, i32) {
    %c0_i32 = arith.constant 0 : i32
    %c0_i32_0 = arith.constant 0 : i32
    %c0_i32_1 = arith.constant 0 : i32
    return %c0_i32, %c0_i32_0 : i32, i32
  }
  func.func @transform_12(%arg0: i32) -> (i32, i32) {
    %c0_i32 = arith.constant 0 : i32
    %c0_i32_0 = arith.constant 0 : i32
    %c0_i32_1 = arith.constant 0 : i32
    return %c0_i32, %c0_i32_0 : i32, i32
  }
  func.func @transform_13(%arg0: i32) -> (i32, i32) {
    %c0_i32 = arith.constant 0 : i32
    %c0_i32_0 = arith.constant 0 : i32
    %c0_i32_1 = arith.constant 0 : i32
    return %c0_i32, %c0_i32_0 : i32, i32
  }
  func.func @transform_14(%arg0: i32) -> (i32, i32) {
    %c0_i32 = arith.constant 0 : i32
    %c0_i32_0 = arith.constant 0 : i32
    %c0_i32_1 = arith.constant 0 : i32
    return %c0_i32, %c0_i32_0 : i32, i32
  }
  func.func @transform_15(%arg0: i32) -> (i32, i32) {
    %c0_i32 = arith.constant 0 : i32
    %c0_i32_0 = arith.constant 0 : i32
    %c0_i32_1 = arith.constant 0 : i32
    return %c0_i32, %c0_i32_0 : i32, i32
  }
  func.func @transform_16(%arg0: i32) -> (i32, i32) {
    %c0_i32 = arith.constant 0 : i32
    %c0_i32_0 = arith.constant 0 : i32
    %c0_i32_1 = arith.constant 0 : i32
    return %c0_i32, %c0_i32_0 : i32, i32
  }
  func.func @transform_17(%arg0: i32) -> (i32, i32) {
    %c0_i32 = arith.constant 0 : i32
    %c0_i32_0 = arith.constant 0 : i32
    %c0_i32_1 = arith.constant 0 : i32
    return %c0_i32, %c0_i32_0 : i32, i32
  }
  func.func @transform_18(%arg0: i32) -> (i32, i32) {
    %c0_i32 = arith.constant 0 : i32
    %c0_i32_0 = arith.constant 0 : i32
    %c0_i32_1 = arith.constant 0 : i32
    return %c0_i32, %c0_i32_0 : i32, i32
  }
  func.func @transform_19(%arg0: i32) -> (i32, i32) {
    %c0_i32 = arith.constant 0 : i32
    %c0_i32_0 = arith.constant 0 : i32
    %c0_i32_1 = arith.constant 0 : i32
    return %c0_i32, %c0_i32_0 : i32, i32
  }
  func.func @transform_20(%arg0: i32) -> (i32, i32) {
    %c0_i32 = arith.constant 0 : i32
    %c0_i32_0 = arith.constant 0 : i32
    return %arg0, %c0_i32 : i32, i32
  }
  func.func @transform_21(%arg0: i32) -> (i32, i32) {
    %c0_i32 = arith.constant 0 : i32
    %c0_i32_0 = arith.constant 0 : i32
    return %arg0, %c0_i32 : i32, i32
  }
}

</mosaic_0001>

<bundles_post_ra>
// kernel: crossformer_forward.29
= control target key start
LH: loop header
LB: loop body
LE: loop exit
PB: predicated region body
PF: predicated region fallthrough
CT: control target
= control target key end

     0   :  { %vm50_vm0 = vcmask 261120   ;;  %v958_v16 = vmov 0   ;;  %vm245_vm1 = vcmask 130048   ;;  %vm340_vm5 = vcmask 125952   ;;  %s961_s21 = smov 80   ;;  %s962_s29 = smov 16   ;;  %s1159_s6 = inlined_call_operand.vmem [shape: f32[32,64], index: 6, kind: input, shape index: {}]   ;;  %s1160_s1 = inlined_call_operand.vmem [shape: f32[16,32], index: 1, kind: input, shape index: {}]   ;;  %s1161_s4 = inlined_call_operand.vmem [shape: f32[32,32], index: 4, kind: input, shape index: {}]   ;;  %s1162_s0 = inlined_call_operand.vmem [shape: f32[12,32], index: 0, kind: input, shape index: {}]   ;;  %s1163_s2 = inlined_call_operand.vmem [shape: f32[12,1], index: 2, kind: input, shape index: {}]   ;;  %s1164_s7 = inlined_call_operand.vmem [shape: f32[1,64], index: 7, kind: input, shape index: {}]   ;;  %s1165_s5 = inlined_call_operand.vmem [shape: f32[1,32], index: 5, kind: input, shape index: {}]   ;;  %s1166_s3 = inlined_call_operand.vmem [shape: f32[1,16], index: 3, kind: input, shape index: {}]   ;;  %s1167_s8 = inlined_call_operand.vmem [shape: f32[32,32], index: 8, kind: input, shape index: {}]   ;;  %s1168_s9 = inlined_call_operand.vmem [shape: f32[1,32], index: 9, kind: input, shape index: {}]   ;;  %s1169_s10 = inlined_call_operand.vmem [shape: f32[12,32], index: 10, kind: output, shape index: {}]  }
   0x1   :  { %v132_v0 = vld [vmem:[%s1159_s6] sm:$0xff]  ;;  %v133_v1 = vld [vmem:[%s1159_s6 + $0x8] sm:$0xff]  ;;  %v134_v2 = vld [vmem:[%s1159_s6 + $0x10] sm:$0xff]  ;;  %926 = vset.pattern.permute.xlu0 %v958_v16  ;;  %vm754_vm6 = vcmask 257024  }
   0x2   :  { %v885_v3 = vpack.c.bf16 %v133_v1, %v132_v0  ;;  %v135_v4 = vld [vmem:[%s1159_s6 + $0x18] sm:$0xff]  ;;  %v37_v5 = vld [vmem:[%s1160_s1] sm:$0xff]  ;;  %v40_v8 = vld [vmem:[%s1161_s4 + $0x8] sm:$0xff] }
   0x3   :  { %v889_v6 = vpack.c.bf16 %v135_v4, %v134_v2  ;;  %835 = vmatprep.mubr.msk.f32.mxu1 %vm50_vm0, %v37_v5  ;;  %v39_v7 = vld [vmem:[%s1161_s4] sm:$0xff]  ;;  %v41_v9 = vld [vmem:[%s1161_s4 + $0x10] sm:$0xff]  ;;  %v42_v11 = vld [vmem:[%s1161_s4 + $0x18] sm:$0xff] }
   0x4   :  { %886 = vmatprep.subr.bf16.mxu1 %v885_v3  ;;  %v877_v10 = vpack.c.bf16 %v40_v8, %v39_v7  ;;  %v35_v12 = vld [vmem:[%s1162_s0] sm:$0xff]  ;;  %v881_v13 = vpack.c.bf16 %v42_v11, %v41_v9  ;;  %v38_v14 = vld [vmem:[%s1160_s1 + $0x8] sm:$0xff]  ;;  %vm1072_vm2 = vmpackc.low %vm245_vm1, %vm245_vm1 }
   0x5   :  { %888 = vmatpush3.bf16.msra.mxu1 %v885_v3  ;;  %824 = vmatprep.mubr.msk.f32.mxu0 %vm50_vm0, %v35_v12  ;;  %v36_v15 = vld [vmem:[%s1162_s0 + $0x8] sm:$0xf]  ;;  %v224_v17 = vld [vmem:[%s1163_s2] sm:$0xff] }
   0x6   :  { %890 = vmatprep.subr.bf16.mxu1 %v889_v6  ;;  %878 = vmatprep.subr.bf16.mxu0 %v877_v10  ;;  %v225_v18 = vld [vmem:[%s1163_s2 + $0x8] sm:$0xf]  ;;  %v763_v19 = vld [vmem:[%s1164_s7] ss:$0 sm:$0xff]  ;;  %s960_s7 = smov 112  }
   0x7   :  { %880 = vmatpush3.bf16.msra.mxu0 %v877_v10  ;;  %229 = vperm.xlu0 %926, %v224_v17   ;;  %v760_v23 = vld [vmem:[%s1165_s5] ss:$0 sm:$0xff] }
   0x8   :  { %882 = vmatprep.subr.bf16.mxu0 %v881_v13  ;;  %v1089_v33 = vld [vmem:[%s1166_s3] ss:$0 sm:$0xff]  ;;  %s959_s3 = smov 96  }
   0x9   :  { %892 = vmatpush3.bf16.msra.mxu1 %v889_v6 }
   0xb   :  { %884 = vmatpush3.bf16.msra.mxu0 %v881_v13  ;;  %234 = vperm.xlu0 %926, %v225_v18  }
   0xc   :  { %836 = vmatmul.mubr.msk.f32.vlgmr.msra.gmra.mrb[0].mxu1 %vm50_vm0, %v38_v14 }
   0xe   :  { %825 = vmatmul.mubr.msk.f32.vlgmr.msra.gmra.mrb[0].mxu0 %vm50_vm0, %v36_v15 }
  0x86   :  { %v1084_v32 = vpop.permute.xlu0 %229 }
  0x87   :  { %vm243_vm3 = vcmp.eq.f32.partialorder %v1084_v32, %v1089_v33 }
  0x8a   :  { %v1091_v35 = vpop.permute.xlu0 %234 }
  0x8b   :  { %vm244_vm4 = vcmp.eq.f32.partialorder %v1091_v35, %v1089_v33 }
  0xdf   :  { %v837_v20 = vpop.f32.mrb[0].mxu1 }
  0xe0   :  { %v221_v21 = vadd.f32 %v837_v20, %v763_v19  ;;  %v215_v22 = vpop.f32.mrb[1].mxu1 }
  0xe1   :  { %v216_v24 = vadd.f32 %v763_v19, %v215_v22  ;;  %v826_v25 = vpop.f32.mrb[0].mxu0 }
  0xe2   :  { %v123_v27 = vpop.f32.mrb[1].mxu0  ;;  %v129_v31 = vadd.f32 %v826_v25, %v760_v23 }
  0xe3   :  { %v893_v28 = vpack.c.bf16 %v221_v21, %v216_v24  ;;  %v124_v29 = vadd.f32 %v760_v23, %v123_v27  ;;  %v1076_v30 = vpack.i.bf16 %v221_v21, %v216_v24 }
  0xe5   :  { %895 = vmatprep.subr.msk.bf16.mxu0 %vm1072_vm2, %v893_v28  ;;  %842 = vmatprep.mubr.msk.f32.mxu0 %vm245_vm1, %v124_v29 }
  0xe6   :  { %898 = vmatpush3.bf16.xpose.msk.msra.mxu0 %vm1072_vm2, %v893_v28 }
  0xed   :  { %843 = vmatmul.mubr.msk.f32.vlgmr.msra.gmra.mrb[2].mxu0 %vm245_vm1, %v129_v31 }
 0x1c0   :  { %v844_v34 = vpop.f32.mrb[2].mxu0 }
 0x1c1   :  { %v324_v36 = vpop.f32.mrb[3].mxu0  ;;  %v334_v37 = vmul.f32 0.25, %v844_v34 }
 0x1c2   :  { %v333_v38 = vmul.f32 0.25, %v324_v36  ;;  %v662_v36 = vld [vmem:[%s1167_s8 + $0x8] sm:$0xff] }
 0x1c3   :  { %v336_v41 = vsel %vm244_vm4, %v334_v37, -1e+30 }
 0x1c4   :  { %v335_v39 = vsel %vm243_vm3, %v333_v38, -1e+30  ;;  %v341_v42 = vsel %vm340_vm5, %v336_v41, -inf  ;;  %v663_v38 = vld [vmem:[%s1167_s8 + $0x10] sm:$0xff] }
 0x1c5   :  { %v337_v40 = vsel %vm245_vm1, %v335_v39, -inf }
 0x1c6   :  { %338 = vmax.xlane.f32.xlu1 %v337_v40 }
 0x1ca   :  { %342 = vmax.xlane.f32.xlu1 %v341_v42 }
 0x253   :  { %v339_v43 = vpop.xlane.xlu1 %338 }
 0x254   :  { %v344_v44 = vsub.f32 %v335_v39, %v339_v43  ;;  %v664_v39 = vld [vmem:[%s1167_s8 + $0x18] sm:$0xff] }
 0x255   :  { %v917_v40 = vpack.c.bf16 %v664_v39, %v663_v38 }
 0x256   :  { %v346_v45 = vmul.f32 1.442695, %v344_v44 }
 0x257   :  { %v343_v46 = vpop.xlane.xlu1 %342 }
 0x258   :  { %942 = vpow2.f32 %v346_v45  ;;  %v345_v47 = vsub.f32 %v336_v41, %v343_v46 }
 0x25a   :  { %v348_v48 = vmul.f32 1.442695, %v345_v47  ;;  %v779_v47 = vld [vmem:[%s1168_s9] ss:$0 sm:$0xff] }
 0x25c   :  { %944 = vpow2.f32 %v348_v48 }
 0x262   :  { %v943_v49 = vpop.eup %942 }
 0x263   :  { %v350_v50 = vsel %vm245_vm1, %v943_v49, 0.0 }
 0x264   :  { %351 = vadd.xlane.f32.xlu0 %v350_v50 }
 0x266   :  { %v945_v51 = vpop.eup %944 }
 0x267   :  { %v353_v52 = vsel %vm340_vm5, %v945_v51, 0.0 }
 0x268   :  { %354 = vadd.xlane.f32.xlu1 %v353_v52 }
 0x279   :  { %928 = vrot.lane.b32.xlu1 %v1076_v30, %s959_s3 }
 0x27d   :  { %933 = vrot.lane.b32.xlu1 %v1076_v30, %s960_s7 }
 0x281   :  { %447 = vrot.lane.b32.xlu1 %v124_v29, %s960_s7 }
 0x285   :  { %449 = vrot.lane.b32.xlu1 %v129_v31, %s960_s7 }
 0x2f1   :  { %v352_v53 = vpop.xlane.xlu0 %351 }
 0x2f2   :  { %946 = vrcp.f32 %v352_v53 }
 0x2f5   :  { %v355_v54 = vpop.xlane.xlu1 %354 }
 0x2f6   :  { %948 = vrcp.f32 %v355_v54 }
 0x2f9   :  { %v929_v55 = vpop.permute.xlu1 %928 }
 0x2fa   :  { %v931_v56 = vunpack.i.h.bf16 %v929_v55  ;;  %v930_v57 = vunpack.i.l.bf16 %v929_v55 }
 0x2fc   :  { %v947_v58 = vpop.eup %946  ;;  %v899_v59 = vpack.c.bf16 %v931_v56, %v930_v57 }
 0x2fd   :  { %v934_v60 = vpop.permute.xlu1 %933  ;;  %v358_v61 = vmul.f32 %v947_v58, %v943_v49 }
 0x2fe   :  { %v936_v62 = vunpack.i.h.bf16 %v934_v60  ;;  %v935_v63 = vunpack.i.l.bf16 %v934_v60  ;;  %900 = vmatprep.subr.bf16.mxu1 %v899_v59 }
 0x2ff   :  { %902 = vmatpush3.bf16.msra.mxu1 %v899_v59  ;;  %849 = vmatprep.mubr.msk.f32.mxu1 %vm245_vm1, %v358_v61 }
 0x300   :  { %v949_v0 = vpop.eup %948  ;;  %v903_v1 = vpack.c.bf16 %v936_v62, %v935_v63 }
 0x301   :  { %v359_v2 = vmul.f32 %v949_v0, %v945_v51  ;;  %v448_v3 = vpop.permute.xlu1 %447 }
 0x302   :  { %905 = vmatprep.subr.msk.bf16.mxu1 %vm1072_vm2, %v903_v1 }
 0x303   :  { %850 = vmatmul.mubr.msk.f32.vlgmr.msra.gmra.mrb[2].mxu1 %vm245_vm1, %v359_v2 }
 0x304   :  { %856 = vmatprep.mubr.msk.f32.mxu1 %vm245_vm1, %v448_v3 }
 0x305   :  { %v450_v4 = vpop.permute.xlu1 %449 }
 0x308   :  { %908 = vmatpush3.bf16.xpose.msk.msra.mxu1 %vm1072_vm2, %v903_v1 }
 0x30f   :  { %857 = vmatmul.mubr.msk.f32.vlgmr.msra.gmra.mrb[4].mxu1 %vm245_vm1, %v450_v4 }
 0x3d6   :  { %v1117_v5 = vpop.f32.mrb[2].mxu1 }
 0x3d7   :  { %v438_v6 = vpop.f32.mrb[3].mxu1 }
 0x3e2   :  { %v858_v7 = vpop.f32.mrb[4].mxu1 }
 0x3e3   :  { %v539_v8 = vmul.f32 0.25, %v858_v7  ;;  %v529_v9 = vpop.f32.mrb[5].mxu1 }
 0x3e4   :  { %v538_v10 = vmul.f32 0.25, %v529_v9 }
 0x3e5   :  { %v541_v11 = vsel %vm244_vm4, %v539_v8, -1e+30 }
 0x3e6   :  { %v545_v12 = vsel %vm340_vm5, %v541_v11, -inf  ;;  %v540_v13 = vsel %vm243_vm3, %v538_v10, -1e+30 }
 0x3e7   :  { %546 = vmax.xlane.f32.xlu1 %v545_v12  ;;  %v542_v14 = vsel %vm245_vm1, %v540_v13, -inf }
 0x3e8   :  { %543 = vmax.xlane.f32.xlu0 %v542_v14 }
 0x474   :  { %v547_v15 = vpop.xlane.xlu1 %546 }
 0x475   :  { %v549_v16 = vsub.f32 %v541_v11, %v547_v15  ;;  %v544_v17 = vpop.xlane.xlu0 %543 }
 0x476   :  { %v548_v18 = vsub.f32 %v540_v13, %v544_v17 }
 0x477   :  { %v552_v19 = vmul.f32 1.442695, %v549_v16 }
 0x478   :  { %v550_v20 = vmul.f32 1.442695, %v548_v18 }
 0x479   :  { %950 = vpow2.f32 %v552_v19 }
 0x47a   :  { %952 = vpow2.f32 %v550_v20 }
 0x483   :  { %v951_v21 = vpop.eup %950 }
 0x484   :  { %v557_v22 = vsel %vm340_vm5, %v951_v21, 0.0  ;;  %v953_v23 = vpop.eup %952 }
 0x485   :  { %558 = vadd.xlane.f32.xlu0 %v557_v22  ;;  %v554_v24 = vsel %vm245_vm1, %v953_v23, 0.0 }
 0x489   :  { %555 = vadd.xlane.f32.xlu0 %v554_v24 }
 0x49f   :  { %938 = vrot.lane.b32.xlu0 %v1076_v30, %s961_s21  ;;  %v661_v30 = vld [vmem:[%s1167_s8] sm:$0xff] }
 0x4a0   :  { %v913_v37 = vpack.c.bf16 %v662_v36, %v661_v30 }
 0x4a2   :  { %914 = vmatprep.subr.bf16.mxu0 %v913_v37 }
 0x4a3   :  { %916 = vmatpush3.bf16.msra.mxu0 %v913_v37 }
 0x4a4   :  { %918 = vmatprep.subr.bf16.mxu0 %v917_v40 }
 0x4a7   :  { %920 = vmatpush3.bf16.msra.mxu0 %v917_v40 }
 0x512   :  { %v559_v25 = vpop.xlane.xlu0 %558 }
 0x513   :  { %954 = vrcp.f32 %v559_v25 }
 0x516   :  { %v556_v26 = vpop.xlane.xlu0 %555 }
 0x517   :  { %956 = vrcp.f32 %v556_v26 }
 0x51a   :  { %v939_v27 = vpop.permute.xlu0 %938 }
 0x51b   :  { %v941_v28 = vunpack.i.h.bf16 %v939_v27  ;;  %v940_v29 = vunpack.i.l.bf16 %v939_v27 }
 0x51d   :  { %v909_v31 = vpack.c.bf16 %v941_v28, %v940_v29  ;;  %v955_v32 = vpop.eup %954 }
 0x51e   :  { %v563_v35 = vmul.f32 %v955_v32, %v951_v21 }
 0x51f   :  { %910 = vmatprep.subr.bf16.mxu1 %v909_v31 }
 0x520   :  { %912 = vmatpush3.bf16.msra.mxu1 %v909_v31 }
 0x521   :  { %v957_v33 = vpop.eup %956 }
 0x522   :  { %v562_v34 = vmul.f32 %v957_v33, %v953_v23 }
 0x524   :  { %863 = vmatprep.mubr.msk.f32.mxu1 %vm245_vm1, %v562_v34 }
 0x525   :  { %864 = vmatmul.mubr.msk.f32.vlgmr.msra.gmra.mrb[6].mxu1 %vm245_vm1, %v563_v35 }
 0x5f8   :  { %v865_v41 = vpop.f32.mrb[6].mxu1 }
 0x5f9   :  { %v642_v42 = vpop.f32.mrb[7].mxu1 }
 0x5fa   :  { %653 = vrot.lane.b32.xlu0 %v642_v42, %s962_s29 }
 0x5fe   :  { %655 = vrot.lane.b32.xlu0 %v865_v41, %s962_s29 }
 0x66c   :  { %v654_v43 = vpop.permute.xlu0 %653 }
 0x66d   :  { %v659_v44 = vsel %vm245_vm1, %v438_v6, %v654_v43 }
 0x66e   :  { %874 = vmatprep.mubr.msk.f32.mxu0 %vm50_vm0, %v659_v44 }
 0x670   :  { %v656_v45 = vpop.permute.xlu0 %655 }
 0x671   :  { %v660_v46 = vsel %vm245_vm1, %v1117_v5, %v656_v45 }
 0x672   :  { %875 = vmatmul.mubr.msk.f32.vlgmr.msra.gmra.mrb[4].mxu0 %vm50_vm0, %v660_v46 }
 0x745   :  { %v876_v48 = vpop.f32.mrb[4].mxu0 }
 0x746   :  { %v750_v49 = vadd.f32 %v876_v48, %v779_v47  ;;  %v744_v50 = vpop.f32.mrb[5].mxu0 }
 0x747   :  { %v745_v51 = vadd.f32 %v779_v47, %v744_v50 }
 0x748   :  { %755 = vst.msk [vmem:[%s1169_s10 + $0x8] sm:$0xf] %vm754_vm6, %v750_v49 }
 0x749   :  { %753 = vst.msk [vmem:[%s1169_s10] sm:$0xff] %vm50_vm0, %v745_v51 }

// kernel: crossformer_forward.20
= control target key start
LH: loop header
LB: loop body
LE: loop exit
PB: predicated region body
PF: predicated region fallthrough
CT: control target
= control target key end

     0   :  { %s539_s21 = smov 0   ;;  %s587_s0 = inlined_call_operand.vmem [shape: f32[32,4], index: 0, kind: input, shape index: {}]   ;;  %s588_s1 = inlined_call_operand.vmem [shape: f32[4,32], index: 1, kind: input, shape index: {}]   ;;  %s589_s2 = inlined_call_operand.vmem [shape: f32[1,32], index: 2, kind: input, shape index: {}]   ;;  %s590_s3 = inlined_call_operand.vmem [shape: f32[16,32], index: 3, kind: input, shape index: {}]   ;;  %s591_s4 = inlined_call_operand.vmem [shape: f32[1,32], index: 4, kind: input, shape index: {}]   ;;  %s592_s5 = inlined_call_operand.vmem [shape: f32[1,32], index: 5, kind: input, shape index: {}]   ;;  %s593_s6 = inlined_call_operand.vmem [shape: f32[32,32], index: 6, kind: output, shape index: {}]  }
   0x1 LB: > { %s459_s22 = sadd.s32 4294967295, %s502_s21   ;;  %p463_p0 = scmp.ge.s32.totalorder %s502_s21, 1  ;;  %s502_s21 = sphi %s539_s21, %s16_s21  }
   0x2   : > { %p213_p1 = scmp.lt.s32.totalorder %s502_s21, 3 }
   0x4   : > { %p214_p2 = pnand %p463_p0, %p213_p1 }
   0x5   : > { %v257_v0 = vld [vmem:[%s588_s1] sm:$0xf] (!%p214_p2)  ;;  %vm272_vm0 = vcmask (!%p214_p2), 1043456   ;;  %s464_s25 = sshll.u32 (!%p214_p2), %s459_s22, 1  ;;  %vm265_vm1 = vcmask (!%p214_p2), 31744   ;;  %vm357_vm2 = vcmask (!%p214_p2), 261120  }
   0x6   : > { %217 = sbr.rel (%p214_p2) target bundleno = 553 (0x229), region = 44  ;;  %479 = vmatprep.subr.msk.mxu0 (!%p214_p2), %vm272_vm0, %v257_v0  ;;  %p244_p3 = scmp.lt.s32.totalorder (!%p214_p2), %s464_s25, 3  ;;  %v468_v3 = vld [vmem:[%s589_s2] ss:$0 sm:$0xff] (!%p214_p2)  ;;  %v352_v9 = vld [vmem:[%s590_s3 + $0x8] sm:$0xff] (!%p214_p2) }
   0x7   : > { %480 = vmatpush3.msk.msra.mxu0 (!%p214_p2), %vm272_vm0, %v257_v0  ;;  %v351_v6 = vld [vmem:[%s590_s3] sm:$0xff] (!%p214_p2) }
   0x8   : > { %v472_v31 = vld [vmem:[%s591_s4] ss:$0 sm:$0xff] (!%p214_p2) }
   0x9   : > { %v473_v33 = vld [vmem:[%s592_s5] ss:$0 sm:$0xff] (!%p214_p2) }
   0xd   : > { %s595_s25 = smov (!%p244_p3, %s464_s25), 3 }
   0xe   : > { %s465_s26 = sshll.u32 %s595_s25, 3 }
   0xf   : > { %s247_s29 = scalar_lea.vmem %s587_s0, %s465_s26  ;;  %s253_s18 = scalar_lea.vmem %s593_s6, %s465_s26 }
  0x10   : > { %v255_v1 = vld [vmem:[%s247_s29] sm:$0xff]  ;;  %v256_v2 = vld [vmem:[%s247_s29 + $0x8] sm:$0xff] }
  0x11   : > { %481 = vmatprep.mubr.msk.f32.mxu0 %vm265_vm1, %v255_v1 }
  0x12   : > { %482 = vmatmul.mubr.msk.f32.vlgmr.msra.gmra.mrb[0].mxu0 %vm265_vm1, %v256_v2 }
  0xe5   : > { %v483_v4 = vpop.f32.mrb[0].mxu0 }
  0xe6   : > { %v342_v5 = vpop.f32.mrb[1].mxu0  ;;  %v348_v7 = vadd.f32 %v483_v4, %v468_v3 }
  0xe7   : > { %v343_v8 = vadd.f32 %v468_v3, %v342_v5 }
  0xe8   : > { %v354_v12 = vadd.f32 %v352_v9, %v348_v7 }
  0xe9   : > { %v353_v10 = vadd.f32 %v351_v6, %v343_v8 }
  0xea   : > { %v361_v13 = vsel %vm357_vm2, %v354_v12, 0.0 }
  0xeb   : > { %v358_v11 = vsel %vm357_vm2, %v353_v10, 0.0 }
  0xec   : > { %359 = vadd.xlane.f32.xlu0 %v358_v11 }
  0xf0   : > { %362 = vadd.xlane.f32.xlu0 %v361_v13 }
 0x179   : > { %v360_v14 = vpop.xlane.xlu0 %359 }
 0x17a   : > { %v365_v15 = vmul.f32 0.03125, %v360_v14 }
 0x17c   : > { %v367_v16 = vsub.f32 %v353_v10, %v365_v15 }
 0x17d   : > { %v363_v17 = vpop.xlane.xlu0 %362 }
 0x17e   : > { %v366_v18 = vmul.f32 0.03125, %v363_v17  ;;  %v369_v19 = vmul.f32 %v367_v16, %v367_v16 }
 0x180   : > { %v368_v20 = vsub.f32 %v354_v12, %v366_v18  ;;  %v371_v21 = vsel %vm357_vm2, %v369_v19, 0.0 }
 0x181   : > { %372 = vadd.xlane.f32.xlu1 %v371_v21 }
 0x182   : > { %v370_v22 = vmul.f32 %v368_v20, %v368_v20 }
 0x184   : > { %v374_v23 = vsel %vm357_vm2, %v370_v22, 0.0 }
 0x185   : > { %375 = vadd.xlane.f32.xlu1 %v374_v23 }
 0x20e   : > { %v373_v24 = vpop.xlane.xlu1 %372 }
 0x20f   : > { %v377_v25 = vmul.f32 0.03125, %v373_v24 }
 0x211   : > { %v379_v26 = vadd.f32 1e-05, %v377_v25 }
 0x212   : > { %v376_v27 = vpop.xlane.xlu1 %375 }
 0x213   : > { %492 = vrsqrt.f32 %v379_v26  ;;  %v378_v28 = vmul.f32 0.03125, %v376_v27 }
 0x215   : > { %v380_v29 = vadd.f32 1e-05, %v378_v28 }
 0x217   : > { %494 = vrsqrt.f32 %v380_v29 }
 0x21d   : > { %v493_v30 = vpop.eup %492 }
 0x21e   : > { %v383_v32 = vmul.f32 %v493_v30, %v367_v16 }
 0x220   : > { %v391_v34 = vmul.f32 %v472_v31, %v383_v32 }
 0x221   : > { %v495_v35 = vpop.eup %494 }
 0x222   : > { %v399_v36 = vadd.f32 %v473_v33, %v391_v34  ;;  %v384_v37 = vmul.f32 %v495_v35, %v368_v20 }
 0x224   : > { %401 = vst.msk [vmem:[%s253_s18] sm:$0xff] %vm357_vm2, %v399_v36  ;;  %v392_v38 = vmul.f32 %v472_v31, %v384_v37 }
 0x226   : > { %v400_v39 = vadd.f32 %v473_v33, %v392_v38 }
 0x228   : > { %402 = vst.msk [vmem:[%s253_s18 + $0x8] sm:$0xff] %vm357_vm2, %v400_v39 }
 0x229 PF: > { %s16_s21 = sadd.s32 1, %s502_s21  }
 0x22a   : > { %p13_p4 = scmp.ge.s32.totalorder %s16_s21, 4  }
 0x22c   :  { %15 = sbr.rel (!%p13_p4) target bundleno = 1 (0x1), region = 74 }

// kernel: crossformer_forward.28
= control target key start
LH: loop header
LB: loop body
LE: loop exit
PB: predicated region body
PF: predicated region fallthrough
CT: control target
= control target key end

     0   :  { %s1858_s27 = smov 0   ;;  %s2046_s0 = inlined_call_operand.vmem [shape: f32[16,32], index: 0, kind: input, shape index: {}, may-alias: {0,1}]   ;;  %s2047_s1 = inlined_call_operand.vmem [shape: f32[16,32], index: 1, kind: input, shape index: {}, may-alias: {0,1}]   ;;  %s2048_s2 = inlined_call_operand.vmem [shape: f32[8,1], index: 2, kind: input, shape index: {}]   ;;  %s2049_s3 = inlined_call_operand.vmem [shape: f32[1,8], index: 3, kind: input, shape index: {}]   ;;  %s2050_s4 = inlined_call_operand.vmem [shape: f32[32,32], index: 4, kind: input, shape index: {}]   ;;  %s2051_s5 = inlined_call_operand.vmem [shape: f32[1,32], index: 5, kind: input, shape index: {}]   ;;  %s2052_s6 = inlined_call_operand.vmem [shape: f32[32,64], index: 6, kind: input, shape index: {}]   ;;  %s2053_s7 = inlined_call_operand.vmem [shape: f32[1,64], index: 7, kind: input, shape index: {}]   ;;  %s2054_s8 = inlined_call_operand.vmem [shape: f32[32,32], index: 8, kind: input, shape index: {}]   ;;  %s2055_s9 = inlined_call_operand.vmem [shape: f32[1,32], index: 9, kind: input, shape index: {}]   ;;  %s2056_s10 = inlined_call_operand.vmem [shape: f32[1,32], index: 10, kind: input, shape index: {}]   ;;  %s2057_s11 = inlined_call_operand.vmem [shape: f32[1,32], index: 11, kind: input, shape index: {}]   ;;  %s2058_s12 = inlined_call_operand.vmem [shape: f32[32,64], index: 12, kind: input, shape index: {}]   ;;  %s2059_s13 = inlined_call_operand.vmem [shape: f32[1,64], index: 13, kind: input, shape index: {}]   ;;  %s2060_s14 = inlined_call_operand.vmem [shape: f32[64,32], index: 14, kind: input, shape index: {}]   ;;  %s2061_s15 = inlined_call_operand.vmem [shape: f32[1,32], index: 15, kind: input, shape index: {}]   ;;  %s2062_s16 = inlined_call_operand.vmem [shape: f32[1,32], index: 16, kind: input, shape index: {}]   ;;  %s2063_s17 = inlined_call_operand.vmem [shape: f32[1,32], index: 17, kind: input, shape index: {}]   ;;  %s2064_s18 = inlined_call_operand.vmem [shape: f32[16,32], index: 18, kind: output, shape index: {}]  }
   0x1   :  { %2065 = sst [smem:[#allocation2_spill]] %s2046_s0 }
   0x2   :  { %2066 = sst [smem:[#allocation3_spill]] %s2047_s1 }
   0x3   :  { %2067 = sst [smem:[#allocation4_spill]] %s2048_s2 }
   0x4 LB: > { %s1524_s28 = sadd.s32 4294967295, %s1753_s27   ;;  %p1528_p0 = scmp.ge.s32.totalorder %s1753_s27, 1  ;;  %s1753_s27 = sphi %s1858_s27, %s28_s27  }
   0x5   : > { %p520_p1 = scmp.lt.s32.totalorder %s1753_s27, 3 }
   0x7   : > { %p521_p2 = pnand %p1528_p0, %p520_p1 }
   0x8   : > { %v590_v0 = vld [vmem:[%s2050_s4] sm:$0xff] (!%p521_p2)  ;;  %v591_v1 = vld [vmem:[%s2050_s4 + $0x8] sm:$0xff] (!%p521_p2)  ;;  %v592_v2 = vld [vmem:[%s2050_s4 + $0x10] sm:$0xff] (!%p521_p2)  ;;  %v1755_v3 = vmov (!%p521_p2), 0.0|0.0   ;;  %vm1756_vm0 = vmmov (!%p521_p2), 0   ;;  %v1757_v6 = vmov (!%p521_p2), 0.0  }
   0x9   : > { %524 = sbr.rel (%p521_p2) target bundleno = 2539 (0x9eb), region = 92  ;;  %1677 = vmatprep.subr.bf16.mxu1 (!%p521_p2), %v1755_v3  ;;  %v1678_v4 = vpack.c.bf16 (!%p521_p2), %v591_v1, %v590_v0  ;;  %v593_v5 = vld [vmem:[%s2050_s4 + $0x18] sm:$0xff] (!%p521_p2)  ;;  %1602 = vmatprep.mubr.msk.f32.mxu1 (!%p521_p2), %vm1756_vm0, %v1757_v6  ;;  %p576_p3 = scmp.lt.s32.totalorder (!%p521_p2), %s1524_s28, 1  ;;  %v675_v8 = vld [vmem:[%s2052_s6] sm:$0xff] (!%p521_p2)  ;;  %v676_v9 = vld [vmem:[%s2052_s6 + $0x8] sm:$0xff] (!%p521_p2)  ;;  %vm601_vm1 = vcmask (!%p521_p2), 261120  }
   0xa   : > { %1616 = vmatprep.subr.mxu0 (!%p521_p2), %v1757_v6  ;;  %1618 = vmatprep.mubr.msk.f32.mxu0 (!%p521_p2), %vm1756_vm0, %v1757_v6  ;;  %v1681_v7 = vpack.c.bf16 (!%p521_p2), %v593_v5, %v592_v2  ;;  %s2068_s0 = sld [smem:[#allocation2_spill]] (!%p521_p2)  ;;  %v1684_v11 = vpack.c.bf16 (!%p521_p2), %v676_v9, %v675_v8  ;;  %v677_v12 = vld [vmem:[%s2052_s6 + $0x10] sm:$0xff] (!%p521_p2)  ;;  %v678_v13 = vld [vmem:[%s2052_s6 + $0x18] sm:$0xff] (!%p521_p2)  ;;  %s2069_s23 = sld [smem:[#allocation3_spill]] (!%p521_p2)  ;;  %v1758_v17 = vmov (!%p521_p2), 0   ;;  %vm773_vm2 = vcmask (!%p521_p2), 130048  }
   0xb   : > { %1679 = vmatpush3.bf16.msra.mxu1 (!%p521_p2), %v1678_v4  ;;  %v1687_v14 = vpack.c.bf16 (!%p521_p2), %v678_v13, %v677_v12  ;;  %s2070_s30 = sld [smem:[#allocation4_spill]] (!%p521_p2)  ;;  %1729 = vset.pattern.permute.xlu1 (!%p521_p2), %v1758_v17  ;;  %v1534_v20 = vld [vmem:[%s2053_s7] ss:$0 sm:$0xff] (!%p521_p2)  ;;  %s1759_s21 = smov (!%p521_p2), 112   ;;  %vm852_vm4 = vcmask (!%p521_p2), 64512   ;;  %v1113_v59 = vld [vmem:[%s2054_s8 + $0x8] sm:$0xff] (!%p521_p2) }
   0xc   : > { %1680 = vmatprep.subr.bf16.mxu1 (!%p521_p2), %v1755_v3  ;;  %1730 = vset.pattern.permute.xlu0 (!%p521_p2), %v1758_v17  ;;  %v1532_v22 = vld [vmem:[%s2051_s5] ss:$0 sm:$0xff] (!%p521_p2)  ;;  %s1760_s2 = smov (!%p521_p2), 96   ;;  %v1114_v60 = vld [vmem:[%s2054_s8 + $0x10] sm:$0xff] (!%p521_p2)  ;;  %v1115_v62 = vld [vmem:[%s2054_s8 + $0x18] sm:$0xff] (!%p521_p2)  ;;  %vm1346_vm6 = vcmask (!%p521_p2), 523264  }
   0xd   : > { %v1536_v28 = vld [vmem:[%s2049_s3] ss:$0 sm:$0xff] (!%p521_p2)  ;;  %v1693_v63 = vpack.c.bf16 (!%p521_p2), %v1115_v62, %v1114_v60 }
   0xe   : > { %v1112_v58 = vld [vmem:[%s2054_s8] sm:$0xff] (!%p521_p2) }
   0xf   : > { %1682 = vmatpush3.bf16.msra.mxu1 (!%p521_p2), %v1681_v7  ;;  %v1690_v61 = vpack.c.bf16 (!%p521_p2), %v1113_v59, %v1112_v58  ;;  %v1543_v8 = vld [vmem:[%s2055_s9] ss:$0 sm:$0xff] (!%p521_p2) }
  0x10   : > { %s2072_s28 = smov (!%p576_p3, %s1524_s28), 1  ;;  %1683 = vmatprep.subr.bf16.mxu1 %v1755_v3 }
  0x11   : > { %s1891_s26 = sshll.u32 %s2072_s28, 3  ;;  %v759_v16 = vld [vmem:[%s2070_s30] sm:$0xff] }
  0x12   : > { %s579_s19 = scalar_lea.vmem %s2068_s0, %s1891_s26  ;;  %s583_s24 = scalar_lea.vmem %s2069_s23, %s1891_s26  ;;  %763 = vperm.xlu1 %1729, %v759_v16  }
  0x13   : > { %v1897_v10 = vld [vmem:[%s579_s19] sm:$0xff]  ;;  %s1761_s23 = smov 80   ;;  %s587_s22 = scalar_lea.vmem %s2064_s18, %s1891_s26 }
  0x14   : > { %1603 = vmatmul.mubr.msk.f32.vlgmr.msra.gmra.mrb[0].mxu1 %vm601_vm1, %v1897_v10  ;;  %v589_v15 = vld [vmem:[%s583_s24] sm:$0xff] }
  0x15   : > { %1685 = vmatpush3.bf16.msra.mxu1 %v1684_v11  ;;  %1613 = vmatprep.mubr.msk.f32.mxu1 %vm1756_vm0, %v1757_v6 }
  0x16   : > { %1686 = vmatprep.subr.bf16.mxu1 %v1755_v3 }
  0x19   : > { %1688 = vmatpush3.bf16.msra.mxu1 %v1687_v14 }
  0x1a   : > { %1621 = vmatprep.subr.mxu1 %v1757_v6 }
  0x1c   : > { %1614 = vmatmul.mubr.msk.f32.vlgmr.msra.gmra.mrb[2].mxu1 %vm601_vm1, %v589_v15 }
  0x1d   : > { %1623 = vmatprep.mubr.msk.f32.mxu1 %vm1756_vm0, %v1757_v6 }
  0x91   : > { %v764_v29 = vpop.permute.xlu1 %763 }
  0x92   : > { %vm772_vm3 = vcmp.eq.f32.partialorder %v764_v29, %v1536_v28  ;;  %v1545_v28 = vld [vmem:[%s2056_s10] ss:$0 sm:$0xff] }
  0xe7   : > { %v671_v18 = vpop.f32.mrb[0].mxu1 }
  0xe8   : > { %v1604_v19 = vpop.f32.mrb[1].mxu1  ;;  %v672_v25 = vadd.f32 %v1532_v22, %v671_v18  ;;  %v1230_v22 = vld [vmem:[%s2058_s12 + $0x18] sm:$0xff] }
  0xef   : > { %v755_v21 = vpop.f32.mrb[2].mxu1 }
  0xf0   : > { %v756_v23 = vadd.f32 %v1534_v20, %v755_v21  ;;  %v1615_v24 = vpop.f32.mrb[3].mxu1  ;;  %v1228_v20 = vld [vmem:[%s2058_s12 + $0x8] sm:$0xff] }
  0xf2   : > { %942 = vrot.lane.b32.xlu0 %v756_v23, %s1759_s21  ;;  %1617 = vmatpush3.xpose.msk.msra.mxu0 %vm773_vm2, %v756_v23 }
  0xf3   : > { %1626 = vmatprep.subr.mxu0 %v1757_v6 }
  0xf5   : > { %1619 = vmatmul.mubr.msk.f32.vlgmr.msra.gmra.mrb[0].mxu0 %vm773_vm2, %v672_v25 }
  0xf6   : > { %940 = vrot.lane.b32.xlu0 %v672_v25, %s1759_s21  ;;  %1628 = vmatprep.mubr.msk.f32.mxu0 %vm1756_vm0, %v1757_v6  ;;  %s1762_s21 = smov 16  }
 0x164   : > { %v943_v26 = vpop.permute.xlu0 %942 }
 0x165   : > { %1627 = vmatpush3.xpose.msk.msra.mxu0 %vm773_vm2, %v943_v26 }
 0x166   : > { %1689 = vmatprep.subr.bf16.mxu0 %v1755_v3 }
 0x168   : > { %v941_v27 = vpop.permute.xlu0 %940 }
 0x169   : > { %1629 = vmatmul.mubr.msk.f32.vlgmr.msra.gmra.mrb[2].mxu0 %vm773_vm2, %v941_v27 }
 0x16a   : > { %1644 = vmatprep.mubr.msk.f32.mxu0 %vm1756_vm0, %v1757_v6  ;;  %1691 = vmatpush3.bf16.msra.mxu0 %v1690_v61 }
 0x16b   : > { %1692 = vmatprep.subr.bf16.mxu0 %v1755_v3 }
 0x16e   : > { %1694 = vmatpush3.bf16.msra.mxu0 %v1693_v63 }
 0x16f   : > { %1701 = vmatprep.subr.bf16.mxu0 %v1755_v3 }
 0x1c8   : > { %v846_v30 = vpop.f32.mrb[0].mxu0 }
 0x1c9   : > { %v850_v31 = vmul.f32 0.25, %v846_v30  ;;  %v1620_v32 = vpop.f32.mrb[1].mxu0  ;;  %v1546_v30 = vld [vmem:[%s2057_s11] ss:$0 sm:$0xff] }
 0x1cb   : > { %v851_v33 = vsel %vm772_vm3, %v850_v31, -1e+30 }
 0x1cc   : > { %v853_v34 = vsel %vm852_vm4, %v851_v33, -inf }
 0x1cd   : > { %854 = vmax.xlane.f32.xlu1 %v853_v34  ;;  %v1339_v34 = vld [vmem:[%s2060_s14 + $0x8] sm:$0xff] }
 0x23c   : > { %v1014_v35 = vpop.f32.mrb[2].mxu0 }
 0x23d   : > { %v1018_v36 = vmul.f32 0.25, %v1014_v35  ;;  %v1630_v37 = vpop.f32.mrb[3].mxu0 }
 0x23e   : > { %v1341_v37 = vld [vmem:[%s2060_s14 + $0x18] sm:$0xff] }
 0x23f   : > { %v1019_v38 = vsel %vm772_vm3, %v1018_v36, -1e+30  ;;  %v1340_v36 = vld [vmem:[%s2060_s14 + $0x10] sm:$0xff] }
 0x240   : > { %v1020_v39 = vsel %vm852_vm4, %v1019_v38, -inf }
 0x241   : > { %1021 = vmax.xlane.f32.xlu0 %v1020_v39  ;;  %v1342_v39 = vld [vmem:[%s2060_s14 + $0x20] sm:$0xff] }
 0x25a   : > { %v855_v40 = vpop.xlane.xlu1 %854 }
 0x25b   : > { %v856_v41 = vsub.f32 %v851_v33, %v855_v40  ;;  %v1338_v33 = vld [vmem:[%s2060_s14] sm:$0xff]  ;;  %v1343_v40 = vld [vmem:[%s2060_s14 + $0x28] sm:$0xff] }
 0x25c   : > { %v1702_v35 = vpack.c.bf16 %v1339_v34, %v1338_v33 }
 0x25d   : > { %v857_v42 = vmul.f32 1.442695, %v856_v41  ;;  %v1708_v41 = vpack.c.bf16 %v1343_v40, %v1342_v39 }
 0x25f   : > { %1731 = vpow2.f32 %v857_v42  ;;  %v1344_v42 = vld [vmem:[%s2060_s14 + $0x30] sm:$0xff] }
 0x269   : > { %v1732_v43 = vpop.eup %1731 }
 0x26a   : > { %v859_v44 = vsel %vm852_vm4, %v1732_v43, 0.0 }
 0x26b   : > { %860 = vadd.xlane.f32.xlu0 %v859_v44 }
 0x281   : > { %864 = vrot.lane.b32.xlu0 %v756_v23, %s1760_s2 }
 0x2ce   : > { %v1022_v45 = vpop.xlane.xlu0 %1021 }
 0x2cf   : > { %v1023_v46 = vsub.f32 %v1019_v38, %v1022_v45  ;;  %v1705_v38 = vpack.c.bf16 %v1341_v37, %v1340_v36  ;;  %v1547_v45 = vld [vmem:[%s2059_s13] ss:$0 sm:$0xff] }
 0x2d1   : > { %v1024_v47 = vmul.f32 1.442695, %v1023_v46 }
 0x2d3   : > { %1733 = vpow2.f32 %v1024_v47 }
 0x2dd   : > { %v1734_v48 = vpop.eup %1733 }
 0x2de   : > { %v1026_v49 = vsel %vm852_vm4, %v1734_v48, 0.0 }
 0x2df   : > { %1027 = vadd.xlane.f32.xlu1 %v1026_v49 }
 0x2f0   : > { %1031 = vrot.lane.b32.xlu1 %v756_v23, %s1761_s23 }
 0x2f8   : > { %v861_v50 = vpop.xlane.xlu0 %860 }
 0x2f9   : > { %1735 = vrcp.f32 %v861_v50 }
 0x2fc   : > { %v865_v51 = vpop.permute.xlu0 %864 }
 0x2fd   : > { %1622 = vmatpush3.msra.mxu1 %v865_v51 }
 0x2fe   : > { %1631 = vmatprep.subr.mxu1 %v1757_v6 }
 0x303   : > { %v1736_v52 = vpop.eup %1735 }
 0x304   : > { %v863_v53 = vmul.f32 %v1736_v52, %v1732_v43  ;;  %v1345_v43 = vld [vmem:[%s2060_s14 + $0x38] sm:$0xff] }
 0x305   : > { %v1711_v44 = vpack.c.bf16 %v1345_v43, %v1344_v42 }
 0x306   : > { %1624 = vmatmul.mubr.msk.f32.vlgmr.msra.gmra.mrb[4].mxu1 %vm852_vm4, %v863_v53 }
 0x307   : > { %1633 = vmatprep.mubr.msk.f32.mxu1 %vm1756_vm0, %v1757_v6 }
 0x36c   : > { %v1028_v54 = vpop.xlane.xlu1 %1027 }
 0x36d   : > { %1737 = vrcp.f32 %v1028_v54 }
 0x370   : > { %v1032_v55 = vpop.permute.xlu1 %1031 }
 0x371   : > { %1632 = vmatpush3.msra.mxu1 %v1032_v55 }
 0x372   : > { %1695 = vmatprep.subr.bf16.mxu1 %v1755_v3 }
 0x377   : > { %v1738_v56 = vpop.eup %1737 }
 0x378   : > { %v1030_v57 = vmul.f32 %v1738_v56, %v1734_v48 }
 0x37a   : > { %1634 = vmatmul.mubr.msk.f32.vlgmr.msra.gmra.mrb[6].mxu1 %vm852_vm4, %v1030_v57 }
 0x37b   : > { %1655 = vmatprep.mubr.msk.f32.mxu1 %vm1756_vm0, %v1757_v6 }
 0x3d9   : > { %v936_v0 = vpop.f32.mrb[4].mxu1 }
 0x3da   : > { %v1625_v1 = vpop.f32.mrb[5].mxu1 }
 0x44d   : > { %v1103_v2 = vpop.f32.mrb[6].mxu1 }
 0x44e   : > { %1108 = vrot.lane.b32.xlu1 %v1103_v2, %s1762_s21  ;;  %v1635_v4 = vpop.f32.mrb[7].mxu1 }
 0x4c0   : > { %v1109_v5 = vpop.permute.xlu1 %1108 }
 0x4c1   : > { %v1111_v7 = vsel %vm773_vm2, %v936_v0, %v1109_v5 }
 0x4c2   : > { %1645 = vmatmul.mubr.msk.f32.vlgmr.msra.gmra.mrb[4].mxu0 %vm601_vm1, %v1111_v7 }
 0x4c3   : > { %1674 = vmatprep.mubr.msk.f32.mxu0 %vm1756_vm0, %v1757_v6  ;;  %v1227_v6 = vld [vmem:[%s2058_s12] sm:$0xff]  ;;  %1703 = vmatpush3.bf16.msra.mxu0 %v1702_v35 }
 0x4c4   : > { %v1696_v21 = vpack.c.bf16 %v1228_v20, %v1227_v6  ;;  %1704 = vmatprep.subr.bf16.mxu0 %v1755_v3 }
 0x4c6   : > { %1697 = vmatpush3.bf16.msra.mxu1 %v1696_v21 }
 0x4c7   : > { %1698 = vmatprep.subr.bf16.mxu1 %v1755_v3  ;;  %1706 = vmatpush3.bf16.msra.mxu0 %v1705_v38 }
 0x4c8   : > { %1707 = vmatprep.subr.bf16.mxu0 %v1755_v3 }
 0x4cb   : > { %1709 = vmatpush3.bf16.msra.mxu0 %v1708_v41 }
 0x4cc   : > { %1710 = vmatprep.subr.bf16.mxu0 %v1755_v3 }
 0x4cf   : > { %1712 = vmatpush3.bf16.msra.mxu0 %v1711_v44 }
 0x595   : > { %v1192_v9 = vpop.f32.mrb[4].mxu0 }
 0x596   : > { %v1193_v11 = vadd.f32 %v1543_v8, %v1192_v9  ;;  %v1646_v12 = vpop.f32.mrb[5].mxu0 }
 0x598   : > { %v1196_v13 = vadd.f32 %v1193_v11, %v1897_v10  ;;  %v1229_v10 = vld [vmem:[%s2058_s12 + $0x10] sm:$0xff] }
 0x599   : > { %v1699_v23 = vpack.c.bf16 %v1230_v22, %v1229_v10 }
 0x59a   : > { %v1199_v14 = vsel %vm601_vm1, %v1196_v13, 0.0 }
 0x59b   : > { %1200 = vadd.xlane.f32.xlu0 %v1199_v14  ;;  %1700 = vmatpush3.bf16.msra.mxu1 %v1699_v23 }
 0x628   : > { %v1201_v15 = vpop.xlane.xlu0 %1200 }
 0x629   : > { %v1203_v16 = vmul.f32 0.03125, %v1201_v15 }
 0x62b   : > { %v1204_v17 = vsub.f32 %v1196_v13, %v1203_v16  ;;  %v1552_v13 = vld [vmem:[%s2061_s15] ss:$0 sm:$0xff] }
 0x62d   : > { %v1205_v18 = vmul.f32 %v1204_v17, %v1204_v17 }
 0x62f   : > { %v1206_v19 = vsel %vm601_vm1, %v1205_v18, 0.0 }
 0x630   : > { %1207 = vadd.xlane.f32.xlu1 %v1206_v19 }
 0x6bd   : > { %v1208_v24 = vpop.xlane.xlu1 %1207 }
 0x6be   : > { %v1209_v25 = vmul.f32 0.03125, %v1208_v24 }
 0x6c0   : > { %v1210_v26 = vadd.f32 1e-05, %v1209_v25  ;;  %v1553_v25 = vld [vmem:[%s2062_s16] ss:$0 sm:$0xff] }
 0x6c2   : > { %1739 = vrsqrt.f32 %v1210_v26 }
 0x6cc   : > { %v1740_v27 = vpop.eup %1739 }
 0x6cd   : > { %v1212_v29 = vmul.f32 %v1740_v27, %v1204_v17  ;;  %v1554_v27 = vld [vmem:[%s2063_s17] ss:$0 sm:$0xff] }
 0x6cf   : > { %v1219_v31 = vmul.f32 %v1545_v28, %v1212_v29 }
 0x6d1   : > { %v1226_v32 = vadd.f32 %v1546_v30, %v1219_v31 }
 0x6d3   : > { %1656 = vmatmul.mubr.msk.f32.vlgmr.msra.gmra.mrb[8].mxu1 %vm601_vm1, %v1226_v32 }
 0x7a6   : > { %v1307_v46 = vpop.f32.mrb[8].mxu1 }
 0x7a7   : > { %v1308_v47 = vadd.f32 %v1547_v45, %v1307_v46  ;;  %v1657_v48 = vpop.f32.mrb[9].mxu1 }
 0x7a9   : > { %v1311_v49 = vmul.f32 0.70710677, %v1308_v47  ;;  %v1335_v8 = vmul.f32 0.5, %v1308_v47 }
 0x7ab   : > { %v1312_v50 = vand.u32 2147483647, %v1311_v49  ;;  %vm1332_vm5 = vcmp.lt.f32.partialorder %v1311_v49, 0.0 }
 0x7ad   : > { %v1313_v3 = vmul.f32 0.3275911, %v1312_v50  ;;  %v1326_v52 = vsub.f32 0.0, %v1312_v50 }
 0x7af   : > { %v1314_v51 = vadd.f32 1.0, %v1313_v3  ;;  %v1327_v54 = vmul.f32 %v1326_v52, %v1312_v50 }
 0x7b1   : > { %1741 = vrcp.f32 %v1314_v51  ;;  %v1328_v57 = vmul.f32 1.442695, %v1327_v54 }
 0x7b3   : > { %1743 = vpow2.f32 %v1328_v57 }
 0x7bb   : > { %v1742_v53 = vpop.eup %1741 }
 0x7bc   : > { %v1317_v55 = vmul.f32 1.0614054, %v1742_v53 }
 0x7bd   : > { %v1744_v1 = vpop.eup %1743 }
 0x7be   : > { %v1549_v56 = vadd.f32 -1.4531521, %v1317_v55 }
 0x7c0   : > { %v1319_v58 = vmul.f32 %v1742_v53, %v1549_v56 }
 0x7c2   : > { %v1320_v59 = vadd.f32 1.4214138, %v1319_v58 }
 0x7c4   : > { %v1321_v60 = vmul.f32 %v1742_v53, %v1320_v59 }
 0x7c6   : > { %v1550_v61 = vadd.f32 -0.28449672, %v1321_v60 }
 0x7c8   : > { %v1323_v62 = vmul.f32 %v1742_v53, %v1550_v61 }
 0x7ca   : > { %v1324_v63 = vadd.f32 0.2548296, %v1323_v62 }
 0x7cc   : > { %v1325_v0 = vmul.f32 %v1742_v53, %v1324_v63 }
 0x7ce   : > { %v1330_v2 = vmul.f32 %v1744_v1, %v1325_v0 }
 0x7d0   : > { %v1331_v4 = vsub.f32 1.0, %v1330_v2 }
 0x7d2   : > { %v1333_v5 = vsub.f32 0.0, %v1331_v4 }
 0x7d4   : > { %v1334_v7 = vsel %vm1332_vm5, %v1333_v5, %v1331_v4 }
 0x7d5   : > { %v1336_v9 = vadd.f32 1.0, %v1334_v7 }
 0x7d7   : > { %v1337_v11 = vmul.f32 %v1336_v9, %v1335_v8 }
 0x7d9   : > { %1675 = vmatmul.mubr.msk.f32.vlgmr.msra.gmra.mrb[6].mxu0 %vm1346_vm6, %v1337_v11 }
 0x8ac   : > { %v1416_v12 = vpop.f32.mrb[6].mxu0 }
 0x8ad   : > { %v1420_v14 = vadd.f32 %v1416_v12, %v1226_v32  ;;  %v1676_v15 = vpop.f32.mrb[7].mxu0 }
 0x8af   : > { %v1428_v16 = vadd.f32 %v1552_v13, %v1420_v14 }
 0x8b1   : > { %v1431_v17 = vsel %vm601_vm1, %v1428_v16, 0.0 }
 0x8b2   : > { %1432 = vadd.xlane.f32.xlu0 %v1431_v17 }
 0x93f   : > { %v1433_v18 = vpop.xlane.xlu0 %1432 }
 0x940   : > { %v1434_v19 = vmul.f32 0.03125, %v1433_v18 }
 0x942   : > { %v1435_v6 = vsub.f32 %v1428_v16, %v1434_v19 }
 0x944   : > { %v1436_v20 = vmul.f32 %v1435_v6, %v1435_v6 }
 0x946   : > { %v1437_v21 = vsel %vm601_vm1, %v1436_v20, 0.0 }
 0x947   : > { %1438 = vadd.xlane.f32.xlu0 %v1437_v21 }
 0x9d4   : > { %v1439_v10 = vpop.xlane.xlu0 %1438 }
 0x9d5   : > { %v1440_v22 = vmul.f32 0.03125, %v1439_v10 }
 0x9d7   : > { %v1441_v23 = vadd.f32 1e-05, %v1440_v22 }
 0x9d9   : > { %1745 = vrsqrt.f32 %v1441_v23 }
 0x9e3   : > { %v1746_v24 = vpop.eup %1745 }
 0x9e4   : > { %v1443_v26 = vmul.f32 %v1746_v24, %v1435_v6 }
 0x9e6   : > { %v1450_v28 = vmul.f32 %v1553_v25, %v1443_v26 }
 0x9e8   : > { %v1457_v29 = vadd.f32 %v1554_v27, %v1450_v28 }
 0x9ea   : > { %1458 = vst.msk [vmem:[%s587_s22] sm:$0xff] %vm601_vm1, %v1457_v29 }
 0x9eb PF: > { %s28_s27 = sadd.s32 1, %s1753_s27  }
 0x9ec   : > { %p25_p4 = scmp.ge.s32.totalorder %s28_s27, 4  }
 0x9ee   :  { %27 = sbr.rel (!%p25_p4) target bundleno = 4 (0x4), region = 125 }

// kernel: crossformer_forward.30
= control target key start
LH: loop header
LB: loop body
LE: loop exit
PB: predicated region body
PF: predicated region fallthrough
CT: control target
= control target key end

     0   :  { %vm74_vm0 = vcmask 261120   ;;  %v1429_v16 = vmov 0   ;;  %vm269_vm1 = vcmask 130048   ;;  %vm361_vm4 = vcmask 97280   ;;  %s1434_s25 = smov 16   ;;  %s1764_s4 = inlined_call_operand.vmem [shape: f32[32,32], index: 4, kind: input, shape index: {}]   ;;  %s1765_s0 = inlined_call_operand.vmem [shape: f32[16,32], index: 0, kind: input, shape index: {}]   ;;  %s1766_s6 = inlined_call_operand.vmem [shape: f32[32,64], index: 6, kind: input, shape index: {}]   ;;  %s1767_s1 = inlined_call_operand.vmem [shape: f32[12,32], index: 1, kind: input, shape index: {}]   ;;  %s1768_s2 = inlined_call_operand.vmem [shape: f32[16,1], index: 2, kind: input, shape index: {}]   ;;  %s1769_s5 = inlined_call_operand.vmem [shape: f32[1,32], index: 5, kind: input, shape index: {}]   ;;  %s1770_s7 = inlined_call_operand.vmem [shape: f32[1,64], index: 7, kind: input, shape index: {}]   ;;  %s1771_s3 = inlined_call_operand.vmem [shape: f32[1,12], index: 3, kind: input, shape index: {}]   ;;  %s1772_s8 = inlined_call_operand.vmem [shape: f32[32,32], index: 8, kind: input, shape index: {}]   ;;  %s1773_s9 = inlined_call_operand.vmem [shape: f32[1,32], index: 9, kind: input, shape index: {}]   ;;  %s1774_s12 = inlined_call_operand.vmem [shape: f32[32,64], index: 12, kind: input, shape index: {}]   ;;  %s1775_s10 = inlined_call_operand.vmem [shape: f32[1,32], index: 10, kind: input, shape index: {}]   ;;  %s1776_s11 = inlined_call_operand.vmem [shape: f32[1,32], index: 11, kind: input, shape index: {}]   ;;  %s1777_s14 = inlined_call_operand.vmem [shape: f32[64,32], index: 14, kind: input, shape index: {}]   ;;  %s1778_s13 = inlined_call_operand.vmem [shape: f32[1,64], index: 13, kind: input, shape index: {}]   ;;  %s1779_s15 = inlined_call_operand.vmem [shape: f32[1,32], index: 15, kind: input, shape index: {}]   ;;  %s1780_s16 = inlined_call_operand.vmem [shape: f32[1,32], index: 16, kind: input, shape index: {}]   ;;  %s1781_s17 = inlined_call_operand.vmem [shape: f32[1,32], index: 17, kind: input, shape index: {}]   ;;  %s1782_s18 = inlined_call_operand.vmem [shape: f32[16,32], index: 18, kind: output, shape index: {}]  }
   0x1   :  { %1786 = sst [smem:[#allocation2_spill]] %s1764_s4  ;;  %v61_v14 = vld [vmem:[%s1767_s1] sm:$0xff]  ;;  %v62_v15 = vld [vmem:[%s1767_s1 + $0x8] sm:$0xf]  ;;  %1381 = vset.pattern.permute.xlu0 %v1429_v16  ;;  %vm1591_vm2 = vmpackc.low %vm269_vm1, %vm269_vm1  ;;  %vm395_vm6 = vcmask 1043456   ;;  %vm1432_vm7 = vmmov 1  }
   0x2   :  { %1787 = sst [smem:[#allocation3_spill]] %s1765_s0  ;;  %s1789_s29 = sld [smem:[#allocation2_spill]]  ;;  %v248_v17 = vld [vmem:[%s1768_s2] sm:$0xff]  ;;  %v249_v18 = vld [vmem:[%s1768_s2 + $0x8] sm:$0xff]  ;;  %vm1627_vm8 = vmpackc.low %vm395_vm6, %vm1432_vm7  ;;  %vm981_vm11 = vcmask 523264  }
   0x3   :  { %1788 = sst [smem:[#allocation4_spill]] %s1766_s6  ;;  %s1790_s23 = sld [smem:[#allocation3_spill]]  ;;  %253 = vperm.xlu0 %1381, %v248_v17   ;;  %v1124_v19 = vld [vmem:[%s1769_s5] ss:$0 sm:$0xff] }
   0x4   :  { %s1791_s26 = sld [smem:[#allocation4_spill]]  ;;  %v1127_v23 = vld [vmem:[%s1770_s7] ss:$0 sm:$0xff]  ;;  %s1431_s7 = smov 112  }
   0x5   :  { %v1607_v33 = vld [vmem:[%s1771_s3] ss:$0 sm:$0xff]  ;;  %s1430_s3 = smov 96   ;;  %s1433_s4 = smov 80  }
   0x7   :  { %258 = vperm.xlu0 %1381, %v249_v18  }
   0x8   :  { %v63_v0 = vld [vmem:[%s1789_s29] sm:$0xff]  ;;  %v64_v1 = vld [vmem:[%s1789_s29 + $0x8] sm:$0xff]  ;;  %v65_v2 = vld [vmem:[%s1789_s29 + $0x10] sm:$0xff] }
   0x9   :  { %v1303_v3 = vpack.c.bf16 %v64_v1, %v63_v0  ;;  %v66_v4 = vld [vmem:[%s1789_s29 + $0x18] sm:$0xff]  ;;  %v1545_v5 = vld [vmem:[%s1790_s23] sm:$0xff]  ;;  %v1564_v12 = vld [vmem:[%s1790_s23 + $0x8] sm:$0xff] }
   0xa   :  { %v1307_v6 = vpack.c.bf16 %v66_v4, %v65_v2  ;;  %1220 = vmatprep.mubr.msk.f32.mxu1 %vm74_vm0, %v1545_v5  ;;  %v156_v7 = vld [vmem:[%s1791_s26] sm:$0xff]  ;;  %v157_v8 = vld [vmem:[%s1791_s26 + $0x8] sm:$0xff]  ;;  %v158_v10 = vld [vmem:[%s1791_s26 + $0x10] sm:$0xff] }
   0xb   :  { %1304 = vmatprep.subr.bf16.mxu1 %v1303_v3  ;;  %v1311_v9 = vpack.c.bf16 %v157_v8, %v156_v7  ;;  %v159_v11 = vld [vmem:[%s1791_s26 + $0x18] sm:$0xff] }
   0xc   :  { %1306 = vmatpush3.bf16.msra.mxu1 %v1303_v3  ;;  %v1315_v13 = vpack.c.bf16 %v159_v11, %v158_v10 }
   0xd   :  { %1308 = vmatprep.subr.bf16.mxu1 %v1307_v6 }
  0x10   :  { %1310 = vmatpush3.bf16.msra.mxu1 %v1307_v6 }
  0x11   :  { %1312 = vmatprep.subr.bf16.mxu1 %v1311_v9 }
  0x13   :  { %1221 = vmatmul.mubr.msk.f32.vlgmr.msra.gmra.mrb[0].mxu1 %vm74_vm0, %v1564_v12 }
  0x14   :  { %1314 = vmatpush3.bf16.msra.mxu1 %v1311_v9  ;;  %1231 = vmatprep.mubr.msk.f32.mxu1 %vm74_vm0, %v61_v14 }
  0x15   :  { %1316 = vmatprep.subr.bf16.mxu1 %v1315_v13 }
  0x18   :  { %1318 = vmatpush3.bf16.msra.mxu1 %v1315_v13 }
  0x1b   :  { %1232 = vmatmul.mubr.msk.f32.vlgmr.msra.gmra.mrb[2].mxu1 %vm74_vm0, %v62_v15 }
  0x82   :  { %v1602_v32 = vpop.permute.xlu0 %253 }
  0x83   :  { %vm267_vm3 = vcmp.eq.f32.partialorder %v1602_v32, %v1607_v33 }
  0x86   :  { %v1609_v35 = vpop.permute.xlu0 %258 }
  0x87   :  { %vm268_vm5 = vcmp.eq.f32.partialorder %v1609_v35, %v1607_v33 }
  0xe6   :  { %v1222_v20 = vpop.f32.mrb[0].mxu1 }
  0xe7   :  { %v147_v21 = vpop.f32.mrb[1].mxu1  ;;  %v153_v31 = vadd.f32 %v1222_v20, %v1124_v19 }
  0xe8   :  { %v148_v22 = vadd.f32 %v1124_v19, %v147_v21 }
  0xea   :  { %1238 = vmatprep.mubr.msk.f32.mxu0 %vm269_vm1, %v148_v22 }
  0xee   :  { %v1233_v24 = vpop.f32.mrb[2].mxu1 }
  0xef   :  { %v245_v25 = vadd.f32 %v1233_v24, %v1127_v23  ;;  %v239_v26 = vpop.f32.mrb[3].mxu1 }
  0xf0   :  { %v240_v27 = vadd.f32 %v1127_v23, %v239_v26 }
  0xf2   :  { %v1319_v29 = vpack.c.bf16 %v245_v25, %v240_v27  ;;  %v1595_v30 = vpack.i.bf16 %v245_v25, %v240_v27 }
  0xf4   :  { %1321 = vmatprep.subr.msk.bf16.mxu0 %vm1591_vm2, %v1319_v29 }
  0xf5   :  { %1324 = vmatpush3.bf16.xpose.msk.msra.mxu0 %vm1591_vm2, %v1319_v29 }
  0xfc   :  { %1239 = vmatmul.mubr.msk.f32.vlgmr.msra.gmra.mrb[0].mxu0 %vm269_vm1, %v153_v31 }
 0x1cf   :  { %v1240_v34 = vpop.f32.mrb[0].mxu0 }
 0x1d0   :  { %v348_v36 = vpop.f32.mrb[1].mxu0  ;;  %v358_v37 = vmul.f32 0.25, %v1240_v34 }
 0x1d1   :  { %v357_v38 = vmul.f32 0.25, %v348_v36 }
 0x1d2   :  { %v360_v41 = vsel %vm268_vm5, %v358_v37, -1e+30 }
 0x1d3   :  { %v359_v39 = vsel %vm267_vm3, %v357_v38, -1e+30  ;;  %v365_v42 = vsel %vm361_vm4, %v360_v41, -inf }
 0x1d4   :  { %v362_v40 = vsel %vm361_vm4, %v359_v39, -inf }
 0x1d5   :  { %363 = vmax.xlane.f32.xlu1 %v362_v40 }
 0x1d9   :  { %366 = vmax.xlane.f32.xlu1 %v365_v42  ;;  %v691_v42 = vld [vmem:[%s1772_s8 + $0x18] sm:$0xff] }
 0x262   :  { %v364_v43 = vpop.xlane.xlu1 %363 }
 0x263   :  { %v368_v44 = vsub.f32 %v359_v39, %v364_v43  ;;  %v689_v39 = vld [vmem:[%s1772_s8 + $0x8] sm:$0xff] }
 0x265   :  { %v370_v45 = vmul.f32 1.442695, %v368_v44 }
 0x266   :  { %v367_v46 = vpop.xlane.xlu1 %366 }
 0x267   :  { %1397 = vpow2.f32 %v370_v45  ;;  %v369_v47 = vsub.f32 %v360_v41, %v367_v46  ;;  %v690_v41 = vld [vmem:[%s1772_s8 + $0x10] sm:$0xff] }
 0x268   :  { %v1347_v43 = vpack.c.bf16 %v691_v42, %v690_v41 }
 0x269   :  { %v372_v48 = vmul.f32 1.442695, %v369_v47 }
 0x26b   :  { %1399 = vpow2.f32 %v372_v48 }
 0x271   :  { %v1398_v49 = vpop.eup %1397 }
 0x272   :  { %v374_v50 = vsel %vm361_vm4, %v1398_v49, 0.0 }
 0x273   :  { %375 = vadd.xlane.f32.xlu0 %v374_v50  ;;  %v1145_v50 = vld [vmem:[%s1773_s9] ss:$0 sm:$0xff] }
 0x275   :  { %v1400_v51 = vpop.eup %1399 }
 0x276   :  { %v377_v52 = vsel %vm361_vm4, %v1400_v51, 0.0 }
 0x277   :  { %378 = vadd.xlane.f32.xlu1 %v377_v52 }
 0x288   :  { %1383 = vrot.lane.b32.xlu1 %v1595_v30, %s1430_s3 }
 0x28c   :  { %1388 = vrot.lane.b32.xlu1 %v1595_v30, %s1431_s7 }
 0x290   :  { %473 = vrot.lane.b32.xlu1 %v148_v22, %s1431_s7 }
 0x294   :  { %475 = vrot.lane.b32.xlu1 %v153_v31, %s1431_s7 }
 0x300   :  { %v376_v53 = vpop.xlane.xlu0 %375 }
 0x301   :  { %1401 = vrcp.f32 %v376_v53 }
 0x304   :  { %v379_v54 = vpop.xlane.xlu1 %378 }
 0x305   :  { %1403 = vrcp.f32 %v379_v54 }
 0x308   :  { %v1384_v55 = vpop.permute.xlu1 %1383 }
 0x309   :  { %v1386_v56 = vunpack.i.h.bf16 %v1384_v55  ;;  %v1385_v57 = vunpack.i.l.bf16 %v1384_v55 }
 0x30b   :  { %v1402_v59 = vpop.eup %1401  ;;  %v1325_v60 = vpack.c.bf16 %v1386_v56, %v1385_v57 }
 0x30c   :  { %v1389_v61 = vpop.permute.xlu1 %1388  ;;  %v382_v62 = vmul.f32 %v1402_v59, %v1398_v49 }
 0x30d   :  { %v1391_v63 = vunpack.i.h.bf16 %v1389_v61  ;;  %v1390_v0 = vunpack.i.l.bf16 %v1389_v61  ;;  %1327 = vmatprep.subr.msk.bf16.mxu1 %vm1627_vm8, %v1325_v60 }
 0x30e   :  { %1330 = vmatpush3.bf16.msk.msra.mxu1 %vm1627_vm8, %v1325_v60  ;;  %1245 = vmatprep.mubr.msk.f32.mxu1 %vm361_vm4, %v382_v62 }
 0x30f   :  { %v1404_v1 = vpop.eup %1403  ;;  %v1331_v2 = vpack.c.bf16 %v1391_v63, %v1390_v0 }
 0x310   :  { %v383_v3 = vmul.f32 %v1404_v1, %v1400_v51  ;;  %v474_v4 = vpop.permute.xlu1 %473 }
 0x311   :  { %1333 = vmatprep.subr.msk.bf16.mxu1 %vm1591_vm2, %v1331_v2 }
 0x312   :  { %1246 = vmatmul.mubr.msk.f32.vlgmr.msra.gmra.mrb[4].mxu1 %vm361_vm4, %v383_v3 }
 0x313   :  { %1252 = vmatprep.mubr.msk.f32.mxu1 %vm269_vm1, %v474_v4  ;;  %v828_v4 = vld [vmem:[%s1774_s12 + $0x8] sm:$0xff] }
 0x314   :  { %v476_v6 = vpop.permute.xlu1 %475 }
 0x317   :  { %1336 = vmatpush3.bf16.xpose.msk.msra.mxu1 %vm1591_vm2, %v1331_v2 }
 0x31e   :  { %1253 = vmatmul.mubr.msk.f32.vlgmr.msra.gmra.mrb[6].mxu1 %vm269_vm1, %v476_v6 }
 0x3e5   :  { %v1643_v7 = vpop.f32.mrb[4].mxu1 }
 0x3e6   :  { %v464_v8 = vpop.f32.mrb[5].mxu1 }
 0x3f1   :  { %v1254_v9 = vpop.f32.mrb[6].mxu1 }
 0x3f2   :  { %v565_v10 = vmul.f32 0.25, %v1254_v9  ;;  %v555_v11 = vpop.f32.mrb[7].mxu1 }
 0x3f3   :  { %v564_v13 = vmul.f32 0.25, %v555_v11 }
 0x3f4   :  { %v567_v14 = vsel %vm268_vm5, %v565_v10, -1e+30 }
 0x3f5   :  { %v571_v15 = vsel %vm361_vm4, %v567_v14, -inf  ;;  %v566_v16 = vsel %vm267_vm3, %v564_v13, -1e+30 }
 0x3f6   :  { %572 = vmax.xlane.f32.xlu1 %v571_v15  ;;  %v568_v17 = vsel %vm361_vm4, %v566_v16, -inf }
 0x3f7   :  { %569 = vmax.xlane.f32.xlu0 %v568_v17 }
 0x483   :  { %v573_v18 = vpop.xlane.xlu1 %572 }
 0x484   :  { %v575_v19 = vsub.f32 %v567_v14, %v573_v18  ;;  %v570_v20 = vpop.xlane.xlu0 %569  ;;  %v1148_v18 = vld [vmem:[%s1775_s10] ss:$0 sm:$0xff] }
 0x485   :  { %v574_v21 = vsub.f32 %v566_v16, %v570_v20  ;;  %v1149_v20 = vld [vmem:[%s1776_s11] ss:$0 sm:$0xff] }
 0x486   :  { %v578_v22 = vmul.f32 1.442695, %v575_v19 }
 0x487   :  { %v576_v23 = vmul.f32 1.442695, %v574_v21 }
 0x488   :  { %1405 = vpow2.f32 %v578_v22 }
 0x489   :  { %1407 = vpow2.f32 %v576_v23 }
 0x492   :  { %v1406_v24 = vpop.eup %1405 }
 0x493   :  { %v583_v25 = vsel %vm361_vm4, %v1406_v24, 0.0  ;;  %v1408_v26 = vpop.eup %1407 }
 0x494   :  { %584 = vadd.xlane.f32.xlu0 %v583_v25  ;;  %v580_v27 = vsel %vm361_vm4, %v1408_v26, 0.0 }
 0x498   :  { %581 = vadd.xlane.f32.xlu0 %v580_v27  ;;  %v973_v27 = vld [vmem:[%s1777_s14] sm:$0xff] }
 0x4ae   :  { %1393 = vrot.lane.b32.xlu0 %v1595_v30, %s1433_s4  ;;  %v688_v30 = vld [vmem:[%s1772_s8] sm:$0xff] }
 0x4af   :  { %v1343_v40 = vpack.c.bf16 %v689_v39, %v688_v30  ;;  %v1150_v39 = vld [vmem:[%s1778_s13] ss:$0 sm:$0xff] }
 0x521   :  { %v585_v28 = vpop.xlane.xlu0 %584 }
 0x522   :  { %1409 = vrcp.f32 %v585_v28  ;;  %v974_v28 = vld [vmem:[%s1777_s14 + $0x8] sm:$0xff] }
 0x525   :  { %v582_v29 = vpop.xlane.xlu0 %581 }
 0x526   :  { %1411 = vrcp.f32 %v582_v29  ;;  %v1359_v29 = vpack.c.bf16 %v974_v28, %v973_v27 }
 0x529   :  { %v1394_v31 = vpop.permute.xlu0 %1393 }
 0x52a   :  { %v1396_v32 = vunpack.i.h.bf16 %v1394_v31  ;;  %v1395_v33 = vunpack.i.l.bf16 %v1394_v31  ;;  %v975_v31 = vld [vmem:[%s1777_s14 + $0x10] sm:$0xff] }
 0x52c   :  { %v1337_v34 = vpack.c.bf16 %v1396_v32, %v1395_v33  ;;  %v1410_v35 = vpop.eup %1409  ;;  %v976_v32 = vld [vmem:[%s1777_s14 + $0x18] sm:$0xff] }
 0x52d   :  { %v589_v38 = vmul.f32 %v1410_v35, %v1406_v24  ;;  %v1363_v33 = vpack.c.bf16 %v976_v32, %v975_v31  ;;  %v978_v35 = vld [vmem:[%s1777_s14 + $0x28] sm:$0xff] }
 0x52e   :  { %1339 = vmatprep.subr.msk.bf16.mxu0 %vm1627_vm8, %v1337_v34 }
 0x52f   :  { %1342 = vmatpush3.bf16.msk.msra.mxu0 %vm1627_vm8, %v1337_v34  ;;  %v977_v34 = vld [vmem:[%s1777_s14 + $0x20] sm:$0xff] }
 0x530   :  { %v1412_v36 = vpop.eup %1411  ;;  %1344 = vmatprep.subr.bf16.mxu0 %v1343_v40 }
 0x531   :  { %v588_v37 = vmul.f32 %v1412_v36, %v1408_v26  ;;  %v1367_v36 = vpack.c.bf16 %v978_v35, %v977_v34  ;;  %v1159_v35 = vld [vmem:[%s1779_s15] ss:$0 sm:$0xff] }
 0x533   :  { %1259 = vmatprep.mubr.msk.f32.mxu0 %vm361_vm4, %v588_v37  ;;  %v979_v37 = vld [vmem:[%s1777_s14 + $0x30] sm:$0xff] }
 0x534   :  { %1260 = vmatmul.mubr.msk.f32.vlgmr.msra.gmra.mrb[2].mxu0 %vm361_vm4, %v589_v38  ;;  %v980_v38 = vld [vmem:[%s1777_s14 + $0x38] sm:$0xff] }
 0x535   :  { %1346 = vmatpush3.bf16.msra.mxu0 %v1343_v40  ;;  %v1371_v30 = vpack.c.bf16 %v980_v38, %v979_v37 }
 0x536   :  { %1348 = vmatprep.subr.bf16.mxu0 %v1347_v43 }
 0x539   :  { %1350 = vmatpush3.bf16.msra.mxu0 %v1347_v43 }
 0x53a   :  { %1360 = vmatprep.subr.bf16.mxu0 %v1359_v29 }
 0x607   :  { %v1261_v44 = vpop.f32.mrb[2].mxu0 }
 0x608   :  { %v669_v45 = vpop.f32.mrb[3].mxu0 }
 0x609   :  { %680 = vrot.lane.b32.xlu0 %v669_v45, %s1434_s25 }
 0x60d   :  { %682 = vrot.lane.b32.xlu0 %v1261_v44, %s1434_s25 }
 0x67b   :  { %v681_v46 = vpop.permute.xlu0 %680 }
 0x67c   :  { %v686_v47 = vsel %vm269_vm1, %v464_v8, %v681_v46  ;;  %v830_v8 = vld [vmem:[%s1774_s12 + $0x18] sm:$0xff] }
 0x67d   :  { %1270 = vmatprep.mubr.msk.f32.mxu0 %vm74_vm0, %v686_v47 }
 0x67f   :  { %v683_v48 = vpop.permute.xlu0 %682 }
 0x680   :  { %v687_v49 = vsel %vm269_vm1, %v1643_v7, %v683_v48  ;;  %v829_v7 = vld [vmem:[%s1774_s12 + $0x10] sm:$0xff] }
 0x681   :  { %1271 = vmatmul.mubr.msk.f32.vlgmr.msra.gmra.mrb[4].mxu0 %vm74_vm0, %v687_v49  ;;  %v1355_v9 = vpack.c.bf16 %v830_v8, %v829_v7 }
 0x682   :  { %1362 = vmatpush3.bf16.msra.mxu0 %v1359_v29 }
 0x683   :  { %1364 = vmatprep.subr.bf16.mxu0 %v1363_v33 }
 0x686   :  { %1366 = vmatpush3.bf16.msra.mxu0 %v1363_v33 }
 0x687   :  { %1368 = vmatprep.subr.bf16.mxu0 %v1367_v36 }
 0x68a   :  { %1370 = vmatpush3.bf16.msra.mxu0 %v1367_v36 }
 0x68b   :  { %1372 = vmatprep.subr.bf16.mxu0 %v1371_v30 }
 0x68e   :  { %1374 = vmatpush3.bf16.msra.mxu0 %v1371_v30 }
 0x754   :  { %v1272_v51 = vpop.f32.mrb[4].mxu0 }
 0x755   :  { %v777_v52 = vadd.f32 %v1272_v51, %v1145_v50  ;;  %v771_v53 = vpop.f32.mrb[5].mxu0 }
 0x756   :  { %v772_v54 = vadd.f32 %v1145_v50, %v771_v53 }
 0x757   :  { %v781_v55 = vadd.f32 %v777_v52, %v1564_v12 }
 0x758   :  { %v780_v56 = vadd.f32 %v772_v54, %v1545_v5  ;;  %v827_v5 = vld [vmem:[%s1774_s12] sm:$0xff] }
 0x759   :  { %v787_v57 = vsel %vm74_vm0, %v781_v55, 0.0  ;;  %v1351_v6 = vpack.c.bf16 %v828_v4, %v827_v5 }
 0x75a   :  { %788 = vadd.xlane.f32.xlu0 %v787_v57  ;;  %v784_v58 = vsel %vm74_vm0, %v780_v56, 0.0 }
 0x75b   :  { %785 = vadd.xlane.f32.xlu1 %v784_v58  ;;  %1352 = vmatprep.subr.bf16.mxu1 %v1351_v6 }
 0x75c   :  { %1354 = vmatpush3.bf16.msra.mxu1 %v1351_v6 }
 0x75d   :  { %1356 = vmatprep.subr.bf16.mxu1 %v1355_v9 }
 0x760   :  { %1358 = vmatpush3.bf16.msra.mxu1 %v1355_v9 }
 0x7e7   :  { %v789_v59 = vpop.xlane.xlu0 %788 }
 0x7e8   :  { %v792_v60 = vmul.f32 0.03125, %v789_v59  ;;  %v786_v61 = vpop.xlane.xlu1 %785 }
 0x7e9   :  { %v791_v62 = vmul.f32 0.03125, %v786_v61 }
 0x7ea   :  { %v794_v63 = vsub.f32 %v781_v55, %v792_v60 }
 0x7eb   :  { %v793_v0 = vsub.f32 %v780_v56, %v791_v62 }
 0x7ec   :  { %v796_v3 = vmul.f32 %v794_v63, %v794_v63 }
 0x7ed   :  { %v795_v1 = vmul.f32 %v793_v0, %v793_v0 }
 0x7ee   :  { %v800_v12 = vsel %vm74_vm0, %v796_v3, 0.0 }
 0x7ef   :  { %v797_v2 = vsel %vm74_vm0, %v795_v1, 0.0 }
 0x7f0   :  { %798 = vadd.xlane.f32.xlu1 %v797_v2 }
 0x7f4   :  { %801 = vadd.xlane.f32.xlu1 %v800_v12 }
 0x87d   :  { %v799_v10 = vpop.xlane.xlu1 %798 }
 0x87e   :  { %v803_v11 = vmul.f32 0.03125, %v799_v10 }
 0x880   :  { %v805_v13 = vadd.f32 1e-05, %v803_v11 }
 0x881   :  { %v802_v14 = vpop.xlane.xlu1 %801 }
 0x882   :  { %1413 = vrsqrt.f32 %v805_v13  ;;  %v804_v15 = vmul.f32 0.03125, %v802_v14 }
 0x884   :  { %v806_v16 = vadd.f32 1e-05, %v804_v15 }
 0x886   :  { %1415 = vrsqrt.f32 %v806_v16 }
 0x88c   :  { %v1414_v17 = vpop.eup %1413 }
 0x88d   :  { %v809_v19 = vmul.f32 %v1414_v17, %v793_v0 }
 0x88f   :  { %v817_v21 = vmul.f32 %v1148_v18, %v809_v19 }
 0x890   :  { %v1416_v22 = vpop.eup %1415 }
 0x891   :  { %v810_v23 = vmul.f32 %v1416_v22, %v794_v63  ;;  %v1706_v24 = vadd.f32 %v1149_v20, %v817_v21 }
 0x893   :  { %v818_v25 = vmul.f32 %v1148_v18, %v810_v23  ;;  %1281 = vmatprep.mubr.msk.f32.mxu1 %vm74_vm0, %v1706_v24 }
 0x895   :  { %v1710_v26 = vadd.f32 %v1149_v20, %v818_v25 }
 0x897   :  { %1282 = vmatmul.mubr.msk.f32.vlgmr.msra.gmra.mrb[8].mxu1 %vm74_vm0, %v1710_v26 }
 0x96a   :  { %v1283_v40 = vpop.f32.mrb[8].mxu1 }
 0x96b   :  { %v916_v41 = vadd.f32 %v1283_v40, %v1150_v39  ;;  %v910_v42 = vpop.f32.mrb[9].mxu1 }
 0x96c   :  { %v911_v43 = vadd.f32 %v1150_v39, %v910_v42 }
 0x96d   :  { %v920_v44 = vmul.f32 0.70710677, %v916_v41  ;;  %v968_v29 = vmul.f32 0.5, %v916_v41 }
 0x96e   :  { %v919_v45 = vmul.f32 0.70710677, %v911_v43  ;;  %v967_v27 = vmul.f32 0.5, %v911_v43 }
 0x96f   :  { %v922_v46 = vand.u32 2147483647, %v920_v44  ;;  %vm962_vm9 = vcmp.lt.f32.partialorder %v920_v44, 0.0 }
 0x970   :  { %v921_v47 = vand.u32 2147483647, %v919_v45  ;;  %vm961_vm10 = vcmp.lt.f32.partialorder %v919_v45, 0.0 }
 0x971   :  { %v924_v48 = vmul.f32 0.3275911, %v922_v46  ;;  %v950_v52 = vsub.f32 0.0, %v922_v46 }
 0x972   :  { %v923_v49 = vmul.f32 0.3275911, %v921_v47  ;;  %v949_v53 = vsub.f32 0.0, %v921_v47 }
 0x973   :  { %v926_v50 = vadd.f32 1.0, %v924_v48  ;;  %v952_v55 = vmul.f32 %v950_v52, %v922_v46 }
 0x974   :  { %v925_v51 = vadd.f32 1.0, %v923_v49  ;;  %v951_v58 = vmul.f32 %v949_v53, %v921_v47 }
 0x975   :  { %1417 = vrcp.f32 %v926_v50  ;;  %v955_v61 = vmul.f32 1.442695, %v952_v55 }
 0x976   :  { %1419 = vrcp.f32 %v925_v51  ;;  %v953_v0 = vmul.f32 1.442695, %v951_v58  ;;  %v1161_v58 = vld [vmem:[%s1781_s17] ss:$0 sm:$0xff] }
 0x977   :  { %1421 = vpow2.f32 %v955_v61 }
 0x978   :  { %1423 = vpow2.f32 %v953_v0 }
 0x97f   :  { %v1418_v54 = vpop.eup %1417 }
 0x980   :  { %v1420_v56 = vpop.eup %1419  ;;  %v932_v57 = vmul.f32 1.0614054, %v1418_v54 }
 0x981   :  { %v931_v59 = vmul.f32 1.0614054, %v1420_v56  ;;  %v1422_v13 = vpop.eup %1421 }
 0x982   :  { %v1154_v60 = vadd.f32 -1.4531521, %v932_v57  ;;  %v1424_v15 = vpop.eup %1423 }
 0x983   :  { %v1153_v62 = vadd.f32 -1.4531521, %v931_v59 }
 0x984   :  { %v936_v63 = vmul.f32 %v1418_v54, %v1154_v60 }
 0x985   :  { %v935_v1 = vmul.f32 %v1420_v56, %v1153_v62 }
 0x986   :  { %v938_v2 = vadd.f32 1.4214138, %v936_v63 }
 0x987   :  { %v937_v3 = vadd.f32 1.4214138, %v935_v1 }
 0x988   :  { %v940_v12 = vmul.f32 %v1418_v54, %v938_v2 }
 0x989   :  { %v939_v5 = vmul.f32 %v1420_v56, %v937_v3 }
 0x98a   :  { %v1156_v4 = vadd.f32 -0.28449672, %v940_v12 }
 0x98b   :  { %v1155_v6 = vadd.f32 -0.28449672, %v939_v5 }
 0x98c   :  { %v944_v7 = vmul.f32 %v1418_v54, %v1156_v4 }
 0x98d   :  { %v943_v8 = vmul.f32 %v1420_v56, %v1155_v6 }
 0x98e   :  { %v946_v9 = vadd.f32 0.2548296, %v944_v7 }
 0x98f   :  { %v945_v10 = vadd.f32 0.2548296, %v943_v8 }
 0x990   :  { %v948_v11 = vmul.f32 %v1418_v54, %v946_v9 }
 0x991   :  { %v947_v14 = vmul.f32 %v1420_v56, %v945_v10  ;;  %v1160_v56 = vld [vmem:[%s1780_s16] ss:$0 sm:$0xff] }
 0x992   :  { %v958_v16 = vmul.f32 %v1422_v13, %v948_v11 }
 0x993   :  { %v957_v17 = vmul.f32 %v1424_v15, %v947_v14 }
 0x994   :  { %v960_v18 = vsub.f32 1.0, %v958_v16 }
 0x995   :  { %v959_v19 = vsub.f32 1.0, %v957_v17 }
 0x996   :  { %v964_v20 = vsub.f32 0.0, %v960_v18 }
 0x997   :  { %v963_v21 = vsub.f32 0.0, %v959_v19 }
 0x998   :  { %v966_v22 = vsel %vm962_vm9, %v964_v20, %v960_v18 }
 0x999   :  { %v970_v23 = vadd.f32 1.0, %v966_v22  ;;  %v965_v25 = vsel %vm961_vm10, %v963_v21, %v959_v19 }
 0x99a   :  { %v969_v28 = vadd.f32 1.0, %v965_v25 }
 0x99b   :  { %v972_v32 = vmul.f32 %v970_v23, %v968_v29 }
 0x99c   :  { %v971_v31 = vmul.f32 %v969_v28, %v967_v27 }
 0x99e   :  { %1300 = vmatprep.mubr.msk.f32.mxu0 %vm981_vm11, %v971_v31 }
 0x99f   :  { %1301 = vmatmul.mubr.msk.f32.vlgmr.msra.gmra.mrb[6].mxu0 %vm981_vm11, %v972_v32 }
 0xa72   :  { %v1302_v33 = vpop.f32.mrb[6].mxu0 }
 0xa73   :  { %v1054_v34 = vpop.f32.mrb[7].mxu0  ;;  %v1064_v36 = vadd.f32 %v1302_v33, %v1710_v26 }
 0xa74   :  { %v1063_v37 = vadd.f32 %v1054_v34, %v1706_v24 }
 0xa75   :  { %v1073_v39 = vadd.f32 %v1159_v35, %v1064_v36 }
 0xa76   :  { %v1072_v38 = vadd.f32 %v1159_v35, %v1063_v37 }
 0xa77   :  { %v1079_v40 = vsel %vm74_vm0, %v1073_v39, 0.0 }
 0xa78   :  { %v1076_v30 = vsel %vm74_vm0, %v1072_v38, 0.0 }
 0xa79   :  { %1077 = vadd.xlane.f32.xlu1 %v1076_v30 }
 0xa7d   :  { %1080 = vadd.xlane.f32.xlu1 %v1079_v40 }
 0xb06   :  { %v1078_v41 = vpop.xlane.xlu1 %1077 }
 0xb07   :  { %v1082_v42 = vmul.f32 0.03125, %v1078_v41 }
 0xb09   :  { %v1084_v43 = vsub.f32 %v1072_v38, %v1082_v42 }
 0xb0a   :  { %v1081_v44 = vpop.xlane.xlu1 %1080 }
 0xb0b   :  { %v1083_v45 = vmul.f32 0.03125, %v1081_v44  ;;  %v1086_v46 = vmul.f32 %v1084_v43, %v1084_v43 }
 0xb0d   :  { %v1085_v47 = vsub.f32 %v1073_v39, %v1083_v45  ;;  %v1088_v48 = vsel %vm74_vm0, %v1086_v46, 0.0 }
 0xb0e   :  { %1089 = vadd.xlane.f32.xlu1 %v1088_v48 }
 0xb0f   :  { %v1087_v26 = vmul.f32 %v1085_v47, %v1085_v47 }
 0xb11   :  { %v1091_v24 = vsel %vm74_vm0, %v1087_v26, 0.0 }
 0xb12   :  { %1092 = vadd.xlane.f32.xlu1 %v1091_v24 }
 0xb9b   :  { %v1090_v49 = vpop.xlane.xlu1 %1089 }
 0xb9c   :  { %v1094_v50 = vmul.f32 0.03125, %v1090_v49 }
 0xb9e   :  { %v1096_v51 = vadd.f32 1e-05, %v1094_v50 }
 0xb9f   :  { %v1093_v52 = vpop.xlane.xlu1 %1092 }
 0xba0   :  { %1425 = vrsqrt.f32 %v1096_v51  ;;  %v1095_v53 = vmul.f32 0.03125, %v1093_v52 }
 0xba2   :  { %v1097_v54 = vadd.f32 1e-05, %v1095_v53 }
 0xba4   :  { %1427 = vrsqrt.f32 %v1097_v54 }
 0xbaa   :  { %v1426_v55 = vpop.eup %1425 }
 0xbab   :  { %v1100_v57 = vmul.f32 %v1426_v55, %v1084_v43 }
 0xbad   :  { %v1108_v59 = vmul.f32 %v1160_v56, %v1100_v57 }
 0xbae   :  { %v1428_v60 = vpop.eup %1427 }
 0xbaf   :  { %v1116_v61 = vadd.f32 %v1161_v58, %v1108_v59  ;;  %v1101_v62 = vmul.f32 %v1428_v60, %v1085_v47 }
 0xbb1   :  { %1118 = vst.msk [vmem:[%s1782_s18] sm:$0xff] %vm74_vm0, %v1116_v61  ;;  %v1109_v63 = vmul.f32 %v1160_v56, %v1101_v62 }
 0xbb3   :  { %v1117_v0 = vadd.f32 %v1161_v58, %v1109_v63 }
 0xbb5   :  { %1119 = vst.msk [vmem:[%s1782_s18 + $0x8] sm:$0xff] %vm74_vm0, %v1117_v0 }

// kernel: crossformer_forward.21
= control target key start
LH: loop header
LB: loop body
LE: loop exit
PB: predicated region body
PF: predicated region fallthrough
CT: control target
= control target key end

     0   :  { %s2153_s27 = smov 0   ;;  %s2382_s0 = inlined_call_operand.vmem [shape: f32[32,32], index: 0, kind: input, shape index: {}, may-alias: {0,1}]   ;;  %s2383_s1 = inlined_call_operand.vmem [shape: f32[32,32], index: 1, kind: input, shape index: {}, may-alias: {0,1}]   ;;  %s2384_s2 = inlined_call_operand.vmem [shape: f32[16,1], index: 2, kind: input, shape index: {}]   ;;  %s2385_s3 = inlined_call_operand.vmem [shape: f32[1,16], index: 3, kind: input, shape index: {}]   ;;  %s2386_s4 = inlined_call_operand.vmem [shape: f32[32,32], index: 4, kind: input, shape index: {}]   ;;  %s2387_s5 = inlined_call_operand.vmem [shape: f32[1,32], index: 5, kind: input, shape index: {}]   ;;  %s2388_s6 = inlined_call_operand.vmem [shape: f32[32,64], index: 6, kind: input, shape index: {}]   ;;  %s2389_s7 = inlined_call_operand.vmem [shape: f32[1,64], index: 7, kind: input, shape index: {}]   ;;  %s2390_s8 = inlined_call_operand.vmem [shape: f32[32,32], index: 8, kind: input, shape index: {}]   ;;  %s2391_s9 = inlined_call_operand.vmem [shape: f32[1,32], index: 9, kind: input, shape index: {}]   ;;  %s2392_s10 = inlined_call_operand.vmem [shape: f32[1,32], index: 10, kind: input, shape index: {}]   ;;  %s2393_s11 = inlined_call_operand.vmem [shape: f32[1,32], index: 11, kind: input, shape index: {}]   ;;  %s2394_s12 = inlined_call_operand.vmem [shape: f32[32,64], index: 12, kind: input, shape index: {}]   ;;  %s2395_s13 = inlined_call_operand.vmem [shape: f32[1,64], index: 13, kind: input, shape index: {}]   ;;  %s2396_s14 = inlined_call_operand.vmem [shape: f32[64,32], index: 14, kind: input, shape index: {}]   ;;  %s2397_s15 = inlined_call_operand.vmem [shape: f32[1,32], index: 15, kind: input, shape index: {}]   ;;  %s2398_s16 = inlined_call_operand.vmem [shape: f32[1,32], index: 16, kind: input, shape index: {}]   ;;  %s2399_s17 = inlined_call_operand.vmem [shape: f32[1,32], index: 17, kind: input, shape index: {}]   ;;  %s2400_s18 = inlined_call_operand.vmem [shape: f32[32,32], index: 18, kind: output, shape index: {}]  }
   0x1   :  { %2402 = sst [smem:[#allocation2_spill]] %s2382_s0 }
   0x2   :  { %2403 = sst [smem:[#allocation3_spill]] %s2383_s1 }
   0x3   :  { %2404 = sst [smem:[#allocation4_spill]] %s2384_s2 }
   0x4 LB: > { %s1726_s28 = sadd.s32 4294967295, %s2051_s27   ;;  %p1730_p0 = scmp.ge.s32.totalorder %s2051_s27, 1  ;;  %s2051_s27 = sphi %s2153_s27, %s28_s27  }
   0x5   : > { %p524_p1 = scmp.lt.s32.totalorder %s2051_s27, 3 }
   0x7   : > { %p525_p2 = pnand %p1730_p0, %p524_p1 }
   0x8   : > { %v605_v0 = vld [vmem:[%s2386_s4] sm:$0xff] (!%p525_p2)  ;;  %v606_v1 = vld [vmem:[%s2386_s4 + $0x8] sm:$0xff] (!%p525_p2)  ;;  %v607_v2 = vld [vmem:[%s2386_s4 + $0x10] sm:$0xff] (!%p525_p2)  ;;  %s1731_s21 = sshll.u32 (!%p525_p2), %s1726_s28, 1  ;;  %vm616_vm0 = vcmask (!%p525_p2), 261120   ;;  %s2405_s0 = sld [smem:[#allocation2_spill]] (!%p525_p2) }
   0x9   : > { %528 = sbr.rel (%p525_p2) target bundleno = 3000 (0xbb8), region = 92  ;;  %v1916_v3 = vpack.c.bf16 (!%p525_p2), %v606_v1, %v605_v0  ;;  %v608_v4 = vld [vmem:[%s2386_s4 + $0x18] sm:$0xff] (!%p525_p2)  ;;  %p584_p3 = scmp.lt.s32.totalorder (!%p525_p2), %s1731_s21, 3  ;;  %v698_v6 = vld [vmem:[%s2388_s6] sm:$0xff] (!%p525_p2)  ;;  %v699_v7 = vld [vmem:[%s2388_s6 + $0x8] sm:$0xff] (!%p525_p2)  ;;  %v2053_v17 = vmov (!%p525_p2), 0  }
   0xa   : > { %v1920_v5 = vpack.c.bf16 (!%p525_p2), %v608_v4, %v607_v2  ;;  %v1924_v8 = vpack.c.bf16 (!%p525_p2), %v699_v7, %v698_v6  ;;  %v700_v9 = vld [vmem:[%s2388_s6 + $0x10] sm:$0xff] (!%p525_p2)  ;;  %v701_v10 = vld [vmem:[%s2388_s6 + $0x18] sm:$0xff] (!%p525_p2)  ;;  %s2406_s24 = sld [smem:[#allocation3_spill]] (!%p525_p2)  ;;  %s2407_s30 = sld [smem:[#allocation4_spill]] (!%p525_p2)  ;;  %1997 = vset.pattern.permute.xlu0 (!%p525_p2), %v2053_v17  ;;  %v1737_v19 = vld [vmem:[%s2387_s5] ss:$0 sm:$0xff] (!%p525_p2) }
   0xb   : > { %1917 = vmatprep.subr.bf16.mxu1 (!%p525_p2), %v1916_v3  ;;  %v1928_v13 = vpack.c.bf16 (!%p525_p2), %v701_v10, %v700_v9  ;;  %vm811_vm1 = vcmask (!%p525_p2), 130048   ;;  %v1740_v23 = vld [vmem:[%s2389_s7] ss:$0 sm:$0xff] (!%p525_p2)  ;;  %s2056_s26 = smov (!%p525_p2), 80   ;;  %s2057_s23 = smov (!%p525_p2), 16   ;;  %vm1519_vm7 = vcmask (!%p525_p2), 523264  }
   0xc   : > { %1919 = vmatpush3.bf16.msra.mxu1 (!%p525_p2), %v1916_v3  ;;  %vm2220_vm2 = vmpackc.low (!%p525_p2), %vm811_vm1, %vm811_vm1  ;;  %v2236_v33 = vld [vmem:[%s2385_s3] ss:$0 sm:$0xff] (!%p525_p2) }
   0xd   : > { %1921 = vmatprep.subr.bf16.mxu1 (!%p525_p2), %v1920_v5 }
  0x10   : > { %s2411_s21 = smov (!%p584_p3, %s1731_s21), 3  ;;  %1923 = vmatpush3.bf16.msra.mxu1 %v1920_v5  ;;  %v790_v16 = vld [vmem:[%s2407_s30] sm:$0xff]  ;;  %v791_v18 = vld [vmem:[%s2407_s30 + $0x8] sm:$0xff] }
  0x11   : > { %s2179_s28 = sshll.u32 %s2411_s21, 3  ;;  %1925 = vmatprep.subr.bf16.mxu1 %v1924_v8  ;;  %795 = vperm.xlu0 %1997, %v790_v16  }
  0x12   : > { %s587_s19 = scalar_lea.vmem %s2405_s0, %s2179_s28  ;;  %s593_s25 = scalar_lea.vmem %s2406_s24, %s2179_s28 }
  0x13   : > { %v2191_v11 = vld [vmem:[%s587_s19] sm:$0xff]  ;;  %v2197_v12 = vld [vmem:[%s587_s19 + $0x8] sm:$0xff]  ;;  %s2054_s24 = smov 96   ;;  %s599_s0 = scalar_lea.vmem %s2400_s18, %s2179_s28 }
  0x14   : > { %1833 = vmatprep.mubr.msk.f32.mxu1 %vm616_vm0, %v2191_v11  ;;  %v603_v14 = vld [vmem:[%s593_s25] sm:$0xff]  ;;  %v604_v15 = vld [vmem:[%s593_s25 + $0x8] sm:$0xff]  ;;  %s2055_s25 = smov 112  }
  0x15   : > { %1834 = vmatmul.mubr.msk.f32.vlgmr.msra.gmra.mrb[0].mxu1 %vm616_vm0, %v2197_v12  ;;  %800 = vperm.xlu0 %1997, %v791_v18  }
  0x16   : > { %1927 = vmatpush3.bf16.msra.mxu1 %v1924_v8  ;;  %1844 = vmatprep.mubr.msk.f32.mxu1 %vm616_vm0, %v603_v14 }
  0x17   : > { %1929 = vmatprep.subr.bf16.mxu1 %v1928_v13 }
  0x1a   : > { %1931 = vmatpush3.bf16.msra.mxu1 %v1928_v13 }
  0x1d   : > { %1845 = vmatmul.mubr.msk.f32.vlgmr.msra.gmra.mrb[2].mxu1 %vm616_vm0, %v604_v15 }
  0x90   : > { %v2231_v32 = vpop.permute.xlu0 %795 }
  0x91   : > { %vm809_vm3 = vcmp.eq.f32.partialorder %v2231_v32, %v2236_v33 }
  0x94   : > { %v2238_v35 = vpop.permute.xlu0 %800 }
  0x95   : > { %vm810_vm4 = vcmp.eq.f32.partialorder %v2238_v35, %v2236_v33 }
  0xe8   : > { %v1835_v20 = vpop.f32.mrb[0].mxu1 }
  0xe9   : > { %v689_v21 = vpop.f32.mrb[1].mxu1  ;;  %v695_v31 = vadd.f32 %v1835_v20, %v1737_v19 }
  0xea   : > { %v690_v22 = vadd.f32 %v1737_v19, %v689_v21 }
  0xec   : > { %1851 = vmatprep.mubr.msk.f32.mxu0 %vm811_vm1, %v690_v22 }
  0xf0   : > { %v1846_v24 = vpop.f32.mrb[2].mxu1 }
  0xf1   : > { %v787_v25 = vadd.f32 %v1846_v24, %v1740_v23  ;;  %v781_v26 = vpop.f32.mrb[3].mxu1 }
  0xf2   : > { %v782_v27 = vadd.f32 %v1740_v23, %v781_v26 }
  0xf4   : > { %v1932_v29 = vpack.c.bf16 %v787_v25, %v782_v27  ;;  %v2224_v30 = vpack.i.bf16 %v787_v25, %v782_v27 }
  0xf6   : > { %1934 = vmatprep.subr.msk.bf16.mxu0 %vm2220_vm2, %v1932_v29 }
  0xf7   : > { %1937 = vmatpush3.bf16.xpose.msk.msra.mxu0 %vm2220_vm2, %v1932_v29 }
  0xfe   : > { %1852 = vmatmul.mubr.msk.f32.vlgmr.msra.gmra.mrb[0].mxu0 %vm811_vm1, %v695_v31 }
 0x1d1   : > { %v1853_v34 = vpop.f32.mrb[0].mxu0 }
 0x1d2   : > { %v890_v36 = vpop.f32.mrb[1].mxu0  ;;  %v900_v37 = vmul.f32 0.25, %v1853_v34 }
 0x1d3   : > { %v899_v38 = vmul.f32 0.25, %v890_v36 }
 0x1d4   : > { %v902_v41 = vsel %vm810_vm4, %v900_v37, -1e+30 }
 0x1d5   : > { %v901_v39 = vsel %vm809_vm3, %v899_v38, -1e+30  ;;  %v906_v42 = vsel %vm811_vm1, %v902_v41, -inf  ;;  %v1227_v38 = vld [vmem:[%s2390_s8 + $0x8] sm:$0xff] }
 0x1d6   : > { %v903_v40 = vsel %vm811_vm1, %v901_v39, -inf }
 0x1d7   : > { %904 = vmax.xlane.f32.xlu1 %v903_v40  ;;  %v1228_v40 = vld [vmem:[%s2390_s8 + $0x10] sm:$0xff] }
 0x1db   : > { %907 = vmax.xlane.f32.xlu1 %v906_v42 }
 0x264   : > { %v905_v43 = vpop.xlane.xlu1 %904 }
 0x265   : > { %v909_v44 = vsub.f32 %v901_v39, %v905_v43 }
 0x267   : > { %v911_v45 = vmul.f32 1.442695, %v909_v44 }
 0x268   : > { %v908_v46 = vpop.xlane.xlu1 %907 }
 0x269   : > { %2013 = vpow2.f32 %v911_v45  ;;  %v910_v47 = vsub.f32 %v902_v41, %v908_v46  ;;  %v1229_v41 = vld [vmem:[%s2390_s8 + $0x18] sm:$0xff] }
 0x26a   : > { %v1956_v42 = vpack.c.bf16 %v1229_v41, %v1228_v40 }
 0x26b   : > { %v913_v48 = vmul.f32 1.442695, %v910_v47 }
 0x26d   : > { %2015 = vpow2.f32 %v913_v48 }
 0x273   : > { %v2014_v49 = vpop.eup %2013 }
 0x274   : > { %v915_v50 = vsel %vm811_vm1, %v2014_v49, 0.0 }
 0x275   : > { %916 = vadd.xlane.f32.xlu0 %v915_v50 }
 0x277   : > { %v2016_v51 = vpop.eup %2015 }
 0x278   : > { %v918_v52 = vsel %vm811_vm1, %v2016_v51, 0.0 }
 0x279   : > { %919 = vadd.xlane.f32.xlu1 %v918_v52 }
 0x28a   : > { %1999 = vrot.lane.b32.xlu1 %v2224_v30, %s2054_s24 }
 0x28e   : > { %2004 = vrot.lane.b32.xlu1 %v2224_v30, %s2055_s25 }
 0x292   : > { %1012 = vrot.lane.b32.xlu1 %v690_v22, %s2055_s25 }
 0x296   : > { %1014 = vrot.lane.b32.xlu1 %v695_v31, %s2055_s25 }
 0x302   : > { %v917_v53 = vpop.xlane.xlu0 %916 }
 0x303   : > { %2017 = vrcp.f32 %v917_v53 }
 0x306   : > { %v920_v54 = vpop.xlane.xlu1 %919 }
 0x307   : > { %2019 = vrcp.f32 %v920_v54 }
 0x30a   : > { %v2000_v55 = vpop.permute.xlu1 %1999 }
 0x30b   : > { %v2002_v56 = vunpack.i.h.bf16 %v2000_v55  ;;  %v2001_v57 = vunpack.i.l.bf16 %v2000_v55 }
 0x30d   : > { %v2018_v58 = vpop.eup %2017  ;;  %v1938_v59 = vpack.c.bf16 %v2002_v56, %v2001_v57 }
 0x30e   : > { %v2005_v60 = vpop.permute.xlu1 %2004  ;;  %v923_v61 = vmul.f32 %v2018_v58, %v2014_v49  ;;  %v1756_v49 = vld [vmem:[%s2391_s9] ss:$0 sm:$0xff] }
 0x30f   : > { %v2007_v62 = vunpack.i.h.bf16 %v2005_v60  ;;  %v2006_v63 = vunpack.i.l.bf16 %v2005_v60  ;;  %1939 = vmatprep.subr.bf16.mxu1 %v1938_v59 }
 0x310   : > { %1941 = vmatpush3.bf16.msra.mxu1 %v1938_v59  ;;  %1858 = vmatprep.mubr.msk.f32.mxu1 %vm811_vm1, %v923_v61 }
 0x311   : > { %v2020_v0 = vpop.eup %2019  ;;  %v1942_v1 = vpack.c.bf16 %v2007_v62, %v2006_v63 }
 0x312   : > { %v924_v2 = vmul.f32 %v2020_v0, %v2016_v51  ;;  %v1013_v3 = vpop.permute.xlu1 %1012 }
 0x313   : > { %1944 = vmatprep.subr.msk.bf16.mxu1 %vm2220_vm2, %v1942_v1 }
 0x314   : > { %1859 = vmatmul.mubr.msk.f32.vlgmr.msra.gmra.mrb[4].mxu1 %vm811_vm1, %v924_v2 }
 0x315   : > { %1865 = vmatprep.mubr.msk.f32.mxu1 %vm811_vm1, %v1013_v3  ;;  %v1366_v3 = vld [vmem:[%s2394_s12 + $0x8] sm:$0xff] }
 0x316   : > { %v1015_v4 = vpop.permute.xlu1 %1014 }
 0x319   : > { %1947 = vmatpush3.bf16.xpose.msk.msra.mxu1 %vm2220_vm2, %v1942_v1 }
 0x320   : > { %1866 = vmatmul.mubr.msk.f32.vlgmr.msra.gmra.mrb[6].mxu1 %vm811_vm1, %v1015_v4 }
 0x3e7   : > { %v2264_v5 = vpop.f32.mrb[4].mxu1 }
 0x3e8   : > { %v1003_v6 = vpop.f32.mrb[5].mxu1 }
 0x3f3   : > { %v1867_v7 = vpop.f32.mrb[6].mxu1 }
 0x3f4   : > { %v1104_v8 = vmul.f32 0.25, %v1867_v7  ;;  %v1094_v9 = vpop.f32.mrb[7].mxu1 }
 0x3f5   : > { %v1103_v10 = vmul.f32 0.25, %v1094_v9 }
 0x3f6   : > { %v1106_v13 = vsel %vm810_vm4, %v1104_v8, -1e+30 }
 0x3f7   : > { %v1110_v14 = vsel %vm811_vm1, %v1106_v13, -inf  ;;  %v1105_v15 = vsel %vm809_vm3, %v1103_v10, -1e+30 }
 0x3f8   : > { %1111 = vmax.xlane.f32.xlu1 %v1110_v14  ;;  %v1107_v16 = vsel %vm811_vm1, %v1105_v15, -inf }
 0x3f9   : > { %1108 = vmax.xlane.f32.xlu0 %v1107_v16 }
 0x485   : > { %v1112_v17 = vpop.xlane.xlu1 %1111 }
 0x486   : > { %v1114_v18 = vsub.f32 %v1106_v13, %v1112_v17  ;;  %v1109_v19 = vpop.xlane.xlu0 %1108  ;;  %v1759_v17 = vld [vmem:[%s2392_s10] ss:$0 sm:$0xff] }
 0x487   : > { %v1113_v20 = vsub.f32 %v1105_v15, %v1109_v19  ;;  %v1760_v19 = vld [vmem:[%s2393_s11] ss:$0 sm:$0xff] }
 0x488   : > { %v1117_v21 = vmul.f32 1.442695, %v1114_v18 }
 0x489   : > { %v1115_v22 = vmul.f32 1.442695, %v1113_v20 }
 0x48a   : > { %2021 = vpow2.f32 %v1117_v21 }
 0x48b   : > { %2023 = vpow2.f32 %v1115_v22 }
 0x494   : > { %v2022_v23 = vpop.eup %2021 }
 0x495   : > { %v1122_v24 = vsel %vm811_vm1, %v2022_v23, 0.0  ;;  %v2024_v25 = vpop.eup %2023 }
 0x496   : > { %1123 = vadd.xlane.f32.xlu0 %v1122_v24  ;;  %v1119_v26 = vsel %vm811_vm1, %v2024_v25, 0.0 }
 0x49a   : > { %1120 = vadd.xlane.f32.xlu0 %v1119_v26  ;;  %v1511_v26 = vld [vmem:[%s2396_s14] sm:$0xff] }
 0x4b0   : > { %2009 = vrot.lane.b32.xlu0 %v2224_v30, %s2056_s26  ;;  %v1226_v30 = vld [vmem:[%s2390_s8] sm:$0xff] }
 0x4b1   : > { %v1952_v39 = vpack.c.bf16 %v1227_v38, %v1226_v30  ;;  %v1761_v38 = vld [vmem:[%s2395_s13] ss:$0 sm:$0xff] }
 0x523   : > { %v1124_v27 = vpop.xlane.xlu0 %1123 }
 0x524   : > { %2025 = vrcp.f32 %v1124_v27  ;;  %v1512_v27 = vld [vmem:[%s2396_s14 + $0x8] sm:$0xff] }
 0x527   : > { %v1121_v28 = vpop.xlane.xlu0 %1120 }
 0x528   : > { %2027 = vrcp.f32 %v1121_v28  ;;  %v1968_v28 = vpack.c.bf16 %v1512_v27, %v1511_v26 }
 0x52b   : > { %v2010_v29 = vpop.permute.xlu0 %2009 }
 0x52c   : > { %v2012_v31 = vunpack.i.h.bf16 %v2010_v29  ;;  %v2011_v32 = vunpack.i.l.bf16 %v2010_v29  ;;  %v1513_v29 = vld [vmem:[%s2396_s14 + $0x10] sm:$0xff] }
 0x52e   : > { %v1948_v33 = vpack.c.bf16 %v2012_v31, %v2011_v32  ;;  %v2026_v34 = vpop.eup %2025  ;;  %v1514_v31 = vld [vmem:[%s2396_s14 + $0x18] sm:$0xff] }
 0x52f   : > { %v1128_v37 = vmul.f32 %v2026_v34, %v2022_v23  ;;  %v1972_v32 = vpack.c.bf16 %v1514_v31, %v1513_v29  ;;  %v1516_v34 = vld [vmem:[%s2396_s14 + $0x28] sm:$0xff] }
 0x530   : > { %1949 = vmatprep.subr.bf16.mxu0 %v1948_v33 }
 0x531   : > { %1951 = vmatpush3.bf16.msra.mxu0 %v1948_v33  ;;  %v1515_v33 = vld [vmem:[%s2396_s14 + $0x20] sm:$0xff] }
 0x532   : > { %v2028_v35 = vpop.eup %2027  ;;  %1953 = vmatprep.subr.bf16.mxu0 %v1952_v39 }
 0x533   : > { %v1127_v36 = vmul.f32 %v2028_v35, %v2024_v25  ;;  %v1976_v35 = vpack.c.bf16 %v1516_v34, %v1515_v33  ;;  %v1770_v34 = vld [vmem:[%s2397_s15] ss:$0 sm:$0xff] }
 0x535   : > { %1872 = vmatprep.mubr.msk.f32.mxu0 %vm811_vm1, %v1127_v36  ;;  %v1517_v36 = vld [vmem:[%s2396_s14 + $0x30] sm:$0xff] }
 0x536   : > { %1873 = vmatmul.mubr.msk.f32.vlgmr.msra.gmra.mrb[2].mxu0 %vm811_vm1, %v1128_v37  ;;  %v1518_v37 = vld [vmem:[%s2396_s14 + $0x38] sm:$0xff] }
 0x537   : > { %1955 = vmatpush3.bf16.msra.mxu0 %v1952_v39  ;;  %v1980_v30 = vpack.c.bf16 %v1518_v37, %v1517_v36 }
 0x538   : > { %1957 = vmatprep.subr.bf16.mxu0 %v1956_v42 }
 0x53b   : > { %1959 = vmatpush3.bf16.msra.mxu0 %v1956_v42 }
 0x53c   : > { %1969 = vmatprep.subr.bf16.mxu0 %v1968_v28 }
 0x609   : > { %v1874_v43 = vpop.f32.mrb[2].mxu0 }
 0x60a   : > { %v1207_v44 = vpop.f32.mrb[3].mxu0 }
 0x60b   : > { %1218 = vrot.lane.b32.xlu0 %v1207_v44, %s2057_s23 }
 0x60f   : > { %1220 = vrot.lane.b32.xlu0 %v1874_v43, %s2057_s23 }
 0x67d   : > { %v1219_v45 = vpop.permute.xlu0 %1218 }
 0x67e   : > { %v1224_v46 = vsel %vm811_vm1, %v1003_v6, %v1219_v45  ;;  %v1368_v6 = vld [vmem:[%s2394_s12 + $0x18] sm:$0xff] }
 0x67f   : > { %1883 = vmatprep.mubr.msk.f32.mxu0 %vm616_vm0, %v1224_v46 }
 0x681   : > { %v1221_v47 = vpop.permute.xlu0 %1220 }
 0x682   : > { %v1225_v48 = vsel %vm811_vm1, %v2264_v5, %v1221_v47  ;;  %v1367_v5 = vld [vmem:[%s2394_s12 + $0x10] sm:$0xff] }
 0x683   : > { %1884 = vmatmul.mubr.msk.f32.vlgmr.msra.gmra.mrb[4].mxu0 %vm616_vm0, %v1225_v48  ;;  %v1964_v7 = vpack.c.bf16 %v1368_v6, %v1367_v5 }
 0x684   : > { %1971 = vmatpush3.bf16.msra.mxu0 %v1968_v28 }
 0x685   : > { %1973 = vmatprep.subr.bf16.mxu0 %v1972_v32 }
 0x688   : > { %1975 = vmatpush3.bf16.msra.mxu0 %v1972_v32 }
 0x689   : > { %1977 = vmatprep.subr.bf16.mxu0 %v1976_v35 }
 0x68c   : > { %1979 = vmatpush3.bf16.msra.mxu0 %v1976_v35 }
 0x68d   : > { %1981 = vmatprep.subr.bf16.mxu0 %v1980_v30 }
 0x690   : > { %1983 = vmatpush3.bf16.msra.mxu0 %v1980_v30 }
 0x756   : > { %v1885_v50 = vpop.f32.mrb[4].mxu0 }
 0x757   : > { %v1315_v51 = vadd.f32 %v1885_v50, %v1756_v49  ;;  %v1309_v52 = vpop.f32.mrb[5].mxu0 }
 0x758   : > { %v1310_v53 = vadd.f32 %v1756_v49, %v1309_v52 }
 0x759   : > { %v1319_v54 = vadd.f32 %v1315_v51, %v2197_v12 }
 0x75a   : > { %v1318_v55 = vadd.f32 %v1310_v53, %v2191_v11  ;;  %v1365_v11 = vld [vmem:[%s2394_s12] sm:$0xff] }
 0x75b   : > { %v1325_v56 = vsel %vm616_vm0, %v1319_v54, 0.0  ;;  %v1960_v4 = vpack.c.bf16 %v1366_v3, %v1365_v11 }
 0x75c   : > { %1326 = vadd.xlane.f32.xlu0 %v1325_v56  ;;  %v1322_v57 = vsel %vm616_vm0, %v1318_v55, 0.0 }
 0x75d   : > { %1323 = vadd.xlane.f32.xlu1 %v1322_v57  ;;  %1961 = vmatprep.subr.bf16.mxu1 %v1960_v4 }
 0x75e   : > { %1963 = vmatpush3.bf16.msra.mxu1 %v1960_v4 }
 0x75f   : > { %1965 = vmatprep.subr.bf16.mxu1 %v1964_v7 }
 0x762   : > { %1967 = vmatpush3.bf16.msra.mxu1 %v1964_v7 }
 0x7e9   : > { %v1327_v58 = vpop.xlane.xlu0 %1326 }
 0x7ea   : > { %v1330_v59 = vmul.f32 0.03125, %v1327_v58  ;;  %v1324_v60 = vpop.xlane.xlu1 %1323 }
 0x7eb   : > { %v1329_v61 = vmul.f32 0.03125, %v1324_v60 }
 0x7ec   : > { %v1332_v62 = vsub.f32 %v1319_v54, %v1330_v59 }
 0x7ed   : > { %v1331_v63 = vsub.f32 %v1318_v55, %v1329_v61 }
 0x7ee   : > { %v1334_v2 = vmul.f32 %v1332_v62, %v1332_v62 }
 0x7ef   : > { %v1333_v0 = vmul.f32 %v1331_v63, %v1331_v63 }
 0x7f0   : > { %v1338_v12 = vsel %vm616_vm0, %v1334_v2, 0.0 }
 0x7f1   : > { %v1335_v1 = vsel %vm616_vm0, %v1333_v0, 0.0 }
 0x7f2   : > { %1336 = vadd.xlane.f32.xlu1 %v1335_v1 }
 0x7f6   : > { %1339 = vadd.xlane.f32.xlu1 %v1338_v12 }
 0x87f   : > { %v1337_v8 = vpop.xlane.xlu1 %1336 }
 0x880   : > { %v1341_v9 = vmul.f32 0.03125, %v1337_v8 }
 0x882   : > { %v1343_v10 = vadd.f32 1e-05, %v1341_v9 }
 0x883   : > { %v1340_v13 = vpop.xlane.xlu1 %1339 }
 0x884   : > { %2029 = vrsqrt.f32 %v1343_v10  ;;  %v1342_v14 = vmul.f32 0.03125, %v1340_v13 }
 0x886   : > { %v1344_v15 = vadd.f32 1e-05, %v1342_v14 }
 0x888   : > { %2031 = vrsqrt.f32 %v1344_v15 }
 0x88e   : > { %v2030_v16 = vpop.eup %2029 }
 0x88f   : > { %v1347_v18 = vmul.f32 %v2030_v16, %v1331_v63 }
 0x891   : > { %v1355_v20 = vmul.f32 %v1759_v17, %v1347_v18 }
 0x892   : > { %v2032_v21 = vpop.eup %2031 }
 0x893   : > { %v1348_v22 = vmul.f32 %v2032_v21, %v1332_v62  ;;  %v2323_v23 = vadd.f32 %v1760_v19, %v1355_v20 }
 0x895   : > { %v1356_v24 = vmul.f32 %v1759_v17, %v1348_v22  ;;  %1894 = vmatprep.mubr.msk.f32.mxu1 %vm616_vm0, %v2323_v23 }
 0x897   : > { %v2327_v25 = vadd.f32 %v1760_v19, %v1356_v24 }
 0x899   : > { %1895 = vmatmul.mubr.msk.f32.vlgmr.msra.gmra.mrb[8].mxu1 %vm616_vm0, %v2327_v25 }
 0x96c   : > { %v1896_v39 = vpop.f32.mrb[8].mxu1 }
 0x96d   : > { %v1454_v40 = vadd.f32 %v1896_v39, %v1761_v38  ;;  %v1448_v41 = vpop.f32.mrb[9].mxu1 }
 0x96e   : > { %v1449_v42 = vadd.f32 %v1761_v38, %v1448_v41 }
 0x96f   : > { %v1458_v43 = vmul.f32 0.70710677, %v1454_v40  ;;  %v1506_v28 = vmul.f32 0.5, %v1454_v40 }
 0x970   : > { %v1457_v44 = vmul.f32 0.70710677, %v1449_v42  ;;  %v1505_v26 = vmul.f32 0.5, %v1449_v42 }
 0x971   : > { %v1460_v45 = vand.u32 2147483647, %v1458_v43  ;;  %vm1500_vm5 = vcmp.lt.f32.partialorder %v1458_v43, 0.0 }
 0x972   : > { %v1459_v46 = vand.u32 2147483647, %v1457_v44  ;;  %vm1499_vm6 = vcmp.lt.f32.partialorder %v1457_v44, 0.0 }
 0x973   : > { %v1462_v47 = vmul.f32 0.3275911, %v1460_v45  ;;  %v1488_v51 = vsub.f32 0.0, %v1460_v45 }
 0x974   : > { %v1461_v48 = vmul.f32 0.3275911, %v1459_v46  ;;  %v1487_v52 = vsub.f32 0.0, %v1459_v46 }
 0x975   : > { %v1464_v49 = vadd.f32 1.0, %v1462_v47  ;;  %v1490_v54 = vmul.f32 %v1488_v51, %v1460_v45 }
 0x976   : > { %v1463_v50 = vadd.f32 1.0, %v1461_v48  ;;  %v1489_v57 = vmul.f32 %v1487_v52, %v1459_v46 }
 0x977   : > { %2033 = vrcp.f32 %v1464_v49  ;;  %v1493_v60 = vmul.f32 1.442695, %v1490_v54 }
 0x978   : > { %2035 = vrcp.f32 %v1463_v50  ;;  %v1491_v63 = vmul.f32 1.442695, %v1489_v57  ;;  %v1772_v57 = vld [vmem:[%s2399_s17] ss:$0 sm:$0xff] }
 0x979   : > { %2037 = vpow2.f32 %v1493_v60 }
 0x97a   : > { %2039 = vpow2.f32 %v1491_v63 }
 0x981   : > { %v2034_v53 = vpop.eup %2033 }
 0x982   : > { %v2036_v55 = vpop.eup %2035  ;;  %v1470_v56 = vmul.f32 1.0614054, %v2034_v53 }
 0x983   : > { %v1469_v58 = vmul.f32 1.0614054, %v2036_v55  ;;  %v2038_v10 = vpop.eup %2037 }
 0x984   : > { %v1765_v59 = vadd.f32 -1.4531521, %v1470_v56  ;;  %v2040_v14 = vpop.eup %2039 }
 0x985   : > { %v1764_v61 = vadd.f32 -1.4531521, %v1469_v58 }
 0x986   : > { %v1474_v62 = vmul.f32 %v2034_v53, %v1765_v59 }
 0x987   : > { %v1473_v0 = vmul.f32 %v2036_v55, %v1764_v61 }
 0x988   : > { %v1476_v1 = vadd.f32 1.4214138, %v1474_v62 }
 0x989   : > { %v1475_v2 = vadd.f32 1.4214138, %v1473_v0 }
 0x98a   : > { %v1478_v12 = vmul.f32 %v2034_v53, %v1476_v1 }
 0x98b   : > { %v1477_v11 = vmul.f32 %v2036_v55, %v1475_v2 }
 0x98c   : > { %v1767_v3 = vadd.f32 -0.28449672, %v1478_v12 }
 0x98d   : > { %v1766_v4 = vadd.f32 -0.28449672, %v1477_v11 }
 0x98e   : > { %v1482_v5 = vmul.f32 %v2034_v53, %v1767_v3 }
 0x98f   : > { %v1481_v6 = vmul.f32 %v2036_v55, %v1766_v4 }
 0x990   : > { %v1484_v7 = vadd.f32 0.2548296, %v1482_v5 }
 0x991   : > { %v1483_v8 = vadd.f32 0.2548296, %v1481_v6 }
 0x992   : > { %v1486_v9 = vmul.f32 %v2034_v53, %v1484_v7 }
 0x993   : > { %v1485_v13 = vmul.f32 %v2036_v55, %v1483_v8  ;;  %v1771_v55 = vld [vmem:[%s2398_s16] ss:$0 sm:$0xff] }
 0x994   : > { %v1496_v15 = vmul.f32 %v2038_v10, %v1486_v9 }
 0x995   : > { %v1495_v16 = vmul.f32 %v2040_v14, %v1485_v13 }
 0x996   : > { %v1498_v17 = vsub.f32 1.0, %v1496_v15 }
 0x997   : > { %v1497_v18 = vsub.f32 1.0, %v1495_v16 }
 0x998   : > { %v1502_v19 = vsub.f32 0.0, %v1498_v17 }
 0x999   : > { %v1501_v20 = vsub.f32 0.0, %v1497_v18 }
 0x99a   : > { %v1504_v21 = vsel %vm1500_vm5, %v1502_v19, %v1498_v17 }
 0x99b   : > { %v1508_v22 = vadd.f32 1.0, %v1504_v21  ;;  %v1503_v24 = vsel %vm1499_vm6, %v1501_v20, %v1497_v18 }
 0x99c   : > { %v1507_v27 = vadd.f32 1.0, %v1503_v24 }
 0x99d   : > { %v1510_v31 = vmul.f32 %v1508_v22, %v1506_v28 }
 0x99e   : > { %v1509_v29 = vmul.f32 %v1507_v27, %v1505_v26 }
 0x9a0   : > { %1913 = vmatprep.mubr.msk.f32.mxu0 %vm1519_vm7, %v1509_v29 }
 0x9a1   : > { %1914 = vmatmul.mubr.msk.f32.vlgmr.msra.gmra.mrb[6].mxu0 %vm1519_vm7, %v1510_v31 }
 0xa74   : > { %v1915_v32 = vpop.f32.mrb[6].mxu0 }
 0xa75   : > { %v1592_v33 = vpop.f32.mrb[7].mxu0  ;;  %v1602_v35 = vadd.f32 %v1915_v32, %v2327_v25 }
 0xa76   : > { %v1601_v36 = vadd.f32 %v1592_v33, %v2323_v23 }
 0xa77   : > { %v1611_v38 = vadd.f32 %v1770_v34, %v1602_v35 }
 0xa78   : > { %v1610_v37 = vadd.f32 %v1770_v34, %v1601_v36 }
 0xa79   : > { %v1617_v39 = vsel %vm616_vm0, %v1611_v38, 0.0 }
 0xa7a   : > { %v1614_v30 = vsel %vm616_vm0, %v1610_v37, 0.0 }
 0xa7b   : > { %1615 = vadd.xlane.f32.xlu1 %v1614_v30 }
 0xa7f   : > { %1618 = vadd.xlane.f32.xlu1 %v1617_v39 }
 0xb08   : > { %v1616_v40 = vpop.xlane.xlu1 %1615 }
 0xb09   : > { %v1620_v41 = vmul.f32 0.03125, %v1616_v40 }
 0xb0b   : > { %v1622_v42 = vsub.f32 %v1610_v37, %v1620_v41 }
 0xb0c   : > { %v1619_v43 = vpop.xlane.xlu1 %1618 }
 0xb0d   : > { %v1621_v44 = vmul.f32 0.03125, %v1619_v43  ;;  %v1624_v45 = vmul.f32 %v1622_v42, %v1622_v42 }
 0xb0f   : > { %v1623_v46 = vsub.f32 %v1611_v38, %v1621_v44  ;;  %v1626_v47 = vsel %vm616_vm0, %v1624_v45, 0.0 }
 0xb10   : > { %1627 = vadd.xlane.f32.xlu1 %v1626_v47 }
 0xb11   : > { %v1625_v25 = vmul.f32 %v1623_v46, %v1623_v46 }
 0xb13   : > { %v1629_v23 = vsel %vm616_vm0, %v1625_v25, 0.0 }
 0xb14   : > { %1630 = vadd.xlane.f32.xlu1 %v1629_v23 }
 0xb9d   : > { %v1628_v48 = vpop.xlane.xlu1 %1627 }
 0xb9e   : > { %v1632_v49 = vmul.f32 0.03125, %v1628_v48 }
 0xba0   : > { %v1634_v50 = vadd.f32 1e-05, %v1632_v49 }
 0xba1   : > { %v1631_v51 = vpop.xlane.xlu1 %1630 }
 0xba2   : > { %2041 = vrsqrt.f32 %v1634_v50  ;;  %v1633_v52 = vmul.f32 0.03125, %v1631_v51 }
 0xba4   : > { %v1635_v53 = vadd.f32 1e-05, %v1633_v52 }
 0xba6   : > { %2043 = vrsqrt.f32 %v1635_v53 }
 0xbac   : > { %v2042_v54 = vpop.eup %2041 }
 0xbad   : > { %v1638_v56 = vmul.f32 %v2042_v54, %v1622_v42 }
 0xbaf   : > { %v1646_v58 = vmul.f32 %v1771_v55, %v1638_v56 }
 0xbb0   : > { %v2044_v59 = vpop.eup %2043 }
 0xbb1   : > { %v1654_v60 = vadd.f32 %v1772_v57, %v1646_v58  ;;  %v1639_v61 = vmul.f32 %v2044_v59, %v1623_v46 }
 0xbb3   : > { %1656 = vst.msk [vmem:[%s599_s0] sm:$0xff] %vm616_vm0, %v1654_v60  ;;  %v1647_v62 = vmul.f32 %v1771_v55, %v1639_v61 }
 0xbb5   : > { %v1655_v63 = vadd.f32 %v1772_v57, %v1647_v62 }
 0xbb7   : > { %1657 = vst.msk [vmem:[%s599_s0 + $0x8] sm:$0xff] %vm616_vm0, %v1655_v63 }
 0xbb8 PF: > { %s28_s27 = sadd.s32 1, %s2051_s27  }
 0xbb9   : > { %p25_p4 = scmp.ge.s32.totalorder %s28_s27, 4  }
 0xbbb   :  { %27 = sbr.rel (!%p25_p4) target bundleno = 4 (0x4), region = 125 }

// kernel: crossformer_forward.31
= control target key start
LH: loop header
LB: loop body
LE: loop exit
PB: predicated region body
PF: predicated region fallthrough
CT: control target
= control target key end

     0   :  { %s2373_s0 = inlined_call_operand.vmem [shape: f32[16,32], index: 0, kind: input, shape index: {}]   ;;  %s2374_s1 = inlined_call_operand.vmem [shape: f32[32,32], index: 1, kind: input, shape index: {}]   ;;  %s2375_s2 = inlined_call_operand.vmem [shape: f32[8,1], index: 2, kind: input, shape index: {}]   ;;  %s2376_s3 = inlined_call_operand.vmem [shape: f32[1,16], index: 3, kind: input, shape index: {}]   ;;  %s2377_s4 = inlined_call_operand.vmem [shape: f32[32,32], index: 4, kind: input, shape index: {}]   ;;  %s2378_s5 = inlined_call_operand.vmem [shape: f32[1,32], index: 5, kind: input, shape index: {}]   ;;  %s2379_s6 = inlined_call_operand.vmem [shape: f32[32,64], index: 6, kind: input, shape index: {}]   ;;  %s2380_s7 = inlined_call_operand.vmem [shape: f32[1,64], index: 7, kind: input, shape index: {}]   ;;  %s2381_s8 = inlined_call_operand.vmem [shape: f32[32,32], index: 8, kind: input, shape index: {}]   ;;  %s2382_s9 = inlined_call_operand.vmem [shape: f32[1,32], index: 9, kind: input, shape index: {}]   ;;  %s2383_s10 = inlined_call_operand.vmem [shape: f32[1,32], index: 10, kind: input, shape index: {}]   ;;  %s2384_s11 = inlined_call_operand.vmem [shape: f32[1,32], index: 11, kind: input, shape index: {}]   ;;  %s2385_s12 = inlined_call_operand.vmem [shape: f32[32,32], index: 12, kind: input, shape index: {}]   ;;  %s2386_s13 = inlined_call_operand.vmem [shape: f32[1,32], index: 13, kind: input, shape index: {}]   ;;  %s2387_s14 = inlined_call_operand.vmem [shape: f32[32,32], index: 14, kind: input, shape index: {}]   ;;  %s2388_s15 = inlined_call_operand.vmem [shape: f32[1,32], index: 15, kind: input, shape index: {}]   ;;  %s2389_s16 = inlined_call_operand.vmem [shape: f32[1,32], index: 16, kind: input, shape index: {}]   ;;  %s2390_s17 = inlined_call_operand.vmem [shape: f32[1,32], index: 17, kind: input, shape index: {}]   ;;  %s2391_s18 = inlined_call_operand.vmem [shape: f32[32,4], index: 18, kind: input, shape index: {}]   ;;  %s2392_s19 = inlined_call_operand.vmem [shape: f32[1,4], index: 19, kind: input, shape index: {}]   ;;  %s2393_s20 = inlined_call_operand.vmem [shape: f32[16,32], index: 20, kind: output, shape index: {0}]   ;;  %s2394_s21 = inlined_call_operand.vmem [shape: f32[16,4], index: 21, kind: output, shape index: {1}]  }
   0x1   :  { %2396 = sst [smem:[#allocation2_spill]] %s2373_s0 }
   0x2   :  { %2397 = sst [smem:[#allocation3_spill]] %s2374_s1 }
   0x3   :  { %2398 = sst [smem:[#allocation4_spill]] %s2375_s2  ;;  %s2157_s2 = smov 0  }
   0x4   :  { %2399 = sst [smem:[#allocation5_spill]] %s2376_s3 }
   0x5   :  { %2400 = sst [smem:[#allocation6_spill]] %s2377_s4 }
   0x6   :  { %2401 = sst [smem:[#allocation7_spill]] %s2378_s5 }
   0x7 LB: > { %s1754_s25 = sadd.s32 4294967295, %s2037_s2   ;;  %p1758_p0 = scmp.ge.s32.totalorder %s2037_s2, 1  ;;  %s2037_s2 = sphi %s2157_s2, %s32_s2  }
   0x8   : > { %p600_p1 = scmp.lt.s32.totalorder %s2037_s2, 3 }
   0xa   : > { %p601_p2 = pnand %p1758_p0, %p600_p1 }
   0xb   : > { %v773_v0 = vld [vmem:[%s2379_s6] sm:$0xff] (!%p601_p2)  ;;  %v774_v1 = vld [vmem:[%s2379_s6 + $0x8] sm:$0xff] (!%p601_p2)  ;;  %v775_v2 = vld [vmem:[%s2379_s6 + $0x10] sm:$0xff] (!%p601_p2)  ;;  %s1760_s4 = sshll.u32 (!%p601_p2), %s1754_s25, 1  ;;  %v2039_v5 = vmov (!%p601_p2), 0.0|0.0   ;;  %s2403_s24 = sld [smem:[#allocation6_spill]] (!%p601_p2) }
   0xc   : > { %604 = sbr.rel (%p601_p2) target bundleno = 3177 (0xc69), region = 100  ;;  %v1937_v3 = vpack.c.bf16 (!%p601_p2), %v774_v1, %v773_v0  ;;  %v776_v4 = vld [vmem:[%s2379_s6 + $0x18] sm:$0xff] (!%p601_p2)  ;;  %p2177_p3 = scmp.lt.s32.totalorder (!%p601_p2), %s1760_s4, 3  ;;  %1931 = vmatprep.subr.bf16.mxu0 (!%p601_p2), %v2039_v5  ;;  %vm2040_vm0 = vmmov (!%p601_p2), 0   ;;  %v2041_v12 = vmov (!%p601_p2), 0.0   ;;  %vm699_vm1 = vcmask (!%p601_p2), 261120  }
   0xd   : > { %v1941_v8 = vpack.c.bf16 (!%p601_p2), %v776_v4, %v775_v2  ;;  %1845 = vmatprep.mubr.msk.f32.mxu0 (!%p601_p2), %vm2040_vm0, %v2041_v12  ;;  %p667_p4 = scmp.lt.s32.totalorder (!%p601_p2), %s1754_s25, 1  ;;  %s2404_s1 = sld [smem:[#allocation3_spill]] (!%p601_p2)  ;;  %v2042_v18 = vmov (!%p601_p2), 0   ;;  %v1766_v19 = vld [vmem:[%s2380_s7] ss:$0 sm:$0xff] (!%p601_p2)  ;;  %vm879_vm2 = vcmask (!%p601_p2), 130048  }
   0xe   : > { %1938 = vmatprep.subr.bf16.mxu1 (!%p601_p2), %v1937_v3  ;;  %s2405_s28 = sld [smem:[#allocation2_spill]] (!%p601_p2)  ;;  %s2406_s0 = sld [smem:[#allocation4_spill]] (!%p601_p2)  ;;  %1999 = vset.pattern.permute.xlu0 (!%p601_p2), %v2042_v18  ;;  %vm2228_vm3 = vmpackc.low (!%p601_p2), %vm879_vm2, %vm879_vm2  ;;  %vm1656_vm6 = vcmask (!%p601_p2), 31744  }
   0xf   : > { %1940 = vmatpush3.bf16.msra.mxu1 (!%p601_p2), %v1937_v3  ;;  %s2043_s23 = smov (!%p601_p2), 96   ;;  %s2409_s3 = sld [smem:[#allocation7_spill]] (!%p601_p2) }
  0x10   : > { %1942 = vmatprep.subr.bf16.mxu1 (!%p601_p2), %v1941_v8  ;;  %s2044_s22 = smov (!%p601_p2), 112  }
  0x11   : > { %v688_v6 = vld [vmem:[%s2403_s24] sm:$0xff] (!%p601_p2)  ;;  %v689_v7 = vld [vmem:[%s2403_s24 + $0x8] sm:$0xff] (!%p601_p2)  ;;  %v690_v10 = vld [vmem:[%s2403_s24 + $0x10] sm:$0xff] (!%p601_p2) }
  0x12   : > { %v1932_v9 = vpack.c.bf16 (!%p601_p2), %v689_v7, %v688_v6  ;;  %v691_v11 = vld [vmem:[%s2403_s24 + $0x18] sm:$0xff] (!%p601_p2) }
  0x13   : > { %s2412_s4 = smov (!%p2177_p3, %s1760_s4), 3  ;;  %s2414_s25 = smov (!%p667_p4, %s1754_s25), 1  ;;  %v1935_v13 = vpack.c.bf16 %v691_v11, %v690_v10  ;;  %1944 = vmatpush3.bf16.msra.mxu1 %v1941_v8  ;;  %v1230_v11 = vld [vmem:[%s2381_s8] sm:$0xff] }
  0x14   : > { %1933 = vmatpush3.bf16.msra.mxu0 %v1932_v9  ;;  %s1761_s30 = sshll.u32 %s2412_s4, 3  ;;  %s2202_s27 = sshll.u32 %s2414_s25, 3  ;;  %1949 = vmatprep.subr.bf16.mxu1 %v2039_v5  ;;  %v865_v17 = vld [vmem:[%s2406_s0] sm:$0xff] }
  0x15   : > { %1934 = vmatprep.subr.bf16.mxu0 %v2039_v5  ;;  %s675_s26 = scalar_lea.vmem %s2404_s1, %s1761_s30  ;;  %s670_s29 = scalar_lea.vmem %s2405_s28, %s2202_s27  ;;  %869 = vperm.xlu0 %1999, %v865_v17   ;;  %v1764_v29 = vld [vmem:[%s2409_s3] ss:$0 sm:$0xff]  ;;  %v1233_v17 = vld [vmem:[%s2381_s8 + $0x18] sm:$0xff] }
  0x16   : > { %v686_v14 = vld [vmem:[%s675_s26] sm:$0xff]  ;;  %v687_v15 = vld [vmem:[%s675_s26 + $0x8] sm:$0xff]  ;;  %s2410_s25 = sld [smem:[#allocation5_spill]]  ;;  %s2045_s4 = smov 80  }
  0x17   : > { %1856 = vmatprep.mubr.msk.f32.mxu1 %vm699_vm1, %v686_v14  ;;  %v2209_v16 = vld [vmem:[%s670_s29] sm:$0xff]  ;;  %v1232_v14 = vld [vmem:[%s2381_s8 + $0x10] sm:$0xff]  ;;  %s2046_s28 = smov 16   ;;  %s680_s30 = scalar_lea.vmem %s2393_s20, %s2202_s27 }
  0x18   : > { %1936 = vmatpush3.bf16.msra.mxu0 %v1935_v13  ;;  %1857 = vmatmul.mubr.msk.f32.vlgmr.msra.gmra.mrb[0].mxu1 %vm699_vm1, %v687_v15  ;;  %v1231_v13 = vld [vmem:[%s2381_s8 + $0x8] sm:$0xff]  ;;  %v1963_v18 = vpack.c.bf16 %v1233_v17, %v1232_v14  ;;  %s684_s3 = scalar_lea.vmem %s2394_s21, %s2202_s27 }
  0x19   : > { %1945 = vmatprep.subr.bf16.mxu0 %v2039_v5  ;;  %1870 = vmatprep.mubr.msk.f32.mxu1 %vm2040_vm0, %v2041_v12  ;;  %v1960_v15 = vpack.c.bf16 %v1231_v13, %v1230_v11 }
  0x1b   : > { %1846 = vmatmul.mubr.msk.f32.vlgmr.msra.gmra.mrb[0].mxu0 %vm699_vm1, %v2209_v16 }
  0x1c   : > { %1863 = vmatprep.mubr.msk.f32.mxu0 %vm2040_vm0, %v2041_v12  ;;  %v1769_v35 = vld [vmem:[%s2410_s25] ss:$0 sm:$0xff] }
  0x94   : > { %v870_v36 = vpop.permute.xlu0 %869 }
  0x95   : > { %vm878_vm4 = vcmp.eq.f32.partialorder %v870_v36, %v1769_v35  ;;  %v1346_v35 = vld [vmem:[%s2385_s12 + $0x8] sm:$0xff] }
  0xeb   : > { %v1858_v20 = vpop.f32.mrb[0].mxu1 }
  0xec   : > { %v862_v21 = vadd.f32 %v1858_v20, %v1766_v19  ;;  %v856_v22 = vpop.f32.mrb[1].mxu1 }
  0xed   : > { %v857_v24 = vadd.f32 %v1766_v19, %v856_v22 }
  0xee   : > { %v769_v23 = vpop.f32.mrb[0].mxu0 }
  0xef   : > { %v1847_v25 = vpop.f32.mrb[1].mxu0  ;;  %v1946_v27 = vpack.c.bf16 %v862_v21, %v857_v24  ;;  %v2232_v28 = vpack.i.bf16 %v862_v21, %v857_v24  ;;  %v770_v30 = vadd.f32 %v1764_v29, %v769_v23  ;;  %v1778_v23 = vld [vmem:[%s2382_s9] ss:$0 sm:$0xff] }
  0xf1   : > { %2001 = vrot.lane.b32.xlu1 %v2232_v28, %s2043_s23  ;;  %1948 = vmatpush3.bf16.xpose.msk.msra.mxu0 %vm2228_vm3, %v1946_v27 }
  0xf2   : > { %1956 = vmatprep.subr.bf16.mxu0 %v2039_v5 }
  0xf5   : > { %2006 = vrot.lane.b32.xlu1 %v2232_v28, %s2044_s22 }
  0xf8   : > { %1864 = vmatmul.mubr.msk.f32.vlgmr.msra.gmra.mrb[2].mxu0 %vm879_vm2, %v770_v30 }
  0xf9   : > { %1884 = vmatprep.mubr.msk.f32.mxu0 %vm2040_vm0, %v2041_v12 }
 0x163   : > { %v2002_v31 = vpop.permute.xlu1 %2001 }
 0x164   : > { %v2004_v32 = vunpack.i.h.bf16 %v2002_v31  ;;  %v2003_v33 = vunpack.i.l.bf16 %v2002_v31 }
 0x166   : > { %v1950_v34 = vpack.c.bf16 %v2004_v32, %v2003_v33 }
 0x167   : > { %v2007_v47 = vpop.permute.xlu1 %2006 }
 0x168   : > { %1951 = vmatpush3.bf16.msra.mxu1 %v1950_v34  ;;  %v2009_v49 = vunpack.i.h.bf16 %v2007_v47  ;;  %v2008_v50 = vunpack.i.l.bf16 %v2007_v47  ;;  %v1345_v34 = vld [vmem:[%s2385_s12] sm:$0xff] }
 0x169   : > { %1952 = vmatprep.subr.bf16.mxu1 %v2039_v5  ;;  %v1966_v36 = vpack.c.bf16 %v1346_v35, %v1345_v34  ;;  %v1574_v35 = vld [vmem:[%s2391_s18 + $0x10] sm:$0xff] }
 0x16a   : > { %v1953_v53 = vpack.c.bf16 %v2009_v49, %v2008_v50  ;;  %v1457_v49 = vld [vmem:[%s2387_s14 + $0x8] sm:$0xff] }
 0x1cb   : > { %v955_v37 = vpop.f32.mrb[2].mxu0 }
 0x1cc   : > { %v959_v38 = vmul.f32 0.25, %v955_v37  ;;  %v1865_v39 = vpop.f32.mrb[3].mxu0  ;;  %v1348_v37 = vld [vmem:[%s2385_s12 + $0x18] sm:$0xff] }
 0x1ce   : > { %v960_v40 = vsel %vm878_vm4, %v959_v38, -1e+30 }
 0x1cf   : > { %v961_v41 = vsel %vm879_vm2, %v960_v40, -inf }
 0x1d0   : > { %962 = vmax.xlane.f32.xlu0 %v961_v41 }
 0x25d   : > { %v963_v42 = vpop.xlane.xlu0 %962 }
 0x25e   : > { %v964_v43 = vsub.f32 %v960_v40, %v963_v42 }
 0x260   : > { %v965_v44 = vmul.f32 1.442695, %v964_v43  ;;  %v1780_v43 = vld [vmem:[%s2383_s10] ss:$0 sm:$0xff] }
 0x262   : > { %2015 = vpow2.f32 %v965_v44 }
 0x26c   : > { %v2016_v45 = vpop.eup %2015 }
 0x26d   : > { %v967_v46 = vsel %vm879_vm2, %v2016_v45, 0.0 }
 0x26e   : > { %968 = vadd.xlane.f32.xlu1 %v967_v46 }
 0x27f   : > { %1051 = vrot.lane.b32.xlu1 %v770_v30, %s2044_s22 }
 0x2fb   : > { %v969_v48 = vpop.xlane.xlu1 %968 }
 0x2fc   : > { %2017 = vrcp.f32 %v969_v48  ;;  %v1456_v48 = vld [vmem:[%s2387_s14] sm:$0xff] }
 0x2fd   : > { %v1972_v50 = vpack.c.bf16 %v1457_v49, %v1456_v48 }
 0x2ff   : > { %v1052_v54 = vpop.permute.xlu1 %1051 }
 0x306   : > { %v2018_v51 = vpop.eup %2017 }
 0x307   : > { %v971_v52 = vmul.f32 %v2018_v51, %v2016_v45  ;;  %v1781_v45 = vld [vmem:[%s2384_s11] ss:$0 sm:$0xff]  ;;  %v1458_v51 = vld [vmem:[%s2387_s14 + $0x10] sm:$0xff] }
 0x309   : > { %1871 = vmatmul.mubr.msk.f32.vlgmr.msra.gmra.mrb[2].mxu1 %vm879_vm2, %v971_v52 }
 0x30a   : > { %1955 = vmatpush3.bf16.xpose.msk.msra.mxu1 %vm2228_vm3, %v1953_v53  ;;  %1877 = vmatprep.mubr.msk.f32.mxu1 %vm2040_vm0, %v2041_v12  ;;  %v1782_v53 = vld [vmem:[%s2386_s13] ss:$0 sm:$0xff] }
 0x30b   : > { %1965 = vmatprep.subr.bf16.mxu1 %v2039_v5 }
 0x311   : > { %1878 = vmatmul.mubr.msk.f32.vlgmr.msra.gmra.mrb[4].mxu1 %vm879_vm2, %v1052_v54 }
 0x312   : > { %1906 = vmatprep.mubr.msk.f32.mxu1 %vm2040_vm0, %v2041_v12  ;;  %1967 = vmatpush3.bf16.msra.mxu1 %v1966_v36  ;;  %v1575_v36 = vld [vmem:[%s2391_s18 + $0x18] sm:$0xff] }
 0x313   : > { %1968 = vmatprep.subr.bf16.mxu1 %v2039_v5 }
 0x3dc   : > { %v1047_v55 = vpop.f32.mrb[2].mxu1 }
 0x3dd   : > { %v1872_v56 = vpop.f32.mrb[3].mxu1 }
 0x3e4   : > { %v1129_v57 = vpop.f32.mrb[4].mxu1 }
 0x3e5   : > { %v1133_v58 = vmul.f32 0.25, %v1129_v57  ;;  %v1879_v59 = vpop.f32.mrb[5].mxu1 }
 0x3e7   : > { %v1134_v60 = vsel %vm878_vm4, %v1133_v58, -1e+30 }
 0x3e8   : > { %v1135_v61 = vsel %vm879_vm2, %v1134_v60, -inf }
 0x3e9   : > { %1136 = vmax.xlane.f32.xlu1 %v1135_v61 }
 0x476   : > { %v1137_v62 = vpop.xlane.xlu1 %1136 }
 0x477   : > { %v1138_v63 = vsub.f32 %v1134_v60, %v1137_v62 }
 0x479   : > { %v1139_v0 = vmul.f32 1.442695, %v1138_v63 }
 0x47b   : > { %2019 = vpow2.f32 %v1139_v0 }
 0x485   : > { %v2020_v1 = vpop.eup %2019 }
 0x486   : > { %v1141_v2 = vsel %vm879_vm2, %v2020_v1, 0.0 }
 0x487   : > { %1142 = vadd.xlane.f32.xlu0 %v1141_v2 }
 0x49d   : > { %2011 = vrot.lane.b32.xlu0 %v2232_v28, %s2045_s4 }
 0x514   : > { %v1143_v3 = vpop.xlane.xlu0 %1142 }
 0x515   : > { %2021 = vrcp.f32 %v1143_v3 }
 0x518   : > { %v2012_v4 = vpop.permute.xlu0 %2011 }
 0x519   : > { %v2014_v6 = vunpack.i.h.bf16 %v2012_v4  ;;  %v2013_v7 = vunpack.i.l.bf16 %v2012_v4 }
 0x51b   : > { %v1957_v8 = vpack.c.bf16 %v2014_v6, %v2013_v7 }
 0x51d   : > { %1958 = vmatpush3.bf16.msra.mxu0 %v1957_v8 }
 0x51e   : > { %1959 = vmatprep.subr.bf16.mxu0 %v2039_v5 }
 0x51f   : > { %v2022_v9 = vpop.eup %2021 }
 0x520   : > { %v1145_v10 = vmul.f32 %v2022_v9, %v2020_v1 }
 0x522   : > { %1885 = vmatmul.mubr.msk.f32.vlgmr.msra.gmra.mrb[4].mxu0 %vm879_vm2, %v1145_v10 }
 0x523   : > { %1895 = vmatprep.mubr.msk.f32.mxu0 %vm2040_vm0, %v2041_v12  ;;  %1961 = vmatpush3.bf16.msra.mxu0 %v1960_v15 }
 0x524   : > { %1962 = vmatprep.subr.bf16.mxu0 %v2039_v5 }
 0x527   : > { %1964 = vmatpush3.bf16.msra.mxu0 %v1963_v18 }
 0x528   : > { %1971 = vmatprep.subr.bf16.mxu0 %v2039_v5 }
 0x5f5   : > { %v1221_v19 = vpop.f32.mrb[4].mxu0 }
 0x5f6   : > { %1226 = vrot.lane.b32.xlu0 %v1221_v19, %s2046_s28  ;;  %v1886_v20 = vpop.f32.mrb[5].mxu0 }
 0x668   : > { %v1227_v21 = vpop.permute.xlu0 %1226 }
 0x669   : > { %v1229_v22 = vsel %vm879_vm2, %v1047_v55, %v1227_v21 }
 0x66a   : > { %1896 = vmatmul.mubr.msk.f32.vlgmr.msra.gmra.mrb[6].mxu0 %vm699_vm1, %v1229_v22  ;;  %v1787_v22 = vld [vmem:[%s2388_s15] ss:$0 sm:$0xff] }
 0x66b   : > { %1917 = vmatprep.mubr.msk.f32.mxu0 %vm2040_vm0, %v2041_v12  ;;  %1973 = vmatpush3.bf16.msra.mxu0 %v1972_v50 }
 0x66c   : > { %1974 = vmatprep.subr.bf16.mxu0 %v2039_v5 }
 0x73d   : > { %v1310_v24 = vpop.f32.mrb[6].mxu0 }
 0x73e   : > { %v1311_v25 = vadd.f32 %v1778_v23, %v1310_v24  ;;  %v1897_v26 = vpop.f32.mrb[7].mxu0 }
 0x740   : > { %v1314_v27 = vadd.f32 %v1311_v25, %v2209_v16  ;;  %v1347_v16 = vld [vmem:[%s2385_s12 + $0x10] sm:$0xff] }
 0x741   : > { %v1969_v38 = vpack.c.bf16 %v1348_v37, %v1347_v16  ;;  %v1981_v16 = vpack.c.bf16 %v1575_v36, %v1574_v35 }
 0x742   : > { %v1317_v28 = vsel %vm699_vm1, %v1314_v27, 0.0 }
 0x743   : > { %1318 = vadd.xlane.f32.xlu0 %v1317_v28  ;;  %1970 = vmatpush3.bf16.msra.mxu1 %v1969_v38 }
 0x744   : > { %1977 = vmatprep.subr.bf16.mxu1 %v2039_v5 }
 0x7d0   : > { %v1319_v29 = vpop.xlane.xlu0 %1318 }
 0x7d1   : > { %v1321_v30 = vmul.f32 0.03125, %v1319_v29 }
 0x7d3   : > { %v1322_v31 = vsub.f32 %v1314_v27, %v1321_v30 }
 0x7d5   : > { %v1323_v32 = vmul.f32 %v1322_v31, %v1322_v31 }
 0x7d7   : > { %v1324_v33 = vsel %vm699_vm1, %v1323_v32, 0.0  ;;  %v1572_v32 = vld [vmem:[%s2391_s18] sm:$0xff] }
 0x7d8   : > { %1325 = vadd.xlane.f32.xlu1 %v1324_v33  ;;  %v1573_v33 = vld [vmem:[%s2391_s18 + $0x8] sm:$0xff] }
 0x7d9   : > { %v1978_v34 = vpack.c.bf16 %v1573_v33, %v1572_v32 }
 0x865   : > { %v1326_v39 = vpop.xlane.xlu1 %1325 }
 0x866   : > { %v1327_v40 = vmul.f32 0.03125, %v1326_v39 }
 0x868   : > { %v1328_v41 = vadd.f32 1e-05, %v1327_v40 }
 0x86a   : > { %2023 = vrsqrt.f32 %v1328_v41 }
 0x874   : > { %v2024_v42 = vpop.eup %2023 }
 0x875   : > { %v1330_v44 = vmul.f32 %v2024_v42, %v1322_v31  ;;  %v1789_v42 = vld [vmem:[%s2390_s17] ss:$0 sm:$0xff] }
 0x877   : > { %v1337_v46 = vmul.f32 %v1780_v43, %v1330_v44 }
 0x879   : > { %v1344_v47 = vadd.f32 %v1781_v45, %v1337_v46  ;;  %v1790_v45 = vld [vmem:[%s2392_s19] ss:$0 sm:$0xff] }
 0x87b   : > { %1907 = vmatmul.mubr.msk.f32.vlgmr.msra.gmra.mrb[6].mxu1 %vm699_vm1, %v1344_v47 }
 0x87c   : > { %1928 = vmatprep.mubr.msk.f32.mxu1 %vm2040_vm0, %v2041_v12  ;;  %v1459_v12 = vld [vmem:[%s2387_s14 + $0x18] sm:$0xff]  ;;  %1979 = vmatpush3.bf16.msra.mxu1 %v1978_v34 }
 0x87d   : > { %v1975_v52 = vpack.c.bf16 %v1459_v12, %v1458_v51  ;;  %1980 = vmatprep.subr.bf16.mxu1 %v2039_v5  ;;  %v1788_v5 = vld [vmem:[%s2389_s16] ss:$0 sm:$0xff] }
 0x87f   : > { %1976 = vmatpush3.bf16.msra.mxu0 %v1975_v52 }
 0x880   : > { %1982 = vmatpush3.bf16.msra.mxu1 %v1981_v16 }
 0x94e   : > { %v1425_v54 = vpop.f32.mrb[6].mxu1 }
 0x94f   : > { %v1426_v55 = vadd.f32 %v1782_v53, %v1425_v54  ;;  %v1908_v56 = vpop.f32.mrb[7].mxu1 }
 0x951   : > { %v1429_v57 = vmul.f32 0.70710677, %v1426_v55  ;;  %v1453_v18 = vmul.f32 0.5, %v1426_v55 }
 0x953   : > { %v1430_v58 = vand.u32 2147483647, %v1429_v57  ;;  %vm1450_vm5 = vcmp.lt.f32.partialorder %v1429_v57, 0.0 }
 0x955   : > { %v1431_v59 = vmul.f32 0.3275911, %v1430_v58  ;;  %v1444_v61 = vsub.f32 0.0, %v1430_v58 }
 0x957   : > { %v1432_v60 = vadd.f32 1.0, %v1431_v59  ;;  %v1445_v63 = vmul.f32 %v1444_v61, %v1430_v58 }
 0x959   : > { %2025 = vrcp.f32 %v1432_v60  ;;  %v1446_v2 = vmul.f32 1.442695, %v1445_v63 }
 0x95b   : > { %2027 = vpow2.f32 %v1446_v2 }
 0x963   : > { %v2026_v62 = vpop.eup %2025 }
 0x964   : > { %v1435_v0 = vmul.f32 1.0614054, %v2026_v62 }
 0x965   : > { %v2028_v11 = vpop.eup %2027 }
 0x966   : > { %v1784_v1 = vadd.f32 -1.4531521, %v1435_v0 }
 0x968   : > { %v1437_v3 = vmul.f32 %v2026_v62, %v1784_v1 }
 0x96a   : > { %v1438_v4 = vadd.f32 1.4214138, %v1437_v3 }
 0x96c   : > { %v1439_v6 = vmul.f32 %v2026_v62, %v1438_v4 }
 0x96e   : > { %v1785_v7 = vadd.f32 -0.28449672, %v1439_v6 }
 0x970   : > { %v1441_v8 = vmul.f32 %v2026_v62, %v1785_v7 }
 0x972   : > { %v1442_v9 = vadd.f32 0.2548296, %v1441_v8 }
 0x974   : > { %v1443_v10 = vmul.f32 %v2026_v62, %v1442_v9 }
 0x976   : > { %v1448_v13 = vmul.f32 %v2028_v11, %v1443_v10 }
 0x978   : > { %v1449_v14 = vsub.f32 1.0, %v1448_v13 }
 0x97a   : > { %v1451_v15 = vsub.f32 0.0, %v1449_v14 }
 0x97c   : > { %v1452_v17 = vsel %vm1450_vm5, %v1451_v15, %v1449_v14 }
 0x97d   : > { %v1454_v19 = vadd.f32 1.0, %v1452_v17 }
 0x97f   : > { %v1455_v20 = vmul.f32 %v1454_v19, %v1453_v18 }
 0x981   : > { %1918 = vmatmul.mubr.msk.f32.vlgmr.msra.gmra.mrb[8].mxu0 %vm699_vm1, %v1455_v20 }
 0xa54   : > { %v1529_v21 = vpop.f32.mrb[8].mxu0 }
 0xa55   : > { %v1533_v23 = vadd.f32 %v1529_v21, %v1344_v47  ;;  %v1919_v24 = vpop.f32.mrb[9].mxu0 }
 0xa57   : > { %v1541_v25 = vadd.f32 %v1787_v22, %v1533_v23 }
 0xa59   : > { %v1544_v26 = vsel %vm699_vm1, %v1541_v25, 0.0 }
 0xa5a   : > { %1545 = vadd.xlane.f32.xlu1 %v1544_v26 }
 0xae7   : > { %v1546_v27 = vpop.xlane.xlu1 %1545 }
 0xae8   : > { %v1547_v28 = vmul.f32 0.03125, %v1546_v27 }
 0xaea   : > { %v1548_v29 = vsub.f32 %v1541_v25, %v1547_v28 }
 0xaec   : > { %v1549_v30 = vmul.f32 %v1548_v29, %v1548_v29 }
 0xaee   : > { %v1550_v31 = vsel %vm699_vm1, %v1549_v30, 0.0 }
 0xaef   : > { %1551 = vadd.xlane.f32.xlu1 %v1550_v31 }
 0xb7c   : > { %v1552_v37 = vpop.xlane.xlu1 %1551 }
 0xb7d   : > { %v1553_v38 = vmul.f32 0.03125, %v1552_v37 }
 0xb7f   : > { %v1554_v39 = vadd.f32 1e-05, %v1553_v38 }
 0xb81   : > { %2029 = vrsqrt.f32 %v1554_v39 }
 0xb8b   : > { %v2030_v40 = vpop.eup %2029 }
 0xb8c   : > { %v1556_v41 = vmul.f32 %v2030_v40, %v1548_v29 }
 0xb8e   : > { %v1563_v43 = vmul.f32 %v1788_v5, %v1556_v41 }
 0xb90   : > { %v1570_v44 = vadd.f32 %v1789_v42, %v1563_v43 }
 0xb92   : > { %1571 = vst.msk [vmem:[%s680_s30] sm:$0xff] %vm699_vm1, %v1570_v44  ;;  %1929 = vmatmul.mubr.msk.f32.vlgmr.msra.gmra.mrb[8].mxu1 %vm699_vm1, %v1570_v44 }
 0xc65   : > { %v1652_v46 = vpop.f32.mrb[8].mxu1 }
 0xc66   : > { %v1653_v47 = vadd.f32 %v1790_v45, %v1652_v46  ;;  %v1930_v48 = vpop.f32.mrb[9].mxu1 }
 0xc68   : > { %1657 = vst.msk [vmem:[%s684_s3] sm:$0xff] %vm1656_vm6, %v1653_v47 }
 0xc69 PF: > { %s32_s2 = sadd.s32 1, %s2037_s2  }
 0xc6a   : > { %p29_p5 = scmp.ge.s32.totalorder %s32_s2, 4  }
 0xc6c   :  { %31 = sbr.rel (!%p29_p5) target bundleno = 7 (0x7), region = 145 }

// kernel: crossformer_forward.22
= control target key start
LH: loop header
LB: loop body
LE: loop exit
PB: predicated region body
PF: predicated region fallthrough
CT: control target
= control target key end

     0   :  { %vm53_vm0 = vcmask 261120   ;;  %v1207_v3 = vmov 0.0|0.0   ;;  %vm1208_vm1 = vmmov 0   ;;  %v1209_v4 = vmov 0.0   ;;  %s1212_s28 = smov 112   ;;  %s1214_s16 = smov 16   ;;  %s1524_s6 = inlined_call_operand.vmem [shape: f32[32,64], index: 6, kind: input, shape index: {}]   ;;  %s1525_s1 = inlined_call_operand.vmem [shape: f32[32,32], index: 1, kind: input, shape index: {}]   ;;  %s1526_s4 = inlined_call_operand.vmem [shape: f32[32,32], index: 4, kind: input, shape index: {}]   ;;  %s1527_s0 = inlined_call_operand.vmem [shape: f32[24,32], index: 0, kind: input, shape index: {}]   ;;  %s1528_s2 = inlined_call_operand.vmem [shape: f32[24,1], index: 2, kind: input, shape index: {}]   ;;  %s1529_s7 = inlined_call_operand.vmem [shape: f32[1,64], index: 7, kind: input, shape index: {}]   ;;  %s1530_s5 = inlined_call_operand.vmem [shape: f32[1,32], index: 5, kind: input, shape index: {}]   ;;  %s1531_s3 = inlined_call_operand.vmem [shape: f32[1,32], index: 3, kind: input, shape index: {}]   ;;  %s1532_s8 = inlined_call_operand.vmem [shape: f32[32,32], index: 8, kind: input, shape index: {}]   ;;  %s1533_s9 = inlined_call_operand.vmem [shape: f32[1,32], index: 9, kind: input, shape index: {}]   ;;  %s1534_s10 = inlined_call_operand.vmem [shape: f32[24,32], index: 10, kind: output, shape index: {}]  }
   0x1   :  { %v143_v0 = vld [vmem:[%s1524_s6] sm:$0xff]  ;;  %v144_v1 = vld [vmem:[%s1524_s6 + $0x8] sm:$0xff]  ;;  %v145_v2 = vld [vmem:[%s1524_s6 + $0x10] sm:$0xff]  ;;  %1091 = vmatprep.subr.bf16.mxu0 %v1207_v3  ;;  %983 = vmatprep.mubr.msk.f32.mxu0 %vm1208_vm1, %v1209_v4  ;;  %v1210_v21 = vmov 0   ;;  %vm279_vm2 = vcmask 130048  }
   0x2   :  { %v1097_v5 = vpack.c.bf16 %v144_v1, %v143_v0  ;;  %v146_v6 = vld [vmem:[%s1524_s6 + $0x18] sm:$0xff]  ;;  %v38_v7 = vld [vmem:[%s1525_s1] sm:$0xff]  ;;  %v43_v10 = vld [vmem:[%s1526_s4 + $0x8] sm:$0xff]  ;;  %1151 = vset.pattern.permute.xlu0 %v1210_v21  ;;  %1152 = vset.pattern.permute.xlu1 %v1210_v21  ;;  %s1213_s6 = smov 80  }
   0x3   :  { %v1101_v8 = vpack.c.bf16 %v146_v6, %v145_v2  ;;  %1000 = vmatprep.mubr.msk.f32.mxu1 %vm53_vm0, %v38_v7  ;;  %v42_v9 = vld [vmem:[%s1526_s4] sm:$0xff]  ;;  %v44_v11 = vld [vmem:[%s1526_s4 + $0x10] sm:$0xff]  ;;  %v45_v12 = vld [vmem:[%s1526_s4 + $0x18] sm:$0xff] }
   0x4   :  { %1098 = vmatprep.subr.bf16.mxu1 %v1097_v5  ;;  %v1092_v13 = vpack.c.bf16 %v43_v10, %v42_v9  ;;  %v1095_v14 = vpack.c.bf16 %v45_v12, %v44_v11  ;;  %v39_v15 = vld [vmem:[%s1525_s1 + $0x8] sm:$0xff]  ;;  %v40_v16 = vld [vmem:[%s1525_s1 + $0x10] sm:$0xff]  ;;  %v35_v17 = vld [vmem:[%s1527_s0] sm:$0xff] }
   0x5   :  { %1100 = vmatpush3.bf16.msra.mxu1 %v1097_v5  ;;  %v41_v18 = vld [vmem:[%s1525_s1 + $0x18] sm:$0xff]  ;;  %v36_v19 = vld [vmem:[%s1527_s0 + $0x8] sm:$0xff]  ;;  %v37_v20 = vld [vmem:[%s1527_s0 + $0x10] sm:$0xff] }
   0x6   :  { %1102 = vmatprep.subr.bf16.mxu1 %v1101_v8  ;;  %1093 = vmatpush3.bf16.msra.mxu0 %v1092_v13  ;;  %v251_v22 = vld [vmem:[%s1528_s2] sm:$0xff]  ;;  %v253_v23 = vld [vmem:[%s1528_s2 + $0x10] sm:$0xff]  ;;  %v252_v24 = vld [vmem:[%s1528_s2 + $0x8] sm:$0xff] }
   0x7   :  { %1094 = vmatprep.subr.bf16.mxu0 %v1207_v3  ;;  %257 = vperm.xlu0 %1151, %v251_v22   ;;  %v895_v25 = vld [vmem:[%s1529_s7] ss:$0 sm:$0xff]  ;;  %vm1350_vm3 = vmpackc.low %vm279_vm2, %vm279_vm2 }
   0x8   :  { %267 = vperm.xlu1 %1152, %v253_v23   ;;  %v891_v45 = vld [vmem:[%s1530_s5] ss:$0 sm:$0xff] }
   0x9   :  { %1104 = vmatpush3.bf16.msra.mxu1 %v1101_v8  ;;  %v1388_v49 = vld [vmem:[%s1531_s3] ss:$0 sm:$0xff]  ;;  %s1211_s3 = smov 96  }
   0xa   :  { %1113 = vmatprep.subr.bf16.mxu1 %v1207_v3  ;;  %1096 = vmatpush3.bf16.msra.mxu0 %v1095_v14 }
   0xb   :  { %1105 = vmatprep.subr.bf16.mxu0 %v1207_v3  ;;  %262 = vperm.xlu0 %1151, %v252_v24  }
   0xc   :  { %1001 = vmatmul.mubr.msk.f32.vlgmr.msra.gmra.mrb[0].mxu1 %vm53_vm0, %v39_v15 }
   0xd   :  { %1003 = vmatprep.mubr.msk.f32.mxu1 %vm53_vm0, %v40_v16  ;;  %984 = vmatmul.mubr.msk.f32.vlgmr.msra.gmra.mrb[0].mxu0 %vm53_vm0, %v35_v17 }
   0xe   :  { %986 = vmatprep.mubr.msk.f32.mxu0 %vm1208_vm1, %v1209_v4 }
  0x10   :  { %1004 = vmatmul.mubr.msk.f32.gmra.mrb[2].mxu1 %vm53_vm0, %v41_v18 }
  0x11   :  { %1031 = vmatprep.mubr.msk.f32.mxu1 %vm1208_vm1, %v1209_v4  ;;  %987 = vmatmul.mubr.msk.f32.gmra.mrb[2].mxu0 %vm53_vm0, %v36_v19 }
  0x12   :  { %989 = vmatprep.mubr.msk.f32.mxu0 %vm1208_vm1, %v1209_v4 }
  0x15   :  { %990 = vmatmul.mubr.msk.f32.gmra.mrb[4].mxu0 %vm53_vm0, %v37_v20 }
  0x16   :  { %1014 = vmatprep.mubr.msk.f32.mxu0 %vm1208_vm1, %v1209_v4 }
  0x86   :  { %v1390_v50 = vpop.permute.xlu0 %257 }
  0x87   :  { %vm276_vm4 = vcmp.eq.f32.partialorder %v1390_v50, %v1388_v49  ;;  %v1400_v60 = vpop.permute.xlu1 %267 }
  0x88   :  { %vm278_vm6 = vcmp.eq.f32.partialorder %v1400_v60, %v1388_v49 }
  0x8a   :  { %v1394_v54 = vpop.permute.xlu0 %262 }
  0x8b   :  { %vm277_vm5 = vcmp.eq.f32.partialorder %v1394_v54, %v1388_v49 }
  0xdf   :  { %v1002_v26 = vpop.f32.mrb[0].mxu1 }
  0xe0   :  { %v238_v27 = vadd.f32 %v1002_v26, %v895_v25  ;;  %v232_v28 = vpop.f32.mrb[1].mxu1  ;;  %v129_v30 = vpop.f32.mrb[0].mxu0 }
  0xe1   :  { %v233_v29 = vadd.f32 %v895_v25, %v232_v28  ;;  %v985_v32 = vpop.f32.mrb[1].mxu0  ;;  %v1367_v46 = vadd.f32 %v891_v45, %v129_v30 }
  0xe3   :  { %v1106_v33 = vpack.c.bf16 %v238_v27, %v233_v29  ;;  %v1005_v34 = vpop.f32.mrb[2].mxu1  ;;  %v1354_v35 = vpack.i.bf16 %v238_v27, %v233_v29 }
  0xe4   :  { %v248_v36 = vadd.f32 %v1005_v34, %v895_v25  ;;  %v242_v37 = vpop.f32.mrb[3].mxu1  ;;  %v134_v39 = vpop.f32.mrb[2].mxu0 }
  0xe5   :  { %1108 = vmatpush3.bf16.xpose.msk.msra.mxu0 %vm1350_vm3, %v1106_v33  ;;  %v243_v38 = vadd.f32 %v895_v25, %v242_v37  ;;  %v988_v40 = vpop.f32.mrb[3].mxu0  ;;  %v1371_v47 = vadd.f32 %v891_v45, %v134_v39 }
  0xe6   :  { %1109 = vmatprep.subr.bf16.mxu0 %v1207_v3 }
  0xe7   :  { %v1110_v41 = vpack.c.bf16 %v248_v36, %v243_v38  ;;  %v1359_v42 = vpack.i.bf16 %v248_v36, %v243_v38 }
  0xe8   :  { %v139_v43 = vpop.f32.mrb[4].mxu0 }
  0xe9   :  { %v991_v44 = vpop.f32.mrb[5].mxu0  ;;  %v1377_v48 = vadd.f32 %v891_v45, %v139_v43 }
  0xed   :  { %1112 = vmatpush3.bf16.xpose.msk.msra.mxu0 %vm1350_vm3, %v1110_v41 }
  0xee   :  { %1127 = vmatprep.subr.bf16.mxu0 %v1207_v3 }
  0xf4   :  { %1015 = vmatmul.mubr.msk.f32.vlgmr.msra.gmra.mrb[6].mxu0 %vm279_vm2, %v1367_v46 }
  0xf5   :  { %1017 = vmatprep.mubr.msk.f32.mxu0 %vm1208_vm1, %v1209_v4 }
  0xf8   :  { %1018 = vmatmul.mubr.msk.f32.gmra.mrb[8].mxu0 %vm279_vm2, %v1371_v47 }
  0xf9   :  { %1020 = vmatprep.mubr.msk.f32.mxu0 %vm1208_vm1, %v1209_v4 }
  0xfc   :  { %1021 = vmatmul.mubr.msk.f32.gmra.mrb[10].mxu0 %vm279_vm2, %v1377_v48 }
  0xfd   :  { %1065 = vmatprep.mubr.msk.f32.mxu0 %vm1208_vm1, %v1209_v4 }
 0x1c7   :  { %v367_v51 = vpop.f32.mrb[6].mxu0 }
 0x1c8   :  { %v381_v52 = vmul.f32 0.25, %v367_v51  ;;  %v1016_v53 = vpop.f32.mrb[7].mxu0 }
 0x1ca   :  { %v384_v55 = vsel %vm276_vm4, %v381_v52, -1e+30 }
 0x1cb   :  { %v372_v56 = vpop.f32.mrb[8].mxu0  ;;  %v387_v57 = vsel %vm53_vm0, %v384_v55, -inf }
 0x1cc   :  { %v382_v58 = vmul.f32 0.25, %v372_v56  ;;  %388 = vmax.xlane.f32.xlu1 %v387_v57  ;;  %v1019_v59 = vpop.f32.mrb[9].mxu0 }
 0x1ce   :  { %v385_v61 = vsel %vm277_vm5, %v382_v58, -1e+30 }
 0x1cf   :  { %v377_v62 = vpop.f32.mrb[10].mxu0  ;;  %v390_v63 = vsel %vm53_vm0, %v385_v61, -inf }
 0x1d0   :  { %v383_v0 = vmul.f32 0.25, %v377_v62  ;;  %391 = vmax.xlane.f32.xlu0 %v390_v63  ;;  %v1022_v1 = vpop.f32.mrb[11].mxu0 }
 0x1d2   :  { %v386_v2 = vsel %vm278_vm6, %v383_v0, -1e+30 }
 0x1d3   :  { %v393_v5 = vsel %vm53_vm0, %v386_v2, -inf }
 0x1d4   :  { %394 = vmax.xlane.f32.xlu0 %v393_v5 }
 0x1dd   :  { %1159 = vrot.lane.b32.xlu1 %v1359_v42, %s1211_s3 }
 0x1ea   :  { %1154 = vrot.lane.b32.xlu0 %v1354_v35, %s1211_s3 }
 0x259   :  { %v389_v6 = vpop.xlane.xlu1 %388 }
 0x25a   :  { %v396_v7 = vsub.f32 %v384_v55, %v389_v6 }
 0x25c   :  { %v399_v8 = vmul.f32 1.442695, %v396_v7 }
 0x25d   :  { %v392_v9 = vpop.xlane.xlu0 %391  ;;  %v1160_v13 = vpop.permute.xlu1 %1159 }
 0x25e   :  { %1183 = vpow2.f32 %v399_v8  ;;  %v397_v10 = vsub.f32 %v385_v61, %v392_v9  ;;  %v1162_v18 = vunpack.i.h.bf16 %v1160_v13  ;;  %v1161_v19 = vunpack.i.l.bf16 %v1160_v13 }
 0x260   :  { %v401_v11 = vmul.f32 1.442695, %v397_v10  ;;  %v1117_v23 = vpack.c.bf16 %v1162_v18, %v1161_v19 }
 0x261   :  { %v395_v12 = vpop.xlane.xlu0 %394 }
 0x262   :  { %1185 = vpow2.f32 %v401_v11  ;;  %v398_v25 = vsub.f32 %v386_v2, %v395_v12 }
 0x264   :  { %v403_v26 = vmul.f32 1.442695, %v398_v25 }
 0x265   :  { %v1155_v14 = vpop.permute.xlu0 %1154 }
 0x266   :  { %v1157_v15 = vunpack.i.h.bf16 %v1155_v14  ;;  %v1156_v16 = vunpack.i.l.bf16 %v1155_v14  ;;  %1187 = vpow2.f32 %v403_v26 }
 0x268   :  { %v1184_v17 = vpop.eup %1183  ;;  %v1114_v20 = vpack.c.bf16 %v1157_v15, %v1156_v16 }
 0x269   :  { %v405_v21 = vsel %vm53_vm0, %v1184_v17, 0.0 }
 0x26a   :  { %406 = vadd.xlane.f32.xlu1 %v405_v21  ;;  %1115 = vmatpush3.bf16.msra.mxu1 %v1114_v20 }
 0x26b   :  { %1116 = vmatprep.subr.bf16.mxu1 %v1207_v3 }
 0x26c   :  { %v1186_v22 = vpop.eup %1185 }
 0x26d   :  { %v408_v24 = vsel %vm53_vm0, %v1186_v22, 0.0 }
 0x26e   :  { %409 = vadd.xlane.f32.xlu0 %v408_v24  ;;  %1118 = vmatpush3.bf16.msra.mxu1 %v1117_v23 }
 0x26f   :  { %1119 = vmatprep.subr.bf16.mxu1 %v1207_v3 }
 0x270   :  { %v1188_v27 = vpop.eup %1187 }
 0x271   :  { %v411_v28 = vsel %vm53_vm0, %v1188_v27, 0.0 }
 0x27b   :  { %1164 = vrot.lane.b32.xlu1 %v1354_v35, %s1212_s28 }
 0x284   :  { %1169 = vrot.lane.b32.xlu0 %v1359_v42, %s1212_s28 }
 0x288   :  { %523 = vrot.lane.b32.xlu0 %v1371_v47, %s1212_s28 }
 0x29f   :  { %412 = vadd.xlane.f32.xlu1 %v411_v28 }
 0x2b0   :  { %521 = vrot.lane.b32.xlu1 %v1367_v46, %s1212_s28 }
 0x2b4   :  { %525 = vrot.lane.b32.xlu1 %v1377_v48, %s1212_s28 }
 0x2f7   :  { %v407_v29 = vpop.xlane.xlu1 %406 }
 0x2f8   :  { %1189 = vrcp.f32 %v407_v29 }
 0x2fb   :  { %v410_v30 = vpop.xlane.xlu0 %409  ;;  %v1165_v32 = vpop.permute.xlu1 %1164 }
 0x2fc   :  { %1191 = vrcp.f32 %v410_v30  ;;  %v1167_v33 = vunpack.i.h.bf16 %v1165_v32  ;;  %v1166_v34 = vunpack.i.l.bf16 %v1165_v32 }
 0x2fe   :  { %v1120_v38 = vpack.c.bf16 %v1167_v33, %v1166_v34 }
 0x2ff   :  { %v1170_v39 = vpop.permute.xlu0 %1169 }
 0x300   :  { %v1172_v43 = vunpack.i.h.bf16 %v1170_v39  ;;  %v1171_v44 = vunpack.i.l.bf16 %v1170_v39 }
 0x302   :  { %v1190_v36 = vpop.eup %1189  ;;  %v1124_v45 = vpack.c.bf16 %v1172_v43, %v1171_v44  ;;  %v784_v43 = vld [vmem:[%s1532_s8] sm:$0xff]  ;;  %v785_v44 = vld [vmem:[%s1532_s8 + $0x8] sm:$0xff] }
 0x303   :  { %v417_v37 = vmul.f32 %v1190_v36, %v1184_v17  ;;  %v524_v52 = vpop.permute.xlu0 %523 }
 0x305   :  { %1032 = vmatmul.mubr.msk.f32.vlgmr.msra.gmra.mrb[4].mxu1 %vm53_vm0, %v417_v37 }
 0x306   :  { %v1192_v40 = vpop.eup %1191  ;;  %1122 = vmatpush3.bf16.xpose.msk.msra.mxu1 %vm1350_vm3, %v1120_v38  ;;  %1034 = vmatprep.mubr.msk.f32.mxu1 %vm1208_vm1, %v1209_v4 }
 0x307   :  { %v418_v41 = vmul.f32 %v1192_v40, %v1186_v22  ;;  %1123 = vmatprep.subr.bf16.mxu1 %v1207_v3 }
 0x309   :  { %1035 = vmatmul.mubr.msk.f32.gmra.mrb[6].mxu1 %vm53_vm0, %v418_v41 }
 0x30a   :  { %1037 = vmatprep.mubr.msk.f32.mxu1 %vm1208_vm1, %v1209_v4 }
 0x30e   :  { %1126 = vmatpush3.bf16.xpose.msk.msra.mxu1 %vm1350_vm3, %v1124_v45  ;;  %v786_v45 = vld [vmem:[%s1532_s8 + $0x10] sm:$0xff] }
 0x30f   :  { %1139 = vmatprep.subr.bf16.mxu1 %v1207_v3 }
 0x32c   :  { %v413_v46 = vpop.xlane.xlu1 %412 }
 0x32d   :  { %1193 = vrcp.f32 %v413_v46  ;;  %v1134_v46 = vpack.c.bf16 %v785_v44, %v784_v43 }
 0x330   :  { %v522_v51 = vpop.permute.xlu1 %521 }
 0x334   :  { %v526_v31 = vpop.permute.xlu1 %525 }
 0x337   :  { %v1194_v47 = vpop.eup %1193 }
 0x338   :  { %v419_v48 = vmul.f32 %v1194_v47, %v1188_v27  ;;  %v787_v47 = vld [vmem:[%s1532_s8 + $0x18] sm:$0xff] }
 0x33a   :  { %1038 = vmatmul.mubr.msk.f32.gmra.mrb[8].mxu1 %vm53_vm0, %v419_v48  ;;  %v1137_v48 = vpack.c.bf16 %v787_v47, %v786_v45 }
 0x33b   :  { %1048 = vmatprep.mubr.msk.f32.mxu1 %vm1208_vm1, %v1209_v4 }
 0x33e   :  { %1049 = vmatmul.mubr.msk.f32.vlgmr.msra.gmra.mrb[10].mxu1 %vm279_vm2, %v522_v51 }
 0x33f   :  { %1051 = vmatprep.mubr.msk.f32.mxu1 %vm1208_vm1, %v1209_v4  ;;  %1141 = vmatpush3.bf16.msra.mxu1 %v1134_v46 }
 0x340   :  { %1140 = vmatprep.subr.bf16.mxu1 %v1207_v3 }
 0x342   :  { %1052 = vmatmul.mubr.msk.f32.gmra.mrb[12].mxu1 %vm279_vm2, %v524_v52 }
 0x343   :  { %1054 = vmatprep.mubr.msk.f32.mxu1 %vm1208_vm1, %v1209_v4  ;;  %1142 = vmatpush3.bf16.msra.mxu1 %v1137_v48 }
 0x346   :  { %1055 = vmatmul.mubr.msk.f32.gmra.mrb[14].mxu1 %vm279_vm2, %v526_v31 }
 0x347   :  { %1085 = vmatprep.mubr.msk.f32.mxu1 %vm1208_vm1, %v1209_v4 }
 0x3d8   :  { %v1450_v53 = vpop.f32.mrb[4].mxu1 }
 0x3d9   :  { %v1033_v55 = vpop.f32.mrb[5].mxu1 }
 0x3dc   :  { %v1452_v56 = vpop.f32.mrb[6].mxu1 }
 0x3dd   :  { %v1036_v57 = vpop.f32.mrb[7].mxu1 }
 0x40d   :  { %v1454_v58 = vpop.f32.mrb[8].mxu1 }
 0x40e   :  { %v1039_v59 = vpop.f32.mrb[9].mxu1 }
 0x411   :  { %v615_v61 = vpop.f32.mrb[10].mxu1 }
 0x412   :  { %v629_v62 = vmul.f32 0.25, %v615_v61  ;;  %v1050_v63 = vpop.f32.mrb[11].mxu1 }
 0x414   :  { %v632_v0 = vsel %vm276_vm4, %v629_v62, -1e+30 }
 0x415   :  { %v620_v1 = vpop.f32.mrb[12].mxu1  ;;  %v635_v2 = vsel %vm53_vm0, %v632_v0, -inf }
 0x416   :  { %v630_v5 = vmul.f32 0.25, %v620_v1  ;;  %636 = vmax.xlane.f32.xlu0 %v635_v2  ;;  %v1053_v6 = vpop.f32.mrb[13].mxu1 }
 0x418   :  { %v633_v7 = vsel %vm277_vm5, %v630_v5, -1e+30 }
 0x419   :  { %v625_v8 = vpop.f32.mrb[14].mxu1  ;;  %v638_v9 = vsel %vm53_vm0, %v633_v7, -inf }
 0x41a   :  { %v631_v10 = vmul.f32 0.25, %v625_v8  ;;  %639 = vmax.xlane.f32.xlu1 %v638_v9  ;;  %v1056_v11 = vpop.f32.mrb[15].mxu1 }
 0x41c   :  { %v634_v50 = vsel %vm278_vm6, %v631_v10, -1e+30 }
 0x41d   :  { %v641_v12 = vsel %vm53_vm0, %v634_v50, -inf }
 0x41e   :  { %642 = vmax.xlane.f32.xlu0 %v641_v12 }
 0x4a3   :  { %v637_v13 = vpop.xlane.xlu0 %636 }
 0x4a4   :  { %v644_v14 = vsub.f32 %v632_v0, %v637_v13 }
 0x4a6   :  { %v647_v15 = vmul.f32 1.442695, %v644_v14 }
 0x4a7   :  { %v640_v16 = vpop.xlane.xlu1 %639 }
 0x4a8   :  { %1195 = vpow2.f32 %v647_v15  ;;  %v645_v54 = vsub.f32 %v633_v7, %v640_v16 }
 0x4aa   :  { %v649_v17 = vmul.f32 1.442695, %v645_v54 }
 0x4ab   :  { %v643_v18 = vpop.xlane.xlu0 %642 }
 0x4ac   :  { %1197 = vpow2.f32 %v649_v17  ;;  %v646_v19 = vsub.f32 %v634_v50, %v643_v18 }
 0x4ae   :  { %v651_v20 = vmul.f32 1.442695, %v646_v19 }
 0x4b0   :  { %1199 = vpow2.f32 %v651_v20 }
 0x4b2   :  { %v1196_v21 = vpop.eup %1195 }
 0x4b3   :  { %v653_v22 = vsel %vm53_vm0, %v1196_v21, 0.0 }
 0x4b4   :  { %654 = vadd.xlane.f32.xlu0 %v653_v22 }
 0x4b6   :  { %v1198_v49 = vpop.eup %1197 }
 0x4b7   :  { %v656_v60 = vsel %vm53_vm0, %v1198_v49, 0.0 }
 0x4b8   :  { %657 = vadd.xlane.f32.xlu1 %v656_v60 }
 0x4ba   :  { %v1200_v23 = vpop.eup %1199 }
 0x4bb   :  { %v659_v24 = vsel %vm53_vm0, %v1200_v23, 0.0 }
 0x4bc   :  { %660 = vadd.xlane.f32.xlu0 %v659_v24 }
 0x4c9   :  { %1174 = vrot.lane.b32.xlu1 %v1354_v35, %s1213_s6 }
 0x4d2   :  { %1179 = vrot.lane.b32.xlu0 %v1359_v42, %s1213_s6 }
 0x541   :  { %v655_v25 = vpop.xlane.xlu0 %654 }
 0x542   :  { %1201 = vrcp.f32 %v655_v25 }
 0x545   :  { %v658_v26 = vpop.xlane.xlu1 %657 }
 0x546   :  { %1203 = vrcp.f32 %v658_v26 }
 0x549   :  { %v1175_v27 = vpop.permute.xlu1 %1174  ;;  %v661_v28 = vpop.xlane.xlu0 %660 }
 0x54a   :  { %v1177_v29 = vunpack.i.h.bf16 %v1175_v27  ;;  %v1176_v30 = vunpack.i.l.bf16 %v1175_v27  ;;  %1205 = vrcp.f32 %v661_v28 }
 0x54c   :  { %v1128_v32 = vpack.c.bf16 %v1177_v29, %v1176_v30  ;;  %v1202_v37 = vpop.eup %1201 }
 0x54d   :  { %v1180_v33 = vpop.permute.xlu0 %1179  ;;  %v665_v42 = vmul.f32 %v1202_v37, %v1196_v21 }
 0x54e   :  { %v1182_v34 = vunpack.i.h.bf16 %v1180_v33  ;;  %v1181_v36 = vunpack.i.l.bf16 %v1180_v33  ;;  %1129 = vmatpush3.bf16.msra.mxu0 %v1128_v32 }
 0x54f   :  { %1130 = vmatprep.subr.bf16.mxu0 %v1207_v3 }
 0x550   :  { %v1131_v35 = vpack.c.bf16 %v1182_v34, %v1181_v36  ;;  %v1204_v38 = vpop.eup %1203 }
 0x551   :  { %v666_v39 = vmul.f32 %v1204_v38, %v1198_v49 }
 0x552   :  { %1132 = vmatpush3.bf16.msra.mxu0 %v1131_v35 }
 0x553   :  { %1133 = vmatprep.subr.bf16.mxu0 %v1207_v3 }
 0x554   :  { %v1206_v40 = vpop.eup %1205 }
 0x555   :  { %1066 = vmatmul.mubr.msk.f32.vlgmr.msra.gmra.mrb[12].mxu0 %vm53_vm0, %v665_v42  ;;  %v667_v41 = vmul.f32 %v1206_v40, %v1200_v23 }
 0x556   :  { %1068 = vmatprep.mubr.msk.f32.mxu0 %vm1208_vm1, %v1209_v4  ;;  %1135 = vmatpush3.bf16.msra.mxu0 %v1134_v46 }
 0x557   :  { %1136 = vmatprep.subr.bf16.mxu0 %v1207_v3 }
 0x559   :  { %1069 = vmatmul.mubr.msk.f32.gmra.mrb[14].mxu0 %vm53_vm0, %v666_v39 }
 0x55a   :  { %1071 = vmatprep.mubr.msk.f32.mxu0 %vm1208_vm1, %v1209_v4  ;;  %1138 = vmatpush3.bf16.msra.mxu0 %v1137_v48 }
 0x55d   :  { %1072 = vmatmul.mubr.msk.f32.gmra.mrb[16].mxu0 %vm53_vm0, %v667_v41 }
 0x55e   :  { %1082 = vmatprep.mubr.msk.f32.mxu0 %vm1208_vm1, %v1209_v4 }
 0x628   :  { %v755_v51 = vpop.f32.mrb[12].mxu0 }
 0x629   :  { %v1067_v52 = vpop.f32.mrb[13].mxu0 }
 0x62c   :  { %v760_v31 = vpop.f32.mrb[14].mxu0 }
 0x62d   :  { %774 = vrot.lane.b32.xlu1 %v760_v31, %s1214_s16  ;;  %v1070_v55 = vpop.f32.mrb[15].mxu0 }
 0x630   :  { %v765_v57 = vpop.f32.mrb[16].mxu0 }
 0x631   :  { %772 = vrot.lane.b32.xlu1 %v755_v51, %s1214_s16  ;;  %776 = vrot.lane.b32.xlu0 %v765_v57, %s1214_s16  ;;  %v1073_v59 = vpop.f32.mrb[17].mxu0 }
 0x69f   :  { %v775_v61 = vpop.permute.xlu1 %774 }
 0x6a0   :  { %v782_v62 = vsel %vm279_vm2, %v1452_v56, %v775_v61  ;;  %v921_v56 = vld [vmem:[%s1533_s9] ss:$0 sm:$0xff] }
 0x6a1   :  { %1086 = vmatmul.mubr.msk.f32.vlgmr.msra.gmra.mrb[16].mxu1 %vm53_vm0, %v782_v62 }
 0x6a2   :  { %1088 = vmatprep.mubr.msk.f32.mxu1 %vm1208_vm1, %v1209_v4 }
 0x6a3   :  { %v773_v3 = vpop.permute.xlu1 %772  ;;  %v777_v63 = vpop.permute.xlu0 %776 }
 0x6a4   :  { %v781_v0 = vsel %vm279_vm2, %v1450_v53, %v773_v3  ;;  %v783_v1 = vsel %vm279_vm2, %v1454_v58, %v777_v63 }
 0x6a5   :  { %1083 = vmatmul.mubr.msk.f32.vlgmr.msra.gmra.mrb[18].mxu0 %vm53_vm0, %v781_v0  ;;  %1089 = vmatmul.mubr.msk.f32.gmra.mrb[18].mxu1 %vm53_vm0, %v783_v1 }
 0x774   :  { %v875_v2 = vpop.f32.mrb[16].mxu1 }
 0x775   :  { %v876_v5 = vadd.f32 %v921_v56, %v875_v2  ;;  %v1087_v6 = vpop.f32.mrb[17].mxu1 }
 0x777   :  { %885 = vst.msk [vmem:[%s1534_s10 + $0x8] sm:$0xff] %vm53_vm0, %v876_v5 }
 0x778   :  { %v870_v4 = vpop.f32.mrb[18].mxu0  ;;  %v880_v53 = vpop.f32.mrb[18].mxu1 }
 0x779   :  { %v871_v7 = vadd.f32 %v921_v56, %v870_v4  ;;  %v881_v58 = vadd.f32 %v921_v56, %v880_v53  ;;  %v1084_v8 = vpop.f32.mrb[19].mxu0  ;;  %v1090_v9 = vpop.f32.mrb[19].mxu1 }
 0x77b   :  { %884 = vst.msk [vmem:[%s1534_s10] sm:$0xff] %vm53_vm0, %v871_v7  ;;  %886 = vst.msk [vmem:[%s1534_s10 + $0x10] sm:$0xff] %vm53_vm0, %v881_v58 }

// kernel: crossformer_forward.23
= control target key start
LH: loop header
LB: loop body
LE: loop exit
PB: predicated region body
PF: predicated region fallthrough
CT: control target
= control target key end

     0   :  { %vm77_vm0 = vcmask 261120   ;;  %v1887_v11 = vmov 0.0|0.0   ;;  %vm1888_vm1 = vmmov 0   ;;  %v1889_v17 = vmov 0.0   ;;  %s1891_s19 = smov 112   ;;  %s1893_s27 = smov 80   ;;  %s2324_s4 = inlined_call_operand.vmem [shape: f32[32,32], index: 4, kind: input, shape index: {}]   ;;  %s2325_s0 = inlined_call_operand.vmem [shape: f32[32,32], index: 0, kind: input, shape index: {}]   ;;  %s2326_s6 = inlined_call_operand.vmem [shape: f32[32,64], index: 6, kind: input, shape index: {}]   ;;  %s2327_s1 = inlined_call_operand.vmem [shape: f32[24,32], index: 1, kind: input, shape index: {}]   ;;  %s2328_s5 = inlined_call_operand.vmem [shape: f32[1,32], index: 5, kind: input, shape index: {}]   ;;  %s2329_s7 = inlined_call_operand.vmem [shape: f32[1,64], index: 7, kind: input, shape index: {}]   ;;  %s2330_s2 = inlined_call_operand.vmem [shape: f32[32,1], index: 2, kind: input, shape index: {}]   ;;  %s2331_s3 = inlined_call_operand.vmem [shape: f32[1,24], index: 3, kind: input, shape index: {}]   ;;  %s2332_s8 = inlined_call_operand.vmem [shape: f32[32,32], index: 8, kind: input, shape index: {}]   ;;  %s2333_s9 = inlined_call_operand.vmem [shape: f32[1,32], index: 9, kind: input, shape index: {}]   ;;  %s2334_s12 = inlined_call_operand.vmem [shape: f32[32,64], index: 12, kind: input, shape index: {}]   ;;  %s2335_s10 = inlined_call_operand.vmem [shape: f32[1,32], index: 10, kind: input, shape index: {}]   ;;  %s2336_s11 = inlined_call_operand.vmem [shape: f32[1,32], index: 11, kind: input, shape index: {}]   ;;  %s2337_s14 = inlined_call_operand.vmem [shape: f32[64,32], index: 14, kind: input, shape index: {}]   ;;  %s2338_s13 = inlined_call_operand.vmem [shape: f32[1,64], index: 13, kind: input, shape index: {}]   ;;  %s2339_s15 = inlined_call_operand.vmem [shape: f32[1,32], index: 15, kind: input, shape index: {}]   ;;  %s2340_s16 = inlined_call_operand.vmem [shape: f32[1,32], index: 16, kind: input, shape index: {}]   ;;  %s2341_s17 = inlined_call_operand.vmem [shape: f32[1,32], index: 17, kind: input, shape index: {}]   ;;  %s2342_s18 = inlined_call_operand.vmem [shape: f32[32,32], index: 18, kind: output, shape index: {}]  }
   0x1   :  { %2346 = sst [smem:[#allocation2_spill]] %s2324_s4  ;;  %v63_v18 = vld [vmem:[%s2327_s1] sm:$0xff]  ;;  %v64_v19 = vld [vmem:[%s2327_s1 + $0x8] sm:$0xff]  ;;  %v65_v20 = vld [vmem:[%s2327_s1 + $0x10] sm:$0xff]  ;;  %v1890_v21 = vmov 0   ;;  %vm310_vm2 = vcmask 130048  }
   0x2   :  { %2347 = sst [smem:[#allocation3_spill]] %s2325_s0  ;;  %s2349_s29 = sld [smem:[#allocation2_spill]]  ;;  %1812 = vset.pattern.permute.xlu1 %v1890_v21  ;;  %1811 = vset.pattern.permute.xlu0 %v1890_v21  ;;  %v1473_v22 = vld [vmem:[%s2328_s5] ss:$0 sm:$0xff]  ;;  %v276_v37 = vld [vmem:[%s2330_s2 + $0x8] sm:$0xff]  ;;  %vm2069_vm3 = vmpackc.low %vm310_vm2, %vm310_vm2  ;;  %vm425_vm6 = vcmask 195584  }
   0x3   :  { %2348 = sst [smem:[#allocation4_spill]] %s2326_s6  ;;  %s2350_s23 = sld [smem:[#allocation3_spill]]  ;;  %v1478_v32 = vld [vmem:[%s2329_s7] ss:$0 sm:$0xff]  ;;  %v277_v44 = vld [vmem:[%s2330_s2 + $0x10] sm:$0xff]  ;;  %v278_v47 = vld [vmem:[%s2330_s2 + $0x18] sm:$0xff] }
   0x4   :  { %s2351_s26 = sld [smem:[#allocation4_spill]]  ;;  %v275_v46 = vld [vmem:[%s2330_s2] sm:$0xff]  ;;  %s1894_s5 = smov 16   ;;  %vm1278_vm12 = vcmask 523264  }
   0x5   :  { %v1482_v59 = vld [vmem:[%s2331_s3] ss:$0 sm:$0xff]  ;;  %s1892_s3 = smov 96  }
   0x8   :  { %v66_v0 = vld [vmem:[%s2349_s29] sm:$0xff]  ;;  %v67_v1 = vld [vmem:[%s2349_s29 + $0x8] sm:$0xff]  ;;  %v68_v2 = vld [vmem:[%s2349_s29 + $0x10] sm:$0xff] }
   0x9   :  { %v1732_v3 = vpack.c.bf16 %v67_v1, %v66_v0  ;;  %v69_v4 = vld [vmem:[%s2349_s29 + $0x18] sm:$0xff]  ;;  %v2005_v5 = vld [vmem:[%s2350_s23] sm:$0xff]  ;;  %v2018_v9 = vld [vmem:[%s2350_s23 + $0x8] sm:$0xff] }
   0xa   :  { %v1736_v6 = vpack.c.bf16 %v69_v4, %v68_v2  ;;  %1611 = vmatprep.mubr.msk.f32.mxu0 %vm77_vm0, %v2005_v5  ;;  %v175_v7 = vld [vmem:[%s2351_s26] sm:$0xff]  ;;  %v176_v8 = vld [vmem:[%s2351_s26 + $0x8] sm:$0xff]  ;;  %v2023_v12 = vld [vmem:[%s2350_s23 + $0x10] sm:$0xff] }
   0xb   :  { %1733 = vmatprep.subr.bf16.mxu0 %v1732_v3  ;;  %v1741_v10 = vpack.c.bf16 %v176_v8, %v175_v7  ;;  %v177_v13 = vld [vmem:[%s2351_s26 + $0x10] sm:$0xff]  ;;  %v178_v14 = vld [vmem:[%s2351_s26 + $0x18] sm:$0xff] }
   0xc   :  { %1735 = vmatpush3.bf16.msra.mxu0 %v1732_v3  ;;  %v2038_v15 = vld [vmem:[%s2350_s23 + $0x18] sm:$0xff]  ;;  %v1744_v16 = vpack.c.bf16 %v178_v14, %v177_v13 }
   0xd   :  { %1737 = vmatprep.subr.bf16.mxu0 %v1736_v6 }
  0x10   :  { %1739 = vmatpush3.bf16.msra.mxu0 %v1736_v6 }
  0x11   :  { %1740 = vmatprep.subr.bf16.mxu0 %v1887_v11 }
  0x13   :  { %1612 = vmatmul.mubr.msk.f32.vlgmr.msra.gmra.mrb[0].mxu0 %vm77_vm0, %v2018_v9 }
  0x14   :  { %1742 = vmatpush3.bf16.msra.mxu0 %v1741_v10  ;;  %1614 = vmatprep.mubr.msk.f32.mxu0 %vm77_vm0, %v2023_v12 }
  0x15   :  { %1743 = vmatprep.subr.bf16.mxu0 %v1887_v11 }
  0x17   :  { %1615 = vmatmul.mubr.msk.f32.gmra.mrb[2].mxu0 %vm77_vm0, %v2038_v15 }
  0x18   :  { %1745 = vmatpush3.bf16.msra.mxu0 %v1744_v16  ;;  %1625 = vmatprep.mubr.msk.f32.mxu0 %vm1888_vm1, %v1889_v17 }
  0x1b   :  { %1626 = vmatmul.mubr.msk.f32.vlgmr.msra.gmra.mrb[4].mxu0 %vm77_vm0, %v63_v18 }
  0x1c   :  { %1628 = vmatprep.mubr.msk.f32.mxu0 %vm1888_vm1, %v1889_v17 }
  0x1f   :  { %1629 = vmatmul.mubr.msk.f32.gmra.mrb[6].mxu0 %vm77_vm0, %v64_v19 }
  0x20   :  { %1631 = vmatprep.mubr.msk.f32.mxu0 %vm1888_vm1, %v1889_v17 }
  0x23   :  { %1632 = vmatmul.mubr.msk.f32.gmra.mrb[8].mxu0 %vm77_vm0, %v65_v20 }
  0xe6   :  { %v1613_v23 = vpop.f32.mrb[0].mxu0 }
  0xe7   :  { %v156_v24 = vpop.f32.mrb[1].mxu0  ;;  %v162_v28 = vadd.f32 %v1613_v23, %v1473_v22 }
  0xe8   :  { %v157_v25 = vadd.f32 %v1473_v22, %v156_v24 }
  0xea   :  { %v1616_v26 = vpop.f32.mrb[2].mxu0  ;;  %576 = vrot.lane.b32.xlu1 %v157_v25, %s1891_s19  ;;  %1640 = vmatprep.mubr.msk.f32.mxu0 %vm310_vm2, %v157_v25 }
  0xeb   :  { %v166_v27 = vpop.f32.mrb[3].mxu0  ;;  %v172_v31 = vadd.f32 %v1616_v26, %v1473_v22 }
  0xec   :  { %v167_v45 = vadd.f32 %v1473_v22, %v166_v27 }
  0xee   :  { %v261_v29 = vpop.f32.mrb[4].mxu0  ;;  %578 = vrot.lane.b32.xlu1 %v162_v28, %s1891_s19 }
  0xef   :  { %v1627_v30 = vpop.f32.mrb[5].mxu0  ;;  %v262_v34 = vadd.f32 %v1478_v32, %v261_v29 }
  0xf2   :  { %v266_v33 = vpop.f32.mrb[6].mxu0  ;;  %582 = vrot.lane.b32.xlu1 %v172_v31, %s1891_s19 }
  0xf3   :  { %v267_v35 = vadd.f32 %v1478_v32, %v266_v33  ;;  %v1630_v36 = vpop.f32.mrb[7].mxu0 }
  0xf5   :  { %v2073_v39 = vpack.i.bf16 %v267_v35, %v262_v34  ;;  %v1746_v40 = vpack.c.bf16 %v267_v35, %v262_v34 }
  0xf6   :  { %v271_v41 = vpop.f32.mrb[8].mxu0  ;;  %287 = vperm.xlu1 %1812, %v276_v37  }
  0xf7   :  { %1807 = vrot.lane.b32.xlu0 %v2073_v39, %s1891_s19  ;;  %1748 = vmatprep.subr.msk.bf16.mxu0 %vm2069_vm3, %v1746_v40  ;;  %v2079_v42 = vadd.f32 %v1478_v32, %v271_v41  ;;  %v1633_v43 = vpop.f32.mrb[9].mxu0 }
  0xf8   :  { %1751 = vmatpush3.bf16.xpose.msk.msra.mxu0 %vm2069_vm3, %v1746_v40 }
  0xf9   :  { %1638 = vmatprep.subr.msk.mxu0 %vm310_vm2, %v2079_v42 }
  0xfa   :  { %292 = vperm.xlu1 %1812, %v277_v44  }
  0xfb   :  { %588 = vrot.lane.b32.xlu0 %v2079_v42, %s1891_s19 }
  0xff   :  { %580 = vrot.lane.b32.xlu0 %v167_v45, %s1891_s19 }
 0x100   :  { %1639 = vmatpush3.xpose.msk.msra.mxu0 %vm310_vm2, %v2079_v42 }
 0x103   :  { %1641 = vmatmul.mubr.msk.f32.vlgmr.msra.gmra.mrb[10].mxu0 %vm310_vm2, %v162_v28  ;;  %282 = vperm.xlu0 %1811, %v275_v46  }
 0x104   :  { %1643 = vmatprep.mubr.msk.f32.mxu0 %vm310_vm2, %v167_v45 }
 0x107   :  { %1644 = vmatmul.mubr.msk.f32.gmra.mrb[12].mxu0 %vm310_vm2, %v172_v31  ;;  %297 = vperm.xlu0 %1811, %v278_v47  }
 0x15c   :  { %v577_v48 = vpop.permute.xlu1 %576 }
 0x15d   :  { %1664 = vmatprep.mubr.msk.f32.mxu0 %vm310_vm2, %v577_v48 }
 0x160   :  { %v579_v54 = vpop.permute.xlu1 %578 }
 0x164   :  { %v583_v56 = vpop.permute.xlu1 %582 }
 0x169   :  { %v1808_v49 = vpop.permute.xlu0 %1807 }
 0x16a   :  { %v1810_v50 = vunpack.i.h.bf16 %v1808_v49  ;;  %v1809_v51 = vunpack.i.l.bf16 %v1808_v49 }
 0x16c   :  { %v1756_v52 = vpack.c.bf16 %v1810_v50, %v1809_v51 }
 0x16d   :  { %v589_v53 = vpop.permute.xlu0 %588 }
 0x16e   :  { %1758 = vmatprep.subr.msk.bf16.mxu0 %vm2069_vm3, %v1756_v52 }
 0x16f   :  { %1761 = vmatpush3.bf16.xpose.msk.msra.mxu0 %vm2069_vm3, %v1756_v52 }
 0x170   :  { %1662 = vmatprep.subr.msk.mxu0 %vm310_vm2, %v589_v53 }
 0x171   :  { %v581_v55 = vpop.permute.xlu0 %580 }
 0x175   :  { %v288_v58 = vpop.permute.xlu1 %287 }
 0x176   :  { %vm307_vm4 = vcmp.eq.f32.partialorder %v288_v58, %v1482_v59 }
 0x177   :  { %1663 = vmatpush3.xpose.msk.msra.mxu0 %vm310_vm2, %v589_v53 }
 0x179   :  { %v293_v1 = vpop.permute.xlu1 %292 }
 0x17a   :  { %1665 = vmatmul.mubr.msk.f32.vlgmr.msra.gmra.mrb[14].mxu0 %vm310_vm2, %v579_v54  ;;  %vm308_vm8 = vcmp.eq.f32.partialorder %v293_v1, %v1482_v59 }
 0x17b   :  { %1667 = vmatprep.mubr.msk.f32.mxu0 %vm310_vm2, %v581_v55 }
 0x17e   :  { %1668 = vmatmul.mubr.msk.f32.gmra.mrb[16].mxu0 %vm310_vm2, %v583_v56 }
 0x182   :  { %v283_v57 = vpop.permute.xlu0 %282 }
 0x183   :  { %vm306_vm5 = vcmp.eq.f32.partialorder %v283_v57, %v1482_v59 }
 0x186   :  { %v298_v63 = vpop.permute.xlu0 %297 }
 0x187   :  { %vm309_vm7 = vcmp.eq.f32.partialorder %v298_v63, %v1482_v59 }
 0x1d6   :  { %v1642_v60 = vpop.f32.mrb[10].mxu0 }
 0x1d7   :  { %v418_v61 = vmul.f32 0.25, %v1642_v60  ;;  %v398_v62 = vpop.f32.mrb[11].mxu0 }
 0x1d8   :  { %v417_v0 = vmul.f32 0.25, %v398_v62 }
 0x1d9   :  { %v422_v2 = vsel %vm307_vm4, %v418_v61, -1e+30 }
 0x1da   :  { %v1645_v3 = vpop.f32.mrb[12].mxu0  ;;  %v429_v4 = vsel %vm425_vm6, %v422_v2, -inf  ;;  %v421_v6 = vsel %vm306_vm5, %v417_v0, -1e+30 }
 0x1db   :  { %v420_v7 = vmul.f32 0.25, %v1645_v3  ;;  %430 = vmax.xlane.f32.xlu0 %v429_v4  ;;  %v408_v8 = vpop.f32.mrb[13].mxu0  ;;  %v426_v10 = vsel %vm425_vm6, %v421_v6, -inf }
 0x1dc   :  { %v419_v11 = vmul.f32 0.25, %v408_v8  ;;  %427 = vmax.xlane.f32.xlu1 %v426_v10 }
 0x1dd   :  { %v424_v13 = vsel %vm309_vm7, %v420_v7, -1e+30 }
 0x1de   :  { %v435_v14 = vsel %vm425_vm6, %v424_v13, -inf  ;;  %v423_v16 = vsel %vm308_vm8, %v419_v11, -1e+30 }
 0x1df   :  { %v432_v17 = vsel %vm425_vm6, %v423_v16, -inf }
 0x1e0   :  { %436 = vmax.xlane.f32.xlu1 %v435_v14  ;;  %433 = vmax.xlane.f32.xlu0 %v432_v17 }
 0x24d   :  { %v1666_v18 = vpop.f32.mrb[14].mxu0 }
 0x24e   :  { %v690_v19 = vmul.f32 0.25, %v1666_v18  ;;  %v670_v20 = vpop.f32.mrb[15].mxu0 }
 0x24f   :  { %v689_v21 = vmul.f32 0.25, %v670_v20 }
 0x250   :  { %v694_v22 = vsel %vm307_vm4, %v690_v19, -1e+30 }
 0x251   :  { %v1669_v23 = vpop.f32.mrb[16].mxu0  ;;  %v700_v24 = vsel %vm425_vm6, %v694_v22, -inf  ;;  %v693_v25 = vsel %vm306_vm5, %v689_v21, -1e+30 }
 0x252   :  { %v692_v26 = vmul.f32 0.25, %v1669_v23  ;;  %701 = vmax.xlane.f32.xlu1 %v700_v24  ;;  %v680_v27 = vpop.f32.mrb[17].mxu0  ;;  %v697_v28 = vsel %vm425_vm6, %v693_v25, -inf }
 0x253   :  { %v691_v29 = vmul.f32 0.25, %v680_v27  ;;  %698 = vmax.xlane.f32.xlu0 %v697_v28 }
 0x254   :  { %v696_v30 = vsel %vm309_vm7, %v692_v26, -1e+30 }
 0x255   :  { %v706_v31 = vsel %vm425_vm6, %v696_v30, -inf  ;;  %v695_v32 = vsel %vm308_vm8, %v691_v29, -1e+30 }
 0x256   :  { %707 = vmax.xlane.f32.xlu1 %v706_v31  ;;  %v703_v33 = vsel %vm425_vm6, %v695_v32, -inf }
 0x257   :  { %704 = vmax.xlane.f32.xlu0 %v703_v33 }
 0x267   :  { %474 = vrot.lane.b32.xlu1 %v2079_v42, %s1892_s3 }
 0x268   :  { %v431_v35 = vpop.xlane.xlu0 %430 }
 0x269   :  { %v428_v34 = vpop.xlane.xlu1 %427  ;;  %v439_v36 = vsub.f32 %v422_v2, %v431_v35 }
 0x26a   :  { %v438_v37 = vsub.f32 %v421_v6, %v428_v34 }
 0x26b   :  { %v444_v41 = vmul.f32 1.442695, %v439_v36 }
 0x26c   :  { %v442_v44 = vmul.f32 1.442695, %v438_v37 }
 0x26d   :  { %1814 = vrot.lane.b32.xlu0 %v2073_v39, %s1892_s3  ;;  %v437_v38 = vpop.xlane.xlu1 %436  ;;  %v434_v40 = vpop.xlane.xlu0 %433  ;;  %1823 = vpow2.f32 %v444_v41 }
 0x26e   :  { %v441_v43 = vsub.f32 %v424_v13, %v437_v38  ;;  %v440_v45 = vsub.f32 %v423_v16, %v434_v40  ;;  %1825 = vpow2.f32 %v442_v44 }
 0x270   :  { %v448_v46 = vmul.f32 1.442695, %v441_v43  ;;  %v446_v47 = vmul.f32 1.442695, %v440_v45 }
 0x272   :  { %1827 = vpow2.f32 %v448_v46 }
 0x273   :  { %1829 = vpow2.f32 %v446_v47 }
 0x277   :  { %v2133_v48 = vpop.eup %1823 }
 0x278   :  { %v1826_v49 = vpop.eup %1825  ;;  %v453_v50 = vsel %vm425_vm6, %v2133_v48, 0.0 }
 0x279   :  { %v450_v52 = vsel %vm425_vm6, %v1826_v49, 0.0 }
 0x27c   :  { %v2137_v51 = vpop.eup %1827 }
 0x27d   :  { %v1830_v53 = vpop.eup %1829  ;;  %v459_v54 = vsel %vm425_vm6, %v2137_v51, 0.0 }
 0x27e   :  { %v456_v55 = vsel %vm425_vm6, %v1830_v53, 0.0 }
 0x28b   :  { %454 = vadd.xlane.f32.xlu1 %v453_v50  ;;  %v867_v50 = vld [vmem:[%s2332_s8] sm:$0xff] }
 0x28c   :  { %451 = vadd.xlane.f32.xlu0 %v450_v52  ;;  %v869_v52 = vld [vmem:[%s2332_s8 + $0x10] sm:$0xff] }
 0x28f   :  { %460 = vadd.xlane.f32.xlu1 %v459_v54  ;;  %v870_v54 = vld [vmem:[%s2332_s8 + $0x18] sm:$0xff] }
 0x290   :  { %457 = vadd.xlane.f32.xlu0 %v456_v55  ;;  %v1770_v55 = vpack.c.bf16 %v870_v54, %v869_v52 }
 0x2df   :  { %v702_v56 = vpop.xlane.xlu1 %701 }
 0x2e0   :  { %v710_v57 = vsub.f32 %v694_v22, %v702_v56  ;;  %v699_v58 = vpop.xlane.xlu0 %698 }
 0x2e1   :  { %v709_v59 = vsub.f32 %v693_v25, %v699_v58 }
 0x2e2   :  { %v715_v60 = vmul.f32 1.442695, %v710_v57 }
 0x2e3   :  { %v713_v61 = vmul.f32 1.442695, %v709_v59  ;;  %v708_v62 = vpop.xlane.xlu1 %707 }
 0x2e4   :  { %1831 = vpow2.f32 %v715_v60  ;;  %v712_v63 = vsub.f32 %v696_v30, %v708_v62  ;;  %v705_v0 = vpop.xlane.xlu0 %704 }
 0x2e5   :  { %1833 = vpow2.f32 %v713_v61  ;;  %v711_v1 = vsub.f32 %v695_v32, %v705_v0 }
 0x2e6   :  { %v719_v2 = vmul.f32 1.442695, %v712_v63 }
 0x2e7   :  { %v717_v3 = vmul.f32 1.442695, %v711_v1  ;;  %v475_v11 = vpop.permute.xlu1 %474 }
 0x2e8   :  { %1835 = vpow2.f32 %v719_v2  ;;  %v1815_v4 = vpop.permute.xlu0 %1814 }
 0x2e9   :  { %1837 = vpow2.f32 %v717_v3  ;;  %v1817_v6 = vunpack.i.h.bf16 %v1815_v4  ;;  %v1816_v7 = vunpack.i.l.bf16 %v1815_v4 }
 0x2eb   :  { %v1752_v8 = vpack.c.bf16 %v1817_v6, %v1816_v7 }
 0x2ed   :  { %1753 = vmatprep.subr.bf16.mxu1 %v1752_v8 }
 0x2ee   :  { %v1832_v10 = vpop.eup %1831  ;;  %1755 = vmatpush3.bf16.msra.mxu1 %v1752_v8 }
 0x2ef   :  { %v1834_v13 = vpop.eup %1833  ;;  %1650 = vmatprep.subr.mxu1 %v475_v11  ;;  %v724_v14 = vsel %vm425_vm6, %v1832_v10, 0.0 }
 0x2f0   :  { %725 = vadd.xlane.f32.xlu1 %v724_v14  ;;  %v721_v16 = vsel %vm425_vm6, %v1834_v13, 0.0 }
 0x2f1   :  { %722 = vadd.xlane.f32.xlu0 %v721_v16 }
 0x2f2   :  { %v1836_v17 = vpop.eup %1835  ;;  %1651 = vmatpush3.msra.mxu1 %v475_v11 }
 0x2f3   :  { %v1838_v18 = vpop.eup %1837  ;;  %v730_v19 = vsel %vm425_vm6, %v1836_v17, 0.0 }
 0x2f4   :  { %731 = vadd.xlane.f32.xlu1 %v730_v19  ;;  %v727_v20 = vsel %vm425_vm6, %v1838_v18, 0.0 }
 0x2f5   :  { %728 = vadd.xlane.f32.xlu0 %v727_v20 }
 0x305   :  { %1819 = vrot.lane.b32.xlu1 %v2073_v39, %s1893_s27 }
 0x30b   :  { %745 = vrot.lane.b32.xlu0 %v2079_v42, %s1893_s27 }
 0x318   :  { %v455_v21 = vpop.xlane.xlu1 %454 }
 0x319   :  { %1839 = vrcp.f32 %v455_v21  ;;  %v452_v22 = vpop.xlane.xlu0 %451 }
 0x31a   :  { %1841 = vrcp.f32 %v452_v22 }
 0x31c   :  { %v461_v23 = vpop.xlane.xlu1 %460 }
 0x31d   :  { %1843 = vrcp.f32 %v461_v23  ;;  %v458_v24 = vpop.xlane.xlu0 %457 }
 0x31e   :  { %1845 = vrcp.f32 %v458_v24 }
 0x323   :  { %v1840_v25 = vpop.eup %1839 }
 0x324   :  { %v1842_v26 = vpop.eup %1841  ;;  %v467_v28 = vmul.f32 %v1840_v25, %v2133_v48 }
 0x325   :  { %v466_v27 = vmul.f32 %v1842_v26, %v1826_v49 }
 0x327   :  { %v1844_v29 = vpop.eup %1843  ;;  %1652 = vmatprep.mubr.msk.f32.mxu1 %vm425_vm6, %v466_v27 }
 0x328   :  { %v1846_v30 = vpop.eup %1845  ;;  %1653 = vmatmul.mubr.msk.f32.vlgmr.msra.gmra.mrb[0].mxu1 %vm425_vm6, %v467_v28  ;;  %v469_v42 = vmul.f32 %v1844_v29, %v2137_v51  ;;  %v868_v51 = vld [vmem:[%s2332_s8 + $0x8] sm:$0xff] }
 0x329   :  { %v468_v39 = vmul.f32 %v1846_v30, %v1830_v53  ;;  %v1766_v53 = vpack.c.bf16 %v868_v51, %v867_v50 }
 0x32b   :  { %1655 = vmatprep.mubr.msk.f32.mxu1 %vm425_vm6, %v468_v39 }
 0x32c   :  { %1656 = vmatmul.mubr.msk.f32.gmra.mrb[2].mxu1 %vm425_vm6, %v469_v42 }
 0x37d   :  { %v726_v31 = vpop.xlane.xlu1 %725 }
 0x37e   :  { %v723_v32 = vpop.xlane.xlu0 %722 }
 0x37f   :  { %1847 = vrcp.f32 %v723_v32 }
 0x380   :  { %1849 = vrcp.f32 %v726_v31 }
 0x381   :  { %v732_v33 = vpop.xlane.xlu1 %731 }
 0x382   :  { %v729_v34 = vpop.xlane.xlu0 %728 }
 0x383   :  { %1851 = vrcp.f32 %v729_v34 }
 0x384   :  { %1853 = vrcp.f32 %v732_v33 }
 0x385   :  { %v1820_v35 = vpop.permute.xlu1 %1819 }
 0x386   :  { %v1822_v36 = vunpack.i.h.bf16 %v1820_v35  ;;  %v1821_v37 = vunpack.i.l.bf16 %v1820_v35  ;;  %v746_v44 = vpop.permute.xlu0 %745 }
 0x388   :  { %v1762_v38 = vpack.c.bf16 %v1822_v36, %v1821_v37 }
 0x389   :  { %v1848_v40 = vpop.eup %1847 }
 0x38a   :  { %1763 = vmatprep.subr.bf16.mxu1 %v1762_v38  ;;  %v737_v41 = vmul.f32 %v1848_v40, %v1834_v13  ;;  %v1850_v43 = vpop.eup %1849 }
 0x38b   :  { %1765 = vmatpush3.bf16.msra.mxu1 %v1762_v38  ;;  %v738_v46 = vmul.f32 %v1850_v43, %v1832_v10  ;;  %v1505_v10 = vld [vmem:[%s2333_s9] ss:$0 sm:$0xff] }
 0x38c   :  { %1674 = vmatprep.subr.mxu1 %v746_v44  ;;  %1676 = vmatprep.mubr.msk.f32.mxu1 %vm425_vm6, %v737_v41 }
 0x38d   :  { %v1852_v45 = vpop.eup %1851 }
 0x38e   :  { %v739_v47 = vmul.f32 %v1852_v45, %v1838_v18  ;;  %v1854_v48 = vpop.eup %1853  ;;  %v1054_v45 = vld [vmem:[%s2334_s12] sm:$0xff] }
 0x38f   :  { %1675 = vmatpush3.msra.mxu1 %v746_v44  ;;  %v740_v49 = vmul.f32 %v1854_v48, %v1836_v17  ;;  %v1056_v48 = vld [vmem:[%s2334_s12 + $0x10] sm:$0xff] }
 0x390   :  { %1677 = vmatmul.mubr.msk.f32.vlgmr.msra.gmra.mrb[4].mxu1 %vm425_vm6, %v738_v46  ;;  %1767 = vmatprep.subr.bf16.mxu1 %v1766_v53  ;;  %v1055_v46 = vld [vmem:[%s2334_s12 + $0x8] sm:$0xff] }
 0x391   :  { %1679 = vmatprep.mubr.msk.f32.mxu1 %vm425_vm6, %v739_v47  ;;  %1769 = vmatpush3.bf16.msra.mxu1 %v1766_v53  ;;  %v1774_v47 = vpack.c.bf16 %v1055_v46, %v1054_v45 }
 0x392   :  { %1771 = vmatprep.subr.bf16.mxu1 %v1770_v55 }
 0x394   :  { %1680 = vmatmul.mubr.msk.f32.gmra.mrb[6].mxu1 %vm425_vm6, %v740_v49  ;;  %v1057_v49 = vld [vmem:[%s2334_s12 + $0x18] sm:$0xff] }
 0x395   :  { %1773 = vmatpush3.bf16.msra.mxu1 %v1770_v55  ;;  %v1778_v50 = vpack.c.bf16 %v1057_v49, %v1056_v48 }
 0x396   :  { %1775 = vmatprep.subr.bf16.mxu1 %v1774_v47 }
 0x3fb   :  { %v1654_v56 = vpop.f32.mrb[0].mxu1 }
 0x3fc   :  { %v557_v57 = vpop.f32.mrb[1].mxu1 }
 0x3ff   :  { %v1657_v58 = vpop.f32.mrb[2].mxu1 }
 0x400   :  { %v567_v59 = vpop.f32.mrb[3].mxu1 }
 0x463   :  { %v1678_v60 = vpop.f32.mrb[4].mxu1 }
 0x464   :  { %853 = vrot.lane.b32.xlu0 %v1678_v60, %s1894_s5  ;;  %v828_v61 = vpop.f32.mrb[5].mxu1 }
 0x465   :  { %851 = vrot.lane.b32.xlu1 %v828_v61, %s1894_s5 }
 0x467   :  { %v1681_v62 = vpop.f32.mrb[6].mxu1 }
 0x468   :  { %857 = vrot.lane.b32.xlu0 %v1681_v62, %s1894_s5  ;;  %v838_v63 = vpop.f32.mrb[7].mxu1 }
 0x469   :  { %855 = vrot.lane.b32.xlu1 %v838_v63, %s1894_s5 }
 0x4d6   :  { %v854_v0 = vpop.permute.xlu0 %853 }
 0x4d7   :  { %v852_v1 = vpop.permute.xlu1 %851  ;;  %v864_v3 = vsel %vm310_vm2, %v1654_v56, %v854_v0  ;;  %v1510_v0 = vld [vmem:[%s2335_s10] ss:$0 sm:$0xff] }
 0x4d8   :  { %v863_v2 = vsel %vm310_vm2, %v557_v57, %v852_v1 }
 0x4d9   :  { %1690 = vmatprep.mubr.msk.f32.mxu1 %vm77_vm0, %v863_v2 }
 0x4da   :  { %1691 = vmatmul.mubr.msk.f32.vlgmr.msra.gmra.mrb[8].mxu1 %vm77_vm0, %v864_v3  ;;  %v858_v4 = vpop.permute.xlu0 %857 }
 0x4db   :  { %v856_v6 = vpop.permute.xlu1 %855  ;;  %v866_v8 = vsel %vm310_vm2, %v1657_v58, %v858_v4  ;;  %1777 = vmatpush3.bf16.msra.mxu1 %v1774_v47  ;;  %v1511_v4 = vld [vmem:[%s2336_s11] ss:$0 sm:$0xff] }
 0x4dc   :  { %v865_v7 = vsel %vm310_vm2, %v567_v59, %v856_v6  ;;  %1779 = vmatprep.subr.bf16.mxu1 %v1778_v50 }
 0x4dd   :  { %1693 = vmatprep.mubr.msk.f32.mxu1 %vm77_vm0, %v865_v7 }
 0x4de   :  { %1694 = vmatmul.mubr.msk.f32.gmra.mrb[10].mxu1 %vm77_vm0, %v866_v8 }
 0x4df   :  { %1781 = vmatpush3.bf16.msra.mxu1 %v1778_v50 }
 0x5ad   :  { %v1692_v11 = vpop.f32.mrb[8].mxu1 }
 0x5ae   :  { %v962_v13 = vadd.f32 %v1692_v11, %v1505_v10  ;;  %v956_v14 = vpop.f32.mrb[9].mxu1 }
 0x5af   :  { %v957_v16 = vadd.f32 %v1505_v10, %v956_v14 }
 0x5b0   :  { %v976_v17 = vadd.f32 %v962_v13, %v2018_v9 }
 0x5b1   :  { %v1695_v18 = vpop.f32.mrb[10].mxu1  ;;  %v975_v19 = vadd.f32 %v957_v16, %v2005_v5 }
 0x5b2   :  { %v972_v20 = vadd.f32 %v1695_v18, %v1505_v10  ;;  %v966_v21 = vpop.f32.mrb[11].mxu1  ;;  %v984_v22 = vsel %vm77_vm0, %v976_v17, 0.0 }
 0x5b3   :  { %v967_v23 = vadd.f32 %v1505_v10, %v966_v21  ;;  %985 = vadd.xlane.f32.xlu0 %v984_v22  ;;  %v981_v24 = vsel %vm77_vm0, %v975_v19, 0.0  ;;  %v1270_v21 = vld [vmem:[%s2337_s14] sm:$0xff]  ;;  %v1271_v22 = vld [vmem:[%s2337_s14 + $0x8] sm:$0xff] }
 0x5b4   :  { %982 = vadd.xlane.f32.xlu1 %v981_v24  ;;  %v978_v25 = vadd.f32 %v972_v20, %v2038_v15  ;;  %v1272_v24 = vld [vmem:[%s2337_s14 + $0x10] sm:$0xff] }
 0x5b5   :  { %v977_v26 = vadd.f32 %v967_v23, %v2023_v12  ;;  %v1782_v23 = vpack.c.bf16 %v1271_v22, %v1270_v21 }
 0x5b6   :  { %v990_v27 = vsel %vm77_vm0, %v978_v25, 0.0 }
 0x5b7   :  { %v987_v9 = vsel %vm77_vm0, %v977_v26, 0.0  ;;  %1783 = vmatprep.subr.bf16.mxu1 %v1782_v23 }
 0x5b8   :  { %988 = vadd.xlane.f32.xlu0 %v987_v9  ;;  %991 = vadd.xlane.f32.xlu1 %v990_v27  ;;  %v1274_v27 = vld [vmem:[%s2337_s14 + $0x20] sm:$0xff]  ;;  %v1275_v9 = vld [vmem:[%s2337_s14 + $0x28] sm:$0xff] }
 0x640   :  { %v986_v5 = vpop.xlane.xlu0 %985 }
 0x641   :  { %v995_v28 = vmul.f32 0.03125, %v986_v5  ;;  %v983_v29 = vpop.xlane.xlu1 %982  ;;  %v1790_v5 = vpack.c.bf16 %v1275_v9, %v1274_v27 }
 0x642   :  { %v994_v30 = vmul.f32 0.03125, %v983_v29  ;;  %v1277_v29 = vld [vmem:[%s2337_s14 + $0x38] sm:$0xff] }
 0x643   :  { %v999_v39 = vsub.f32 %v976_v17, %v995_v28  ;;  %v1276_v28 = vld [vmem:[%s2337_s14 + $0x30] sm:$0xff] }
 0x644   :  { %v998_v42 = vsub.f32 %v975_v19, %v994_v30  ;;  %v1794_v30 = vpack.c.bf16 %v1277_v29, %v1276_v28 }
 0x645   :  { %v989_v31 = vpop.xlane.xlu0 %988  ;;  %v992_v32 = vpop.xlane.xlu1 %991  ;;  %v1003_v33 = vmul.f32 %v999_v39, %v999_v39 }
 0x646   :  { %v996_v34 = vmul.f32 0.03125, %v989_v31  ;;  %v997_v35 = vmul.f32 0.03125, %v992_v32  ;;  %v1002_v15 = vmul.f32 %v998_v42, %v998_v42 }
 0x647   :  { %v1009_v12 = vsel %vm77_vm0, %v1003_v33, 0.0 }
 0x648   :  { %v1000_v36 = vsub.f32 %v977_v26, %v996_v34  ;;  %v1001_v37 = vsub.f32 %v978_v25, %v997_v35  ;;  %1010 = vadd.xlane.f32.xlu1 %v1009_v12  ;;  %v1006_v38 = vsel %vm77_vm0, %v1002_v15, 0.0  ;;  %v1273_v25 = vld [vmem:[%s2337_s14 + $0x18] sm:$0xff] }
 0x649   :  { %1007 = vadd.xlane.f32.xlu0 %v1006_v38  ;;  %v1786_v26 = vpack.c.bf16 %v1273_v25, %v1272_v24 }
 0x64a   :  { %v1004_v40 = vmul.f32 %v1000_v36, %v1000_v36  ;;  %v1005_v41 = vmul.f32 %v1001_v37, %v1001_v37 }
 0x64c   :  { %v1012_v43 = vsel %vm77_vm0, %v1004_v40, 0.0  ;;  %v1015_v44 = vsel %vm77_vm0, %v1005_v41, 0.0 }
 0x64d   :  { %1013 = vadd.xlane.f32.xlu0 %v1012_v43  ;;  %1016 = vadd.xlane.f32.xlu1 %v1015_v44 }
 0x6d5   :  { %v1011_v51 = vpop.xlane.xlu1 %1010 }
 0x6d6   :  { %v1019_v52 = vmul.f32 0.03125, %v1011_v51  ;;  %v1008_v53 = vpop.xlane.xlu0 %1007 }
 0x6d7   :  { %v1018_v54 = vmul.f32 0.03125, %v1008_v53 }
 0x6d8   :  { %v1023_v55 = vadd.f32 1e-05, %v1019_v52 }
 0x6d9   :  { %v1022_v56 = vadd.f32 1e-05, %v1018_v54 }
 0x6da   :  { %1855 = vrsqrt.f32 %v1023_v55  ;;  %v1014_v57 = vpop.xlane.xlu0 %1013  ;;  %v1017_v58 = vpop.xlane.xlu1 %1016 }
 0x6db   :  { %1857 = vrsqrt.f32 %v1022_v56  ;;  %v1020_v59 = vmul.f32 0.03125, %v1014_v57  ;;  %v1021_v60 = vmul.f32 0.03125, %v1017_v58 }
 0x6dd   :  { %v1024_v61 = vadd.f32 1e-05, %v1020_v59  ;;  %v1025_v62 = vadd.f32 1e-05, %v1021_v60 }
 0x6df   :  { %1859 = vrsqrt.f32 %v1024_v61 }
 0x6e0   :  { %1861 = vrsqrt.f32 %v1025_v62 }
 0x6e4   :  { %v1856_v63 = vpop.eup %1855 }
 0x6e5   :  { %v1858_v1 = vpop.eup %1857  ;;  %v1031_v2 = vmul.f32 %v1856_v63, %v999_v39  ;;  %v1512_v39 = vld [vmem:[%s2338_s13] ss:$0 sm:$0xff] }
 0x6e6   :  { %v1030_v3 = vmul.f32 %v1858_v1, %v998_v42 }
 0x6e7   :  { %v1041_v6 = vmul.f32 %v1510_v0, %v1031_v2 }
 0x6e8   :  { %v1040_v7 = vmul.f32 %v1510_v0, %v1030_v3 }
 0x6e9   :  { %v1860_v8 = vpop.eup %1859  ;;  %v2214_v14 = vadd.f32 %v1511_v4, %v1041_v6 }
 0x6ea   :  { %v1862_v10 = vpop.eup %1861  ;;  %v2212_v11 = vadd.f32 %v1511_v4, %v1040_v7  ;;  %v1032_v13 = vmul.f32 %v1860_v8, %v1000_v36 }
 0x6eb   :  { %v1033_v16 = vmul.f32 %v1862_v10, %v1001_v37 }
 0x6ec   :  { %1704 = vmatprep.mubr.msk.f32.mxu1 %vm77_vm0, %v2212_v11  ;;  %v1042_v17 = vmul.f32 %v1510_v0, %v1032_v13 }
 0x6ed   :  { %1705 = vmatmul.mubr.msk.f32.vlgmr.msra.gmra.mrb[12].mxu1 %vm77_vm0, %v2214_v14  ;;  %v1043_v18 = vmul.f32 %v1510_v0, %v1033_v16 }
 0x6ee   :  { %v2220_v19 = vadd.f32 %v1511_v4, %v1042_v17  ;;  %1785 = vmatpush3.bf16.msra.mxu1 %v1782_v23 }
 0x6ef   :  { %v2222_v20 = vadd.f32 %v1511_v4, %v1043_v18  ;;  %1787 = vmatprep.subr.bf16.mxu1 %v1786_v26 }
 0x6f0   :  { %1707 = vmatprep.mubr.msk.f32.mxu1 %vm77_vm0, %v2220_v19 }
 0x6f1   :  { %1708 = vmatmul.mubr.msk.f32.gmra.mrb[14].mxu1 %vm77_vm0, %v2222_v20 }
 0x6f2   :  { %1789 = vmatpush3.bf16.msra.mxu1 %v1786_v26 }
 0x6f3   :  { %1791 = vmatprep.subr.bf16.mxu1 %v1790_v5 }
 0x6f6   :  { %1793 = vmatpush3.bf16.msra.mxu1 %v1790_v5 }
 0x6f7   :  { %1795 = vmatprep.subr.bf16.mxu1 %v1794_v30 }
 0x6fa   :  { %1797 = vmatpush3.bf16.msra.mxu1 %v1794_v30 }
 0x7c0   :  { %v1706_v42 = vpop.f32.mrb[12].mxu1 }
 0x7c1   :  { %v2255_v31 = vadd.f32 %v1706_v42, %v1512_v39  ;;  %v1143_v32 = vpop.f32.mrb[13].mxu1 }
 0x7c2   :  { %v2257_v33 = vadd.f32 %v1512_v39, %v1143_v32 }
 0x7c3   :  { %v2260_v34 = vmul.f32 0.70710677, %v2255_v31 }
 0x7c4   :  { %v2263_v35 = vmul.f32 0.70710677, %v2257_v33  ;;  %v1709_v15 = vpop.f32.mrb[14].mxu1 }
 0x7c5   :  { %v1167_v12 = vand.u32 2147483647, %v2260_v34  ;;  %v2266_v36 = vadd.f32 %v1709_v15, %v1512_v39  ;;  %v1153_v37 = vpop.f32.mrb[15].mxu1  ;;  %vm1247_vm9 = vcmp.lt.f32.partialorder %v2260_v34, 0.0 }
 0x7c6   :  { %v1166_v38 = vand.u32 2147483647, %v2263_v35  ;;  %v2269_v40 = vadd.f32 %v1512_v39, %v1153_v37  ;;  %vm1246_vm10 = vcmp.lt.f32.partialorder %v2263_v35, 0.0 }
 0x7c7   :  { %v1171_v41 = vmul.f32 0.3275911, %v1167_v12  ;;  %v2272_v43 = vmul.f32 0.70710677, %v2266_v36  ;;  %v1223_v54 = vsub.f32 0.0, %v1167_v12 }
 0x7c8   :  { %v1170_v44 = vmul.f32 0.3275911, %v1166_v38  ;;  %v2275_v45 = vmul.f32 0.70710677, %v2269_v40  ;;  %v1222_v55 = vsub.f32 0.0, %v1166_v38 }
 0x7c9   :  { %v1175_v46 = vadd.f32 1.0, %v1171_v41  ;;  %v1169_v47 = vand.u32 2147483647, %v2272_v43  ;;  %v1227_v57 = vmul.f32 %v1223_v54, %v1167_v12  ;;  %vm1249_vm11 = vcmp.lt.f32.partialorder %v2272_v43, 0.0 }
 0x7ca   :  { %v1174_v48 = vadd.f32 1.0, %v1170_v44  ;;  %v1168_v49 = vand.u32 2147483647, %v2275_v45  ;;  %v1226_v61 = vmul.f32 %v1222_v55, %v1166_v38  ;;  %vm1248_vm13 = vcmp.lt.f32.partialorder %v2275_v45, 0.0 }
 0x7cb   :  { %1863 = vrcp.f32 %v1175_v46  ;;  %v1173_v50 = vmul.f32 0.3275911, %v1169_v47  ;;  %v1225_v58 = vsub.f32 0.0, %v1169_v47  ;;  %v1232_v2 = vmul.f32 1.442695, %v1227_v57 }
 0x7cc   :  { %1865 = vrcp.f32 %v1174_v48  ;;  %v1172_v51 = vmul.f32 0.3275911, %v1168_v49  ;;  %v1224_v62 = vsub.f32 0.0, %v1168_v49  ;;  %v1230_v8 = vmul.f32 1.442695, %v1226_v61 }
 0x7cd   :  { %v1177_v52 = vadd.f32 1.0, %v1173_v50  ;;  %v1229_v4 = vmul.f32 %v1225_v58, %v1169_v47 }
 0x7ce   :  { %v1176_v53 = vadd.f32 1.0, %v1172_v51  ;;  %v1228_v13 = vmul.f32 %v1224_v62, %v1168_v49 }
 0x7cf   :  { %1867 = vrcp.f32 %v1177_v52  ;;  %v1236_v23 = vmul.f32 1.442695, %v1229_v4 }
 0x7d0   :  { %1869 = vrcp.f32 %v1176_v53  ;;  %v1234_v27 = vmul.f32 1.442695, %v1228_v13  ;;  %v1258_v13 = vmul.f32 0.5, %v2257_v33  ;;  %v1261_v33 = vmul.f32 0.5, %v2266_v36 }
 0x7d1   :  { %1871 = vpow2.f32 %v1232_v2 }
 0x7d2   :  { %1873 = vpow2.f32 %v1230_v8 }
 0x7d3   :  { %1875 = vpow2.f32 %v1236_v23  ;;  %v1260_v23 = vmul.f32 0.5, %v2269_v40 }
 0x7d4   :  { %1877 = vpow2.f32 %v1234_v27 }
 0x7d5   :  { %v1864_v56 = vpop.eup %1863 }
 0x7d6   :  { %v1866_v59 = vpop.eup %1865  ;;  %v1187_v60 = vmul.f32 1.0614054, %v1864_v56 }
 0x7d7   :  { %v1186_v63 = vmul.f32 1.0614054, %v1866_v59 }
 0x7d8   :  { %v1518_v0 = vadd.f32 -1.4531521, %v1187_v60 }
 0x7d9   :  { %v1868_v1 = vpop.eup %1867  ;;  %v1517_v3 = vadd.f32 -1.4531521, %v1186_v63 }
 0x7da   :  { %v1870_v6 = vpop.eup %1869  ;;  %v1195_v7 = vmul.f32 %v1864_v56, %v1518_v0  ;;  %v1189_v10 = vmul.f32 1.0614054, %v1868_v1 }
 0x7db   :  { %v1194_v16 = vmul.f32 %v1866_v59, %v1517_v3  ;;  %v1188_v17 = vmul.f32 1.0614054, %v1870_v6  ;;  %v1872_v48 = vpop.eup %1871 }
 0x7dc   :  { %v1199_v18 = vadd.f32 1.4214138, %v1195_v7  ;;  %v1520_v21 = vadd.f32 -1.4531521, %v1189_v10  ;;  %v1874_v51 = vpop.eup %1873 }
 0x7dd   :  { %v1198_v22 = vadd.f32 1.4214138, %v1194_v16  ;;  %v1519_v24 = vadd.f32 -1.4531521, %v1188_v17  ;;  %v1876_v60 = vpop.eup %1875 }
 0x7de   :  { %v1203_v25 = vmul.f32 %v1864_v56, %v1199_v18  ;;  %v1197_v26 = vmul.f32 %v1868_v1, %v1520_v21  ;;  %v1878_v63 = vpop.eup %1877 }
 0x7df   :  { %v1202_v9 = vmul.f32 %v1866_v59, %v1198_v22  ;;  %v1196_v5 = vmul.f32 %v1870_v6, %v1519_v24 }
 0x7e0   :  { %v1522_v28 = vadd.f32 -0.28449672, %v1203_v25  ;;  %v1201_v29 = vadd.f32 1.4214138, %v1197_v26  ;;  %v1529_v26 = vld [vmem:[%s2339_s15] ss:$0 sm:$0xff] }
 0x7e1   :  { %v1521_v30 = vadd.f32 -0.28449672, %v1202_v9  ;;  %v1200_v39 = vadd.f32 1.4214138, %v1196_v5 }
 0x7e2   :  { %v1211_v42 = vmul.f32 %v1864_v56, %v1522_v28  ;;  %v1205_v32 = vmul.f32 %v1868_v1, %v1201_v29 }
 0x7e3   :  { %v1210_v15 = vmul.f32 %v1866_v59, %v1521_v30  ;;  %v1204_v12 = vmul.f32 %v1870_v6, %v1200_v39 }
 0x7e4   :  { %v1215_v37 = vadd.f32 0.2548296, %v1211_v42  ;;  %v1524_v38 = vadd.f32 -0.28449672, %v1205_v32 }
 0x7e5   :  { %v1214_v41 = vadd.f32 0.2548296, %v1210_v15  ;;  %v1523_v44 = vadd.f32 -0.28449672, %v1204_v12 }
 0x7e6   :  { %v1219_v46 = vmul.f32 %v1864_v56, %v1215_v37  ;;  %v1213_v47 = vmul.f32 %v1868_v1, %v1524_v38 }
 0x7e7   :  { %v1218_v49 = vmul.f32 %v1866_v59, %v1214_v41  ;;  %v1212_v50 = vmul.f32 %v1870_v6, %v1523_v44 }
 0x7e8   :  { %v1239_v52 = vmul.f32 %v1872_v48, %v1219_v46  ;;  %v1217_v53 = vadd.f32 0.2548296, %v1213_v47 }
 0x7e9   :  { %v1238_v54 = vmul.f32 %v1874_v51, %v1218_v49  ;;  %v1216_v55 = vadd.f32 0.2548296, %v1212_v50 }
 0x7ea   :  { %v1243_v57 = vsub.f32 1.0, %v1239_v52  ;;  %v1221_v58 = vmul.f32 %v1868_v1, %v1217_v53 }
 0x7eb   :  { %v1242_v61 = vsub.f32 1.0, %v1238_v54  ;;  %v1220_v62 = vmul.f32 %v1870_v6, %v1216_v55  ;;  %v1259_v6 = vmul.f32 0.5, %v2255_v31 }
 0x7ec   :  { %v1251_v0 = vsub.f32 0.0, %v1243_v57  ;;  %v1241_v2 = vmul.f32 %v1876_v60, %v1221_v58 }
 0x7ed   :  { %v1250_v56 = vsub.f32 0.0, %v1242_v61  ;;  %v1240_v3 = vmul.f32 %v1878_v63, %v1220_v62 }
 0x7ee   :  { %v1255_v4 = vsel %vm1247_vm9, %v1251_v0, %v1243_v57  ;;  %v1245_v59 = vsub.f32 1.0, %v1241_v2 }
 0x7ef   :  { %v1263_v7 = vadd.f32 1.0, %v1255_v4  ;;  %v1254_v8 = vsel %vm1246_vm10, %v1250_v56, %v1242_v61  ;;  %v1244_v10 = vsub.f32 1.0, %v1240_v3 }
 0x7f0   :  { %v1262_v1 = vadd.f32 1.0, %v1254_v8  ;;  %v1253_v16 = vsub.f32 0.0, %v1245_v59 }
 0x7f1   :  { %v1252_v17 = vsub.f32 0.0, %v1244_v10  ;;  %v1267_v21 = vmul.f32 %v1263_v7, %v1259_v6 }
 0x7f2   :  { %v1266_v34 = vmul.f32 %v1262_v1, %v1258_v13  ;;  %v1257_v18 = vsel %vm1249_vm11, %v1253_v16, %v1245_v59  ;;  %v1530_v1 = vld [vmem:[%s2340_s16] ss:$0 sm:$0xff] }
 0x7f3   :  { %v1265_v35 = vadd.f32 1.0, %v1257_v18  ;;  %v1256_v22 = vsel %vm1248_vm13, %v1252_v17, %v1244_v10  ;;  %v1531_v17 = vld [vmem:[%s2341_s17] ss:$0 sm:$0xff] }
 0x7f4   :  { %v1264_v24 = vadd.f32 1.0, %v1256_v22  ;;  %1726 = vmatprep.mubr.msk.f32.mxu1 %vm1278_vm12, %v1266_v34 }
 0x7f5   :  { %1727 = vmatmul.mubr.msk.f32.vlgmr.msra.gmra.mrb[16].mxu1 %vm1278_vm12, %v1267_v21  ;;  %v1269_v31 = vmul.f32 %v1265_v35, %v1261_v33 }
 0x7f6   :  { %v1268_v25 = vmul.f32 %v1264_v24, %v1260_v23 }
 0x7f8   :  { %1729 = vmatprep.mubr.msk.f32.mxu1 %vm1278_vm12, %v1268_v25 }
 0x7f9   :  { %1730 = vmatmul.mubr.msk.f32.gmra.mrb[18].mxu1 %vm1278_vm12, %v1269_v31 }
 0x8c8   :  { %v1728_v43 = vpop.f32.mrb[16].mxu1 }
 0x8c9   :  { %v1377_v45 = vadd.f32 %v1728_v43, %v2214_v14  ;;  %v1357_v27 = vpop.f32.mrb[17].mxu1 }
 0x8ca   :  { %v1376_v9 = vadd.f32 %v1357_v27, %v2212_v11 }
 0x8cb   :  { %v1388_v40 = vadd.f32 %v1529_v26, %v1377_v45 }
 0x8cc   :  { %v1731_v5 = vpop.f32.mrb[18].mxu1  ;;  %v1387_v28 = vadd.f32 %v1529_v26, %v1376_v9 }
 0x8cd   :  { %v1379_v36 = vadd.f32 %v1731_v5, %v2222_v20  ;;  %v1367_v29 = vpop.f32.mrb[19].mxu1  ;;  %v1396_v30 = vsel %vm77_vm0, %v1388_v40, 0.0 }
 0x8ce   :  { %v1378_v39 = vadd.f32 %v1367_v29, %v2220_v19  ;;  %1397 = vadd.xlane.f32.xlu1 %v1396_v30  ;;  %v1393_v42 = vsel %vm77_vm0, %v1387_v28, 0.0 }
 0x8cf   :  { %1394 = vadd.xlane.f32.xlu0 %v1393_v42  ;;  %v1390_v32 = vadd.f32 %v1529_v26, %v1379_v36 }
 0x8d0   :  { %v1389_v15 = vadd.f32 %v1529_v26, %v1378_v39 }
 0x8d1   :  { %v1402_v14 = vsel %vm77_vm0, %v1390_v32, 0.0 }
 0x8d2   :  { %1403 = vadd.xlane.f32.xlu1 %v1402_v14  ;;  %v1399_v11 = vsel %vm77_vm0, %v1389_v15, 0.0 }
 0x8d3   :  { %1400 = vadd.xlane.f32.xlu0 %v1399_v11 }
 0x95b   :  { %v1398_v12 = vpop.xlane.xlu1 %1397 }
 0x95c   :  { %v1406_v37 = vmul.f32 0.03125, %v1398_v12  ;;  %v1395_v20 = vpop.xlane.xlu0 %1394 }
 0x95d   :  { %v1405_v38 = vmul.f32 0.03125, %v1395_v20 }
 0x95e   :  { %v1410_v41 = vsub.f32 %v1388_v40, %v1406_v37 }
 0x95f   :  { %v1409_v44 = vsub.f32 %v1387_v28, %v1405_v38  ;;  %v1404_v46 = vpop.xlane.xlu1 %1403 }
 0x960   :  { %v1408_v19 = vmul.f32 0.03125, %v1404_v46  ;;  %v1401_v47 = vpop.xlane.xlu0 %1400  ;;  %v1414_v48 = vmul.f32 %v1410_v41, %v1410_v41 }
 0x961   :  { %v1407_v49 = vmul.f32 0.03125, %v1401_v47  ;;  %v1413_v50 = vmul.f32 %v1409_v44, %v1409_v44 }
 0x962   :  { %v1412_v51 = vsub.f32 %v1390_v32, %v1408_v19  ;;  %v1420_v52 = vsel %vm77_vm0, %v1414_v48, 0.0 }
 0x963   :  { %v1411_v53 = vsub.f32 %v1389_v15, %v1407_v49  ;;  %1421 = vadd.xlane.f32.xlu1 %v1420_v52  ;;  %v1417_v54 = vsel %vm77_vm0, %v1413_v50, 0.0 }
 0x964   :  { %1418 = vadd.xlane.f32.xlu0 %v1417_v54  ;;  %v1416_v55 = vmul.f32 %v1412_v51, %v1412_v51 }
 0x965   :  { %v1415_v57 = vmul.f32 %v1411_v53, %v1411_v53 }
 0x966   :  { %v1426_v58 = vsel %vm77_vm0, %v1416_v55, 0.0 }
 0x967   :  { %1427 = vadd.xlane.f32.xlu1 %v1426_v58  ;;  %v1423_v60 = vsel %vm77_vm0, %v1415_v57, 0.0 }
 0x968   :  { %1424 = vadd.xlane.f32.xlu0 %v1423_v60 }
 0x9f0   :  { %v1422_v61 = vpop.xlane.xlu1 %1421 }
 0x9f1   :  { %v1430_v62 = vmul.f32 0.03125, %v1422_v61  ;;  %v1419_v63 = vpop.xlane.xlu0 %1418 }
 0x9f2   :  { %v1429_v0 = vmul.f32 0.03125, %v1419_v63 }
 0x9f3   :  { %v1434_v2 = vadd.f32 1e-05, %v1430_v62 }
 0x9f4   :  { %v1433_v56 = vadd.f32 1e-05, %v1429_v0  ;;  %v1428_v3 = vpop.xlane.xlu1 %1427 }
 0x9f5   :  { %1879 = vrsqrt.f32 %v1434_v2  ;;  %v1432_v4 = vmul.f32 0.03125, %v1428_v3  ;;  %v1425_v59 = vpop.xlane.xlu0 %1424 }
 0x9f6   :  { %1881 = vrsqrt.f32 %v1433_v56  ;;  %v1431_v7 = vmul.f32 0.03125, %v1425_v59 }
 0x9f7   :  { %v1436_v8 = vadd.f32 1e-05, %v1432_v4 }
 0x9f8   :  { %v1435_v10 = vadd.f32 1e-05, %v1431_v7 }
 0x9f9   :  { %1883 = vrsqrt.f32 %v1436_v8 }
 0x9fa   :  { %1885 = vrsqrt.f32 %v1435_v10 }
 0x9ff   :  { %v1880_v13 = vpop.eup %1879 }
 0xa00   :  { %v1882_v16 = vpop.eup %1881  ;;  %v1442_v6 = vmul.f32 %v1880_v13, %v1410_v41 }
 0xa01   :  { %v1441_v34 = vmul.f32 %v1882_v16, %v1409_v44 }
 0xa02   :  { %v1452_v18 = vmul.f32 %v1530_v1, %v1442_v6 }
 0xa03   :  { %v1884_v21 = vpop.eup %1883  ;;  %v1451_v35 = vmul.f32 %v1530_v1, %v1441_v34 }
 0xa04   :  { %v1886_v22 = vpop.eup %1885  ;;  %v1462_v23 = vadd.f32 %v1531_v17, %v1452_v18  ;;  %v1444_v24 = vmul.f32 %v1884_v21, %v1412_v51 }
 0xa05   :  { %v1461_v33 = vadd.f32 %v1531_v17, %v1451_v35  ;;  %v1443_v25 = vmul.f32 %v1886_v22, %v1411_v53 }
 0xa06   :  { %1466 = vst.msk [vmem:[%s2342_s18 + $0x8] sm:$0xff] %vm77_vm0, %v1462_v23  ;;  %v1454_v31 = vmul.f32 %v1530_v1, %v1444_v24 }
 0xa07   :  { %1465 = vst.msk [vmem:[%s2342_s18] sm:$0xff] %vm77_vm0, %v1461_v33  ;;  %v1453_v43 = vmul.f32 %v1530_v1, %v1443_v25 }
 0xa08   :  { %v1464_v26 = vadd.f32 %v1531_v17, %v1454_v31 }
 0xa09   :  { %v1463_v45 = vadd.f32 %v1531_v17, %v1453_v43 }
 0xa0a   :  { %1468 = vst.msk [vmem:[%s2342_s18 + $0x18] sm:$0xff] %vm77_vm0, %v1464_v26 }
 0xa0b   :  { %1467 = vst.msk [vmem:[%s2342_s18 + $0x10] sm:$0xff] %vm77_vm0, %v1463_v45 }

// kernel: crossformer_forward.24
= control target key start
LH: loop header
LB: loop body
LE: loop exit
PB: predicated region body
PF: predicated region fallthrough
CT: control target
= control target key end

     0   :  { %s502_s18 = smov 0   ;;  %s562_s0 = inlined_call_operand.vmem [shape: f32[16,64], index: 0, kind: input, shape index: {}]   ;;  %s563_s1 = inlined_call_operand.vmem [shape: f32[1,64], index: 1, kind: input, shape index: {}]   ;;  %s564_s2 = inlined_call_operand.vmem [shape: f32[1,64], index: 2, kind: input, shape index: {}]   ;;  %s565_s3 = inlined_call_operand.vmem [shape: f32[64,32], index: 3, kind: input, shape index: {}]   ;;  %s566_s4 = inlined_call_operand.vmem [shape: f32[1,32], index: 4, kind: input, shape index: {}]   ;;  %s567_s5 = inlined_call_operand.vmem [shape: f32[16,32], index: 5, kind: output, shape index: {}]  }
   0x1 LB: > { %s395_s19 = sadd.s32 4294967295, %s467_s18   ;;  %p399_p0 = scmp.ge.s32.totalorder %s467_s18, 1  ;;  %s467_s18 = sphi %s502_s18, %s15_s18  }
   0x2   : > { %p186_p1 = scmp.lt.s32.totalorder %s467_s18, 3 }
   0x4   : > { %p187_p2 = pnand %p399_p0, %p186_p1 }
   0x5   : > { %p212_p3 = scmp.lt.s32.totalorder (!%p187_p2), %s395_s19, 1  ;;  %vm223_vm0 = vcmask (!%p187_p2), 523264   ;;  %v252_v7 = vld [vmem:[%s565_s3] sm:$0xff] (!%p187_p2)  ;;  %v253_v8 = vld [vmem:[%s565_s3 + $0x8] sm:$0xff] (!%p187_p2)  ;;  %v254_v10 = vld [vmem:[%s565_s3 + $0x10] sm:$0xff] (!%p187_p2)  ;;  %v469_v12 = vmov (!%p187_p2), 0.0|0.0  }
   0x6   : > { %190 = sbr.rel (%p187_p2) target bundleno = 545 (0x221), region = 40  ;;  %v437_v9 = vpack.c.bf16 (!%p187_p2), %v253_v8, %v252_v7  ;;  %v255_v11 = vld [vmem:[%s565_s3 + $0x18] sm:$0xff] (!%p187_p2)  ;;  %436 = vmatprep.subr.bf16.mxu0 (!%p187_p2), %v469_v12  ;;  %vm470_vm1 = vmmov (!%p187_p2), 0   ;;  %v471_v13 = vmov (!%p187_p2), 0.0   ;;  %v256_v15 = vld [vmem:[%s565_s3 + $0x20] sm:$0xff] (!%p187_p2)  ;;  %v257_v16 = vld [vmem:[%s565_s3 + $0x28] sm:$0xff] (!%p187_p2) }
   0x7   : > { %433 = vmatprep.mubr.msk.f32.mxu0 (!%p187_p2), %vm470_vm1, %v471_v13  ;;  %v440_v14 = vpack.c.bf16 (!%p187_p2), %v255_v11, %v254_v10  ;;  %v443_v17 = vpack.c.bf16 (!%p187_p2), %v257_v16, %v256_v15  ;;  %v258_v18 = vld [vmem:[%s565_s3 + $0x30] sm:$0xff] (!%p187_p2)  ;;  %v259_v19 = vld [vmem:[%s565_s3 + $0x38] sm:$0xff] (!%p187_p2)  ;;  %v402_v25 = vld [vmem:[%s563_s1] ss:$0 sm:$0xff] (!%p187_p2)  ;;  %vm340_vm2 = vcmask (!%p187_p2), 261120  }
   0x8   : > { %438 = vmatpush3.bf16.msra.mxu0 (!%p187_p2), %v437_v9  ;;  %v446_v20 = vpack.c.bf16 (!%p187_p2), %v259_v19, %v258_v18  ;;  %v403_v27 = vld [vmem:[%s564_s2] ss:$0 sm:$0xff] (!%p187_p2) }
   0x9   : > { %439 = vmatprep.subr.bf16.mxu0 (!%p187_p2), %v469_v12  ;;  %v404_v30 = vld [vmem:[%s566_s4] ss:$0 sm:$0xff] (!%p187_p2) }
   0xc   : > { %441 = vmatpush3.bf16.msra.mxu0 (!%p187_p2), %v440_v14 }
   0xd   : > { %s569_s19 = smov (!%p212_p3, %s395_s19), 1  ;;  %442 = vmatprep.subr.bf16.mxu0 %v469_v12 }
   0xe   : > { %s400_s20 = sshll.u32 %s569_s19, 3 }
   0xf   : > { %s215_s23 = scalar_lea.vmem %s562_s0, %s400_s20  ;;  %s219_s26 = scalar_lea.vmem %s567_s5, %s400_s20 }
  0x10   : > { %v220_v0 = vld [vmem:[%s215_s23] sm:$0xff]  ;;  %444 = vmatpush3.bf16.msra.mxu0 %v443_v17 }
  0x11   : > { %v224_v1 = vsel %vm223_vm0, %v220_v0, 0.0  ;;  %445 = vmatprep.subr.bf16.mxu0 %v469_v12 }
  0x12   : > { %225 = vadd.xlane.f32.xlu0 %v224_v1 }
  0x14   : > { %447 = vmatpush3.bf16.msra.mxu0 %v446_v20 }
  0x9f   : > { %v226_v2 = vpop.xlane.xlu0 %225 }
  0xa0   : > { %v228_v3 = vmul.f32 0.015625, %v226_v2 }
  0xa2   : > { %v229_v4 = vsub.f32 %v220_v0, %v228_v3 }
  0xa4   : > { %v230_v5 = vmul.f32 %v229_v4, %v229_v4 }
  0xa6   : > { %v231_v6 = vsel %vm223_vm0, %v230_v5, 0.0 }
  0xa7   : > { %232 = vadd.xlane.f32.xlu0 %v231_v6 }
 0x134   : > { %v233_v21 = vpop.xlane.xlu0 %232 }
 0x135   : > { %v234_v22 = vmul.f32 0.015625, %v233_v21 }
 0x137   : > { %v235_v23 = vadd.f32 1e-05, %v234_v22 }
 0x139   : > { %459 = vrsqrt.f32 %v235_v23 }
 0x143   : > { %v460_v24 = vpop.eup %459 }
 0x144   : > { %v237_v26 = vmul.f32 %v460_v24, %v229_v4 }
 0x146   : > { %v244_v28 = vmul.f32 %v402_v25, %v237_v26 }
 0x148   : > { %v251_v29 = vadd.f32 %v403_v27, %v244_v28 }
 0x14a   : > { %434 = vmatmul.mubr.msk.f32.vlgmr.msra.gmra.mrb[0].mxu0 %vm223_vm0, %v251_v29 }
 0x21d   : > { %v336_v31 = vpop.f32.mrb[0].mxu0 }
 0x21e   : > { %v337_v32 = vadd.f32 %v404_v30, %v336_v31  ;;  %v435_v33 = vpop.f32.mrb[1].mxu0 }
 0x220   : > { %341 = vst.msk [vmem:[%s219_s26] sm:$0xff] %vm340_vm2, %v337_v32 }
 0x221 PF: > { %s15_s18 = sadd.s32 1, %s467_s18  }
 0x222   : > { %p12_p4 = scmp.ge.s32.totalorder %s15_s18, 4  }
 0x224   :  { %14 = sbr.rel (!%p12_p4) target bundleno = 1 (0x1), region = 70 }

// kernel: crossformer_forward.39
= control target key start
LH: loop header
LB: loop body
LE: loop exit
PB: predicated region body
PF: predicated region fallthrough
CT: control target
= control target key end

     0   :  { %s2468_s0 = inlined_call_operand.vmem [shape: f32[16,32], index: 0, kind: input, shape index: {}]   ;;  %s2469_s1 = inlined_call_operand.vmem [shape: f32[16,32], index: 1, kind: input, shape index: {}]   ;;  %s2470_s2 = inlined_call_operand.vmem [shape: f32[8,1], index: 2, kind: input, shape index: {}]   ;;  %s2471_s3 = inlined_call_operand.vmem [shape: f32[1,8], index: 3, kind: input, shape index: {}]   ;;  %s2472_s4 = inlined_call_operand.vmem [shape: f32[32,32], index: 4, kind: input, shape index: {}]   ;;  %s2473_s5 = inlined_call_operand.vmem [shape: f32[1,32], index: 5, kind: input, shape index: {}]   ;;  %s2474_s6 = inlined_call_operand.vmem [shape: f32[32,64], index: 6, kind: input, shape index: {}]   ;;  %s2475_s7 = inlined_call_operand.vmem [shape: f32[1,64], index: 7, kind: input, shape index: {}]   ;;  %s2476_s8 = inlined_call_operand.vmem [shape: f32[32,32], index: 8, kind: input, shape index: {}]   ;;  %s2477_s9 = inlined_call_operand.vmem [shape: f32[1,32], index: 9, kind: input, shape index: {}]   ;;  %s2478_s10 = inlined_call_operand.vmem [shape: f32[1,32], index: 10, kind: input, shape index: {}]   ;;  %s2479_s11 = inlined_call_operand.vmem [shape: f32[1,32], index: 11, kind: input, shape index: {}]   ;;  %s2480_s12 = inlined_call_operand.vmem [shape: f32[32,32], index: 12, kind: input, shape index: {}]   ;;  %s2481_s13 = inlined_call_operand.vmem [shape: f32[1,32], index: 13, kind: input, shape index: {}]   ;;  %s2482_s14 = inlined_call_operand.vmem [shape: f32[32,32], index: 14, kind: input, shape index: {}]   ;;  %s2483_s15 = inlined_call_operand.vmem [shape: f32[1,32], index: 15, kind: input, shape index: {}]   ;;  %s2484_s16 = inlined_call_operand.vmem [shape: f32[1,32], index: 16, kind: input, shape index: {}]   ;;  %s2485_s17 = inlined_call_operand.vmem [shape: f32[1,32], index: 17, kind: input, shape index: {}]   ;;  %s2486_s18 = inlined_call_operand.vmem [shape: f32[32,4], index: 18, kind: input, shape index: {}]   ;;  %s2487_s19 = inlined_call_operand.vmem [shape: f32[1,4], index: 19, kind: input, shape index: {}]   ;;  %s2488_s20 = inlined_call_operand.hbm [shape: f32[16,32], index: 20, kind: output, shape index: {0}]   ;;  %s2489_s21 = inlined_call_operand.vmem [shape: f32[16,4], index: 21, kind: output, shape index: {1}]  }
   0x1   :  { %2495 = sst [smem:[#allocation8_spill]] %s2468_s0 }
   0x2   :  { %2496 = sst [smem:[#allocation9_spill]] %s2469_s1 }
   0x3   :  { %2497 = sst [smem:[#allocation10_spill]] %s2470_s2 }
   0x4   :  { %2498 = sst [smem:[#allocation11_spill]] %s2471_s3 }
   0x5   :  { %2499 = sst [smem:[#allocation12_spill]] %s2472_s4 }
   0x6   :  { %2500 = sst [smem:[#allocation13_spill]] %s2473_s5 }
   0x7   :  { %2501 = sst [smem:[#allocation14_spill]] %s2474_s6 }
   0x8   :  { %2502 = sst [smem:[#allocation15_spill]] %s2475_s7 }
   0x9   :  { %2503 = sst [smem:[#allocation16_spill]] %s2476_s8 }
   0xa   :  { %2504 = sst [smem:[#allocation17_spill]] %s2477_s9 }
   0xb   :  { %27 = vsyncpa [#allocation3], 0 }
   0xc   :  { %29 = vsyncpa [#allocation3 + $0x1], 0  ;;  %s2193_s2 = smov 0   ;;  %s2195_s25 = smov 0  }
   0xd   :  { %s2197_s26 = smov 0   ;;  %s2199_s27 = smov 0  }
   0xe LB: > { %2505 = sst [smem:[#allocation5_spill]] %s2068_s26  ;;  %s2214_s3 = sadd.s32 4294967295, %s2072_s27   ;;  %s2072_s27 = sphi %s2199_s27, %s2520_s27   ;;  %s2068_s26 = sphi %s2197_s26, %s2522_s26   ;;  %s2064_s25 = sphi %s2195_s25, %s2524_s25   ;;  %s2060_s2 = sphi %s2193_s2, %s2523_s2  }
   0xf   : > { %s1748_s28 = sadd.s32 4294967294, %s2072_s27   ;;  %s2218_s29 = sadd.s32 1, %s2072_s27  }
  0x10   : > { %2506 = sst [smem:[#allocation6_spill]] %s2218_s29  ;;  %s472_s0 = sadd.s32 1, %s2068_s26 }
  0x11   : > { %s469_s4 = ssub.s32 %s2072_s27, %s2218_s29  ;;  %p482_p0 = scmp.ne.s32.totalorder %s2068_s26, %s2064_s25 }
  0x12   : > { %p470_p1 = scmp.eq.s32.totalorder %s469_s4, 0  ;;  %p483_p2 = scmp.eq.s32.totalorder %s2214_s3, 1 }
  0x13   : > { %p488_p3 = scmp.ne.s32.totalorder %s2064_s25, %s2060_s2  ;;  %p489_p4 = scmp.eq.s32.totalorder %s1748_s28, 1 }
  0x14   : > { %s2229_s30 = scalar_select %p470_p1, %s2068_s26, %s472_s0  }
  0x15   : > { %p2231_p5 = por %p483_p2, %p482_p0  ;;  %p2235_p6 = por %p489_p4, %p488_p3 }
  0x16   : > { %2507 = sst [smem:[#allocation7_spill]] %s2229_s30  ;;  %p1751_p7 = scmp.ge.s32.totalorder %s2072_s27, 1 }
  0x17   : > { %p601_p8 = scmp.lt.s32.totalorder %s2072_s27, 3 }
  0x19   : > { %p602_p9 = pnand %p1751_p7, %p601_p8 }
  0x1a   : > { %s2510_s6 = sld [smem:[#allocation14_spill]] (!%p602_p9)  ;;  %s2511_s30 = sld [smem:[#allocation12_spill]] (!%p602_p9)  ;;  %v2074_v3 = vmov (!%p602_p9), 0.0|0.0   ;;  %vm2075_vm0 = vmmov (!%p602_p9), 0   ;;  %v2076_v9 = vmov (!%p602_p9), 0.0   ;;  %vm693_vm1 = vcmask (!%p602_p9), 261120  }
  0x1b   : > { %605 = sbr.rel (%p602_p9) target bundleno = 2767 (0xacf), region = 100  ;;  %1915 = vmatprep.subr.bf16.mxu1 (!%p602_p9), %v2074_v3  ;;  %1909 = vmatprep.subr.bf16.mxu0 (!%p602_p9), %v2074_v3  ;;  %p668_p10 = scmp.lt.s32.totalorder (!%p602_p9), %s2214_s3, 1  ;;  %v2077_v17 = vmov (!%p602_p9), 0   ;;  %vm865_vm2 = vcmask (!%p602_p9), 130048   ;;  %vm944_vm4 = vcmask (!%p602_p9), 64512  }
  0x1c   : > { %1842 = vmatprep.mubr.msk.f32.mxu1 (!%p602_p9), %vm2075_vm0, %v2076_v9  ;;  %1831 = vmatprep.mubr.msk.f32.mxu0 (!%p602_p9), %vm2075_vm0, %v2076_v9  ;;  %s2512_s0 = sld [smem:[#allocation9_spill]] (!%p602_p9)  ;;  %s2514_s24 = sld [smem:[#allocation10_spill]] (!%p602_p9) }
  0x1d   : > { %1992 = vset.pattern.permute.xlu1 (!%p602_p9), %v2077_v17  ;;  %1993 = vset.pattern.permute.xlu0 (!%p602_p9), %v2077_v17  ;;  %s2515_s7 = sld [smem:[#allocation15_spill]] (!%p602_p9)  ;;  %s2516_s26 = sld [smem:[#allocation13_spill]] (!%p602_p9) }
  0x1e   : > { %s2078_s29 = smov (!%p602_p9), 112   ;;  %s2080_s28 = smov (!%p602_p9), 80  }
  0x1f   : > { %s2518_s8 = sld [smem:[#allocation16_spill]] (!%p602_p9)  ;;  %s2519_s9 = sld [smem:[#allocation17_spill]] (!%p602_p9) }
  0x20   : > { %v767_v0 = vld [vmem:[%s2510_s6] sm:$0xff] (!%p602_p9)  ;;  %v768_v1 = vld [vmem:[%s2510_s6 + $0x8] sm:$0xff] (!%p602_p9)  ;;  %v769_v6 = vld [vmem:[%s2510_s6 + $0x10] sm:$0xff] (!%p602_p9) }
  0x21   : > { %v682_v2 = vld [vmem:[%s2511_s30] sm:$0xff] (!%p602_p9)  ;;  %v1916_v4 = vpack.c.bf16 (!%p602_p9), %v768_v1, %v767_v0  ;;  %v683_v5 = vld [vmem:[%s2511_s30 + $0x8] sm:$0xff] (!%p602_p9)  ;;  %v770_v7 = vld [vmem:[%s2510_s6 + $0x18] sm:$0xff] (!%p602_p9)  ;;  %s2513_s6 = sld [smem:[#allocation8_spill]] (!%p602_p9) }
  0x22   : > { %v1910_v8 = vpack.c.bf16 %v683_v5, %v682_v2  ;;  %v684_v10 = vld [vmem:[%s2511_s30 + $0x10] sm:$0xff]  ;;  %v685_v11 = vld [vmem:[%s2511_s30 + $0x18] sm:$0xff]  ;;  %v1919_v12 = vpack.c.bf16 %v770_v7, %v769_v6  ;;  %s669_s23 = scalar_select %p668_p10, %s2214_s3, 1  ;;  %v851_v16 = vld [vmem:[%s2514_s24] sm:$0xff] }
  0x23   : > { %1917 = vmatpush3.bf16.msra.mxu1 %v1916_v4  ;;  %v1913_v13 = vpack.c.bf16 %v685_v11, %v684_v10  ;;  %855 = vperm.xlu1 %1992, %v851_v16   ;;  %v1758_v18 = vld [vmem:[%s2515_s7] ss:$0 sm:$0xff]  ;;  %s2517_s24 = sld [smem:[#allocation11_spill]] }
  0x24   : > { %1911 = vmatpush3.bf16.msra.mxu0 %v1910_v8  ;;  %1918 = vmatprep.subr.bf16.mxu1 %v2074_v3  ;;  %s2275_s1 = sshll.u32 %s669_s23, 3  ;;  %v1756_v19 = vld [vmem:[%s2516_s26] ss:$0 sm:$0xff]  ;;  %s1782_s23 = sshll.u32 %s2214_s3, 7 }
  0x25   : > { %1912 = vmatprep.subr.bf16.mxu0 %v2074_v3  ;;  %s675_s4 = scalar_lea.vmem %s2512_s0, %s2275_s1  ;;  %v1204_v58 = vld [vmem:[%s2518_s8] sm:$0xff]  ;;  %v1205_v59 = vld [vmem:[%s2518_s8 + $0x8] sm:$0xff]  ;;  %v1206_v60 = vld [vmem:[%s2518_s8 + $0x10] sm:$0xff]  ;;  %s2082_s26 = smov [#allocation2]  }
  0x26   : > { %v681_v14 = vld [vmem:[%s675_s4] sm:$0xff]  ;;  %v1922_v61 = vpack.c.bf16 %v1205_v59, %v1204_v58  ;;  %v1207_v62 = vld [vmem:[%s2518_s8 + $0x18] sm:$0xff] }
  0x27   : > { %s671_s30 = scalar_lea.vmem %s2513_s6, %s2275_s1  ;;  %1920 = vmatpush3.bf16.msra.mxu1 %v1919_v12  ;;  %v1925_v63 = vpack.c.bf16 %v1207_v62, %v1206_v60  ;;  %v1767_v7 = vld [vmem:[%s2519_s9] ss:$0 sm:$0xff] }
  0x28   : > { %1914 = vmatpush3.bf16.msra.mxu0 %v1913_v13  ;;  %v2285_v15 = vld [vmem:[%s671_s30] sm:$0xff]  ;;  %1850 = vmatprep.subr.mxu1 %v2076_v9  ;;  %s2079_s30 = smov 96  }
  0x29   : > { %1845 = vmatprep.subr.mxu0 %v2076_v9  ;;  %v1760_v28 = vld [vmem:[%s2517_s24] ss:$0 sm:$0xff] }
  0x2a   : > { %1843 = vmatmul.mubr.msk.f32.vlgmr.msra.gmra.mrb[0].mxu1 %vm693_vm1, %v681_v14 }
  0x2b   : > { %1832 = vmatmul.mubr.msk.f32.vlgmr.msra.gmra.mrb[0].mxu0 %vm693_vm1, %v2285_v15  ;;  %1852 = vmatprep.mubr.msk.f32.mxu1 %vm2075_vm0, %v2076_v9 }
  0x2c   : > { %1847 = vmatprep.mubr.msk.f32.mxu0 %vm2075_vm0, %v2076_v9 }
  0xa2   : > { %v856_v29 = vpop.permute.xlu1 %855 }
  0xa3   : > { %vm864_vm3 = vcmp.eq.f32.partialorder %v856_v29, %v1760_v28  ;;  %v1769_v29 = vld [vmem:[%s2478_s10] ss:$0 sm:$0xff] }
  0xfd   : > { %v847_v20 = vpop.f32.mrb[0].mxu1 }
  0xfe   : > { %v848_v21 = vadd.f32 %v1758_v18, %v847_v20  ;;  %v1844_v22 = vpop.f32.mrb[1].mxu1  ;;  %v763_v23 = vpop.f32.mrb[0].mxu0  ;;  %v1319_v20 = vld [vmem:[%s2480_s12] sm:$0xff] }
  0xff   : > { %v764_v24 = vadd.f32 %v1756_v19, %v763_v23  ;;  %v1833_v25 = vpop.f32.mrb[1].mxu0  ;;  %v1322_v23 = vld [vmem:[%s2480_s12 + $0x18] sm:$0xff] }
 0x100   : > { %1034 = vrot.lane.b32.xlu0 %v848_v21, %s2078_s29  ;;  %1846 = vmatpush3.xpose.msk.msra.mxu0 %vm865_vm2, %v848_v21 }
 0x101   : > { %1855 = vmatprep.subr.mxu0 %v2076_v9 }
 0x103   : > { %1848 = vmatmul.mubr.msk.f32.vlgmr.msra.gmra.mrb[2].mxu0 %vm865_vm2, %v764_v24 }
 0x104   : > { %1032 = vrot.lane.b32.xlu0 %v764_v24, %s2078_s29  ;;  %1857 = vmatprep.mubr.msk.f32.mxu0 %vm2075_vm0, %v2076_v9  ;;  %s2014_s29 = sshll.u32 %s2082_s26, 4  ;;  %s2015_s29 = int_to_ptr.vmem [resolvable:$false] %s2014_s29 }
 0x172   : > { %v1035_v26 = vpop.permute.xlu0 %1034 }
 0x173   : > { %1856 = vmatpush3.xpose.msk.msra.mxu0 %vm865_vm2, %v1035_v26 }
 0x174   : > { %1921 = vmatprep.subr.bf16.mxu0 %v2074_v3 }
 0x176   : > { %v1033_v27 = vpop.permute.xlu0 %1032 }
 0x177   : > { %1858 = vmatmul.mubr.msk.f32.vlgmr.msra.gmra.mrb[4].mxu0 %vm865_vm2, %v1033_v27 }
 0x178   : > { %1873 = vmatprep.mubr.msk.f32.mxu0 %vm2075_vm0, %v2076_v9  ;;  %1923 = vmatpush3.bf16.msra.mxu0 %v1922_v61 }
 0x179   : > { %1924 = vmatprep.subr.bf16.mxu0 %v2074_v3 }
 0x17c   : > { %1926 = vmatpush3.bf16.msra.mxu0 %v1925_v63 }
 0x17d   : > { %1933 = vmatprep.subr.bf16.mxu0 %v2074_v3 }
 0x1d6   : > { %v938_v30 = vpop.f32.mrb[2].mxu0 }
 0x1d7   : > { %v942_v31 = vmul.f32 0.25, %v938_v30  ;;  %v1849_v32 = vpop.f32.mrb[3].mxu0 }
 0x1d9   : > { %v943_v33 = vsel %vm864_vm3, %v942_v31, -1e+30  ;;  %v1770_v31 = vld [vmem:[%s2479_s11] ss:$0 sm:$0xff] }
 0x1da   : > { %v945_v34 = vsel %vm944_vm4, %v943_v33, -inf }
 0x1db   : > { %946 = vmax.xlane.f32.xlu1 %v945_v34  ;;  %v1430_v34 = vld [vmem:[%s2482_s14] sm:$0xff] }
 0x24a   : > { %v1106_v35 = vpop.f32.mrb[4].mxu0 }
 0x24b   : > { %v1110_v36 = vmul.f32 0.25, %v1106_v35  ;;  %v1859_v37 = vpop.f32.mrb[5].mxu0  ;;  %v1431_v35 = vld [vmem:[%s2482_s14 + $0x8] sm:$0xff] }
 0x24c   : > { %v1432_v37 = vld [vmem:[%s2482_s14 + $0x10] sm:$0xff] }
 0x24d   : > { %v1111_v38 = vsel %vm864_vm3, %v1110_v36, -1e+30  ;;  %v1934_v36 = vpack.c.bf16 %v1431_v35, %v1430_v34 }
 0x24e   : > { %v1112_v39 = vsel %vm944_vm4, %v1111_v38, -inf }
 0x24f   : > { %1113 = vmax.xlane.f32.xlu0 %v1112_v39  ;;  %v1771_v39 = vld [vmem:[%s2481_s13] ss:$0 sm:$0xff] }
 0x268   : > { %v947_v40 = vpop.xlane.xlu1 %946 }
 0x269   : > { %v948_v41 = vsub.f32 %v943_v33, %v947_v40 }
 0x26b   : > { %v949_v42 = vmul.f32 1.442695, %v948_v41 }
 0x26d   : > { %1994 = vpow2.f32 %v949_v42 }
 0x277   : > { %v1995_v43 = vpop.eup %1994 }
 0x278   : > { %v951_v44 = vsel %vm944_vm4, %v1995_v43, 0.0 }
 0x279   : > { %952 = vadd.xlane.f32.xlu0 %v951_v44 }
 0x28f   : > { %956 = vrot.lane.b32.xlu0 %v848_v21, %s2079_s30  ;;  %s659_s30 = sand.u32 1, %s2064_s25  }
 0x290   : > { %s1752_s4 = sshll.u32 %s659_s30, 3  ;;  %s1633_s0 = scalar_lea.sflag [#allocation3], %s659_s30 }
 0x291   : > { %s661_s6 = scalar_lea.vmem [#allocation2], %s1752_s4  ;;  %s2016_s4 = scalar_lea.vmem %s2015_s29, 256 }
 0x292   : > { %s1650_s24 = sshll.u32 %s661_s6, 4  ;;  %s1651_s24 = int_to_ptr.vmem [resolvable:$true] %s1650_s24 }
 0x293   : > { %s2010_s9 = scalar_lea.vmem %s1651_s24, 128  ;;  %p2017_p0 = scmp.lt.s32.totalorder %s1651_s24, %s2015_s29 }
 0x294   : > { %p2011_p11 = scmp.ne.s32.totalorder %s1651_s24, %s2010_s9  ;;  %p2018_p1 = scmp.lt.s32.totalorder %s2016_s4, %s2010_s9 }
 0x296   : > { %p2012_p12 = pnand %p2011_p11, %p2231_p5  ;;  %p2019_p2 = por %p2018_p1, %p2017_p0 }
 0x298   : > { %p2013_p13 = pneg %p2012_p12 }
 0x29a   : > { %p2020_p3 = pnand %p2019_p2, %p2013_p13 }
 0x2dc   : > { %v1114_v45 = vpop.xlane.xlu0 %1113 }
 0x2dd   : > { %v1115_v46 = vsub.f32 %v1111_v38, %v1114_v45 }
 0x2df   : > { %v1116_v47 = vmul.f32 1.442695, %v1115_v46 }
 0x2e1   : > { %1996 = vpow2.f32 %v1116_v47 }
 0x2eb   : > { %v1997_v48 = vpop.eup %1996 }
 0x2ec   : > { %v1118_v49 = vsel %vm944_vm4, %v1997_v48, 0.0 }
 0x2ed   : > { %1119 = vadd.xlane.f32.xlu1 %v1118_v49 }
 0x2fe   : > { %1123 = vrot.lane.b32.xlu1 %v848_v21, %s2080_s28  ;;  %s2081_s28 = smov 16   ;;  %v1320_v21 = vld [vmem:[%s2480_s12 + $0x8] sm:$0xff] }
 0x2ff   : > { %v1928_v22 = vpack.c.bf16 %v1320_v21, %v1319_v20  ;;  %v1548_v21 = vld [vmem:[%s2486_s18 + $0x10] sm:$0xff] }
 0x306   : > { %v953_v50 = vpop.xlane.xlu0 %952 }
 0x307   : > { %1998 = vrcp.f32 %v953_v50 }
 0x30a   : > { %v957_v51 = vpop.permute.xlu0 %956 }
 0x30b   : > { %1851 = vmatpush3.msra.mxu1 %v957_v51 }
 0x30c   : > { %1860 = vmatprep.subr.mxu1 %v2076_v9 }
 0x311   : > { %v1999_v52 = vpop.eup %1998 }
 0x312   : > { %v955_v53 = vmul.f32 %v1999_v52, %v1995_v43 }
 0x314   : > { %1853 = vmatmul.mubr.msk.f32.vlgmr.msra.gmra.mrb[2].mxu1 %vm944_vm4, %v955_v53 }
 0x315   : > { %1862 = vmatprep.mubr.msk.f32.mxu1 %vm2075_vm0, %v2076_v9 }
 0x37a   : > { %v1120_v54 = vpop.xlane.xlu1 %1119 }
 0x37b   : > { %2000 = vrcp.f32 %v1120_v54 }
 0x37e   : > { %v1124_v55 = vpop.permute.xlu1 %1123 }
 0x37f   : > { %1861 = vmatpush3.msra.mxu1 %v1124_v55 }
 0x380   : > { %1927 = vmatprep.subr.bf16.mxu1 %v2074_v3 }
 0x385   : > { %v2001_v56 = vpop.eup %2000 }
 0x386   : > { %v1122_v57 = vmul.f32 %v2001_v56, %v1997_v48 }
 0x388   : > { %1863 = vmatmul.mubr.msk.f32.vlgmr.msra.gmra.mrb[4].mxu1 %vm944_vm4, %v1122_v57 }
 0x389   : > { %1884 = vmatprep.mubr.msk.f32.mxu1 %vm2075_vm0, %v2076_v9  ;;  %1929 = vmatpush3.bf16.msra.mxu1 %v1928_v22  ;;  %v1549_v22 = vld [vmem:[%s2486_s18 + $0x18] sm:$0xff] }
 0x38a   : > { %1930 = vmatprep.subr.bf16.mxu1 %v2074_v3 }
 0x3e7   : > { %v1028_v0 = vpop.f32.mrb[2].mxu1 }
 0x3e8   : > { %v1854_v1 = vpop.f32.mrb[3].mxu1 }
 0x45b   : > { %v1195_v2 = vpop.f32.mrb[4].mxu1 }
 0x45c   : > { %1200 = vrot.lane.b32.xlu1 %v1195_v2, %s2081_s28  ;;  %v1864_v4 = vpop.f32.mrb[5].mxu1  ;;  %s2425_s28 = scalar_lea.hbm %s2488_s20, %s1782_s23 }
 0x4ce   : > { %v1201_v5 = vpop.permute.xlu1 %1200 }
 0x4cf   : > { %v1203_v6 = vsel %vm865_vm2, %v1028_v0, %v1201_v5 }
 0x4d0   : > { %1874 = vmatmul.mubr.msk.f32.vlgmr.msra.gmra.mrb[6].mxu0 %vm693_vm1, %v1203_v6  ;;  %v1776_v6 = vld [vmem:[%s2483_s15] ss:$0 sm:$0xff] }
 0x4d1   : > { %1895 = vmatprep.mubr.msk.f32.mxu0 %vm2075_vm0, %v2076_v9  ;;  %1935 = vmatpush3.bf16.msra.mxu0 %v1934_v36 }
 0x4d2   : > { %1936 = vmatprep.subr.bf16.mxu0 %v2074_v3 }
 0x5a3   : > { %v1284_v8 = vpop.f32.mrb[6].mxu0 }
 0x5a4   : > { %v1285_v10 = vadd.f32 %v1767_v7, %v1284_v8  ;;  %v1875_v11 = vpop.f32.mrb[7].mxu0 }
 0x5a6   : > { %v1288_v12 = vadd.f32 %v1285_v10, %v2285_v15  ;;  %v1321_v15 = vld [vmem:[%s2480_s12 + $0x10] sm:$0xff] }
 0x5a7   : > { %v1931_v24 = vpack.c.bf16 %v1322_v23, %v1321_v15  ;;  %v1943_v15 = vpack.c.bf16 %v1549_v22, %v1548_v21 }
 0x5a8   : > { %v1291_v13 = vsel %vm693_vm1, %v1288_v12, 0.0 }
 0x5a9   : > { %1292 = vadd.xlane.f32.xlu0 %v1291_v13  ;;  %1932 = vmatpush3.bf16.msra.mxu1 %v1931_v24 }
 0x5aa   : > { %1939 = vmatprep.subr.bf16.mxu1 %v2074_v3 }
 0x636   : > { %v1293_v14 = vpop.xlane.xlu0 %1292 }
 0x637   : > { %v1295_v16 = vmul.f32 0.03125, %v1293_v14 }
 0x639   : > { %v1296_v17 = vsub.f32 %v1288_v12, %v1295_v16 }
 0x63b   : > { %v1297_v18 = vmul.f32 %v1296_v17, %v1296_v17 }
 0x63d   : > { %v1298_v19 = vsel %vm693_vm1, %v1297_v18, 0.0  ;;  %v1546_v18 = vld [vmem:[%s2486_s18] sm:$0xff] }
 0x63e   : > { %1299 = vadd.xlane.f32.xlu1 %v1298_v19  ;;  %v1547_v19 = vld [vmem:[%s2486_s18 + $0x8] sm:$0xff] }
 0x63f   : > { %v1940_v20 = vpack.c.bf16 %v1547_v19, %v1546_v18 }
 0x6cb   : > { %v1300_v25 = vpop.xlane.xlu1 %1299 }
 0x6cc   : > { %v1301_v26 = vmul.f32 0.03125, %v1300_v25 }
 0x6ce   : > { %v1302_v27 = vadd.f32 1e-05, %v1301_v26 }
 0x6d0   : > { %2002 = vrsqrt.f32 %v1302_v27 }
 0x6da   : > { %v2003_v28 = vpop.eup %2002 }
 0x6db   : > { %v1304_v30 = vmul.f32 %v2003_v28, %v1296_v17  ;;  %v1778_v28 = vld [vmem:[%s2485_s17] ss:$0 sm:$0xff] }
 0x6dd   : > { %v1311_v32 = vmul.f32 %v1769_v29, %v1304_v30 }
 0x6df   : > { %v1318_v33 = vadd.f32 %v1770_v31, %v1311_v32 }
 0x6e1   : > { %1885 = vmatmul.mubr.msk.f32.vlgmr.msra.gmra.mrb[6].mxu1 %vm693_vm1, %v1318_v33 }
 0x6e2   : > { %1906 = vmatprep.mubr.msk.f32.mxu1 %vm2075_vm0, %v2076_v9  ;;  %v1433_v9 = vld [vmem:[%s2482_s14 + $0x18] sm:$0xff]  ;;  %1941 = vmatpush3.bf16.msra.mxu1 %v1940_v20 }
 0x6e3   : > { %v1937_v38 = vpack.c.bf16 %v1433_v9, %v1432_v37  ;;  %1942 = vmatprep.subr.bf16.mxu1 %v2074_v3  ;;  %v1777_v3 = vld [vmem:[%s2484_s16] ss:$0 sm:$0xff] }
 0x6e5   : > { %1938 = vmatpush3.bf16.msra.mxu0 %v1937_v38 }
 0x6e6   : > { %1944 = vmatpush3.bf16.msra.mxu1 %v1943_v15 }
 0x7b4   : > { %v1399_v40 = vpop.f32.mrb[6].mxu1 }
 0x7b5   : > { %v1400_v41 = vadd.f32 %v1771_v39, %v1399_v40  ;;  %v1886_v42 = vpop.f32.mrb[7].mxu1 }
 0x7b7   : > { %v1403_v43 = vmul.f32 0.70710677, %v1400_v41  ;;  %v1427_v1 = vmul.f32 0.5, %v1400_v41 }
 0x7b9   : > { %v1404_v44 = vand.u32 2147483647, %v1403_v43  ;;  %vm1424_vm5 = vcmp.lt.f32.partialorder %v1403_v43, 0.0 }
 0x7bb   : > { %v1405_v45 = vmul.f32 0.3275911, %v1404_v44  ;;  %v1418_v47 = vsub.f32 0.0, %v1404_v44 }
 0x7bd   : > { %v1406_v46 = vadd.f32 1.0, %v1405_v45  ;;  %v1419_v49 = vmul.f32 %v1418_v47, %v1404_v44 }
 0x7bf   : > { %2004 = vrcp.f32 %v1406_v46  ;;  %v1420_v52 = vmul.f32 1.442695, %v1419_v49 }
 0x7c1   : > { %2006 = vpow2.f32 %v1420_v52 }
 0x7c9   : > { %v2005_v48 = vpop.eup %2004 }
 0x7ca   : > { %v1409_v50 = vmul.f32 1.0614054, %v2005_v48 }
 0x7cb   : > { %v2007_v60 = vpop.eup %2006 }
 0x7cc   : > { %v1773_v51 = vadd.f32 -1.4531521, %v1409_v50 }
 0x7ce   : > { %v1411_v53 = vmul.f32 %v2005_v48, %v1773_v51 }
 0x7d0   : > { %v1412_v54 = vadd.f32 1.4214138, %v1411_v53 }
 0x7d2   : > { %v1413_v55 = vmul.f32 %v2005_v48, %v1412_v54 }
 0x7d4   : > { %v1774_v56 = vadd.f32 -0.28449672, %v1413_v55 }
 0x7d6   : > { %v1415_v57 = vmul.f32 %v2005_v48, %v1774_v56 }
 0x7d8   : > { %v1416_v58 = vadd.f32 0.2548296, %v1415_v57 }
 0x7da   : > { %v1417_v59 = vmul.f32 %v2005_v48, %v1416_v58 }
 0x7dc   : > { %v1422_v61 = vmul.f32 %v2007_v60, %v1417_v59 }
 0x7de   : > { %v1423_v62 = vsub.f32 1.0, %v1422_v61 }
 0x7e0   : > { %v1425_v63 = vsub.f32 0.0, %v1423_v62 }
 0x7e2   : > { %v1426_v0 = vsel %vm1424_vm5, %v1425_v63, %v1423_v62 }
 0x7e3   : > { %v1428_v2 = vadd.f32 1.0, %v1426_v0 }
 0x7e5   : > { %v1429_v4 = vmul.f32 %v1428_v2, %v1427_v1 }
 0x7e7   : > { %1896 = vmatmul.mubr.msk.f32.vlgmr.msra.gmra.mrb[8].mxu0 %vm693_vm1, %v1429_v4 }
 0x8ba   : > { %v1503_v5 = vpop.f32.mrb[8].mxu0 }
 0x8bb   : > { %v1507_v7 = vadd.f32 %v1503_v5, %v1318_v33  ;;  %v1897_v8 = vpop.f32.mrb[9].mxu0 }
 0x8bd   : > { %v1515_v10 = vadd.f32 %v1776_v6, %v1507_v7 }
 0x8bf   : > { %v1518_v11 = vsel %vm693_vm1, %v1515_v10, 0.0 }
 0x8c0   : > { %1519 = vadd.xlane.f32.xlu0 %v1518_v11 }
 0x94d   : > { %v1520_v12 = vpop.xlane.xlu0 %1519 }
 0x94e   : > { %v1521_v13 = vmul.f32 0.03125, %v1520_v12 }
 0x950   : > { %v1522_v14 = vsub.f32 %v1515_v10, %v1521_v13 }
 0x952   : > { %v1523_v16 = vmul.f32 %v1522_v14, %v1522_v14 }
 0x954   : > { %v1524_v17 = vsel %vm693_vm1, %v1523_v16, 0.0 }
 0x955   : > { %1525 = vadd.xlane.f32.xlu0 %v1524_v17 }
 0x9e2   : > { %v1526_v23 = vpop.xlane.xlu0 %1525 }
 0x9e3   : > { %v1527_v24 = vmul.f32 0.03125, %v1526_v23 }
 0x9e5   : > { %v1528_v25 = vadd.f32 1e-05, %v1527_v24 }
 0x9e7   : > { %2008 = vrsqrt.f32 %v1528_v25 }
 0x9f1   : > { %v2009_v26 = vpop.eup %2008 }
 0x9f2   : > { %v1530_v27 = vmul.f32 %v2009_v26, %v1522_v14 }
 0x9f4   : > { %v1537_v29 = vmul.f32 %v1777_v3, %v1530_v27 }
 0x9f6   : > { %v1544_v30 = vadd.f32 %v1778_v28, %v1537_v29 }
 0x9f8   : > { %1907 = vmatmul.mubr.msk.f32.vlgmr.msra.gmra.mrb[8].mxu1 %vm693_vm1, %v1544_v30  ;;  %1545 = vst.msk [vmem:[%s661_s6] sm:$0xff] %vm693_vm1, %v1544_v30 }
 0x9f9   : > { %2023 = shalt.err (!%p2020_p3)
}
 0x9fa   : > { %s2024_s7 = scalar_lea.hbm %s2425_s28, 128  ;;  %s2028_s30 = scalar_lea.hbm %s2488_s20, 256 }
 0x9fb   : > { %p2025_p4 = scmp.ne.s32.totalorder %s2425_s28, %s2024_s7  ;;  %p2029_p9 = scmp.lt.u32.totalorder %s2425_s28, %s2488_s20 }
 0x9fc   : > { %p2030_p10 = scmp.lt.u32.totalorder %s2028_s30, %s2024_s7  ;;  %p2032_p12 = scmp.lt.u32.totalorder %s2024_s7, %s2425_s28 }
 0x9fd   : > { %p2026_p7 = pnand %p2025_p4, %p2231_p5 }
 0x9fe   : > { %p2031_p11 = por %p2030_p10, %p2029_p9 }
 0x9ff   : > { %p2027_p8 = pneg %p2026_p7 }
 0xa00   : > { %p2033_p13 = por %p2032_p12, %p2031_p11 }
 0xa02   : > { %p2034_p0 = pnand %p2033_p13, %p2027_p8 }
 0xa04   : > { %2037 = shalt.err (!%p2034_p0)
}
 0xa05   : > { %1945 = dma.vmem_to_hbm [thread:$0]  (%p2231_p5), %s1651_s24, 128, %s2425_s28, %s1633_s0   ;;  %v1779_v31 = vld [vmem:[%s2487_s19] ss:$0 sm:$0xff]  ;;  %vm1630_vm6 = vcmask 31744  }
 0xa06   : > { %s679_s8 = scalar_lea.vmem %s2489_s21, %s2275_s1 }
 0xacb   : > { %v1626_v32 = vpop.f32.mrb[8].mxu1 }
 0xacc   : > { %v1627_v33 = vadd.f32 %v1779_v31, %v1626_v32  ;;  %v1908_v34 = vpop.f32.mrb[9].mxu1 }
 0xace   : > { %1631 = vst.msk [vmem:[%s679_s8] sm:$0xff] %vm1630_vm6, %v1627_v33 }
 0xacf PF: > { %p1951_p1 = scmp.ge.s32.totalorder %s2072_s27, 2  ;;  %s1665_s5 = sand.u32 1, %s2060_s2  }
 0xad0   : > { %s1666_s24 = scalar_lea.sflag [#allocation3], %s1665_s5 }
 0xad1   : > { %p1948_p5 = pnand %p1951_p1, %p2235_p6 }
 0xad3   : > { %2055 = dma.done.wait (!%p1948_p5), %s1666_s24, 128  }
 0xad4   : > { %2057 = vsyncadd (!%p1948_p5), %s1666_s24, 4294967168  ;;  %s2520_s27 = sld [smem:[#allocation6_spill]]  ;;  %s2521_s28 = sld [smem:[#allocation5_spill]] }
 0xad5   : > { %s2522_s26 = sld [smem:[#allocation7_spill]]  ;;  %s2523_s2 = smov %s2064_s25 }
 0xada   : > { %p32_p2 = scmp.ge.s32.totalorder %s2520_s27, 4   ;;  %s2524_s25 = smov %s2521_s28 }
 0xadc   :  { %34 = sbr.rel (!%p32_p2) target bundleno = 14 (0xe), region = 150 }
 0xae3   :  { %1678 = vsyncpa [#allocation3], 1 }
 0xae4   :  { %1680 = vsyncpa [#allocation3 + $0x1], 1 }

</bundles_post_ra>
